<compile_context>
chip_gen: v7x
topology: tpu7x:2x2x1
jax: 0.10.0
libtpu: 0.0.40
codegen_flags: <defaults>
</compile_context>

<pallas_src>
import math
from functools import partial

import jax
import jax.numpy as jnp
from jax.experimental import pallas as pl
from jax.experimental.pallas import tpu as pltpu


# --------------------------------------------------------------------------------------
# Kernel
# --------------------------------------------------------------------------------------
def _temporal_attn_gelu_kernel(x_ref, w_in_ref, b_in_ref, wo_ref, bo_ref, o_ref,
                               *, n_head: int, T: int, approx_recip: bool):
    """Fused QKV proj -> per-head attention over T tokens -> out proj -> QuickGELU.

    x_ref:    (tn*T, d)  float32 rows (T consecutive rows = one temporal group)
    w_in_ref: (d, 3d)    fused [wq|wk|wv]^T in compute dtype, query scale pre-folded
    b_in_ref: (1, 3d)    fused bias, f32, query scale pre-folded
    wo_ref:   (d, d)     output projection weight (transposed), compute dtype
    bo_ref:   (1, d)     output projection bias, f32
    o_ref:    (tn*T, d)  output block
    """
    rows, d = x_ref.shape
    tn = rows // T
    hd = d // n_head
    cd = w_in_ref.dtype                      # matmul operand dtype (bf16 or f32)

    # In-kernel cast (VPU op hidden under the matmuls) instead of a host-side HBM pass.
    x2d = x_ref[...].astype(cd)                                           # (rows, d)

    # Fused QKV projection: one big MXU matmul; cast to compute dtype right away to
    # halve the live intermediate footprint (softmax stats stay f32 below).
    qkv = (jnp.dot(x2d, w_in_ref[...], preferred_element_type=jnp.float32)
           + b_in_ref[...]).astype(cd)                                    # (rows, 3d)

    # Head-major views merged into a single batch dimension (tn*H, T, hd): one batched
    # dot_general instead of H unrolled chains of lane-sliced einsums + concatenate.
    # (Review option (a); option (b) — pure VPU broadcast-mul for T=8 — left for bundle-dump tuning.)
    def to_heads(a):                                                      # (rows, d) -> (tn*H, T, hd)
        return (a.reshape(tn, T, n_head, hd)
                 .transpose(0, 2, 1, 3)
                 .reshape(tn * n_head, T, hd))

    q = to_heads(qkv[:, 0 * d:1 * d])        # 1/sqrt(hd) already folded into w_in/b_in
    k = to_heads(qkv[:, 1 * d:2 * d])
    v = to_heads(qkv[:, 2 * d:3 * d])

    s = jnp.einsum('bqe,bke->bqk', q, k,
                   preferred_element_type=jnp.float32)                    # (tn*H, T, T) f32
    m = jnp.max(s, axis=-1, keepdims=True)
    ex = jnp.exp(s - m)
    den = jnp.sum(ex, axis=-1, keepdims=True)
    if approx_recip:
        p = ex * pl.reciprocal(den, approx=True)                          # EUP slot (bf16 path)
    else:
        p = ex / den                                                      # exact (f32 path)

    ctx = jnp.einsum('bqk,bke->bqe', p.astype(cd), v,
                     preferred_element_type=jnp.float32)                  # (tn*H, T, hd) f32
    ctx = (ctx.reshape(tn, n_head, T, hd)
              .transpose(0, 2, 1, 3)
              .reshape(rows, d))                                          # back to (rows, d)

    # Output projection (single MXU matmul) + QuickGELU, both accumulated / applied in f32.
    y = jnp.dot(ctx.astype(cd), wo_ref[...],
                preferred_element_type=jnp.float32) + bo_ref[...]
    y = y * jax.nn.sigmoid(1.702 * y)
    o_ref[...] = y.astype(o_ref.dtype)


# --------------------------------------------------------------------------------------
# Tiling / VMEM budgeting helpers
# --------------------------------------------------------------------------------------
def _weight_vmem_bytes(d, cb, buffers):
    return buffers * (d * 3 * d * cb + 3 * d * 4 + d * d * cb + d * 4)


def _tile_vmem_bytes(tn, T, d, n_head, xb, cb, ob):
    """Rough per-grid-step VMEM footprint for a tn-row tile (one row = one (l,b) group of T tokens)."""
    rows = tn * T
    f32 = 4
    x_blk = 2 * rows * d * xb                  # double-buffered input block
    o_blk = 2 * rows * d * ob                  # double-buffered output block
    qkv = rows * 3 * d * (f32 + cb)            # f32 matmul result + compute-dtype copy
    qkvh = 3 * rows * d * cb                   # head-major q/k/v copies
    attn = 4 * tn * n_head * T * T * f32       # s, exp, p (+ stats)
    ctx = rows * d * (f32 + cb)                # f32 ctx + compute-dtype copy
    y = 2 * rows * d * f32                     # out-proj result + QuickGELU temp
    return x_blk + o_blk + qkv + qkvh + attn + ctx + y


def _pick_row_tile(N, *, T, d, n_head, x_bytes, c_bytes, o_bytes, budget):
    """Largest row tile (in (l,b) groups) whose tile fits the VMEM budget, preferring a grid
    with >= 4 and an even number of steps (>= 2 pipelined steps per v7x TensorCore)."""
    weight = _weight_vmem_bytes(d, c_bytes, buffers=2)     # conservative: assume double-buffered
    divs = [t for t in range(1, N + 1)
            if N % t == 0 and ((t * T) % 8 == 0 or t == N)]
    fits = [t for t in divs
            if weight + _tile_vmem_bytes(t, T, d, n_head, x_bytes, c_bytes, o_bytes) <= budget]
    if not fits:
        fits = divs[:1]                                    # smallest legal tile
    best = lambda c: max(c) if c else None
    t = best([t for t in fits if N // t >= 4 and (N // t) % 2 == 0])   # v7x-friendly
    if t is None:
        t = best([t for t in fits if N // t >= 2])
    if t is None:
        t = best(fits)
    return t


# --------------------------------------------------------------------------------------
# Wrapper
# --------------------------------------------------------------------------------------
def temporal_block_v2(x, params, *, T: int, n_head: int,
                      compute_dtype=jnp.bfloat16, out_dtype=None,
                      row_tile: int = None, vmem_budget_bytes: int = 40 * 2**20,
                      approx_softmax_recip: bool = None):
    """x: (l, b*T, d) float32. Returns (l, b*T, d) in out_dtype (default: x.dtype).

    compute_dtype: MXU operand dtype. bf16 is recommended on ALL generations (the v5e MXU is
    bf16-native; f32 operands take a slower multi-pass matmul path). Accumulation, softmax and
    QuickGELU stay in f32 regardless. Use jnp.float32 for a bit-tighter result (that path also
    uses exact softmax division rather than the approximate EUP reciprocal).
    out_dtype: set to jnp.bfloat16 if the downstream consumer accepts it (halves HBM writeback
    and vector-store traffic, notably on v5e's single vst slot).
    vmem_budget_bytes: per-step VMEM budget used to derive the row tile. Default fits v7x
    (64 MiB physical); on single-TC v6e/v5e (128 MiB) a larger budget / explicit row_tile
    buys a bigger tile (2-4 grid steps is plenty to pipeline DMA there).
    """
    l, bt, d = x.shape
    assert bt % T == 0, "second dim must be b*T"
    assert d % n_head == 0
    b = bt // T
    N = l * b
    hd = d // n_head
    out_dtype = x.dtype if out_dtype is None else out_dtype
    if approx_softmax_recip is None:
        approx_softmax_recip = (jnp.dtype(compute_dtype) != jnp.dtype(jnp.float32))

    # Both einops rearranges are a zero-copy reshape in this layout (b-major, t-minor):
    # row r = l_i*b*T + b_i*T + t, so each (l_i, b_i)'s T tokens are T consecutive rows.
    xk = x.reshape(N * T, d)                    # stays f32; cast inside the kernel

    # Fused QKV weight/bias; fold the 1/sqrt(hd) query scale into wq/bq on the host.
    scale = 1.0 / math.sqrt(hd)
    w_in = jnp.concatenate([params['wq'].T * scale, params['wk'].T, params['wv'].T],
                           axis=1).astype(compute_dtype)                      # (d, 3d)
    b_in = jnp.concatenate([params['bq'] * scale, params['bk'], params['bv']]
                           ).reshape(1, 3 * d).astype(jnp.float32)            # (1, 3d)
    wo_t = params['wo'].T.astype(compute_dtype)                               # (d, d)
    bo = params['bo'].reshape(1, d).astype(jnp.float32)                       # (1, d)

    xb = jnp.dtype(x.dtype).itemsize
    cb = jnp.dtype(compute_dtype).itemsize
    ob = jnp.dtype(out_dtype).itemsize

    tn = row_tile if row_tile is not None else _pick_row_tile(
        N, T=T, d=d, n_head=n_head, x_bytes=xb, c_bytes=cb, o_bytes=ob,
        budget=vmem_budget_bytes)
    assert N % tn == 0 and ((tn * T) % 8 == 0 or tn == N)
    rows = tn * T
    grid = (N // tn,)

    # Explicit scoped-VMEM limit from the actual tile footprint (+25% headroom); the 16/32 MiB
    # defaults are too small for large production tiles.
    tile_bytes = (_tile_vmem_bytes(tn, T, d, n_head, xb, cb, ob)
                  + _weight_vmem_bytes(d, cb, buffers=2))
    vmem_limit = int(min(128 * 2**20, max(16 * 2**20, 1.25 * tile_bytes + (2 << 20))))

    # Advisory cost estimate so XLA schedules neighbouring ops around the custom call.
    flops = N * T * d * (8 * d + 4 * T)
    transcendentals = N * n_head * T * T + N * T * d
    bytes_accessed = (N * T * d) * (xb + ob) + (3 * d * d + d * d) * cb + 4 * d * 4

    kern = partial(_temporal_attn_gelu_kernel, n_head=n_head, T=T,
                   approx_recip=approx_softmax_recip)

    def _run(single_buffer_weights: bool):
        def wspec(shape):
            if single_buffer_weights:
                # Constant-index weight/bias blocks: single-buffer them so their VMEM
                # (≈ d*3d*2B at production d) goes to a bigger row tile instead.
                return pl.BlockSpec(shape, lambda i: (0, 0), pipeline_mode=pl.Buffered(1))
            return pl.BlockSpec(shape, lambda i: (0, 0))

        return pl.pallas_call(
            kern,
            out_shape=jax.ShapeDtypeStruct((N * T, d), out_dtype),
            grid_spec=pltpu.PrefetchScalarGridSpec(
                num_scalar_prefetch=0,
                grid=grid,
                in_specs=[
                    pl.BlockSpec((rows, d), lambda i: (i, 0)),   # x rows (f32)
                    wspec((d, 3 * d)),                           # fused QKV weight
                    wspec((1, 3 * d)),                           # fused QKV bias
                    wspec((d, d)),                               # out-proj weight
                    wspec((1, d)),                               # out-proj bias
                ],
                out_specs=pl.BlockSpec((rows, d), lambda i: (i, 0)),
            ),
            compiler_params=pltpu.CompilerParams(
                dimension_semantics=("parallel",),
                vmem_limit_bytes=vmem_limit),
            cost_estimate=pl.CostEstimate(flops=flops,
                                          transcendentals=transcendentals,
                                          bytes_accessed=bytes_accessed),
        )(xk, w_in, b_in, wo_t, bo)

    try:
        yk = _run(True)
    except Exception:
        # Fallback for Pallas builds that reject Buffered(1): default double buffering.
        yk = _run(False)

    # Inverse of the flatten above (again zero-copy).
    return yk.reshape(l, b * T, d)


# --------------------------------------------------------------------------------------
# Pure-JAX reference (literal rearranges, PyTorch nn.MultiheadAttention semantics)
# --------------------------------------------------------------------------------------
def reference_temporal_block_v2(x, params, *, T: int, n_head: int):
    l, bt, d = x.shape
    b = bt // T
    hd = d // n_head
    xr = x.reshape(l, b, T, d).transpose(2, 1, 0, 3).reshape(T, b * l, d)   # 'l (b t) d -> t (b l) d'
    N = b * l
    q = xr @ params['wq'].T + params['bq']
    k = xr @ params['wk'].T + params['bk']
    v = xr @ params['wv'].T + params['bv']

    def split(a):
        return a.reshape(T, N, n_head, hd).transpose(1, 2, 0, 3)            # (N, H, T, hd)

    qh, kh, vh = split(q), split(k), split(v)
    s = jnp.einsum('nhqe,nhke->nhqk', qh / math.sqrt(hd), kh)
    p = jax.nn.softmax(s, axis=-1)
    ctx = jnp.einsum('nhqk,nhke->nhqe', p, vh)                               # (N, H, T, hd)
    ctx = ctx.transpose(2, 0, 1, 3).reshape(T, N, d)
    y = ctx @ params['wo'].T + params['bo']
    out = y.reshape(T, b, l, d).transpose(2, 1, 0, 3).reshape(l, b * T, d)   # 't (b l) d -> l (b t) d'
    return out * jax.nn.sigmoid(1.702 * out)


# --------------------------------------------------------------------------------------
# Demo / correctness check (small shapes; b != T != l so the layout mapping is exercised)
# --------------------------------------------------------------------------------------
if __name__ == "__main__":
    d_model, n_head, T, b, l = 32, 4, 8, 2, 16                 # x: (16, 16, 32)

    key = jax.random.PRNGKey(0)
    k_x, k_in_w, k_in_b, k_out_w, k_out_b = jax.random.split(key, 5)

    x = jax.random.normal(k_x, (l, b * T, d_model), dtype=jnp.float32)

    in_proj_w = jax.random.normal(k_in_w, (3 * d_model, d_model), jnp.float32) * 0.05
    in_proj_b = jax.random.normal(k_in_b, (3 * d_model,), jnp.float32) * 0.05
    out_w = jax.random.normal(k_out_w, (d_model, d_model), jnp.float32) * 0.05
    out_b = jax.random.normal(k_out_b, (d_model,), jnp.float32) * 0.05

    params = {
        'wq': in_proj_w[0 * d_model:1 * d_model],
        'wk': in_proj_w[1 * d_model:2 * d_model],
        'wv': in_proj_w[2 * d_model:3 * d_model],
        'bq': in_proj_b[0 * d_model:1 * d_model],
        'bk': in_proj_b[1 * d_model:2 * d_model],
        'bv': in_proj_b[2 * d_model:3 * d_model],
        'wo': out_w,
        'bo': out_b,
    }

    ref = reference_temporal_block_v2(x, params, T=T, n_head=n_head)

    # bf16 MXU operands (recommended on v5e/v6e/v7x); f32 accumulation & elementwise.
    out_bf16 = jax.block_until_ready(
        temporal_block_v2(x, params, T=T, n_head=n_head, compute_dtype=jnp.bfloat16))
    assert out_bf16.shape == (l, b * T, d_model)
    assert jnp.allclose(out_bf16, ref, rtol=2e-2, atol=2e-2), "bf16 mismatch vs reference"

    # f32 operands + exact softmax division: tighter check.
    out_f32 = jax.block_until_ready(
        temporal_block_v2(x, params, T=T, n_head=n_head, compute_dtype=jnp.float32))
    assert jnp.allclose(out_f32, ref, rtol=5e-3, atol=5e-3), "f32 mismatch vs reference"

    print("KERNEL_OK")
</pallas_src>

<mosaic_0001>
module attributes {stable_mosaic.version = 11 : i64} {
  func.func @_temporal_attn_gelu_kernel(%arg0: i32, %arg1: memref<64x32xf32, #tpu.memory_space<vmem>>, %arg2: memref<32x96xbf16, #tpu.memory_space<vmem>>, %arg3: memref<1x96xf32, #tpu.memory_space<vmem>>, %arg4: memref<32x32xbf16, #tpu.memory_space<vmem>>, %arg5: memref<1x32xf32, #tpu.memory_space<vmem>>, %arg6: memref<64x32xf32, #tpu.memory_space<vmem>>) attributes {dimension_semantics = [#tpu.dimension_semantics<parallel>], iteration_bounds = array<i64: 4>, scalar_prefetch = 0 : i64, scratch_operands = 0 : i64, tpu.core_type = #tpu.core_type<tc>, window_params = [{transform_indices = @transform_0, window_bounds = array<i64: 64, 32>}, {pipeline_mode = #tpu.pipeline_mode<synchronous>, transform_indices = @transform_1, window_bounds = array<i64: 32, 96>}, {pipeline_mode = #tpu.pipeline_mode<synchronous>, transform_indices = @transform_2, window_bounds = array<i64: 1, 96>}, {pipeline_mode = #tpu.pipeline_mode<synchronous>, transform_indices = @transform_3, window_bounds = array<i64: 32, 32>}, {pipeline_mode = #tpu.pipeline_mode<synchronous>, transform_indices = @transform_4, window_bounds = array<i64: 1, 32>}, {transform_indices = @transform_5, window_bounds = array<i64: 64, 32>}]} {
    %c0 = arith.constant 0 : index
    %c0_0 = arith.constant 0 : index
    %0 = vector.load %arg1[%c0, %c0_0] : memref<64x32xf32, #tpu.memory_space<vmem>>, vector<64x32xf32>
    %1 = arith.truncf %0 : vector<64x32xf32> to vector<64x32xbf16>
    %c0_1 = arith.constant 0 : index
    %c0_2 = arith.constant 0 : index
    %2 = vector.load %arg2[%c0_1, %c0_2] : memref<32x96xbf16, #tpu.memory_space<vmem>>, vector<32x96xbf16>
    %cst = arith.constant dense<0.000000e+00> : vector<64x96xf32>
    %3 = tpu.matmul %1, %2, %cst {dimension_numbers = #tpu.dot_dimension_numbers<[1], [0], [0], [1], [0, 0, 1, 1], [], []>} : vector<64x32xbf16>, vector<32x96xbf16>, vector<64x96xf32> -> vector<64x96xf32>
    %c0_3 = arith.constant 0 : index
    %c0_4 = arith.constant 0 : index
    %4 = vector.load %arg3[%c0_3, %c0_4] : memref<1x96xf32, #tpu.memory_space<vmem>>, vector<1x96xf32>
    %5 = vector.broadcast %4 : vector<1x96xf32> to vector<64x96xf32>
    %6 = arith.addf %3, %5 : vector<64x96xf32>
    %7 = arith.truncf %6 : vector<64x96xf32> to vector<64x96xbf16>
    %8 = vector.extract_strided_slice %7 {offsets = [0, 0], sizes = [64, 32], strides = [1, 1]} : vector<64x96xbf16> to vector<64x32xbf16>
    %9 = vector.shape_cast %8 : vector<64x32xbf16> to vector<8x8x4x8xbf16>
    %10 = tpu.transpose %9, [0, 2, 1, 3] : vector<8x8x4x8xbf16> -> vector<8x4x8x8xbf16>
    %11 = vector.shape_cast %10 : vector<8x4x8x8xbf16> to vector<32x8x8xbf16>
    %12 = vector.extract_strided_slice %7 {offsets = [0, 32], sizes = [64, 32], strides = [1, 1]} : vector<64x96xbf16> to vector<64x32xbf16>
    %13 = vector.shape_cast %12 : vector<64x32xbf16> to vector<8x8x4x8xbf16>
    %14 = tpu.transpose %13, [0, 2, 1, 3] : vector<8x8x4x8xbf16> -> vector<8x4x8x8xbf16>
    %15 = vector.shape_cast %14 : vector<8x4x8x8xbf16> to vector<32x8x8xbf16>
    %16 = vector.extract_strided_slice %7 {offsets = [0, 64], sizes = [64, 32], strides = [1, 1]} : vector<64x96xbf16> to vector<64x32xbf16>
    %17 = vector.shape_cast %16 : vector<64x32xbf16> to vector<8x8x4x8xbf16>
    %18 = tpu.transpose %17, [0, 2, 1, 3] : vector<8x8x4x8xbf16> -> vector<8x4x8x8xbf16>
    %19 = vector.shape_cast %18 : vector<8x4x8x8xbf16> to vector<32x8x8xbf16>
    "tpu.trace_start"() <{level = 10 : i32, message = "bqe,bke->bqk"}> : () -> ()
    %cst_5 = arith.constant dense<0.000000e+00> : vector<32x8x8xf32>
    %20 = tpu.matmul %11, %15, %cst_5 {dimension_numbers = #tpu.dot_dimension_numbers<[2], [2], [1], [1], [0, 0, 0, 1, 1, 1], [0], [0]>} : vector<32x8x8xbf16>, vector<32x8x8xbf16>, vector<32x8x8xf32> -> vector<32x8x8xf32>
    "tpu.trace_stop"() : () -> ()
    %cst_6 = arith.constant dense<0xFF800000> : vector<32x8xf32>
    %21 = vector.multi_reduction <maximumf>, %20, %cst_6 [2] : vector<32x8x8xf32> to vector<32x8xf32>
    %22 = vector.shape_cast %21 : vector<32x8xf32> to vector<32x8x1xf32>
    %23 = vector.broadcast %22 : vector<32x8x1xf32> to vector<32x8x8xf32>
    %24 = arith.subf %20, %23 : vector<32x8x8xf32>
    %25 = math.exp %24 : vector<32x8x8xf32>
    %cst_7 = arith.constant dense<0.000000e+00> : vector<32x8xf32>
    %26 = vector.multi_reduction <add>, %25, %cst_7 [2] : vector<32x8x8xf32> to vector<32x8xf32>
    %27 = vector.shape_cast %26 : vector<32x8xf32> to vector<32x8x1xf32>
    %28 = tpu.reciprocal %27 {approx = true} : vector<32x8x1xf32> -> vector<32x8x1xf32>
    %29 = vector.broadcast %28 : vector<32x8x1xf32> to vector<32x8x8xf32>
    %30 = arith.mulf %25, %29 : vector<32x8x8xf32>
    %31 = arith.truncf %30 : vector<32x8x8xf32> to vector<32x8x8xbf16>
    "tpu.trace_start"() <{level = 10 : i32, message = "bqk,bke->bqe"}> : () -> ()
    %cst_8 = arith.constant dense<0.000000e+00> : vector<32x8x8xf32>
    %32 = tpu.matmul %31, %19, %cst_8 {dimension_numbers = #tpu.dot_dimension_numbers<[2], [1], [1], [2], [0, 0, 0, 1, 1, 2], [0], [0]>} : vector<32x8x8xbf16>, vector<32x8x8xbf16>, vector<32x8x8xf32> -> vector<32x8x8xf32>
    "tpu.trace_stop"() : () -> ()
    %33 = vector.shape_cast %32 : vector<32x8x8xf32> to vector<8x4x8x8xf32>
    %34 = tpu.transpose %33, [0, 2, 1, 3] : vector<8x4x8x8xf32> -> vector<8x8x4x8xf32>
    %35 = vector.shape_cast %34 : vector<8x8x4x8xf32> to vector<64x32xf32>
    %36 = arith.truncf %35 : vector<64x32xf32> to vector<64x32xbf16>
    %c0_9 = arith.constant 0 : index
    %c0_10 = arith.constant 0 : index
    %37 = vector.load %arg4[%c0_9, %c0_10] : memref<32x32xbf16, #tpu.memory_space<vmem>>, vector<32x32xbf16>
    %cst_11 = arith.constant dense<0.000000e+00> : vector<64x32xf32>
    %38 = tpu.matmul %36, %37, %cst_11 {dimension_numbers = #tpu.dot_dimension_numbers<[1], [0], [0], [1], [0, 0, 1, 1], [], []>} : vector<64x32xbf16>, vector<32x32xbf16>, vector<64x32xf32> -> vector<64x32xf32>
    %c0_12 = arith.constant 0 : index
    %c0_13 = arith.constant 0 : index
    %39 = vector.load %arg5[%c0_12, %c0_13] : memref<1x32xf32, #tpu.memory_space<vmem>>, vector<1x32xf32>
    %40 = vector.broadcast %39 : vector<1x32xf32> to vector<64x32xf32>
    %41 = arith.addf %38, %40 : vector<64x32xf32>
    %cst_14 = arith.constant 1.702000e+00 : f32
    %42 = vector.broadcast %cst_14 : f32 to vector<64x32xf32>
    %43 = arith.mulf %42, %41 : vector<64x32xf32>
    %44 = arith.negf %43 : vector<64x32xf32>
    %45 = math.exp %44 : vector<64x32xf32>
    %cst_15 = arith.constant 1.000000e+00 : f32
    %46 = vector.broadcast %cst_15 : f32 to vector<64x32xf32>
    %47 = arith.addf %46, %45 : vector<64x32xf32>
    %48 = arith.divf %46, %47 : vector<64x32xf32>
    %49 = arith.mulf %41, %48 : vector<64x32xf32>
    %c0_16 = arith.constant 0 : index
    %c0_17 = arith.constant 0 : index
    %50 = vector.load %arg6[%c0_16, %c0_17] : memref<64x32xf32, #tpu.memory_space<vmem>>, vector<64x32xf32>
    tpu.vector_store %arg6[%c0_16, %c0_17], %49 {strides = array<i32>} : memref<64x32xf32, #tpu.memory_space<vmem>>, vector<64x32xf32>,
    return
  }
  func.func @transform_0(%arg0: i32) -> (i32, i32) {
    %c0_i32 = arith.constant 0 : i32
    %c0_i32_0 = arith.constant 0 : i32
    return %arg0, %c0_i32 : i32, i32
  }
  func.func @transform_1(%arg0: i32) -> (i32, i32) {
    %c0_i32 = arith.constant 0 : i32
    %c0_i32_0 = arith.constant 0 : i32
    %c0_i32_1 = arith.constant 0 : i32
    return %c0_i32, %c0_i32_0 : i32, i32
  }
  func.func @transform_2(%arg0: i32) -> (i32, i32) {
    %c0_i32 = arith.constant 0 : i32
    %c0_i32_0 = arith.constant 0 : i32
    %c0_i32_1 = arith.constant 0 : i32
    return %c0_i32, %c0_i32_0 : i32, i32
  }
  func.func @transform_3(%arg0: i32) -> (i32, i32) {
    %c0_i32 = arith.constant 0 : i32
    %c0_i32_0 = arith.constant 0 : i32
    %c0_i32_1 = arith.constant 0 : i32
    return %c0_i32, %c0_i32_0 : i32, i32
  }
  func.func @transform_4(%arg0: i32) -> (i32, i32) {
    %c0_i32 = arith.constant 0 : i32
    %c0_i32_0 = arith.constant 0 : i32
    %c0_i32_1 = arith.constant 0 : i32
    return %c0_i32, %c0_i32_0 : i32, i32
  }
  func.func @transform_5(%arg0: i32) -> (i32, i32) {
    %c0_i32 = arith.constant 0 : i32
    %c0_i32_0 = arith.constant 0 : i32
    return %arg0, %c0_i32 : i32, i32
  }
}

module attributes {stable_mosaic.version = 11 : i64} {
  func.func @_temporal_attn_gelu_kernel(%arg0: i32, %arg1: memref<64x32xf32, #tpu.memory_space<vmem>>, %arg2: memref<32x96xbf16, #tpu.memory_space<vmem>>, %arg3: memref<1x96xf32, #tpu.memory_space<vmem>>, %arg4: memref<32x32xbf16, #tpu.memory_space<vmem>>, %arg5: memref<1x32xf32, #tpu.memory_space<vmem>>, %arg6: memref<64x32xf32, #tpu.memory_space<vmem>>) attributes {dimension_semantics = [#tpu.dimension_semantics<parallel>], iteration_bounds = array<i64: 4>, scalar_prefetch = 0 : i64, scratch_operands = 0 : i64, tpu.core_type = #tpu.core_type<tc>, window_params = [{transform_indices = @transform_0, window_bounds = array<i64: 64, 32>}, {pipeline_mode = #tpu.pipeline_mode<synchronous>, transform_indices = @transform_1, window_bounds = array<i64: 32, 96>}, {pipeline_mode = #tpu.pipeline_mode<synchronous>, transform_indices = @transform_2, window_bounds = array<i64: 1, 96>}, {pipeline_mode = #tpu.pipeline_mode<synchronous>, transform_indices = @transform_3, window_bounds = array<i64: 32, 32>}, {pipeline_mode = #tpu.pipeline_mode<synchronous>, transform_indices = @transform_4, window_bounds = array<i64: 1, 32>}, {transform_indices = @transform_5, window_bounds = array<i64: 64, 32>}]} {
    %c0 = arith.constant 0 : index
    %c0_0 = arith.constant 0 : index
    %0 = vector.load %arg1[%c0, %c0_0] : memref<64x32xf32, #tpu.memory_space<vmem>>, vector<64x32xf32>
    %1 = arith.truncf %0 : vector<64x32xf32> to vector<64x32xbf16>
    %c0_1 = arith.constant 0 : index
    %c0_2 = arith.constant 0 : index
    %2 = vector.load %arg2[%c0_1, %c0_2] : memref<32x96xbf16, #tpu.memory_space<vmem>>, vector<32x96xbf16>
    %cst = arith.constant dense<0.000000e+00> : vector<64x96xf32>
    %3 = tpu.matmul %1, %2, %cst {dimension_numbers = #tpu.dot_dimension_numbers<[1], [0], [0], [1], [0, 0, 1, 1], [], []>} : vector<64x32xbf16>, vector<32x96xbf16>, vector<64x96xf32> -> vector<64x96xf32>
    %c0_3 = arith.constant 0 : index
    %c0_4 = arith.constant 0 : index
    %4 = vector.load %arg3[%c0_3, %c0_4] : memref<1x96xf32, #tpu.memory_space<vmem>>, vector<1x96xf32>
    %5 = vector.broadcast %4 : vector<1x96xf32> to vector<64x96xf32>
    %6 = arith.addf %3, %5 : vector<64x96xf32>
    %7 = arith.truncf %6 : vector<64x96xf32> to vector<64x96xbf16>
    %8 = vector.extract_strided_slice %7 {offsets = [0, 0], sizes = [64, 32], strides = [1, 1]} : vector<64x96xbf16> to vector<64x32xbf16>
    %9 = vector.shape_cast %8 : vector<64x32xbf16> to vector<8x8x4x8xbf16>
    %10 = tpu.transpose %9, [0, 2, 1, 3] : vector<8x8x4x8xbf16> -> vector<8x4x8x8xbf16>
    %11 = vector.shape_cast %10 : vector<8x4x8x8xbf16> to vector<32x8x8xbf16>
    %12 = vector.extract_strided_slice %7 {offsets = [0, 32], sizes = [64, 32], strides = [1, 1]} : vector<64x96xbf16> to vector<64x32xbf16>
    %13 = vector.shape_cast %12 : vector<64x32xbf16> to vector<8x8x4x8xbf16>
    %14 = tpu.transpose %13, [0, 2, 1, 3] : vector<8x8x4x8xbf16> -> vector<8x4x8x8xbf16>
    %15 = vector.shape_cast %14 : vector<8x4x8x8xbf16> to vector<32x8x8xbf16>
    %16 = vector.extract_strided_slice %7 {offsets = [0, 64], sizes = [64, 32], strides = [1, 1]} : vector<64x96xbf16> to vector<64x32xbf16>
    %17 = vector.shape_cast %16 : vector<64x32xbf16> to vector<8x8x4x8xbf16>
    %18 = tpu.transpose %17, [0, 2, 1, 3] : vector<8x8x4x8xbf16> -> vector<8x4x8x8xbf16>
    %19 = vector.shape_cast %18 : vector<8x4x8x8xbf16> to vector<32x8x8xbf16>
    "tpu.trace_start"() <{level = 10 : i32, message = "bqe,bke->bqk"}> : () -> ()
    %cst_5 = arith.constant dense<0.000000e+00> : vector<32x8x8xf32>
    %20 = tpu.matmul %11, %15, %cst_5 {dimension_numbers = #tpu.dot_dimension_numbers<[2], [2], [1], [1], [0, 0, 0, 1, 1, 1], [0], [0]>} : vector<32x8x8xbf16>, vector<32x8x8xbf16>, vector<32x8x8xf32> -> vector<32x8x8xf32>
    "tpu.trace_stop"() : () -> ()
    %cst_6 = arith.constant dense<0xFF800000> : vector<32x8xf32>
    %21 = vector.multi_reduction <maximumf>, %20, %cst_6 [2] : vector<32x8x8xf32> to vector<32x8xf32>
    %22 = vector.shape_cast %21 : vector<32x8xf32> to vector<32x8x1xf32>
    %23 = vector.broadcast %22 : vector<32x8x1xf32> to vector<32x8x8xf32>
    %24 = arith.subf %20, %23 : vector<32x8x8xf32>
    %25 = math.exp %24 : vector<32x8x8xf32>
    %cst_7 = arith.constant dense<0.000000e+00> : vector<32x8xf32>
    %26 = vector.multi_reduction <add>, %25, %cst_7 [2] : vector<32x8x8xf32> to vector<32x8xf32>
    %27 = vector.shape_cast %26 : vector<32x8xf32> to vector<32x8x1xf32>
    %28 = tpu.reciprocal %27 {approx = true} : vector<32x8x1xf32> -> vector<32x8x1xf32>
    %29 = vector.broadcast %28 : vector<32x8x1xf32> to vector<32x8x8xf32>
    %30 = arith.mulf %25, %29 : vector<32x8x8xf32>
    %31 = arith.truncf %30 : vector<32x8x8xf32> to vector<32x8x8xbf16>
    "tpu.trace_start"() <{level = 10 : i32, message = "bqk,bke->bqe"}> : () -> ()
    %cst_8 = arith.constant dense<0.000000e+00> : vector<32x8x8xf32>
    %32 = tpu.matmul %31, %19, %cst_8 {dimension_numbers = #tpu.dot_dimension_numbers<[2], [1], [1], [2], [0, 0, 0, 1, 1, 2], [0], [0]>} : vector<32x8x8xbf16>, vector<32x8x8xbf16>, vector<32x8x8xf32> -> vector<32x8x8xf32>
    "tpu.trace_stop"() : () -> ()
    %33 = vector.shape_cast %32 : vector<32x8x8xf32> to vector<8x4x8x8xf32>
    %34 = tpu.transpose %33, [0, 2, 1, 3] : vector<8x4x8x8xf32> -> vector<8x8x4x8xf32>
    %35 = vector.shape_cast %34 : vector<8x8x4x8xf32> to vector<64x32xf32>
    %36 = arith.truncf %35 : vector<64x32xf32> to vector<64x32xbf16>
    %c0_9 = arith.constant 0 : index
    %c0_10 = arith.constant 0 : index
    %37 = vector.load %arg4[%c0_9, %c0_10] : memref<32x32xbf16, #tpu.memory_space<vmem>>, vector<32x32xbf16>
    %cst_11 = arith.constant dense<0.000000e+00> : vector<64x32xf32>
    %38 = tpu.matmul %36, %37, %cst_11 {dimension_numbers = #tpu.dot_dimension_numbers<[1], [0], [0], [1], [0, 0, 1, 1], [], []>} : vector<64x32xbf16>, vector<32x32xbf16>, vector<64x32xf32> -> vector<64x32xf32>
    %c0_12 = arith.constant 0 : index
    %c0_13 = arith.constant 0 : index
    %39 = vector.load %arg5[%c0_12, %c0_13] : memref<1x32xf32, #tpu.memory_space<vmem>>, vector<1x32xf32>
    %40 = vector.broadcast %39 : vector<1x32xf32> to vector<64x32xf32>
    %41 = arith.addf %38, %40 : vector<64x32xf32>
    %cst_14 = arith.constant 1.702000e+00 : f32
    %42 = vector.broadcast %cst_14 : f32 to vector<64x32xf32>
    %43 = arith.mulf %42, %41 : vector<64x32xf32>
    %44 = arith.negf %43 : vector<64x32xf32>
    %45 = math.exp %44 : vector<64x32xf32>
    %cst_15 = arith.constant 1.000000e+00 : f32
    %46 = vector.broadcast %cst_15 : f32 to vector<64x32xf32>
    %47 = arith.addf %46, %45 : vector<64x32xf32>
    %48 = arith.divf %46, %47 : vector<64x32xf32>
    %49 = arith.mulf %41, %48 : vector<64x32xf32>
    %c0_16 = arith.constant 0 : index
    %c0_17 = arith.constant 0 : index
    %50 = vector.load %arg6[%c0_16, %c0_17] : memref<64x32xf32, #tpu.memory_space<vmem>>, vector<64x32xf32>
    tpu.vector_store %arg6[%c0_16, %c0_17], %49 {strides = array<i32>} : memref<64x32xf32, #tpu.memory_space<vmem>>, vector<64x32xf32>,
    return
  }
  func.func @transform_0(%arg0: i32) -> (i32, i32) {
    %c0_i32 = arith.constant 0 : i32
    %c0_i32_0 = arith.constant 0 : i32
    return %arg0, %c0_i32 : i32, i32
  }
  func.func @transform_1(%arg0: i32) -> (i32, i32) {
    %c0_i32 = arith.constant 0 : i32
    %c0_i32_0 = arith.constant 0 : i32
    %c0_i32_1 = arith.constant 0 : i32
    return %c0_i32, %c0_i32_0 : i32, i32
  }
  func.func @transform_2(%arg0: i32) -> (i32, i32) {
    %c0_i32 = arith.constant 0 : i32
    %c0_i32_0 = arith.constant 0 : i32
    %c0_i32_1 = arith.constant 0 : i32
    return %c0_i32, %c0_i32_0 : i32, i32
  }
  func.func @transform_3(%arg0: i32) -> (i32, i32) {
    %c0_i32 = arith.constant 0 : i32
    %c0_i32_0 = arith.constant 0 : i32
    %c0_i32_1 = arith.constant 0 : i32
    return %c0_i32, %c0_i32_0 : i32, i32
  }
  func.func @transform_4(%arg0: i32) -> (i32, i32) {
    %c0_i32 = arith.constant 0 : i32
    %c0_i32_0 = arith.constant 0 : i32
    %c0_i32_1 = arith.constant 0 : i32
    return %c0_i32, %c0_i32_0 : i32, i32
  }
  func.func @transform_5(%arg0: i32) -> (i32, i32) {
    %c0_i32 = arith.constant 0 : i32
    %c0_i32_0 = arith.constant 0 : i32
    return %arg0, %c0_i32 : i32, i32
  }
}

</mosaic_0001>

<bundles_post_ra>
// kernel: tpu_custom_call.1
= control target key start
LH: loop header
LB: loop body
LE: loop exit
PB: predicated region body
PF: predicated region fallthrough
CT: control target
= control target key end

     0   :  { %s9489_s18 = smov 0   ;;  %s11865_s0 = inlined_call_operand.vmem [shape: f32[256,32], index: 0, kind: input, shape index: {}]   ;;  %s11866_s1 = inlined_call_operand.vmem [shape: bf16[32,96], index: 1, kind: input, shape index: {}]   ;;  %s11867_s2 = inlined_call_operand.vmem [shape: f32[1,96], index: 2, kind: input, shape index: {}]   ;;  %s11868_s3 = inlined_call_operand.vmem [shape: bf16[32,32], index: 3, kind: input, shape index: {}]   ;;  %s11869_s4 = inlined_call_operand.vmem [shape: f32[1,32], index: 4, kind: input, shape index: {}]   ;;  %s11870_s5 = inlined_call_operand.vmem [shape: f32[256,32], index: 5, kind: output, shape index: {}]  }
   0x1 LB: > { %s8480_s19 = sadd.s32 4294967295, %s9444_s18   ;;  %p8484_p0 = scmp.ge.s32.totalorder %s9444_s18, 1  ;;  %s9444_s18 = sphi %s9489_s18, %s15_s18  }
   0x2   : > { %p188_p1 = scmp.lt.s32.totalorder %s9444_s18, 5 }
   0x4   : > { %p189_p2 = pnand %p8484_p0, %p188_p1 }
   0x6   : > { %192 = sbr.rel (%p189_p2) target bundleno = 1895 (0x767), region = 40 }
   0xd   : > { %v9274_v0 = vld [vmem:[%s11866_s1] sm:$0xff]   ;;  %s8485_s22 = sshll.u32 %s8480_s19, 3  ;;  %v9275_v1 = vld [vmem:[%s11866_s1 + $0x8] sm:$0xff]   ;;  %vm264_vm0 = vcmask 261120   ;;  %s9446_s6 = smov 104   ;;  %v11871_v41 = vmov 0.0   ;;  %v448_v48 = vlaneseq }
   0xe   : > { %p217_p3 = scmp.lt.s32.totalorder %s8485_s22, 31  ;;  %8781 = vmatprep.subr.bf16.mxu0 %v9274_v0  ;;  %9189 = vmatprep.subr.bf16.mxu1 %v9274_v0  ;;  %v8489_v15 = vld [vmem:[%s11867_s2] ss:$0 sm:$0xff]  ;;  %s9447_s7 = smov 120   ;;  %vm9451_vm1 = vmmov 0   ;;  %v11873_v60 = vmov 0  }
   0xf   : > { %8782 = vmatpush3.bf16.msra.mxu0 %v9274_v0  ;;  %9191 = vmatpush3.bf16.msra.mxu1 %v9274_v0  ;;  %s9448_s8 = smov 112   ;;  %s9449_s9 = smov 96   ;;  %v9452_v46 = vmov 1983009808   ;;  %v449_v53 = vshrl.u32 %v448_v48, 7  ;;  %v9599_v61 = vpack.i.b16 %v11873_v60, %v11873_v60  ;;  %vm3708_vm2 = vcmask 64512  }
  0x10   : > { %s11992_s22 = smov (!%p217_p3, %s8485_s22), 31  ;;  %8783 = vmatprep.subr.bf16.mxu0 %v9275_v1  ;;  %9190 = vmatprep.subr.bf16.mxu1 %v9275_v1  ;;  %v446_v47 = vunpack.c.l.s4 %v9452_v46  ;;  %v9453_v56 = vmov 1934713408   ;;  %s9455_s10 = smov 64   ;;  %vm5568_vm3 = vcmask 1043456   ;;  %vm8230_vm4 = vcmask 130048  }
  0x11   : > { %s8486_s25 = sshll.u32 %s11992_s22, 3  ;;  %v477_v57 = vunpack.c.l.s4 %v9453_v56  ;;  %11905 = vst [vmem:[#allocation4_spill] sm:$0xff] %v9599_v61  ;;  %s9456_s11 = smov 24   ;;  %vm8239_vm5 = vcmask 195584  }
  0x12   : > { %s220_s28 = scalar_lea.vmem %s11865_s0, %s8486_s25  ;;  %v447_v52 = vunpack.c.0.s8 %v446_v47  ;;  %s9457_s12 = smov 8  }
  0x13   : > { %8784 = vmatpush3.bf16.msra.mxu0 %v9275_v1  ;;  %v229_v2 = vld [vmem:[%s220_s28] sm:$0xff]  ;;  %v230_v3 = vld [vmem:[%s220_s28 + $0x8] sm:$0xff]  ;;  %v231_v4 = vld [vmem:[%s220_s28 + $0x10] sm:$0xff]  ;;  %9192 = vmatpush3.bf16.msra.mxu1 %v9275_v1  ;;  %s9458_s13 = smov 16   ;;  %s11844_s24 = scalar_lea.vmem %s11870_s5, %s8486_s25 }
  0x14   : > { %v237_v5 = vpack.c.bf16 %v230_v3, %v229_v2  ;;  %v232_v6 = vld [vmem:[%s220_s28 + $0x18] sm:$0xff]  ;;  %v233_v7 = vld [vmem:[%s220_s28 + $0x20] sm:$0xff]  ;;  %v234_v8 = vld [vmem:[%s220_s28 + $0x28] sm:$0xff]  ;;  %8793 = vmatprep.subr.bf16.mxu1 %v11871_v41  ;;  %8805 = vmatprep.subr.bf16.mxu0 %v11871_v41  ;;  %v9610_v2 = vsub.s32 %v447_v52, %v449_v53 }
  0x15   : > { %v238_v9 = vpack.c.bf16 %v232_v6, %v231_v4  ;;  %v239_v10 = vpack.c.bf16 %v234_v8, %v233_v7  ;;  %v235_v11 = vld [vmem:[%s220_s28 + $0x30] sm:$0xff]  ;;  %v236_v12 = vld [vmem:[%s220_s28 + $0x38] sm:$0xff]  ;;  %v478_v6 = vunpack.c.0.s8 %v477_v57 }
  0x16   : > { %8785 = vmatprep.mubr.msk.bf16.mxu0 %vm264_vm0, %v237_v5  ;;  %v240_v13 = vpack.c.bf16 %v236_v12, %v235_v11  ;;  %11907 = vst [vmem:[#allocation6_spill] sm:$0xff] %v9610_v2 }
  0x17   : > { %8786 = vmatmul.mubr.msk.bf16.vlgmr.msra.gmra.mrb[0].mxu0 %vm264_vm0, %v238_v9  ;;  %8789 = vmatprep.mubr.msk.bf16.mxu1 %vm264_vm0, %v239_v10 }
  0x18   : > { %8790 = vmatmul.mubr.msk.bf16.vlgmr.msra.gmra.mrb[0].mxu1 %vm264_vm0, %v240_v13  ;;  %8807 = vmatprep.mubr.msk.bf16.mxu0 %vm9451_vm1, %v11871_v41 }
  0x19   : > { %8795 = vmatprep.mubr.msk.bf16.mxu1 %vm9451_vm1, %v11871_v41 }
  0xea   : > { %v8787_v14 = vpop.f32.mrb[0].mxu0 }
  0xeb   : > { %v311_v16 = vpop.f32.mrb[1].mxu0  ;;  %v8791_v17 = vpop.f32.mrb[0].mxu1  ;;  %v320_v21 = vadd.f32 %v8787_v14, %v8489_v15 }
  0xec   : > { %v8788_v18 = vpop.f32.mrb[2].mxu0  ;;  %v336_v19 = vadd.f32 %v8791_v17, %v8489_v15  ;;  %v327_v20 = vpop.f32.mrb[1].mxu1  ;;  %v312_v26 = vadd.f32 %v8489_v15, %v311_v16 }
  0xed   : > { %v323_v22 = vadd.f32 %v8788_v18, %v8489_v15  ;;  %v314_v23 = vpop.f32.mrb[3].mxu0  ;;  %v328_v24 = vadd.f32 %v8489_v15, %v327_v20  ;;  %v8792_v25 = vpop.f32.mrb[2].mxu1  ;;  %v9627_v18 = vsub.s32 %v478_v6, %v449_v53 }
  0xee   : > { %v315_v27 = vadd.f32 %v8489_v15, %v314_v23  ;;  %v339_v28 = vadd.f32 %v8792_v25, %v8489_v15  ;;  %v330_v29 = vpop.f32.mrb[3].mxu1 }
  0xef   : > { %v9518_v30 = vpack.c.bf16 %v323_v22, %v320_v21  ;;  %v331_v31 = vadd.f32 %v8489_v15, %v330_v29  ;;  %11908 = vst [vmem:[#allocation7_spill] sm:$0xff] %v9627_v18 }
  0xf0   : > { %v9520_v32 = vpack.c.bf16 %v315_v27, %v312_v26  ;;  %v9522_v33 = vpack.c.bf16 %v339_v28, %v336_v19 }
  0xf1   : > { %v9524_v34 = vpack.c.bf16 %v331_v31, %v328_v24  ;;  %v400_v13 = vshrl.u32 %v9518_v30, 16 }
  0xf2   : > { %11903 = vst [vmem:[#allocation2_spill] sm:$0xff] %v9522_v33  ;;  %366 = vrot.lane.b32.xlu1 %v9520_v32, %s9446_s6  ;;  %350 = vrot.lane.b32.xlu0 %v9520_v32, %s9447_s7  ;;  %v378_v55 = vshrl.u32 %v9520_v32, 16 }
  0xf6   : > { %352 = vrot.lane.b32.xlu1 %v9518_v30, %s9447_s7  ;;  %358 = vrot.lane.b32.xlu0 %v9520_v32, %s9448_s8 }
  0xfa   : > { %368 = vrot.lane.b32.xlu1 %v9518_v30, %s9446_s6  ;;  %360 = vrot.lane.b32.xlu0 %v9518_v30, %s9448_s8 }
  0xfe   : > { %1468 = vrot.lane.b32.xlu0 %v9520_v32, %s9449_s9 }
 0x164   : > { %v9534_v35 = vpop.permute.xlu0 %350  ;;  %v9538_v36 = vpop.permute.xlu1 %366 }
 0x165   : > { %1476 = vrot.lane.b32.xlu1 %v9534_v35, %s9449_s9  ;;  %v379_v51 = vshrl.u32 %v9534_v35, 16  ;;  %v376_v62 = vpack.i.b16 %v9534_v35, %v9520_v32  ;;  %v387_v0 = vshrl.u32 %v9538_v36, 16 }
 0x167   : > { %v380_v1 = vpack.i.b16 %v379_v51, %v378_v55  ;;  %v444_v9 = vcombine.high %v376_v62, %v9599_v61  ;;  %v451_v14 = vrot.slane %v376_v62, %v9610_v2 }
 0x168   : > { %v9540_v37 = vpop.permute.xlu0 %358  ;;  %v9551_v38 = vpop.permute.xlu1 %352 }
 0x169   : > { %1492 = vrot.lane.b32.xlu1 %v9538_v36, %s9449_s9  ;;  %1484 = vrot.lane.b32.xlu0 %v9540_v37, %s9449_s9  ;;  %v384_v54 = vpack.i.b16 %v9538_v36, %v9540_v37  ;;  %v386_v58 = vshrl.u32 %v9540_v37, 16  ;;  %v398_v4 = vpack.i.b16 %v9551_v38, %v9518_v30  ;;  %v401_v5 = vshrl.u32 %v9551_v38, 16 }
 0x16a   : > { %v510_v12 = vcombine.high %v380_v1, %v9599_v61  ;;  %v458_v21 = vrot.slane %v444_v9, %v9610_v2  ;;  %v517_v26 = vrot.slane %v380_v1, %v9610_v2 }
 0x16b   : > { %v459_v3 = vcombine.high %v384_v54, %v9599_v61  ;;  %v388_v7 = vpack.i.b16 %v387_v0, %v386_v58  ;;  %v466_v10 = vrot.slane %v384_v54, %v9610_v2  ;;  %v402_v16 = vpack.i.b16 %v401_v5, %v400_v13 }
 0x16c   : > { %v9553_v39 = vpop.permute.xlu0 %360  ;;  %v9559_v40 = vpop.permute.xlu1 %368  ;;  %v576_v17 = vcombine.high %v398_v4, %v9599_v61  ;;  %v524_v27 = vrot.slane %v510_v12, %v9610_v2  ;;  %v9642_v28 = vrot.slane %v398_v4, %v9610_v2 }
 0x16d   : > { %362 = vrot.lane.b32.xlu1 %v9524_v34, %s9448_s8  ;;  %354 = vrot.lane.b32.xlu0 %v9524_v34, %s9447_s7  ;;  %v473_v15 = vrot.slane %v459_v3, %v9610_v2  ;;  %v525_v19 = vcombine.high %v388_v7, %v9599_v61  ;;  %v474_v22 = vcombine.low %v451_v14, %v466_v10  ;;  %v409_v47 = vshrl.u32 %v9559_v40, 16 }
 0x16e   : > { %v532_v23 = vrot.slane %v388_v7, %v9610_v2  ;;  %v475_v29 = vcombine.high %v451_v14, %v466_v10  ;;  %v408_v48 = vshrl.u32 %v9553_v39, 16  ;;  %v9647_v51 = vrot.slane %v576_v17, %v9610_v2 }
 0x16f   : > { %v490_v31 = vcombine.low %v458_v21, %v473_v15  ;;  %v491_v46 = vcombine.high %v458_v21, %v473_v15  ;;  %v642_v52 = vcombine.high %v402_v16, %v9599_v61  ;;  %v539_v53 = vrot.slane %v525_v19, %v9610_v2 }
 0x170   : > { %v9576_v43 = vpop.permute.xlu0 %1468  ;;  %v482_v56 = vrot.slane %v474_v22, %v9627_v18  ;;  %v540_v57 = vcombine.low %v517_v26, %v532_v23  ;;  %v541_v58 = vcombine.high %v517_v26, %v532_v23  ;;  %v406_v62 = vpack.i.b16 %v9559_v40, %v9553_v39 }
 0x171   : > { %1470 = vrot.lane.b32.xlu1 %v9518_v30, %s9449_s9  ;;  %370 = vrot.lane.b32.xlu0 %v9524_v34, %s9446_s6  ;;  %v489_v1 = vrot.slane %v475_v29, %v9627_v18  ;;  %v9670_v6 = vrot.slane %v402_v16, %v9610_v2  ;;  %v9673_v7 = vrot.slane %v490_v31, %v9627_v18  ;;  %v1504_v21 = vshrl.u32 %v9576_v43, 16 }
 0x172   : > { %v9676_v9 = vrot.slane %v491_v46, %v9627_v18  ;;  %v410_v10 = vpack.i.b16 %v409_v47, %v408_v48  ;;  %v9679_v12 = vrot.slane %v642_v52, %v9610_v2  ;;  %v556_v13 = vcombine.low %v524_v27, %v539_v53 }
 0x173   : > { %v9684_v14 = vrot.slane %v540_v57, %v9627_v18  ;;  %v9687_v15 = vrot.slane %v541_v58, %v9627_v18  ;;  %v557_v16 = vcombine.high %v524_v27, %v539_v53  ;;  %v598_v17 = vrot.slane %v406_v62, %v9610_v2 }
 0x174   : > { %v972_v19 = vcombine.low %v482_v56, %v489_v1  ;;  %v8496_v23 = vcombine.high %v482_v56, %v489_v1  ;;  %v1022_v26 = vcombine.low %v9673_v7, %v9676_v9  ;;  %v8498_v27 = vcombine.high %v9673_v7, %v9676_v9 }
 0x175   : > { %1486 = vrot.lane.b32.xlu1 %v9553_v39, %s9449_s9  ;;  %1478 = vrot.lane.b32.xlu0 %v9551_v38, %s9449_s9  ;;  %v591_v29 = vcombine.high %v406_v62, %v9599_v61  ;;  %v9705_v47 = vrot.slane %v557_v16, %v9627_v18  ;;  %v8497_v48 = vcombine.high %v9684_v14, %v9687_v15 }
 0x176   : > { %v9715_v53 = vrot.slane %v972_v19, %v9610_v2  ;;  %v606_v56 = vcombine.low %v9642_v28, %v598_v17  ;;  %v9723_v62 = vrot.slane %v8496_v23, %v9610_v2  ;;  %v657_v1 = vcombine.high %v410_v10, %v9599_v61 }
 0x177   : > { %v607_v16 = vcombine.high %v9642_v28, %v598_v17 }
 0x178   : > { %v9749_v17 = vrot.slane %v657_v1, %v9610_v2 }
 0x179   : > { %356 = vrot.lane.b32.xlu1 %v9522_v33, %s9447_s7  ;;  %1494 = vrot.lane.b32.xlu0 %v9559_v40, %s9449_s9 }
 0x17d   : > { %372 = vrot.lane.b32.xlu1 %v9522_v33, %s9446_s6  ;;  %364 = vrot.lane.b32.xlu0 %v9522_v33, %s9448_s8 }
 0x181   : > { %1472 = vrot.lane.b32.xlu0 %v9524_v34, %s9449_s9 }
 0x1d7   : > { %v9574_v42 = vpop.permute.xlu1 %1476 }
 0x1d8   : > { %v1502_v3 = vpack.i.b16 %v9574_v42, %v9576_v43 }
 0x1db   : > { %v9578_v44 = vpop.permute.xlu1 %1492  ;;  %v9580_v45 = vpop.permute.xlu0 %1484 }
 0x1dc   : > { %v1510_v54 = vpack.i.b16 %v9578_v44, %v9580_v45  ;;  %v1513_v4 = vshrl.u32 %v9578_v44, 16  ;;  %v1512_v5 = vshrl.u32 %v9580_v45, 16  ;;  %v1505_v44 = vshrl.u32 %v9574_v42, 16 }
 0x1dd   : > { %v1571_v42 = vrot.slane %v1502_v3, %v9610_v2 }
 0x1de   : > { %v1586_v45 = vrot.slane %v1510_v54, %v9610_v2  ;;  %v1514_v22 = vpack.i.b16 %v1513_v4, %v1512_v5  ;;  %v1506_v31 = vpack.i.b16 %v1505_v44, %v1504_v21  ;;  %v1579_v52 = vcombine.high %v1510_v54, %v9599_v61 }
 0x1df   : > { %v9582_v49 = vpop.permute.xlu1 %362  ;;  %v9584_v50 = vpop.permute.xlu0 %354  ;;  %v605_v54 = vrot.slane %v591_v29, %v9610_v2 }
 0x1e0   : > { %11904 = vst [vmem:[#allocation3_spill] sm:$0xff] %v9584_v50  ;;  %1488 = vrot.lane.b32.xlu0 %v9582_v49, %s9449_s9  ;;  %1480 = vrot.lane.b32.xlu1 %v9584_v50, %s9449_s9  ;;  %v1594_v43 = vcombine.low %v1571_v42, %v1586_v45  ;;  %v1595_v46 = vcombine.high %v1571_v42, %v1586_v45 }
 0x1e1   : > { %v1645_v57 = vcombine.high %v1514_v22, %v9599_v61  ;;  %v1652_v58 = vrot.slane %v1514_v22, %v9610_v2  ;;  %v1630_v4 = vcombine.high %v1506_v31, %v9599_v61  ;;  %v1637_v5 = vrot.slane %v1506_v31, %v9610_v2 }
 0x1e2   : > { %v1609_v44 = vrot.slane %v1595_v46, %v9627_v18  ;;  %v1593_v19 = vrot.slane %v1579_v52, %v9610_v2  ;;  %v622_v23 = vcombine.low %v9647_v51, %v605_v54  ;;  %v623_v29 = vcombine.high %v9647_v51, %v605_v54 }
 0x1e3   : > { %v9595_v59 = vpop.permute.xlu1 %1470  ;;  %v9603_v63 = vpop.permute.xlu0 %370  ;;  %v1659_v21 = vrot.slane %v1645_v57, %v9610_v2  ;;  %v1660_v42 = vcombine.low %v1637_v5, %v1652_v58  ;;  %v1661_v22 = vcombine.high %v1637_v5, %v1652_v58  ;;  %v664_v31 = vrot.slane %v410_v10, %v9610_v2 }
 0x1e4   : > { %11906 = vst [vmem:[#allocation5_spill] sm:$0xff] %v9603_v63  ;;  %1474 = vrot.lane.b32.xlu0 %v9522_v33, %s9449_s9  ;;  %1496 = vrot.lane.b32.xlu1 %v9603_v63, %s9449_s9  ;;  %v9753_v52 = vrot.slane %v607_v16, %v9627_v18  ;;  %v988_v58 = vcombine.low %v9715_v53, %v9723_v62 }
 0x1e5   : > { %v1668_v51 = vrot.slane %v1660_v42, %v9627_v18  ;;  %v1675_v10 = vrot.slane %v1661_v22, %v9627_v18  ;;  %v672_v5 = vcombine.low %v9670_v6, %v664_v31 }
 0x1e7   : > { %v9616_v8 = vpop.permute.xlu1 %1486  ;;  %v9620_v11 = vpop.permute.xlu0 %1478 }
 0x1e8   : > { %v1528_v22 = vshrl.u32 %v9616_v8, 16 }
 0x1eb   : > { %v9630_v20 = vpop.permute.xlu1 %356  ;;  %v9635_v25 = vpop.permute.xlu0 %1494 }
 0x1ec   : > { %11909 = vst [vmem:[#allocation8_spill] sm:$0xff] %v9630_v20  ;;  %1482 = vrot.lane.b32.xlu1 %v9630_v20, %s9449_s9 }
 0x1ef   : > { %v9653_v55 = vpop.permute.xlu1 %372  ;;  %v9658_v0 = vpop.permute.xlu0 %364 }
 0x1f0   : > { %11910 = vst [vmem:[#allocation9_spill] sm:$0xff] %v9653_v55  ;;  %11911 = vst [vmem:[#allocation10_spill] sm:$0xff] %v9658_v0  ;;  %1498 = vrot.lane.b32.xlu1 %v9653_v55, %s9449_s9  ;;  %1490 = vrot.lane.b32.xlu0 %v9658_v0, %s9449_s9 }
 0x1f4   : > { %2588 = vrot.lane.b32.xlu1 %v9520_v32, %s9455_s10  ;;  %2598 = vrot.lane.b32.xlu0 %v9551_v38, %s9455_s10  ;;  %v9702_v32 = vrot.slane %v556_v13, %v9627_v18  ;;  %v997_v38 = vcombine.low %v9684_v14, %v9687_v15  ;;  %v1602_v13 = vrot.slane %v1594_v43, %v9627_v18 }
 0x1f5   : > { %v9810_v14 = vrot.slane %v672_v5, %v9627_v18 }
 0x1f6   : > { %v8499_v45 = vcombine.high %v9702_v32, %v9705_v47  ;;  %v2092_v43 = vcombine.low %v1602_v13, %v1609_v44  ;;  %v8512_v46 = vcombine.high %v1602_v13, %v1609_v44  ;;  %v1529_v13 = vshrl.u32 %v9635_v25, 16 }
 0x1f7   : > { %v673_v44 = vcombine.high %v9670_v6, %v664_v31  ;;  %v2117_v31 = vcombine.low %v1668_v51, %v1675_v10 }
 0x1f8   : > { %2590 = vrot.lane.b32.xlu1 %v9518_v30, %s9455_s10  ;;  %2596 = vrot.lane.b32.xlu0 %v9534_v35, %s9455_s10  ;;  %v1564_v30 = vcombine.high %v1502_v3, %v9599_v61  ;;  %v1047_v35 = vcombine.low %v9702_v32, %v9705_v47  ;;  %v9741_v3 = vrot.slane %v606_v56, %v9627_v18 }
 0x1f9   : > { %v2099_v16 = vrot.slane %v2092_v43, %v9610_v2  ;;  %v9813_v15 = vrot.slane %v673_v44, %v9627_v18  ;;  %v1062_v9 = vrot.slane %v8499_v45, %v9610_v2 }
 0x1fa   : > { %v1578_v28 = vrot.slane %v1564_v30, %v9610_v2  ;;  %v9762_v30 = vrot.slane %v622_v23, %v9627_v18  ;;  %v1521_v23 = vshrl.u32 %v9620_v11, 16  ;;  %v1072_v43 = vcombine.low %v9741_v3, %v9753_v52 }
 0x1fb   : > { %v1097_v62 = vcombine.low %v9810_v14, %v9813_v15  ;;  %v1054_v7 = vrot.slane %v1047_v35, %v9610_v2 }
 0x1fc   : > { %2606 = vrot.lane.b32.xlu1 %v9553_v39, %s9455_s10  ;;  %v1644_v39 = vrot.slane %v1630_v4, %v9610_v2  ;;  %v1610_v56 = vcombine.low %v1578_v28, %v1593_v19  ;;  %v1611_v57 = vcombine.high %v1578_v28, %v1593_v19  ;;  %v9765_v4 = vrot.slane %v623_v29, %v9627_v18 }
 0x1fd   : > { %v2107_v19 = vrot.slane %v8512_v46, %v9610_v2  ;;  %v8513_v28 = vcombine.high %v1668_v51, %v1675_v10  ;;  %v1520_v46 = vshrl.u32 %v9595_v59, 16  ;;  %v1012_v51 = vrot.slane %v8497_v48, %v9610_v2 }
 0x1fe   : > { %v1676_v54 = vcombine.low %v1644_v39, %v1659_v21  ;;  %v1677_v1 = vcombine.high %v1644_v39, %v1659_v21  ;;  %v1618_v21 = vrot.slane %v1610_v56, %v9627_v18  ;;  %v1625_v42 = vrot.slane %v1611_v57, %v9627_v18 }
 0x1ff   : > { %v9787_v56 = vpack.i.b16 %v1529_v13, %v1528_v22  ;;  %v8500_v57 = vcombine.high %v9741_v3, %v9753_v52  ;;  %v2108_v24 = vcombine.low %v2099_v16, %v2107_v19  ;;  %v9799_v39 = vpack.i.b16 %v1521_v23, %v1520_v46 }
 0x200   : > { %2614 = vrot.lane.b32.xlu1 %v9559_v40, %s9455_s10  ;;  %v688_v40 = vcombine.low %v9679_v12, %v9749_v17  ;;  %v1684_v6 = vrot.slane %v1676_v54, %v9627_v18  ;;  %v1691_v29 = vrot.slane %v1677_v1, %v9627_v18  ;;  %v1004_v54 = vrot.slane %v997_v38, %v9610_v2 }
 0x201   : > { %v2142_v10 = vcombine.low %v1618_v21, %v1625_v42  ;;  %v8514_v1 = vcombine.high %v1618_v21, %v1625_v42  ;;  %v9803_v13 = vpack.i.b16 %v9635_v25, %v9616_v8  ;;  %v2124_v38 = vrot.slane %v2117_v31, %v9610_v2 }
 0x202   : > { %v2167_v16 = vcombine.low %v1684_v6, %v1691_v29  ;;  %v8515_v19 = vcombine.high %v1684_v6, %v1691_v29  ;;  %v2132_v22 = vrot.slane %v8513_v28, %v9610_v2  ;;  %v9817_v48 = vpack.i.b16 %v9620_v11, %v9595_v59 }
 0x203   : > { %v1784_v8 = vrot.slane %v9787_v56, %v9610_v2  ;;  %v1122_v25 = vcombine.low %v9762_v30, %v9765_v4  ;;  %v2115_v21 = vrot.slane %v2108_v24, %v9627_v18  ;;  %v1769_v44 = vrot.slane %v9799_v39, %v9610_v2 }
 0x204   : > { %2592 = vrot.lane.b32.xlu1 %v9524_v34, %s9455_s10  ;;  %v2133_v5 = vcombine.low %v2124_v38, %v2132_v22  ;;  %v1718_v42 = vrot.slane %v9803_v13, %v9610_v2  ;;  %v1013_v59 = vcombine.low %v1004_v54, %v1012_v51  ;;  %v2149_v11 = vrot.slane %v2142_v10, %v9610_v2 }
 0x205   : > { %v2157_v23 = vrot.slane %v8514_v1, %v9610_v2  ;;  %v2174_v6 = vrot.slane %v2167_v16, %v9610_v2  ;;  %v2182_v24 = vrot.slane %v8515_v19, %v9610_v2  ;;  %v1703_v29 = vrot.slane %v9817_v48, %v9610_v2 }
 0x206   : > { %v1792_v31 = vcombine.low %v1769_v44, %v1784_v8  ;;  %v1793_v28 = vcombine.high %v1769_v44, %v1784_v8  ;;  %v9841_v54 = vcombine.high %v2115_v21, %v11873_v60  ;;  %v9847_v10 = vrot.slane %v1072_v43, %v9610_v2 }
 0x207   : > { %v2183_v51 = vcombine.low %v2174_v6, %v2182_v24  ;;  %v1726_v1 = vcombine.low %v1703_v29, %v1718_v42  ;;  %v1727_v16 = vcombine.high %v1703_v29, %v1718_v42  ;;  %v9850_v19 = vrot.slane %v1013_v59, %v9627_v18 }
 0x208   : > { %2604 = vrot.lane.b32.xlu1 %v9540_v37, %s9455_s10  ;;  %v9822_v37 = vrot.slane %v688_v40, %v9627_v18  ;;  %v2140_v40 = vrot.slane %v2133_v5, %v9627_v18  ;;  %v2158_v5 = vcombine.low %v2149_v11, %v2157_v23  ;;  %v1800_v44 = vrot.slane %v1792_v31, %v9627_v18 }
 0x209   : > { %v9860_v43 = vrot.slane %v988_v58, %v9627_v18  ;;  %v1029_v42 = vrot.slane %v1022_v26, %v9610_v2  ;;  %v1037_v59 = vrot.slane %v8498_v27, %v9610_v2  ;;  %v1807_v11 = vrot.slane %v1793_v28, %v9627_v18 }
 0x20a   : > { %v2494_v46 = vpack.i.b16 %v2140_v40, %v2115_v21  ;;  %v2496_v8 = vshrl.u32 %v2140_v40, 16  ;;  %v2495_v23 = vshrl.u32 %v2115_v21, 16  ;;  %v9874_v53 = vrot.slane %v2183_v51, %v9627_v18 }
 0x20b   : > { %v9880_v26 = vcombine.high %v9850_v19, %v11873_v60  ;;  %v1734_v27 = vrot.slane %v1726_v1, %v9627_v18  ;;  %v1741_v58 = vrot.slane %v1727_v16, %v9627_v18  ;;  %v9894_v6 = vrot.slane %v2158_v5, %v9627_v18 }
 0x20c   : > { %2612 = vrot.lane.b32.xlu1 %v9538_v36, %s9455_s10  ;;  %v9844_v36 = vcombine.high %v2140_v40, %v11873_v60  ;;  %v3713_v38 = vsel %vm3708_vm2, %v2494_v46, 0  ;;  %v2497_v21 = vpack.i.b16 %v2496_v8, %v2495_v23  ;;  %v8501_v24 = vcombine.high %v9810_v14, %v9813_v15 }
 0x20d   : > { %8794 = vmatpush3.bf16.xpose.msra.mxu1 %v3713_v38  ;;  %v1777_v35 = vcombine.high %v9787_v56, %v9599_v61  ;;  %v9902_v32 = vcombine.high %v9860_v43, %v11873_v60  ;;  %v1038_v47 = vcombine.low %v1029_v42, %v1037_v59  ;;  %v2217_v45 = vcombine.low %v1800_v44, %v1807_v11 }
 0x20e   : > { %v2500_v22 = vpack.i.b16 %v9844_v36, %v9841_v54  ;;  %8799 = vmatprep.subr.bf16.mxu1 %v11871_v41  ;;  %v8517_v29 = vcombine.high %v1800_v44, %v1807_v11  ;;  %v1374_v31 = vpack.i.b16 %v9850_v19, %v9860_v43  ;;  %v2506_v28 = vpack.i.b16 %v9874_v53, %v9894_v6 }
 0x20f   : > { %v1762_v46 = vcombine.high %v9799_v39, %v9599_v61  ;;  %v1711_v14 = vcombine.high %v9803_v13, %v9599_v61  ;;  %v1380_v56 = vpack.i.b16 %v9880_v26, %v9902_v32  ;;  %v1063_v15 = vcombine.low %v1054_v7, %v1062_v9 }
 0x210   : > { %v3805_v40 = vsel %vm3708_vm2, %v2500_v22, 0  ;;  %v2192_v51 = vcombine.low %v1734_v27, %v1741_v58  ;;  %v8516_v1 = vcombine.high %v1734_v27, %v1741_v58  ;;  %v3759_v16 = vsel %vm3708_vm2, %v2497_v21, 0 }
 0x211   : > { %8806 = vmatpush3.bf16.xpose.msra.mxu0 %v3805_v40  ;;  %v2502_v38 = vshrl.u32 %v9844_v36, 16  ;;  %v1696_v22 = vcombine.high %v9817_v48, %v9599_v61  ;;  %v1791_v39 = vrot.slane %v1777_v35, %v9610_v2  ;;  %v1376_v13 = vshrl.u32 %v9850_v19, 16 }
 0x212   : > { %8817 = vmatprep.subr.bf16.mxu0 %v11871_v41  ;;  %v2501_v8 = vshrl.u32 %v9841_v54, 16  ;;  %v3897_v5 = vsel %vm3708_vm2, %v2506_v28, 0  ;;  %v9929_v36 = vcombine.high %v9874_v53, %v11873_v60  ;;  %v2224_v48 = vrot.slane %v2217_v45, %v9610_v2 }
 0x213   : > { %v2232_v44 = vrot.slane %v8517_v29, %v9610_v2  ;;  %v1776_v42 = vrot.slane %v1762_v46, %v9610_v2  ;;  %v1725_v19 = vrot.slane %v1711_v14, %v9610_v2  ;;  %v1375_v54 = vshrl.u32 %v9860_v43, 16 }
 0x214   : > { %8796 = vmatmul.mubr.msk.bf16.vlgmr.msra.gmra.mrb[4].mxu1 %vm3708_vm2, %v1374_v31  ;;  %v9939_v59 = vrot.slane %v1063_v15, %v9627_v18  ;;  %v2199_v11 = vrot.slane %v2192_v51, %v9610_v2  ;;  %v2207_v40 = vrot.slane %v8516_v1, %v9610_v2  ;;  %v2503_v23 = vpack.i.b16 %v2502_v38, %v2501_v8 }
 0x215   : > { %8800 = vmatpush3.bf16.xpose.msra.mxu1 %v3759_v16  ;;  %8801 = vmatprep.mubr.msk.bf16.mxu1 %vm9451_vm1, %v11871_v41  ;;  %v9946_v7 = vcombine.high %v9894_v6, %v11873_v60  ;;  %v1087_v43 = vrot.slane %v8500_v57, %v9610_v2  ;;  %v1710_v9 = vrot.slane %v1696_v22, %v9610_v2 }
 0x216   : > { %8811 = vmatprep.subr.bf16.mxu1 %v11871_v41  ;;  %v1808_v27 = vcombine.low %v1776_v42, %v1791_v39  ;;  %v9954_v58 = vrot.slane %v1038_v47, %v9627_v18  ;;  %v1809_v21 = vcombine.high %v1776_v42, %v1791_v39  ;;  %v1377_v35 = vpack.i.b16 %v1376_v13, %v1375_v54 }
 0x217   : > { %v2512_v45 = vpack.i.b16 %v9929_v36, %v9946_v7  ;;  %v2233_v29 = vcombine.low %v2224_v48, %v2232_v44  ;;  %v1742_v31 = vcombine.low %v1710_v9, %v1725_v19  ;;  %v1104_v46 = vrot.slane %v1097_v62, %v9610_v2 }
 0x218   : > { %8808 = vmatmul.mubr.msk.bf16.vlgmr.msra.gmra.mrb[4].mxu0 %vm3708_vm2, %v1380_v56  ;;  %v1386_v28 = vpack.i.b16 %v9939_v59, %v9954_v58  ;;  %v1112_v3 = vrot.slane %v8501_v24, %v9610_v2  ;;  %v1743_v52 = vcombine.high %v1710_v9, %v1725_v19  ;;  %v3851_v57 = vsel %vm3708_vm2, %v2503_v23, 0 }
 0x219   : > { %8818 = vmatpush3.bf16.xpose.msra.mxu0 %v3897_v5  ;;  %8819 = vmatprep.mubr.msk.bf16.mxu0 %vm9451_vm1, %v11871_v41  ;;  %v2508_v47 = vshrl.u32 %v9874_v53, 16  ;;  %v2208_v14 = vcombine.low %v2199_v11, %v2207_v40  ;;  %v11912_v56 = vcombine.high %v9679_v12, %v9749_v17  ;;  %v1816_v51 = vrot.slane %v1808_v27, %v9627_v18 }
 0x21a   : > { %8829 = vmatprep.subr.bf16.mxu0 %v11871_v41  ;;  %v1382_v62 = vshrl.u32 %v9880_v26, 16  ;;  %v1088_v24 = vcombine.low %v9847_v10, %v1087_v43  ;;  %v1823_v1 = vrot.slane %v1809_v21, %v9627_v18  ;;  %v3989_v53 = vsel %vm3708_vm2, %v2512_v45, 0 }
 0x21b   : > { %v703_v15 = vrot.slane %v11912_v56, %v9627_v18  ;;  %v2507_v12 = vshrl.u32 %v9894_v6, 16  ;;  %v9980_v17 = vrot.slane %v2233_v29, %v9627_v18  ;;  %v8502_v16 = vcombine.high %v9762_v30, %v9765_v4 }
 0x21c   : > { %8802 = vmatmul.mubr.msk.bf16.vlgmr.msra.gmra.mrb[8].mxu1 %vm3708_vm2, %v1377_v35  ;;  %v1381_v26 = vshrl.u32 %v9902_v32, 16  ;;  %v9989_v10 = vcombine.high %v9939_v59, %v11873_v60  ;;  %v1113_v38 = vcombine.low %v1104_v46, %v1112_v3  ;;  %v1750_v22 = vrot.slane %v1742_v31, %v9627_v18 }
 0x21d   : > { %8812 = vmatpush3.bf16.xpose.msra.mxu1 %v3851_v57  ;;  %8813 = vmatprep.mubr.msk.bf16.mxu1 %vm9451_vm1, %v11871_v41  ;;  %v1757_v6 = vrot.slane %v1743_v52, %v9627_v18  ;;  %v2509_v39 = vpack.i.b16 %v2508_v47, %v2507_v12  ;;  %v9995_v13 = vrot.slane %v2208_v14, %v9627_v18  ;;  %v2514_v21 = vshrl.u32 %v9929_v36, 16 }
 0x21e   : > { %8823 = vmatprep.subr.bf16.mxu1 %v11871_v41  ;;  %v1147_v32 = vcombine.low %v9822_v37, %v703_v15  ;;  %v8503_v8 = vcombine.high %v9822_v37, %v703_v15  ;;  %v10001_v5 = vcombine.high %v9954_v58, %v11873_v60  ;;  %v10004_v48 = vrot.slane %v1088_v24, %v9627_v18 }
 0x21f   : > { %v2267_v44 = vcombine.low %v1816_v51, %v1823_v1  ;;  %v8519_v42 = vcombine.high %v1816_v51, %v1823_v1  ;;  %v1383_v19 = vpack.i.b16 %v1382_v62, %v1381_v26  ;;  %v2518_v54 = vpack.i.b16 %v9980_v17, %v9995_v13 }
 0x220   : > { %8820 = vmatmul.mubr.msk.bf16.vlgmr.msra.gmra.mrb[8].mxu0 %vm3708_vm2, %v1386_v28  ;;  %v1392_v11 = vpack.i.b16 %v9989_v10, %v10001_v5  ;;  %v10011_v40 = vrot.slane %v1113_v38, %v9627_v18  ;;  %v1129_v37 = vrot.slane %v1122_v25, %v9610_v2  ;;  %v1137_v23 = vrot.slane %v8502_v16, %v9610_v2 }
 0x221   : > { %8830 = vmatpush3.bf16.xpose.msra.mxu0 %v3989_v53  ;;  %8831 = vmatprep.mubr.msk.bf16.mxu0 %vm9451_vm1, %v11871_v41  ;;  %v2242_v43 = vcombine.low %v1750_v22, %v1757_v6  ;;  %v8518_v9 = vcombine.high %v1750_v22, %v1757_v6  ;;  %v3943_v27 = vsel %vm3708_vm2, %v2509_v39, 0  ;;  %v1388_v35 = vshrl.u32 %v9939_v59, 16 }
 0x222   : > { %8841 = vmatprep.subr.bf16.mxu0 %v11871_v41  ;;  %v2513_v45 = vshrl.u32 %v9946_v7, 16  ;;  %v1154_v30 = vrot.slane %v1147_v32, %v9610_v2  ;;  %v1162_v4 = vrot.slane %v8503_v8, %v9610_v2  ;;  %v4081_v25 = vsel %vm3708_vm2, %v2518_v54, 0 }
 0x223   : > { %v10032_v36 = vcombine.high %v9980_v17, %v11873_v60  ;;  %v2274_v29 = vrot.slane %v2267_v44, %v9610_v2  ;;  %v2282_v59 = vrot.slane %v8519_v42, %v9610_v2  ;;  %v1387_v7 = vshrl.u32 %v9954_v58, 16 }
 0x224   : > { %8814 = vmatmul.mubr.msk.bf16.vlgmr.msra.gmra.mrb[12].mxu1 %vm3708_vm2, %v1383_v19  ;;  %v1398_v31 = vpack.i.b16 %v10011_v40, %v10004_v48  ;;  %v10043_v28 = vcombine.high %v10004_v48, %v11873_v60  ;;  %v10047_v46 = vcombine.high %v10011_v40, %v11873_v60  ;;  %v2515_v3 = vpack.i.b16 %v2514_v21, %v2513_v45 }
 0x225   : > { %8824 = vmatpush3.bf16.xpose.msra.mxu1 %v3943_v27  ;;  %8825 = vmatprep.mubr.msk.bf16.mxu1 %vm9451_vm1, %v11871_v41  ;;  %v10052_v58 = vcombine.high %v9995_v13, %v11873_v60  ;;  %v2249_v52 = vrot.slane %v2242_v43, %v9610_v2  ;;  %v2257_v57 = vrot.slane %v8518_v9, %v9610_v2  ;;  %v425_v47 = vshrl.u32 %v9603_v63, 16 }
 0x226   : > { %8835 = vmatprep.subr.bf16.mxu1 %v11871_v41  ;;  %v1399_v14 = vshrl.u32 %v10004_v48, 16  ;;  %v1400_v56 = vshrl.u32 %v10011_v40, 16  ;;  %v1138_v15 = vcombine.low %v1129_v37, %v1137_v23  ;;  %v1389_v51 = vpack.i.b16 %v1388_v35, %v1387_v7 }
 0x227   : > { %v2524_v62 = vpack.i.b16 %v10032_v36, %v10052_v58  ;;  %v2283_v24 = vcombine.low %v2274_v29, %v2282_v59  ;;  %v1163_v1 = vcombine.low %v1154_v30, %v1162_v4  ;;  %v424_v53 = vshrl.u32 %v9582_v49, 16 }
 0x228   : > { %8832 = vmatmul.mubr.msk.bf16.vlgmr.msra.gmra.mrb[12].mxu0 %vm3708_vm2, %v1392_v11  ;;  %v417_v12 = vshrl.u32 %v9584_v50, 16  ;;  %v422_v16 = vpack.i.b16 %v9603_v63, %v9582_v49  ;;  %v1394_v26 = vshrl.u32 %v9989_v10, 16  ;;  %v4035_v38 = vsel %vm3708_vm2, %v2515_v3, 0 }
 0x229   : > { %8842 = vmatpush3.bf16.xpose.msra.mxu0 %v4081_v25  ;;  %8843 = vmatprep.mubr.msk.bf16.mxu0 %vm9451_vm1, %v11871_v41  ;;  %v2520_v22 = vshrl.u32 %v9980_v17, 16  ;;  %v1404_v6 = vpack.i.b16 %v10047_v46, %v10043_v28  ;;  %v2258_v39 = vcombine.low %v2249_v52, %v2257_v57  ;;  %v414_v32 = vpack.i.b16 %v9584_v50, %v9524_v34 }
 0x22a   : > { %8853 = vmatprep.subr.bf16.mxu0 %v11871_v41  ;;  %v10073_v8 = vpack.i.b16 %v425_v47, %v424_v53  ;;  %v10078_v10 = vrot.slane %v1138_v15, %v9627_v18  ;;  %v1406_v48 = vshrl.u32 %v10047_v46, 16  ;;  %v4173_v17 = vsel %vm3708_vm2, %v2524_v62, 0 }
 0x22b   : > { %v2519_v44 = vshrl.u32 %v9995_v13, 16  ;;  %v10086_v42 = vrot.slane %v2283_v24, %v9627_v18  ;;  %v10089_v19 = vrot.slane %v1163_v1, %v9627_v18  ;;  %v11913_v54 = vshrl.u32 %v9524_v34, 16 }
 0x22c   : > { %8826 = vmatmul.mubr.msk.bf16.vlgmr.msra.gmra.mrb[16].mxu1 %vm3708_vm2, %v1389_v51  ;;  %v723_v40 = vcombine.high %v422_v16, %v9599_v61  ;;  %v730_v37 = vrot.slane %v422_v16, %v9610_v2  ;;  %v1393_v23 = vshrl.u32 %v10001_v5, 16  ;;  %v10100_v43 = vrot.slane %v2258_v39, %v9627_v18 }
 0x22d   : > { %8836 = vmatpush3.bf16.xpose.msra.mxu1 %v4035_v38  ;;  %8837 = vmatprep.mubr.msk.bf16.mxu1 %vm9451_vm1, %v11871_v41  ;;  %v418_v11 = vpack.i.b16 %v417_v12, %v11913_v54  ;;  %v2521_v13 = vpack.i.b16 %v2520_v22, %v2519_v44  ;;  %v1401_v9 = vpack.i.b16 %v1400_v56, %v1399_v14  ;;  %v1405_v34 = vshrl.u32 %v10043_v28, 16 }
 0x22e   : > { %8847 = vmatprep.subr.bf16.mxu1 %v11871_v41  ;;  %v708_v27 = vcombine.high %v414_v32, %v9599_v61  ;;  %v715_v21 = vrot.slane %v414_v32, %v9610_v2  ;;  %v796_v35 = vrot.slane %v10073_v8, %v9610_v2  ;;  %v1395_v5 = vpack.i.b16 %v1394_v26, %v1393_v23 }
 0x22f   : > { %v2530_v45 = vpack.i.b16 %v10086_v42, %v10100_v43  ;;  %v1410_v30 = vpack.i.b16 %v10089_v19, %v10078_v10  ;;  %v10111_v4 = vpack.i.b16 %v1406_v48, %v1405_v34  ;;  %v10115_v25 = vcombine.high %v10078_v10, %v11873_v60 }
 0x230   : > { %8844 = vmatmul.mubr.msk.bf16.vlgmr.msra.gmra.mrb[16].mxu0 %vm3708_vm2, %v1398_v31  ;;  %v781_v29 = vrot.slane %v418_v11, %v9610_v2  ;;  %v737_v59 = vrot.slane %v723_v40, %v9610_v2  ;;  %v738_v7 = vcombine.low %v715_v21, %v730_v37  ;;  %v739_v31 = vcombine.high %v715_v21, %v730_v37 }
 0x231   : > { %8854 = vmatpush3.bf16.xpose.msra.mxu0 %v4173_v17  ;;  %8855 = vmatprep.mubr.msk.bf16.mxu0 %vm9451_vm1, %v11871_v41  ;;  %v774_v28 = vcombine.high %v418_v11, %v9599_v61  ;;  %v4127_v46 = vsel %vm3708_vm2, %v2521_v13, 0  ;;  %v2526_v3 = vshrl.u32 %v10032_v36, 16  ;;  %v10125_v52 = vcombine.high %v10089_v19, %v11873_v60 }
 0x232   : > { %8865 = vmatprep.subr.bf16.mxu0 %v11871_v41  ;;  %v722_v57 = vrot.slane %v708_v27, %v9610_v2  ;;  %v804_v47 = vcombine.low %v781_v29, %v796_v35  ;;  %v805_v14 = vcombine.high %v781_v29, %v796_v35  ;;  %v432_v56 = vshrl.u32 %v9522_v33, 16 }
 0x233   : > { %v789_v15 = vcombine.high %v10073_v8, %v9599_v61  ;;  %v4265_v36 = vsel %vm3708_vm2, %v2530_v45, 0  ;;  %v2525_v51 = vshrl.u32 %v10052_v58, 16  ;;  %v10139_v62 = vcombine.high %v10086_v42, %v11873_v60 }
 0x234   : > { %8838 = vmatmul.mubr.msk.bf16.vlgmr.msra.gmra.mrb[20].mxu1 %vm3708_vm2, %v1395_v5  ;;  %v746_v24 = vrot.slane %v738_v7, %v9627_v18  ;;  %v753_v1 = vrot.slane %v739_v31, %v9627_v18  ;;  %v754_v53 = vcombine.low %v722_v57, %v737_v59  ;;  %v1411_v12 = vshrl.u32 %v10078_v10, 16 }
 0x235   : > { %8848 = vmatpush3.bf16.xpose.msra.mxu1 %v4127_v46  ;;  %8849 = vmatprep.mubr.msk.bf16.mxu1 %vm9451_vm1, %v11871_v41  ;;  %v438_v16 = vpack.i.b16 %v9653_v55, %v9658_v0  ;;  %v2527_v26 = vpack.i.b16 %v2526_v3, %v2525_v51  ;;  %v10151_v58 = vcombine.high %v10100_v43, %v11873_v60  ;;  %v441_v39 = vshrl.u32 %v9653_v55, 16 }
 0x236   : > { %8859 = vmatprep.subr.bf16.mxu1 %v11871_v41  ;;  %v1416_v38 = vpack.i.b16 %v10125_v52, %v10115_v25  ;;  %v812_v22 = vrot.slane %v804_v47, %v9627_v18  ;;  %v440_v32 = vshrl.u32 %v9658_v0, 16  ;;  %v10160_v8 = vrot.slane %v774_v28, %v9610_v2 }
 0x237   : > { %v430_v48 = vpack.i.b16 %v9630_v20, %v9522_v33  ;;  %v433_v17 = vshrl.u32 %v9630_v20, 16  ;;  %v2536_v44 = vpack.i.b16 %v10139_v62, %v10151_v58  ;;  %v755_v54 = vcombine.high %v722_v57, %v737_v59 }
 0x238   : > { %8856 = vmatmul.mubr.msk.bf16.vlgmr.msra.gmra.mrb[20].mxu0 %vm3708_vm2, %v1404_v6  ;;  %v819_v6 = vrot.slane %v805_v14, %v9627_v18  ;;  %v10168_v11 = vrot.slane %v754_v53, %v9627_v18  ;;  %v10171_v40 = vrot.slane %v789_v15, %v9610_v2  ;;  %v1172_v37 = vcombine.low %v746_v24, %v753_v1 }
 0x239   : > { %8866 = vmatpush3.bf16.xpose.msra.mxu0 %v4265_v36  ;;  %8867 = vmatprep.mubr.msk.bf16.mxu0 %vm9451_vm1, %v11871_v41  ;;  %v8504_v23 = vcombine.high %v746_v24, %v753_v1  ;;  %v855_v13 = vcombine.high %v438_v16, %v9599_v61  ;;  %v4219_v34 = vsel %vm3708_vm2, %v2527_v26, 0  ;;  %v2532_v27 = vshrl.u32 %v10086_v42, 16 }
 0x23a   : > { %8877 = vmatprep.subr.bf16.mxu0 %v11871_v41  ;;  %v1197_v21 = vcombine.low %v812_v22, %v819_v6  ;;  %v442_v35 = vpack.i.b16 %v441_v39, %v440_v32  ;;  %v862_v5 = vrot.slane %v438_v16, %v9610_v2  ;;  %v1417_v45 = vshrl.u32 %v10115_v25, 16  ;;  %v1473_v25 = vpop.permute.xlu0 %1472 }
 0x23b   : > { %v8505_v29 = vcombine.high %v812_v22, %v819_v6  ;;  %v840_v59 = vcombine.high %v430_v48, %v9599_v61  ;;  %v2531_v42 = vshrl.u32 %v10100_v43, 16  ;;  %v769_v7 = vrot.slane %v755_v54, %v9627_v18 }
 0x23c   : > { %8850 = vmatmul.mubr.msk.bf16.vlgmr.msra.gmra.mrb[24].mxu1 %vm3708_vm2, %v1401_v9  ;;  %v4357_v9 = vsel %vm3708_vm2, %v2536_v44, 0  ;;  %v434_v31 = vpack.i.b16 %v433_v17, %v432_v56  ;;  %v847_v28 = vrot.slane %v430_v48, %v9610_v2  ;;  %v1412_v46 = vshrl.u32 %v10089_v19, 16 }
 0x23d   : > { %8860 = vmatpush3.bf16.xpose.msra.mxu1 %v4219_v34  ;;  %8861 = vmatprep.mubr.msk.bf16.mxu1 %vm9451_vm1, %v11871_v41  ;;  %v821_v3 = vcombine.high %v10160_v8, %v10171_v40  ;;  %v869_v57 = vrot.slane %v855_v13, %v9610_v2  ;;  %v2533_v43 = vpack.i.b16 %v2532_v27, %v2531_v42  ;;  %v2538_v32 = vshrl.u32 %v10139_v62, 16 }
 0x23e   : > { %8871 = vmatprep.subr.bf16.mxu1 %v11871_v41  ;;  %v1179_v47 = vrot.slane %v1172_v37, %v9610_v2  ;;  %v870_v14 = vcombine.low %v847_v28, %v862_v5  ;;  %v871_v56 = vcombine.high %v847_v28, %v862_v5  ;;  %v921_v15 = vcombine.high %v442_v35, %v9599_v61 }
 0x23f   : > { %v1187_v36 = vrot.slane %v8504_v23, %v9610_v2  ;;  %v854_v19 = vrot.slane %v840_v59, %v9610_v2  ;;  %v1204_v51 = vrot.slane %v1197_v21, %v9610_v2  ;;  %v1212_v24 = vrot.slane %v8505_v29, %v9610_v2 }
 0x240   : > { %8868 = vmatmul.mubr.msk.bf16.vlgmr.msra.gmra.mrb[24].mxu0 %vm3708_vm2, %v1410_v30  ;;  %v820_v30 = vcombine.low %v10160_v8, %v10171_v40  ;;  %v1222_v1 = vcombine.low %v10168_v11, %v769_v7  ;;  %v906_v53 = vcombine.high %v434_v31, %v9599_v61  ;;  %v913_v16 = vrot.slane %v434_v31, %v9610_v2 }
 0x241   : > { %8878 = vmatpush3.bf16.xpose.msra.mxu0 %v4357_v9  ;;  %8879 = vmatprep.mubr.msk.bf16.mxu0 %vm9451_vm1, %v11871_v41  ;;  %v928_v26 = vrot.slane %v442_v35, %v9610_v2  ;;  %v886_v22 = vcombine.low %v854_v19, %v869_v57  ;;  %v887_v6 = vcombine.high %v854_v19, %v869_v57  ;;  %v4311_v39 = vsel %vm3708_vm2, %v2533_v43, 0 }
 0x242   : > { %8889 = vmatprep.subr.bf16.mxu0 %v11871_v41  ;;  %v878_v8 = vrot.slane %v870_v14, %v9627_v18  ;;  %v885_v48 = vrot.slane %v871_v56, %v9627_v18  ;;  %v935_v17 = vrot.slane %v921_v15, %v9610_v2  ;;  %v1418_v44 = vshrl.u32 %v10125_v52, 16 }
 0x243   : > { %v8506_v54 = vcombine.high %v10168_v11, %v769_v7  ;;  %v1188_v62 = vcombine.low %v1179_v47, %v1187_v36  ;;  %v1213_v40 = vcombine.low %v1204_v51, %v1212_v24  ;;  %v828_v37 = vrot.slane %v820_v30, %v9627_v18 }
 0x244   : > { %8862 = vmatmul.mubr.msk.bf16.vlgmr.msra.gmra.mrb[28].mxu1 %vm3708_vm2, %v10111_v4  ;;  %v2537_v4 = vshrl.u32 %v10151_v58, 16  ;;  %v920_v23 = vrot.slane %v906_v53, %v9610_v2  ;;  %v936_v13 = vcombine.low %v913_v16, %v928_v26  ;;  %v937_v34 = vcombine.high %v913_v16, %v928_v26 }
 0x245   : > { %8872 = vmatpush3.bf16.xpose.msra.mxu1 %v4311_v39  ;;  %8873 = vmatprep.mubr.msk.bf16.mxu1 %vm9451_vm1, %v11871_v41  ;;  %v835_v11 = vrot.slane %v821_v3, %v9627_v18  ;;  %v10230_v52 = vrot.slane %v886_v22, %v9627_v18  ;;  %v1272_v35 = vcombine.low %v878_v8, %v885_v48  ;;  %v1536_v53 = vshrl.u32 %v1473_v25, 16 }
 0x246   : > { %8883 = vmatprep.subr.bf16.mxu1 %v11871_v41  ;;  %v2539_v58 = vpack.i.b16 %v2538_v32, %v2537_v4  ;;  %v952_v27 = vcombine.low %v920_v23, %v935_v17  ;;  %v953_v21 = vcombine.high %v920_v23, %v935_v17  ;;  %v1413_v5 = vpack.i.b16 %v1412_v46, %v1411_v12 }
 0x247   : > { %v10238_v29 = vrot.slane %v1188_v62, %v9627_v18  ;;  %v10241_v59 = vrot.slane %v1213_v40, %v9627_v18  ;;  %v1229_v9 = vrot.slane %v1222_v1, %v9610_v2  ;;  %v1237_v42 = vrot.slane %v8506_v54, %v9610_v2 }
 0x248   : > { %8880 = vmatmul.mubr.msk.bf16.vlgmr.msra.gmra.mrb[28].mxu0 %vm3708_vm2, %v1416_v38  ;;  %v10233_v38 = vrot.slane %v887_v6, %v9627_v18  ;;  %v944_v7 = vrot.slane %v936_v13, %v9627_v18  ;;  %v951_v31 = vrot.slane %v937_v34, %v9627_v18  ;;  %v8508_v28 = vcombine.high %v878_v8, %v885_v48 }
 0x249   : > { %8891 = vmatprep.mubr.msk.bf16.mxu0 %vm9451_vm1, %v11871_v41  ;;  %v1419_v30 = vpack.i.b16 %v1418_v44, %v1417_v45  ;;  %v1247_v10 = vcombine.low %v828_v37, %v835_v11  ;;  %v8507_v12 = vcombine.high %v828_v37, %v835_v11  ;;  %v4403_v3 = vsel %vm3708_vm2, %v2539_v58, 0 }
 0x24a   : > { %v1322_v46 = vcombine.low %v10230_v52, %v10233_v38  ;;  %v10254_v57 = vrot.slane %v952_v27, %v9627_v18  ;;  %v10257_v43 = vrot.slane %v953_v21, %v9627_v18  ;;  %v8510_v47 = vcombine.high %v10230_v52, %v10233_v38 }
 0x24b   : > { %v1279_v45 = vrot.slane %v1272_v35, %v9610_v2  ;;  %v10267_v56 = vcombine.high %v10238_v29, %v11873_v60  ;;  %v10271_v15 = vcombine.high %v10241_v59, %v11873_v60  ;;  %v1238_v36 = vcombine.low %v1229_v9, %v1237_v42 }
 0x24c   : > { %8874 = vmatmul.mubr.msk.bf16.vlgmr.msra.gmra.mrb[32].mxu1 %vm3708_vm2, %v1413_v5  ;;  %v1287_v19 = vrot.slane %v8508_v28, %v9610_v2  ;;  %v1297_v51 = vcombine.low %v944_v7, %v951_v31  ;;  %v8509_v24 = vcombine.high %v944_v7, %v951_v31  ;;  %v1424_v1 = vshrl.u32 %v10241_v59, 16 }
 0x24d   : > { %8884 = vmatpush3.bf16.xpose.msra.mxu1 %v4403_v3  ;;  %8885 = vmatprep.mubr.msk.bf16.mxu1 %vm9451_vm1, %v11871_v41  ;;  %v1254_v26 = vrot.slane %v1247_v10, %v9610_v2  ;;  %v1262_v22 = vrot.slane %v8507_v12, %v9610_v2  ;;  %v1347_v6 = vcombine.low %v10254_v57, %v10257_v43  ;;  %v1423_v48 = vshrl.u32 %v10238_v29, 16 }
 0x24e   : > { %8895 = vmatprep.subr.bf16.mxu1 %v11871_v41  ;;  %v8511_v39 = vcombine.high %v10254_v57, %v10257_v43  ;;  %v1429_v54 = vshrl.u32 %v10267_v56, 16  ;;  %v1430_v4 = vshrl.u32 %v10271_v15, 16  ;;  %v10287_v62 = vrot.slane %v1238_v36, %v9627_v18 }
 0x24f   : > { %v10289_v37 = vpack.i.b16 %v1424_v1, %v1423_v48  ;;  %v1288_v13 = vcombine.low %v1279_v45, %v1287_v19  ;;  %v1263_v27 = vcombine.low %v1254_v26, %v1262_v22  ;;  %v10308_v12 = vrot.slane %v1297_v51, %v9610_v2 }
 0x250   : > { %v10300_v7 = vpack.i.b16 %v1430_v4, %v1429_v54  ;;  %v1435_v31 = vshrl.u32 %v10287_v62, 16  ;;  %v10305_v28 = vcombine.high %v10287_v62, %v11873_v60  ;;  %v10311_v3 = vrot.slane %v8509_v24, %v9610_v2 }
 0x251   : > { %v10317_v45 = vrot.slane %v1288_v13, %v9627_v18  ;;  %v10323_v1 = vrot.slane %v1263_v27, %v9627_v18  ;;  %v10334_v48 = vrot.slane %v1322_v46, %v9610_v2  ;;  %v10345_v13 = vrot.slane %v1347_v6, %v9610_v2 }
 0x252   : > { %v1481_v14 = vpop.permute.xlu1 %1480  ;;  %v1489_v8 = vpop.permute.xlu0 %1488  ;;  %v10353_v52 = vrot.slane %v8511_v39, %v9610_v2  ;;  %v11916_v63 = vmov 0.0  }
 0x253   : > { %v1537_v16 = vshrl.u32 %v1481_v14, 16  ;;  %v1534_v32 = vpack.i.b16 %v1481_v14, %v1473_v25  ;;  %v1544_v11 = vshrl.u32 %v1489_v8, 16  ;;  %v10350_v46 = vcombine.high %v10317_v45, %v11873_v60 }
 0x254   : > { %8886 = vmatmul.mubr.msk.bf16.vlgmr.msra.gmra.mrb[36].mxu1 %vm3708_vm2, %v1419_v30  ;;  %v10362_v39 = vcombine.high %v10323_v1, %v11873_v60 }
 0x255   : > { %v1538_v34 = vpack.i.b16 %v1537_v16, %v1536_v53  ;;  %v1828_v21 = vcombine.high %v1534_v32, %v9599_v61  ;;  %v1835_v35 = vrot.slane %v1534_v32, %v9610_v2  ;;  %8897 = vmatprep.mubr.msk.bf16.mxu1 %vm9451_vm1, %v11871_v41 }
 0x256   : > { %v1497_v17 = vpop.permute.xlu1 %1496  ;;  %v1475_v22 = vpop.permute.xlu0 %1474 }
 0x257   : > { %v1542_v40 = vpack.i.b16 %v1497_v17, %v1489_v8  ;;  %v1545_v58 = vshrl.u32 %v1497_v17, 16  ;;  %v1901_v57 = vrot.slane %v1538_v34, %v9610_v2  ;;  %v1842_v14 = vrot.slane %v1828_v21, %v9610_v2 }
 0x258   : > { %v1894_v36 = vcombine.high %v1538_v34, %v9599_v61  ;;  %v1313_v8 = vcombine.low %v10308_v12, %v10311_v3  ;;  %v10340_v17 = vrot.slane %v8510_v47, %v9610_v2 }
 0x259   : > { %v1843_v5 = vcombine.high %v1542_v40, %v9599_v61  ;;  %v1850_v9 = vrot.slane %v1542_v40, %v9610_v2  ;;  %v1546_v42 = vpack.i.b16 %v1545_v58, %v1544_v11 }
 0x25a   : > { %v1908_v38 = vrot.slane %v1894_v36, %v9610_v2 }
 0x25b   : > { %v1858_v30 = vcombine.low %v1835_v35, %v1850_v9  ;;  %v1859_v10 = vcombine.high %v1835_v35, %v1850_v9  ;;  %v1857_v43 = vrot.slane %v1843_v5, %v9610_v2  ;;  %v1916_v25 = vrot.slane %v1546_v42, %v9610_v2 }
 0x25c   : > { %v1909_v19 = vcombine.high %v1546_v42, %v9599_v61 }
 0x25d   : > { %v1866_v24 = vrot.slane %v1858_v30, %v9627_v18  ;;  %v1873_v53 = vrot.slane %v1859_v10, %v9627_v18  ;;  %v1924_v16 = vcombine.low %v1901_v57, %v1916_v25  ;;  %v1925_v26 = vcombine.high %v1901_v57, %v1916_v25 }
 0x25e   : > { %v1483_v51 = vpop.permute.xlu1 %1482  ;;  %v1874_v54 = vcombine.low %v1842_v14, %v1857_v43  ;;  %v1875_v34 = vcombine.high %v1842_v14, %v1857_v43  ;;  %v1923_v11 = vrot.slane %v1909_v19, %v9610_v2  ;;  %v1552_v10 = vshrl.u32 %v1475_v22, 16 }
 0x25f   : > { %v1932_v4 = vrot.slane %v1924_v16, %v9627_v18  ;;  %v1939_v40 = vrot.slane %v1925_v26, %v9627_v18  ;;  %v2292_v47 = vcombine.low %v1866_v24, %v1873_v53  ;;  %v1550_v27 = vpack.i.b16 %v1483_v51, %v1475_v22 }
 0x260   : > { %v8520_v35 = vcombine.high %v1866_v24, %v1873_v53  ;;  %v1553_v42 = vshrl.u32 %v1483_v51, 16  ;;  %v1882_v30 = vrot.slane %v1874_v54, %v9627_v18  ;;  %v1436_v57 = vshrl.u32 %v10323_v1, 16 }
 0x261   : > { %v2317_v5 = vcombine.low %v1932_v4, %v1939_v40  ;;  %v8521_v9 = vcombine.high %v1932_v4, %v1939_v40  ;;  %v1889_v43 = vrot.slane %v1875_v34, %v9627_v18  ;;  %v1940_v25 = vcombine.low %v1908_v38, %v1923_v11 }
 0x262   : > { %v1499_v58 = vpop.permute.xlu1 %1498  ;;  %v1491_v21 = vpop.permute.xlu0 %1490  ;;  %v1941_v14 = vcombine.high %v1908_v38, %v1923_v11  ;;  %v2299_v24 = vrot.slane %v2292_v47, %v9610_v2  ;;  %v1554_v53 = vpack.i.b16 %v1553_v42, %v1552_v10  ;;  %v2307_v26 = vrot.slane %v8520_v35, %v9610_v2 }
 0x263   : > { %v1561_v36 = vshrl.u32 %v1499_v58, 16  ;;  %v1558_v51 = vpack.i.b16 %v1499_v58, %v1491_v21  ;;  %v1560_v16 = vshrl.u32 %v1491_v21, 16  ;;  %v2324_v22 = vrot.slane %v2317_v5, %v9610_v2 }
 0x264   : > { %v2332_v54 = vrot.slane %v8521_v9, %v9610_v2  ;;  %v1960_v4 = vcombine.high %v1550_v27, %v9599_v61  ;;  %v1967_v34 = vrot.slane %v1550_v27, %v9610_v2  ;;  %v10376_v47 = vrot.slane %v1940_v25, %v9627_v18 }
 0x265   : > { %v1562_v11 = vpack.i.b16 %v1561_v36, %v1560_v16  ;;  %v1975_v38 = vcombine.high %v1558_v51, %v9599_v61  ;;  %v1982_v32 = vrot.slane %v1558_v51, %v9610_v2  ;;  %v10379_v58 = vrot.slane %v1941_v14, %v9627_v18 }
 0x266   : > { %v10365_v19 = vpop.permute.xlu1 %2588  ;;  %v2599_v40 = vpop.permute.xlu0 %2598  ;;  %v2342_v21 = vcombine.low %v1882_v30, %v1889_v43  ;;  %v8522_v35 = vcombine.high %v1882_v30, %v1889_v43  ;;  %v2033_v9 = vrot.slane %v1554_v53, %v9610_v2  ;;  %v1974_v25 = vrot.slane %v1960_v4, %v9610_v2 }
 0x267   : > { %v1990_v42 = vcombine.low %v1967_v34, %v1982_v32  ;;  %v1991_v10 = vcombine.high %v1967_v34, %v1982_v32  ;;  %v2641_v6 = vshrl.u32 %v2599_v40, 16  ;;  %v1989_v27 = vrot.slane %v1975_v38, %v9610_v2 }
 0x268   : > { %v2048_v36 = vrot.slane %v1562_v11, %v9610_v2  ;;  %v2041_v14 = vcombine.high %v1562_v11, %v9599_v61  ;;  %v2333_v30 = vcombine.low %v2324_v22, %v2332_v54  ;;  %v2026_v38 = vcombine.high %v1554_v53, %v9599_v61 }
 0x269   : > { %v10386_v23 = vrot.slane %v1990_v42, %v9627_v18  ;;  %v10390_v43 = vrot.slane %v1991_v10, %v9627_v18  ;;  %v2308_v60 = vcombine.low %v2299_v24, %v2307_v26  ;;  %v10397_v4 = vrot.slane %v1313_v8, %v9627_v18 }
 0x26a   : > { %v2591_v5 = vpop.permute.xlu1 %2590  ;;  %v2056_v44 = vcombine.low %v2033_v9, %v2048_v36  ;;  %v2057_v32 = vcombine.high %v2033_v9, %v2048_v36  ;;  %v10402_v22 = vrot.slane %v2342_v21, %v9610_v2  ;;  %v10405_v54 = vrot.slane %v8522_v35, %v9610_v2  ;;  %v2597_v12 = vpop.permute.xlu0 %2596 }
 0x26b   : > { %v2638_v16 = vpack.i.b16 %v2599_v40, %v2591_v5  ;;  %v2640_v51 = vshrl.u32 %v2591_v5, 16  ;;  %v2006_v53 = vcombine.low %v1974_v25, %v1989_v27  ;;  %v2007_v24 = vcombine.high %v1974_v25, %v1989_v27 }
 0x26c   : > { %v10410_v26 = vrot.slane %v2041_v14, %v9610_v2  ;;  %v10414_v3 = vpack.i.b16 %v1436_v57, %v1435_v31  ;;  %v10419_v11 = vrot.slane %v2056_v44, %v9627_v18  ;;  %v10422_v21 = vrot.slane %v2057_v32, %v9627_v18 }
 0x26d   : > { %v2642_v34 = vpack.i.b16 %v2641_v6, %v2640_v51  ;;  %v2367_v6 = vcombine.low %v10376_v47, %v10379_v58  ;;  %v2392_v35 = vcombine.low %v10386_v23, %v10390_v43  ;;  %v2340_v5 = vrot.slane %v2333_v30, %v9627_v18 }
 0x26e   : > { %v2607_v41 = vpop.permute.xlu1 %2606  ;;  %v10430_v31 = vrot.slane %v2026_v38, %v9610_v2  ;;  %v2624_v57 = vshrl.u32 %v10365_v19, 16  ;;  %v2315_v44 = vrot.slane %v2308_v60, %v9627_v18  ;;  %v10435_v10 = vrot.slane %v2006_v53, %v9627_v18 }
 0x26f   : > { %v10438_v27 = vpack.i.b16 %v2597_v12, %v10365_v19  ;;  %v10443_v51 = vrot.slane %v2367_v6, %v9610_v2  ;;  %v10446_v25 = vrot.slane %v2007_v24, %v9627_v18  ;;  %v2816_v30 = vcombine.high %v2638_v16, %v9599_v61 }
 0x270   : > { %v10456_v32 = vrot.slane %v2392_v35, %v9610_v2  ;;  %v2542_v6 = vpack.i.b16 %v2340_v5, %v2315_v44  ;;  %v2882_v53 = vcombine.high %v2642_v34, %v9599_v61  ;;  %v2625_v24 = vshrl.u32 %v2597_v12, 16 }
 0x271   : > { %v2543_v40 = vshrl.u32 %v2315_v44, 16  ;;  %v2544_v8 = vshrl.u32 %v2340_v5, 16  ;;  %v2648_v42 = vshrl.u32 %v2607_v41, 16  ;;  %v2823_v19 = vrot.slane %v2638_v16, %v9610_v2 }
 0x272   : > { %v2615_v9 = vpop.permute.xlu1 %2614  ;;  %v4449_v36 = vsel %vm3708_vm2, %v2542_v6, 0  ;;  %v2830_v35 = vrot.slane %v2816_v30, %v9610_v2  ;;  %v11915_v38 = vmov 0   ;;  %v10473_v16 = vpack.i.b16 %v2625_v24, %v2624_v57 }
 0x273   : > { %v2646_v60 = vpack.i.b16 %v2615_v9, %v2607_v41  ;;  %v2649_v20 = vshrl.u32 %v2615_v9, 16  ;;  %8890 = vmatpush3.bf16.xpose.msra.mxu0 %v4449_v36  ;;  %v2545_v55 = vpack.i.b16 %v2544_v8, %v2543_v40  ;;  %v2316_v0 = vcombine.high %v2315_v44, %v11915_v38 }
 0x274   : > { %8901 = vmatprep.subr.bf16.mxu0 %v11916_v63  ;;  %v2341_v6 = vcombine.high %v2340_v5, %v11915_v38  ;;  %v2889_v41 = vrot.slane %v2642_v34, %v9610_v2  ;;  %v2896_v9 = vrot.slane %v2882_v53, %v9610_v2 }
 0x275   : > { %v2650_v33 = vpack.i.b16 %v2649_v20, %v2648_v42  ;;  %v2831_v12 = vcombine.high %v2646_v60, %v9599_v61  ;;  %v2838_v50 = vrot.slane %v2646_v60, %v9610_v2  ;;  %v4495_v36 = vsel %vm3708_vm2, %v2545_v55, 0 }
 0x276   : > { %v10461_v14 = vpop.permute.xlu1 %2592  ;;  %8896 = vmatpush3.bf16.xpose.msra.mxu1 %v4495_v36  ;;  %v2548_v60 = vpack.i.b16 %v2341_v6, %v2316_v0  ;;  %v2549_v5 = vshrl.u32 %v2316_v0, 16  ;;  %v2550_v34 = vshrl.u32 %v2341_v6, 16 }
 0x277   : > { %11914 = vst [vmem:[#allocation11_spill] sm:$0xff] %v10461_v14  ;;  %v2845_v40 = vrot.slane %v2831_v12, %v9610_v2  ;;  %v2846_v20 = vcombine.low %v2823_v19, %v2838_v50  ;;  %v2847_v8 = vcombine.high %v2823_v19, %v2838_v50  ;;  %v2897_v42 = vcombine.high %v2650_v33, %v9599_v61 }
 0x278   : > { %v2904_v44 = vrot.slane %v2650_v33, %v9610_v2  ;;  %8907 = vmatprep.subr.bf16.mxu1 %v11916_v63  ;;  %v4541_v19 = vsel %vm3708_vm2, %v2548_v60, 0 }
 0x279   : > { %v2854_v57 = vrot.slane %v2846_v20, %v9627_v18  ;;  %v2861_v53 = vrot.slane %v2847_v8, %v9627_v18  ;;  %v2862_v55 = vcombine.low %v2830_v35, %v2845_v40  ;;  %v2863_v24 = vcombine.high %v2830_v35, %v2845_v40 }
 0x27a   : > { %v2605_v30 = vpop.permute.xlu1 %2604  ;;  %v2911_v12 = vrot.slane %v2897_v42, %v9610_v2  ;;  %v2912_v36 = vcombine.low %v2889_v41, %v2904_v44  ;;  %v2913_v50 = vcombine.high %v2889_v41, %v2904_v44  ;;  %v11917_v20 = vpack.i.b16 %v10241_v59, %v10238_v29 }
 0x27b   : > { %v10485_v33 = vrot.slane %v2862_v55, %v9627_v18  ;;  %v10488_v14 = vrot.slane %v2863_v24, %v9627_v18  ;;  %v3312_v0 = vcombine.low %v2854_v57, %v2861_v53  ;;  %v8532_v6 = vcombine.high %v2854_v57, %v2861_v53 }
 0x27c   : > { %8892 = vmatmul.mubr.msk.bf16.vlgmr.msra.gmra.mrb[32].mxu0 %vm3708_vm2, %v11917_v20  ;;  %v10495_v35 = vrot.slane %v2912_v36, %v9627_v18  ;;  %v10498_v41 = vrot.slane %v2913_v50, %v9627_v18  ;;  %v2928_v40 = vcombine.low %v2896_v9, %v2911_v12  ;;  %v2929_v8 = vcombine.high %v2896_v9, %v2911_v12 }
 0x27d   : > { %8902 = vmatpush3.bf16.xpose.msra.mxu0 %v4541_v19  ;;  %v10501_v42 = vrot.slane %v3312_v0, %v9610_v2  ;;  %v10504_v44 = vrot.slane %v8532_v6, %v9610_v2  ;;  %v3362_v29 = vcombine.low %v10485_v33, %v10488_v14  ;;  %v8534_v59 = vcombine.high %v10485_v33, %v10488_v14 }
 0x27e   : > { %8903 = vmatprep.mubr.msk.bf16.mxu0 %vm9451_vm1, %v11916_v63  ;;  %v10513_v60 = vrot.slane %v2928_v40, %v9627_v18  ;;  %v10516_v9 = vrot.slane %v2929_v8, %v9627_v18  ;;  %v3337_v57 = vcombine.low %v10495_v35, %v10498_v41  ;;  %v8533_v53 = vcombine.high %v10495_v35, %v10498_v41  ;;  %v2613_v55 = vpop.permute.xlu1 %2612 }
 0x27f   : > { %8898 = vmatmul.mubr.msk.bf16.vlgmr.msra.gmra.mrb[40].mxu1 %vm3708_vm2, %v10289_v37  ;;  %v11918_v24 = vcombine.high %v10386_v23, %v10390_v43  ;;  %v8525_v36 = vcombine.high %v10419_v11, %v10422_v21  ;;  %v2551_v19 = vpack.i.b16 %v2550_v34, %v2549_v5  ;;  %8913 = vmatprep.subr.bf16.mxu0 %v11916_v63  ;;  %v2632_v8 = vshrl.u32 %v2605_v30, 16 }
 0x280   : > { %v11919_v37 = vcombine.low %v10419_v11, %v10422_v21  ;;  %v2684_v23 = vcombine.high %v10438_v27, %v9599_v61  ;;  %v3387_v43 = vcombine.low %v10513_v60, %v10516_v9  ;;  %8909 = vmatprep.mubr.msk.bf16.mxu1 %vm9451_vm1, %v11916_v63  ;;  %v2691_v5 = vrot.slane %v10438_v27, %v9610_v2 }
 0x281   : > { %v10528_v12 = vrot.slane %v11918_v24, %v9610_v2  ;;  %v4587_v34 = vsel %vm3708_vm2, %v2551_v19, 0  ;;  %v11920_v11 = vcombine.high %v10376_v47, %v10379_v58  ;;  %v2630_v20 = vpack.i.b16 %v2613_v55, %v2605_v30 }
 0x282   : > { %v10539_v0 = vrot.slane %v11919_v37, %v9610_v2  ;;  %v2750_v40 = vcombine.high %v10473_v16, %v9599_v61  ;;  %8908 = vmatpush3.bf16.xpose.msra.mxu1 %v4587_v34  ;;  %v11921_v24 = vcombine.low %v10402_v22, %v10405_v54  ;;  %v2633_v50 = vshrl.u32 %v2613_v55, 16 }
 0x283   : > { %v2382_v21 = vrot.slane %v11920_v11, %v9610_v2  ;;  %v11922_v27 = vpack.i.b16 %v10271_v15, %v10267_v56  ;;  %8919 = vmatprep.subr.bf16.mxu1 %v11916_v63  ;;  %v2699_v58 = vcombine.high %v2630_v20, %v9599_v61  ;;  %v2706_v19 = vrot.slane %v2630_v20, %v9610_v2 }
 0x284   : > { %v2365_v37 = vrot.slane %v11921_v24, %v9627_v18  ;;  %v1442_v30 = vshrl.u32 %v10362_v39, 16  ;;  %v2432_v34 = vrot.slane %v8525_v36, %v9610_v2  ;;  %v2698_v22 = vrot.slane %v2684_v23, %v9610_v2 }
 0x285   : > { %8904 = vmatmul.mubr.msk.bf16.vlgmr.msra.gmra.mrb[36].mxu0 %vm3708_vm2, %v11922_v27  ;;  %v2383_v47 = vcombine.low %v10443_v51, %v2382_v21  ;;  %v2757_v54 = vrot.slane %v10473_v16, %v9610_v2  ;;  %v2634_v56 = vpack.i.b16 %v2633_v50, %v2632_v8  ;;  %v2713_v51 = vrot.slane %v2699_v58, %v9610_v2 }
 0x286   : > { %8915 = vmatprep.mubr.msk.bf16.mxu0 %vm9451_vm1, %v11916_v63  ;;  %v2714_v55 = vcombine.low %v2691_v5, %v2706_v19  ;;  %v2715_v11 = vcombine.high %v2691_v5, %v2706_v19  ;;  %v2764_v21 = vrot.slane %v2750_v40, %v9610_v2  ;;  %v2555_v23 = vshrl.u32 %v2365_v37, 16 }
 0x287   : > { %v2390_v15 = vrot.slane %v2383_v47, %v9627_v18  ;;  %v2765_v20 = vcombine.high %v2634_v56, %v9599_v61  ;;  %v2772_v36 = vrot.slane %v2634_v56, %v9610_v2  ;;  %v2730_v8 = vcombine.low %v2698_v22, %v2713_v51 }
 0x288   : > { %v2722_v16 = vrot.slane %v2714_v55, %v9627_v18  ;;  %v2729_v50 = vrot.slane %v2715_v11, %v9627_v18  ;;  %v2731_v27 = vcombine.high %v2698_v22, %v2713_v51  ;;  %v2366_v19 = vcombine.high %v2365_v37, %v11915_v38 }
 0x289   : > { %v2554_v24 = vpack.i.b16 %v2390_v15, %v2365_v37  ;;  %v2779_v47 = vrot.slane %v2765_v20, %v9610_v2  ;;  %v2780_v6 = vcombine.low %v2757_v54, %v2772_v36  ;;  %v2781_v58 = vcombine.high %v2757_v54, %v2772_v36  ;;  %8910 = vmatmul.mubr.msk.bf16.vlgmr.msra.gmra.mrb[44].mxu1 %vm3708_vm2, %v10300_v7 }
 0x28a   : > { %v2738_v40 = vrot.slane %v2730_v8, %v9627_v18  ;;  %v2433_v56 = vcombine.low %v10539_v0, %v2432_v34  ;;  %v2745_v55 = vrot.slane %v2731_v27, %v9627_v18  ;;  %v3212_v20 = vcombine.low %v2722_v16, %v2729_v50  ;;  %8921 = vmatprep.mubr.msk.bf16.mxu1 %vm9451_vm1, %v11916_v63 }
 0x28b   : > { %v4633_v5 = vsel %vm3708_vm2, %v2554_v24, 0  ;;  %v2788_v22 = vrot.slane %v2780_v6, %v9627_v18  ;;  %v2795_v51 = vrot.slane %v2781_v58, %v9627_v18  ;;  %v2796_v11 = vcombine.low %v2764_v21, %v2779_v47 }
 0x28c   : > { %8914 = vmatpush3.bf16.xpose.msra.mxu0 %v4633_v5  ;;  %v2797_v54 = vcombine.high %v2764_v21, %v2779_v47  ;;  %v8528_v36 = vcombine.high %v2722_v16, %v2729_v50  ;;  %v2556_v24 = vshrl.u32 %v2390_v15, 16  ;;  %v3262_v34 = vcombine.low %v2738_v40, %v2745_v55 }
 0x28d   : > { %8925 = vmatprep.subr.bf16.mxu0 %v11916_v63  ;;  %v10598_v7 = vrot.slane %v2796_v11, %v9627_v18  ;;  %v3237_v0 = vcombine.low %v2788_v22, %v2795_v51  ;;  %v8529_v37 = vcombine.high %v2788_v22, %v2795_v51  ;;  %v8530_v8 = vcombine.high %v2738_v40, %v2745_v55 }
 0x28e   : > { %v10601_v6 = vrot.slane %v2797_v54, %v9627_v18  ;;  %v2557_v27 = vpack.i.b16 %v2556_v24, %v2555_v23  ;;  %v2391_v21 = vcombine.high %v2390_v15, %v11915_v38  ;;  %v11923_v16 = vcombine.low %v10430_v31, %v10410_v26 }
 0x28f   : > { %v11924_v47 = vcombine.high %v10430_v31, %v10410_v26  ;;  %v2442_v5 = vcombine.low %v10435_v10, %v10446_v25  ;;  %v2408_v22 = vcombine.low %v10456_v32, %v10528_v12  ;;  %v2440_v55 = vrot.slane %v2433_v56, %v9627_v18 }
 0x290   : > { %v2080_v50 = vrot.slane %v11923_v16, %v9627_v18  ;;  %v3287_v23 = vcombine.low %v10598_v7, %v10601_v6  ;;  %v8531_v15 = vcombine.high %v10598_v7, %v10601_v6  ;;  %v4679_v40 = vsel %vm3708_vm2, %v2557_v27, 0 }
 0x291   : > { %v2087_v58 = vrot.slane %v11924_v47, %v9627_v18  ;;  %v3219_v51 = vrot.slane %v3212_v20, %v9610_v2  ;;  %v3227_v26 = vrot.slane %v8528_v36, %v9610_v2  ;;  %8920 = vmatpush3.bf16.xpose.msra.mxu1 %v4679_v40  ;;  %v2560_v31 = vpack.i.b16 %v2391_v21, %v2366_v19 }
 0x292   : > { %v2562_v11 = vshrl.u32 %v2391_v21, 16  ;;  %v8526_v32 = vcombine.high %v10435_v10, %v10446_v25  ;;  %v3244_v12 = vrot.slane %v3237_v0, %v9610_v2  ;;  %v3252_v54 = vrot.slane %v8529_v37, %v9610_v2  ;;  %8931 = vmatprep.subr.bf16.mxu1 %v11916_v63 }
 0x293   : > { %v11925_v24 = vpack.i.b16 %v10323_v1, %v10287_v62  ;;  %v2561_v56 = vshrl.u32 %v2366_v19, 16  ;;  %v4725_v20 = vsel %vm3708_vm2, %v2560_v31, 0  ;;  %v2415_v36 = vrot.slane %v2408_v22, %v9627_v18 }
 0x294   : > { %v1446_v10 = vpack.i.b16 %v10397_v4, %v10317_v45  ;;  %v1448_v25 = vshrl.u32 %v10397_v4, 16  ;;  %v3269_v0 = vrot.slane %v3262_v34, %v9610_v2  ;;  %v3277_v62 = vrot.slane %v8530_v8, %v9610_v2 }
 0x295   : > { %8916 = vmatmul.mubr.msk.bf16.vlgmr.msra.gmra.mrb[40].mxu0 %vm3708_vm2, %v11925_v24  ;;  %v2563_v1 = vpack.i.b16 %v2562_v11, %v2561_v56  ;;  %v11926_v19 = vshrl.u32 %v10305_v28, 16  ;;  %v2467_v27 = vcombine.low %v2080_v50, %v2087_v58  ;;  %v8527_v21 = vcombine.high %v2080_v50, %v2087_v58 }
 0x296   : > { %8927 = vmatprep.mubr.msk.bf16.mxu0 %vm9451_vm1, %v11916_v63  ;;  %8926 = vmatpush3.bf16.xpose.msra.mxu0 %v4725_v20  ;;  %v2441_v16 = vcombine.high %v2440_v55, %v11915_v38  ;;  %v3228_v47 = vcombine.low %v3219_v51, %v3227_v26  ;;  %v2449_v22 = vrot.slane %v2442_v5, %v9610_v2  ;;  %v1447_v56 = vshrl.u32 %v10317_v45, 16 }
 0x297   : > { %v1443_v37 = vpack.i.b16 %v1442_v30, %v11926_v19  ;;  %8937 = vmatprep.subr.bf16.mxu0 %v11916_v63  ;;  %v2457_v34 = vrot.slane %v8526_v32, %v9610_v2  ;;  %v10654_v8 = vrot.slane %v3362_v29, %v9610_v2  ;;  %v3253_v40 = vcombine.low %v3244_v12, %v3252_v54 }
 0x298   : > { %v10660_v30 = vrot.slane %v8534_v59, %v9610_v2  ;;  %v2566_v50 = vpack.i.b16 %v2440_v55, %v2415_v36  ;;  %v2416_v58 = vcombine.high %v2415_v36, %v11915_v38  ;;  %v10664_v5 = vrot.slane %v3228_v47, %v9627_v18  ;;  %8922 = vmatmul.mubr.msk.bf16.vlgmr.msra.gmra.mrb[48].mxu1 %vm3708_vm2, %v10414_v3 }
 0x299   : > { %v4771_v51 = vsel %vm3708_vm2, %v2563_v1, 0  ;;  %v2568_v29 = vshrl.u32 %v2440_v55, 16  ;;  %v10670_v26 = vrot.slane %v3253_v40, %v9627_v18  ;;  %v3278_v31 = vcombine.low %v3269_v0, %v3277_v62  ;;  %8933 = vmatprep.mubr.msk.bf16.mxu1 %vm9451_vm1, %v11916_v63 }
 0x29a   : > { %v3344_v14 = vrot.slane %v3337_v57, %v9610_v2  ;;  %8932 = vmatpush3.bf16.xpose.msra.mxu1 %v4771_v51  ;;  %v2574_v33 = vshrl.u32 %v2441_v16, 16  ;;  %v2474_v59 = vrot.slane %v2467_v27, %v9610_v2  ;;  %v2482_v3 = vrot.slane %v8527_v21, %v9610_v2 }
 0x29b   : > { %v3352_v55 = vrot.slane %v8533_v53, %v9610_v2  ;;  %v3394_v11 = vrot.slane %v3387_v43, %v9610_v2  ;;  %8943 = vmatprep.subr.bf16.mxu1 %v11916_v63  ;;  %v2567_v57 = vshrl.u32 %v2415_v36, 16  ;;  %v10691_v32 = vcombine.high %v10664_v5, %v11915_v38 }
 0x29c   : > { %v11927_v12 = vcombine.high %v10513_v60, %v10516_v9  ;;  %v11928_v35 = vpack.i.b16 %v10362_v39, %v10305_v28  ;;  %v4817_v41 = vsel %vm3708_vm2, %v2566_v50, 0  ;;  %v2573_v53 = vshrl.u32 %v2416_v58, 16 }
 0x29d   : > { %v2458_v43 = vcombine.low %v2449_v22, %v2457_v34  ;;  %v2569_v24 = vpack.i.b16 %v2568_v29, %v2567_v57  ;;  %v10707_v60 = vcombine.high %v10670_v26, %v11915_v38  ;;  %v3294_v28 = vrot.slane %v3287_v23, %v9610_v2 }
 0x29e   : > { %v3402_v54 = vrot.slane %v11927_v12, %v9610_v2  ;;  %8928 = vmatmul.mubr.msk.bf16.vlgmr.msra.gmra.mrb[44].mxu0 %vm3708_vm2, %v11928_v35  ;;  %v2572_v39 = vpack.i.b16 %v2441_v16, %v2416_v58  ;;  %v2575_v9 = vpack.i.b16 %v2574_v33, %v2573_v53  ;;  %v2483_v20 = vcombine.low %v2474_v59, %v2482_v3 }
 0x29f   : > { %8938 = vmatpush3.bf16.xpose.msra.mxu0 %v4817_v41  ;;  %8939 = vmatprep.mubr.msk.bf16.mxu0 %vm9451_vm1, %v11916_v63  ;;  %v3621_v36 = vshrl.u32 %v10691_v32, 16  ;;  %v3622_v62 = vshrl.u32 %v10707_v60, 16  ;;  %v10719_v1 = vrot.slane %v3278_v31, %v9627_v18  ;;  %v3302_v23 = vrot.slane %v8531_v15, %v9610_v2 }
 0x2a0   : > { %8949 = vmatprep.subr.bf16.mxu0 %v11916_v63  ;;  %v1449_v19 = vpack.i.b16 %v1448_v25, %v1447_v56  ;;  %v10727_v27 = vcombine.high %v10397_v4, %v11915_v38  ;;  %v10730_v21 = vrot.slane %v2458_v43, %v9627_v18  ;;  %v11929_v16 = vcombine.low %v10501_v42, %v10504_v44 }
 0x2a1   : > { %8934 = vmatmul.mubr.msk.bf16.vlgmr.msra.gmra.mrb[52].mxu1 %vm3708_vm2, %v1443_v37  ;;  %v4863_v22 = vsel %vm3708_vm2, %v2569_v24, 0  ;;  %v10740_v7 = vpack.i.b16 %v3622_v62, %v3621_v36  ;;  %v3303_v6 = vcombine.low %v3294_v28, %v3302_v23  ;;  %v3353_v15 = vcombine.low %v3344_v14, %v3352_v55 }
 0x2a2   : > { %v10736_v47 = vrot.slane %v11929_v16, %v9627_v18  ;;  %8944 = vmatpush3.bf16.xpose.msra.mxu1 %v4863_v22  ;;  %8945 = vmatprep.mubr.msk.bf16.mxu1 %vm9451_vm1, %v11916_v63  ;;  %v4909_v25 = vsel %vm3708_vm2, %v2572_v39, 0  ;;  %v4955_v34 = vsel %vm3708_vm2, %v2575_v9, 0  ;;  %v2490_v42 = vrot.slane %v2483_v20, %v9627_v18 }
 0x2a3   : > { %v3378_v44 = vcombine.low %v10654_v8, %v10660_v30  ;;  %8955 = vmatprep.subr.bf16.mxu1 %v11916_v63  ;;  %v10751_v37 = vrot.slane %v3303_v6, %v9627_v18  ;;  %v10755_v40 = vcombine.high %v10719_v1, %v11915_v38  ;;  %v10758_v50 = vrot.slane %v3353_v15, %v9627_v18 }
 0x2a4   : > { %11930 = vst [vmem:[#allocation12_spill] sm:$0xff] %v10736_v47  ;;  %v3403_v58 = vcombine.low %v3394_v11, %v3402_v54  ;;  %v3627_v8 = vshrl.u32 %v10719_v1, 16  ;;  %v3639_v30 = vshrl.u32 %v10736_v47, 16  ;;  %v10768_v51 = vcombine.high %v10736_v47, %v11915_v38 }
 0x2a5   : > { %11931 = vst [vmem:[#allocation13_spill] sm:$0xff] %v10755_v40  ;;  %11932 = vst [vmem:[#allocation14_spill] sm:$0xff] %v10758_v50  ;;  %v10771_v29 = vrot.slane %v3378_v44, %v9627_v18  ;;  %v3628_v4 = vshrl.u32 %v10751_v37, 16  ;;  %v3640_v31 = vshrl.u32 %v10758_v50, 16  ;;  %v2578_v14 = vpack.i.b16 %v2490_v42, %v10730_v21 }
 0x2a6   : > { %8940 = vmatmul.mubr.msk.bf16.vlgmr.msra.gmra.mrb[48].mxu0 %vm3708_vm2, %v1446_v10  ;;  %11933 = vst [vmem:[#allocation15_spill] sm:$0xff] %v10768_v51  ;;  %v10780_v10 = vcombine.high %v10751_v37, %v11915_v38  ;;  %v10789_v59 = vcombine.high %v10758_v50, %v11915_v38  ;;  %v10792_v3 = vrot.slane %v3403_v58, %v9627_v18  ;;  %v3633_v11 = vshrl.u32 %v10755_v40, 16 }
 0x2a7   : > { %11934 = vst [vmem:[#allocation16_spill] sm:$0xff] %v10771_v29  ;;  %8950 = vmatpush3.bf16.xpose.msra.mxu0 %v4909_v25  ;;  %8951 = vmatprep.mubr.msk.bf16.mxu0 %vm9451_vm1, %v11916_v63  ;;  %v10794_v55 = vpack.i.b16 %v3628_v4, %v3627_v8  ;;  %v10798_v12 = vpack.i.b16 %v3640_v31, %v3639_v30  ;;  %v3645_v35 = vshrl.u32 %v10768_v51, 16  ;;  %v2580_v43 = vshrl.u32 %v2490_v42, 16 }
 0x2a8   : > { %11935 = vst [vmem:[#allocation17_spill] sm:$0xff] %v10780_v10  ;;  %8961 = vmatprep.subr.bf16.mxu0 %v11916_v63  ;;  %11936 = vst [vmem:[#allocation18_spill] sm:$0xff] %v10789_v59  ;;  %v3634_v57 = vshrl.u32 %v10780_v10, 16  ;;  %v3646_v41 = vshrl.u32 %v10789_v59, 16  ;;  %v3651_v56 = vshrl.u32 %v10771_v29, 16  ;;  %v3652_v28 = vshrl.u32 %v10792_v3, 16 }
 0x2a9   : > { %11937 = vst [vmem:[#allocation19_spill] sm:$0xff] %v10792_v3  ;;  %11938 = vst [vmem:[#allocation20_spill] sm:$0xff] %v10798_v12  ;;  %8946 = vmatmul.mubr.msk.bf16.vlgmr.msra.gmra.mrb[56].mxu1 %vm3708_vm2, %v1449_v19  ;;  %v1452_v39 = vpack.i.b16 %v10727_v27, %v10350_v46  ;;  %v1454_v9 = vshrl.u32 %v10727_v27, 16  ;;  %v2579_v62 = vshrl.u32 %v10730_v21, 16  ;;  %v10826_v19 = vcombine.high %v10771_v29, %v11915_v38 }
 0x2aa   : > { %v10807_v24 = vpack.i.b16 %v3634_v57, %v3633_v11  ;;  %8956 = vmatpush3.bf16.xpose.msra.mxu1 %v4955_v34  ;;  %8957 = vmatprep.mubr.msk.bf16.mxu1 %vm9451_vm1, %v11916_v63  ;;  %v10816_v20 = vpack.i.b16 %v3646_v41, %v3645_v35  ;;  %v10822_v23 = vpack.i.b16 %v3652_v28, %v3651_v56  ;;  %v5001_v27 = vsel %vm3708_vm2, %v2578_v14, 0 }
 0x2ab   : > { %8967 = vmatprep.subr.bf16.mxu1 %v11916_v63  ;;  %11942 = vst [vmem:[#allocation24_spill] sm:$0xff] %v10826_v19  ;;  %v10830_v16 = vcombine.high %v10792_v3, %v11915_v38  ;;  %v1453_v22 = vshrl.u32 %v10350_v46, 16  ;;  %v1338_v6 = vcombine.low %v10334_v48, %v10340_v17  ;;  %v2491_v15 = vcombine.high %v2490_v42, %v11915_v38 }
 0x2ac   : > { %11939 = vst [vmem:[#allocation21_spill] sm:$0xff] %v10807_v24  ;;  %11940 = vst [vmem:[#allocation22_spill] sm:$0xff] %v10816_v20  ;;  %v2581_v25 = vpack.i.b16 %v2580_v43, %v2579_v62  ;;  %v3657_v34 = vshrl.u32 %v10826_v19, 16  ;;  %v11944_v46 = vcombine.low %v10345_v13, %v10353_v52  ;;  %v2466_v48 = vcombine.high %v10730_v21, %v11915_v38 }
 0x2ad   : > { %11941 = vst [vmem:[#allocation23_spill] sm:$0xff] %v10822_v23  ;;  %11943 = vst [vmem:[#allocation25_spill] sm:$0xff] %v10830_v16  ;;  %v3658_v44 = vshrl.u32 %v10830_v16, 16  ;;  %v1455_v17 = vpack.i.b16 %v1454_v9, %v1453_v22  ;;  %v1345_v30 = vrot.slane %v1338_v6, %v9627_v18  ;;  %v2586_v14 = vshrl.u32 %v2491_v15, 16 }
 0x2ae   : > { %8952 = vmatmul.mubr.msk.bf16.vlgmr.msra.gmra.mrb[52].mxu0 %vm3708_vm2, %v1452_v39  ;;  %v1370_v8 = vrot.slane %v11944_v46, %v9627_v18  ;;  %v2584_v4 = vpack.i.b16 %v2491_v15, %v2466_v48  ;;  %v5047_v31 = vsel %vm3708_vm2, %v2581_v25, 0  ;;  %v2585_v52 = vshrl.u32 %v2466_v48, 16 }
 0x2af   : > { %8962 = vmatpush3.bf16.xpose.msra.mxu0 %v5001_v27  ;;  %8963 = vmatprep.mubr.msk.bf16.mxu0 %vm9451_vm1, %v11916_v63  ;;  %v10851_v42 = vpack.i.b16 %v3658_v44, %v3657_v34  ;;  %v1459_v57 = vshrl.u32 %v1345_v30, 16  ;;  %v1346_v56 = vcombine.high %v1345_v30, %v11915_v38  ;;  %v3614_v28 = vpack.i.b16 %v10670_v26, %v10664_v5 }
 0x2b0   : > { %8973 = vmatprep.subr.bf16.mxu0 %v11916_v63  ;;  %v1458_v11 = vpack.i.b16 %v1370_v8, %v1345_v30  ;;  %v1460_v13 = vshrl.u32 %v1370_v8, 16  ;;  %v5093_v21 = vsel %vm3708_vm2, %v2584_v4, 0  ;;  %v2587_v35 = vpack.i.b16 %v2586_v14, %v2585_v52 }
 0x2b1   : > { %11945 = vst [vmem:[#allocation26_spill] sm:$0xff] %v10851_v42  ;;  %8958 = vmatmul.mubr.msk.bf16.vlgmr.msra.gmra.mrb[60].mxu1 %vm3708_vm2, %v1455_v17  ;;  %v1371_v41 = vcombine.high %v1370_v8, %v11915_v38  ;;  %v3616_v9 = vshrl.u32 %v10670_v26, 16  ;;  %v3615_v22 = vshrl.u32 %v10664_v5, 16  ;;  %v5570_v6 = vsel %vm5568_vm3, %v3614_v28, 0 }
 0x2b2   : > { %8968 = vmatpush3.bf16.xpose.msra.mxu1 %v5047_v31  ;;  %8969 = vmatprep.mubr.msk.bf16.mxu1 %vm9451_vm1, %v11916_v63  ;;  %v1461_v43 = vpack.i.b16 %v1460_v13, %v1459_v57  ;;  %v5139_v39 = vsel %vm3708_vm2, %v2587_v35, 0  ;;  %v1465_v15 = vshrl.u32 %v1346_v56, 16 }
 0x2b3   : > { %8979 = vmatprep.subr.bf16.mxu1 %v11916_v63  ;;  %v1464_v62 = vpack.i.b16 %v1371_v41, %v1346_v56  ;;  %v1466_v27 = vshrl.u32 %v1371_v41, 16  ;;  %v3617_v25 = vpack.i.b16 %v3616_v9, %v3615_v22 }
 0x2b5   : > { %v1467_v26 = vpack.i.b16 %v1466_v27, %v1465_v15  ;;  %v5616_v34 = vsel %vm5568_vm3, %v3617_v25, 0 }
 0x2b6   : > { %8964 = vmatmul.mubr.msk.bf16.vlgmr.msra.gmra.mrb[56].mxu0 %vm3708_vm2, %v1458_v11 }
 0x2b7   : > { %8974 = vmatpush3.bf16.xpose.msra.mxu0 %v5093_v21  ;;  %8975 = vmatprep.mubr.msk.bf16.mxu0 %vm9451_vm1, %v11916_v63 }
 0x2b8   : > { %8985 = vmatprep.subr.bf16.mxu0 %v11916_v63 }
 0x2b9   : > { %8970 = vmatmul.mubr.msk.bf16.vlgmr.msra.gmra.mrb[64].mxu1 %vm3708_vm2, %v1461_v43 }
 0x2ba   : > { %8980 = vmatpush3.bf16.xpose.msra.mxu1 %v5139_v39  ;;  %8981 = vmatprep.mubr.msk.bf16.mxu1 %vm9451_vm1, %v11916_v63 }
 0x2bb   : > { %8991 = vmatprep.subr.bf16.mxu1 %v11916_v63 }
 0x2be   : > { %8976 = vmatmul.mubr.msk.bf16.vlgmr.msra.gmra.mrb[60].mxu0 %vm3708_vm2, %v1464_v62 }
 0x2bf   : > { %8986 = vmatpush3.bf16.msra.mxu0 %v5570_v6  ;;  %8987 = vmatprep.mubr.msk.bf16.mxu0 %vm9451_vm1, %v11916_v63 }
 0x2c0   : > { %8997 = vmatprep.subr.bf16.mxu0 %v11916_v63 }
 0x2c1   : > { %8982 = vmatmul.mubr.msk.bf16.vlgmr.msra.gmra.mrb[68].mxu1 %vm3708_vm2, %v1467_v26 }
 0x2c2   : > { %8992 = vmatpush3.bf16.msra.mxu1 %v5616_v34  ;;  %8993 = vmatprep.mubr.msk.bf16.mxu1 %vm9451_vm1, %v11916_v63 }
 0x2c3   : > { %9003 = vmatprep.subr.bf16.mxu1 %v11916_v63 }
 0x2e7   : > { %v10885_v5 = vpop.f32.mrb[4].mxu1 }
 0x2e8   : > { %v8797_v44 = vpop.f32.mrb[5].mxu1  ;;  %v5181_v46 = vsel %vm3708_vm2, %v10885_v5, -inf }
 0x2e9   : > { %5182 = vmax.xlane.f32.xlu0 %v5181_v46  ;;  %v3752_v8 = vpop.f32.mrb[6].mxu1 }
 0x2ea   : > { %v8798_v17 = vpop.f32.mrb[7].mxu1 }
 0x2eb   : > { %v10889_v48 = vpop.f32.mrb[4].mxu0 }
 0x2ec   : > { %v8809_v30 = vpop.f32.mrb[5].mxu0  ;;  %v5187_v14 = vsel %vm3708_vm2, %v10889_v48, -inf }
 0x2ed   : > { %v3844_v4 = vpop.f32.mrb[6].mxu0  ;;  %5188 = vmax.xlane.f32.xlu0 %v5187_v14 }
 0x2ee   : > { %v8810_v31 = vpop.f32.mrb[7].mxu0 }
 0x2ef   : > { %v10893_v11 = vpop.f32.mrb[8].mxu1 }
 0x2f0   : > { %v8803_v13 = vpop.f32.mrb[9].mxu1  ;;  %v5184_v52 = vsel %vm3708_vm2, %v10893_v11, -inf }
 0x2f1   : > { %5185 = vmax.xlane.f32.xlu1 %v5184_v52  ;;  %v3798_v21 = vpop.f32.mrb[10].mxu1 }
 0x2f2   : > { %v8804_v35 = vpop.f32.mrb[11].mxu1 }
 0x2f3   : > { %v10897_v57 = vpop.f32.mrb[8].mxu0 }
 0x2f4   : > { %v8821_v41 = vpop.f32.mrb[9].mxu0  ;;  %v5193_v28 = vsel %vm3708_vm2, %v10897_v57, -inf }
 0x2f5   : > { %v3936_v43 = vpop.f32.mrb[10].mxu0  ;;  %5194 = vmax.xlane.f32.xlu1 %v5193_v28 }
 0x2f6   : > { %v8822_v56 = vpop.f32.mrb[11].mxu0 }
 0x2f7   : > { %v10901_v39 = vpop.f32.mrb[12].mxu1 }
 0x2f8   : > { %v8815_v9 = vpop.f32.mrb[13].mxu1  ;;  %v5190_v62 = vsel %vm3708_vm2, %v10901_v39, -inf }
 0x2f9   : > { %v3890_v27 = vpop.f32.mrb[14].mxu1  ;;  %5191 = vmax.xlane.f32.xlu0 %v5190_v62 }
 0x2fa   : > { %v8816_v6 = vpop.f32.mrb[15].mxu1 }
 0x2fb   : > { %v10905_v22 = vpop.f32.mrb[12].mxu0 }
 0x2fc   : > { %v8833_v15 = vpop.f32.mrb[13].mxu0  ;;  %v5199_v25 = vsel %vm3708_vm2, %v10905_v22, -inf }
 0x2fd   : > { %5200 = vmax.xlane.f32.xlu1 %v5199_v25  ;;  %v4028_v26 = vpop.f32.mrb[14].mxu0 }
 0x2fe   : > { %v8834_v34 = vpop.f32.mrb[15].mxu0 }
 0x2ff   : > { %v10909_v44 = vpop.f32.mrb[16].mxu1 }
 0x300   : > { %v8827_v46 = vpop.f32.mrb[17].mxu1  ;;  %v5196_v8 = vsel %vm3708_vm2, %v10909_v44, -inf }
 0x301   : > { %5197 = vmax.xlane.f32.xlu0 %v5196_v8  ;;  %v3982_v17 = vpop.f32.mrb[18].mxu1 }
 0x302   : > { %v8828_v4 = vpop.f32.mrb[19].mxu1 }
 0x303   : > { %v10913_v30 = vpop.f32.mrb[16].mxu0 }
 0x304   : > { %v8845_v31 = vpop.f32.mrb[17].mxu0  ;;  %v5205_v14 = vsel %vm3708_vm2, %v10913_v30, -inf }
 0x305   : > { %5206 = vmax.xlane.f32.xlu1 %v5205_v14  ;;  %v4120_v13 = vpop.f32.mrb[18].mxu0  ;;  %v11946_v14 = vld [vmem:[#allocation5_spill] sm:$0xff] }
 0x306   : > { %v8846_v52 = vpop.f32.mrb[19].mxu0 }
 0x307   : > { %v10917_v21 = vpop.f32.mrb[20].mxu1 }
 0x308   : > { %v8839_v35 = vpop.f32.mrb[21].mxu1  ;;  %v5202_v41 = vsel %vm3708_vm2, %v10917_v21, -inf }
 0x309   : > { %5203 = vmax.xlane.f32.xlu0 %v5202_v41  ;;  %v4074_v43 = vpop.f32.mrb[22].mxu1 }
 0x30a   : > { %v8840_v28 = vpop.f32.mrb[23].mxu1 }
 0x30b   : > { %v10921_v56 = vpop.f32.mrb[20].mxu0 }
 0x30c   : > { %v8857_v9 = vpop.f32.mrb[21].mxu0 }
 0x30d   : > { %v4212_v62 = vpop.f32.mrb[22].mxu0  ;;  %v11947_v9 = vld [vmem:[#allocation3_spill] sm:$0xff] }
 0x30e   : > { %v8858_v27 = vpop.f32.mrb[23].mxu0 }
 0x30f   : > { %v10923_v6 = vpop.f32.mrb[24].mxu1 }
 0x310   : > { %v8851_v15 = vpop.f32.mrb[25].mxu1 }
 0x311   : > { %v4166_v25 = vpop.f32.mrb[26].mxu1 }
 0x312   : > { %v8852_v34 = vpop.f32.mrb[27].mxu1 }
 0x313   : > { %v10925_v26 = vpop.f32.mrb[24].mxu0 }
 0x314   : > { %v8869_v46 = vpop.f32.mrb[25].mxu0 }
 0x315   : > { %v4304_v8 = vpop.f32.mrb[26].mxu0 }
 0x316   : > { %2608 = vrot.lane.b32.xlu1 %v9582_v49, %s9455_s10  ;;  %v8870_v17 = vpop.f32.mrb[27].mxu0 }
 0x317   : > { %v10929_v4 = vpop.f32.mrb[28].mxu1  ;;  %v5211_v17 = vsel %vm3708_vm2, %v10921_v56, -inf }
 0x318   : > { %v8863_v31 = vpop.f32.mrb[29].mxu1 }
 0x319   : > { %v4258_v13 = vpop.f32.mrb[30].mxu1  ;;  %v5208_v31 = vsel %vm3708_vm2, %v10923_v6, -inf }
 0x31a   : > { %2616 = vrot.lane.b32.xlu1 %v11946_v14, %s9455_s10  ;;  %v8864_v35 = vpop.f32.mrb[31].mxu1  ;;  %v5217_v14 = vsel %vm3708_vm2, %v10925_v26, -inf  ;;  %v5214_v13 = vsel %vm3708_vm2, %v10929_v4, -inf }
 0x31b   : > { %v10933_v52 = vpop.f32.mrb[28].mxu0 }
 0x31c   : > { %v8881_v41 = vpop.f32.mrb[29].mxu0  ;;  %v5223_v35 = vsel %vm3708_vm2, %v10933_v52, -inf }
 0x31d   : > { %v4396_v43 = vpop.f32.mrb[30].mxu0 }
 0x31e   : > { %v8882_v28 = vpop.f32.mrb[31].mxu0 }
 0x31f   : > { %2600 = vrot.lane.b32.xlu0 %v11947_v9, %s9455_s10  ;;  %v10937_v62 = vpop.f32.mrb[32].mxu1 }
 0x320   : > { %v8875_v49 = vpop.f32.mrb[33].mxu1  ;;  %v5220_v41 = vsel %vm3708_vm2, %v10937_v62, -inf }
 0x321   : > { %v4350_v27 = vpop.f32.mrb[34].mxu1 }
 0x322   : > { %v8876_v15 = vpop.f32.mrb[35].mxu1 }
 0x327   : > { %v10939_v25 = vpop.f32.mrb[36].mxu1 }
 0x328   : > { %v8887_v34 = vpop.f32.mrb[37].mxu1  ;;  %v5226_v43 = vsel %vm3708_vm2, %v10939_v25, -inf }
 0x329   : > { %v4442_v46 = vpop.f32.mrb[38].mxu1 }
 0x32a   : > { %v8888_v8 = vpop.f32.mrb[39].mxu1 }
 0x33e   : > { %5212 = vmax.xlane.f32.xlu1 %v5211_v17  ;;  %5209 = vmax.xlane.f32.xlu0 %v5208_v31 }
 0x342   : > { %5218 = vmax.xlane.f32.xlu1 %v5217_v14  ;;  %5215 = vmax.xlane.f32.xlu0 %v5214_v13 }
 0x346   : > { %5224 = vmax.xlane.f32.xlu1 %v5223_v35  ;;  %5221 = vmax.xlane.f32.xlu0 %v5220_v41 }
 0x34a   : > { %5227 = vmax.xlane.f32.xlu0 %v5226_v43 }
 0x34f   : > { %v10955_v28 = vpop.f32.mrb[32].mxu0 }
 0x350   : > { %v8893_v9 = vpop.f32.mrb[33].mxu0  ;;  %v5229_v49 = vsel %vm3708_vm2, %v10955_v28, -inf }
 0x351   : > { %5230 = vmax.xlane.f32.xlu1 %v5229_v49  ;;  %v4488_v27 = vpop.f32.mrb[34].mxu0 }
 0x352   : > { %v10959_v15 = vpop.f32.mrb[40].mxu1  ;;  %v8894_v34 = vpop.f32.mrb[35].mxu0 }
 0x353   : > { %v8899_v46 = vpop.f32.mrb[41].mxu1  ;;  %v5232_v8 = vsel %vm3708_vm2, %v10959_v15, -inf }
 0x354   : > { %5233 = vmax.xlane.f32.xlu0 %v5232_v8  ;;  %v4534_v17 = vpop.f32.mrb[42].mxu1 }
 0x355   : > { %v8900_v31 = vpop.f32.mrb[43].mxu1 }
 0x358   : > { %v10963_v14 = vpop.f32.mrb[36].mxu0 }
 0x359   : > { %v8905_v13 = vpop.f32.mrb[37].mxu0  ;;  %v5235_v35 = vsel %vm3708_vm2, %v10963_v14, -inf }
 0x35a   : > { %5236 = vmax.xlane.f32.xlu1 %v5235_v35  ;;  %v4580_v41 = vpop.f32.mrb[38].mxu0 }
 0x35b   : > { %v8906_v43 = vpop.f32.mrb[39].mxu0 }
 0x35c   : > { %v10967_v9 = vpop.f32.mrb[44].mxu1 }
 0x35d   : > { %v8911_v49 = vpop.f32.mrb[45].mxu1  ;;  %v5238_v27 = vsel %vm3708_vm2, %v10967_v9, -inf }
 0x35e   : > { %5239 = vmax.xlane.f32.xlu0 %v5238_v27  ;;  %v4626_v34 = vpop.f32.mrb[46].mxu1 }
 0x35f   : > { %v8912_v46 = vpop.f32.mrb[47].mxu1 }
 0x368   : > { %v10971_v8 = vpop.f32.mrb[40].mxu0 }
 0x369   : > { %v8917_v17 = vpop.f32.mrb[41].mxu0  ;;  %v5241_v31 = vsel %vm3708_vm2, %v10971_v8, -inf }
 0x36a   : > { %5242 = vmax.xlane.f32.xlu1 %v5241_v31  ;;  %v4672_v13 = vpop.f32.mrb[42].mxu0 }
 0x36b   : > { %v8918_v35 = vpop.f32.mrb[43].mxu0  ;;  %v10975_v41 = vpop.f32.mrb[48].mxu1 }
 0x36c   : > { %v8923_v43 = vpop.f32.mrb[49].mxu1  ;;  %v5244_v49 = vsel %vm3708_vm2, %v10975_v41, -inf }
 0x36d   : > { %5245 = vmax.xlane.f32.xlu0 %v5244_v49  ;;  %v4718_v58 = vpop.f32.mrb[50].mxu1 }
 0x36e   : > { %v8924_v27 = vpop.f32.mrb[51].mxu1 }
 0x371   : > { %v10979_v34 = vpop.f32.mrb[44].mxu0 }
 0x372   : > { %v8929_v46 = vpop.f32.mrb[45].mxu0  ;;  %v5247_v17 = vsel %vm3708_vm2, %v10979_v34, -inf }
 0x373   : > { %5248 = vmax.xlane.f32.xlu1 %v5247_v17  ;;  %v4764_v36 = vpop.f32.mrb[46].mxu0 }
 0x374   : > { %v8930_v31 = vpop.f32.mrb[47].mxu0  ;;  %v10983_v13 = vpop.f32.mrb[52].mxu1 }
 0x375   : > { %v8935_v35 = vpop.f32.mrb[53].mxu1  ;;  %v5250_v36 = vsel %vm3708_vm2, %v10983_v13, -inf }
 0x376   : > { %v4810_v53 = vpop.f32.mrb[54].mxu1  ;;  %v5183_v46 = vpop.xlane.xlu0 %5182 }
 0x377   : > { %v8936_v43 = vpop.f32.mrb[55].mxu1  ;;  %v5277_v53 = vsub.f32 %v10885_v5, %v5183_v46 }
 0x379   : > { %v10985_v33 = vpop.f32.mrb[48].mxu0  ;;  %v5309_v42 = vmul.f32 1.442695, %v5277_v53 }
 0x37a   : > { %v8941_v54 = vpop.f32.mrb[49].mxu0  ;;  %v5253_v58 = vsel %vm3708_vm2, %v10985_v33, -inf }
 0x37b   : > { %5254 = vmax.xlane.f32.xlu0 %v5253_v58  ;;  %v4856_v49 = vpop.f32.mrb[50].mxu0  ;;  %9278 = vpow2.f32 %v5309_v42 }
 0x37c   : > { %v8942_v27 = vpop.f32.mrb[51].mxu0  ;;  %v10989_v45 = vpop.f32.mrb[56].mxu1 }
 0x37d   : > { %v8947_v17 = vpop.f32.mrb[57].mxu1  ;;  %v5189_v49 = vpop.xlane.xlu0 %5188  ;;  %v5256_v5 = vsel %vm3708_vm2, %v10989_v45, -inf }
 0x37e   : > { %v4902_v31 = vpop.f32.mrb[58].mxu1  ;;  %v5279_v19 = vsub.f32 %v10889_v48, %v5189_v49  ;;  %v5186_v16 = vpop.xlane.xlu1 %5185 }
 0x37f   : > { %5251 = vmax.xlane.f32.xlu0 %v5250_v36  ;;  %v8948_v35 = vpop.f32.mrb[59].mxu1  ;;  %v5278_v48 = vsub.f32 %v10893_v11, %v5186_v16 }
 0x381   : > { %v10994_v43 = vpop.f32.mrb[52].mxu0 }
 0x382   : > { %v8953_v54 = vpop.f32.mrb[53].mxu0  ;;  %v5259_v58 = vsel %vm3708_vm2, %v10994_v43, -inf }
 0x383   : > { %5260 = vmax.xlane.f32.xlu1 %v5259_v58  ;;  %v4948_v27 = vpop.f32.mrb[54].mxu0 }
 0x384   : > { %v8954_v0 = vpop.f32.mrb[55].mxu0  ;;  %v10999_v17 = vpop.f32.mrb[60].mxu1 }
 0x385   : > { %v8959_v46 = vpop.f32.mrb[61].mxu1  ;;  %v5262_v36 = vsel %vm3708_vm2, %v10999_v17, -inf  ;;  %v5313_v0 = vmul.f32 1.442695, %v5279_v19 }
 0x386   : > { %v4994_v31 = vpop.f32.mrb[62].mxu1  ;;  %5263 = vmax.xlane.f32.xlu0 %v5262_v36  ;;  %v5192_v49 = vpop.xlane.xlu0 %5191 }
 0x387   : > { %5257 = vmax.xlane.f32.xlu1 %v5256_v5  ;;  %v8960_v35 = vpop.f32.mrb[63].mxu1  ;;  %v11010_v46 = vpop.xlane.xlu1 %5194  ;;  %9280 = vpow2.f32 %v5313_v0  ;;  %v5311_v5 = vmul.f32 1.442695, %v5278_v48  ;;  %v5280_v42 = vsub.f32 %v10901_v39, %v5192_v49 }
 0x388   : > { %v11023_v48 = vpop.eup %9278 }
 0x389   : > { %v11005_v54 = vpop.f32.mrb[56].mxu0  ;;  %9282 = vpow2.f32 %v5311_v5  ;;  %v5373_v5 = vsel %vm3708_vm2, %v11023_v48, 0.0 }
 0x38a   : > { %v8965_v53 = vpop.f32.mrb[57].mxu0  ;;  %v5265_v58 = vsel %vm3708_vm2, %v11005_v54, -inf }
 0x38b   : > { %5266 = vmax.xlane.f32.xlu1 %v5265_v58  ;;  %v5040_v27 = vpop.f32.mrb[58].mxu0  ;;  %v11017_v16 = vpop.xlane.xlu1 %5200  ;;  %v5315_v58 = vmul.f32 1.442695, %v5280_v42 }
 0x38c   : > { %v8966_v23 = vpop.f32.mrb[59].mxu0  ;;  %v11013_v36 = vpop.f32.mrb[64].mxu1 }
 0x38d   : > { %11948 = vst [vmem:[#allocation5_spill] sm:$0xff] %v11013_v36  ;;  %v8971_v31 = vpop.f32.mrb[65].mxu1  ;;  %v5268_v19 = vsel %vm3708_vm2, %v11013_v36, -inf  ;;  %9284 = vpow2.f32 %v5315_v58 }
 0x38e   : > { %v5086_v11 = vpop.f32.mrb[66].mxu1  ;;  %5269 = vmax.xlane.f32.xlu0 %v5268_v19  ;;  %v5198_v23 = vpop.xlane.xlu0 %5197 }
 0x38f   : > { %v8972_v35 = vpop.f32.mrb[67].mxu1  ;;  %v5282_v49 = vsub.f32 %v10909_v44, %v5198_v23 }
 0x391   : > { %v11019_v53 = vpop.f32.mrb[60].mxu0  ;;  %v5319_v19 = vmul.f32 1.442695, %v5282_v49  ;;  %v11034_v29 = vpop.eup %9280 }
 0x392   : > { %v8977_v0 = vpop.f32.mrb[61].mxu0  ;;  %v5271_v39 = vsel %vm3708_vm2, %v11019_v53, -inf  ;;  %v11026_v31 = vpop.xlane.xlu1 %5206  ;;  %v5379_v49 = vsel %vm3708_vm2, %v11034_v29, 0.0 }
 0x393   : > { %5272 = vmax.xlane.f32.xlu1 %v5271_v39  ;;  %v5132_v27 = vpop.f32.mrb[62].mxu0  ;;  %9286 = vpow2.f32 %v5319_v19 }
 0x394   : > { %v8978_v11 = vpop.f32.mrb[63].mxu0  ;;  %v11028_v35 = vpop.f32.mrb[68].mxu1 }
 0x395   : > { %11949 = vst [vmem:[#allocation3_spill] sm:$0xff] %v11028_v35  ;;  %v8983_v42 = vpop.f32.mrb[69].mxu1  ;;  %v5274_v0 = vsel %vm3708_vm2, %v11028_v35, -inf  ;;  %v11039_v11 = vpop.eup %9282 }
 0x396   : > { %v2609_v44 = vpop.permute.xlu1 %2608  ;;  %v5178_v23 = vpop.f32.mrb[70].mxu1  ;;  %5275 = vmax.xlane.f32.xlu0 %v5274_v0 }
 0x397   : > { %5374 = vadd.xlane.f32.xlu1 %v5373_v5  ;;  %v8984_v39 = vpop.f32.mrb[71].mxu1  ;;  %v5204_v27 = vpop.xlane.xlu0 %5203  ;;  %v2664_v3 = vshrl.u32 %v2609_v44, 16  ;;  %v5376_v23 = vsel %vm3708_vm2, %v11039_v11, 0.0 }
 0x398   : > { %v5284_v58 = vsub.f32 %v10917_v21, %v5204_v27  ;;  %v11044_v21 = vpop.eup %9284  ;;  %v11950_v39 = vld [vmem:[#allocation11_spill] sm:$0xff] }
 0x399   : > { %v2656_v27 = vshrl.u32 %v11950_v39, 16  ;;  %v5382_v40 = vsel %vm3708_vm2, %v11044_v21, 0.0 }
 0x39a   : > { %v2617_v42 = vpop.permute.xlu1 %2616  ;;  %5380 = vadd.xlane.f32.xlu0 %v5379_v49  ;;  %v5323_v20 = vmul.f32 1.442695, %v5284_v58 }
 0x39b   : > { %v2662_v5 = vpack.i.b16 %v2617_v42, %v2609_v44  ;;  %v2665_v51 = vshrl.u32 %v2617_v42, 16  ;;  %v2601_v59 = vpop.permute.xlu0 %2600 }
 0x39c   : > { %9288 = vpow2.f32 %v5323_v20  ;;  %v2654_v47 = vpack.i.b16 %v2601_v59, %v11950_v39  ;;  %v2657_v50 = vshrl.u32 %v2601_v59, 16 }
 0x39d   : > { %v2666_v19 = vpack.i.b16 %v2665_v51, %v2664_v3  ;;  %v2963_v0 = vcombine.high %v2662_v5, %v9599_v61  ;;  %v11048_v49 = vpop.eup %9286  ;;  %v2970_v44 = vrot.slane %v2662_v5, %v9610_v2 }
 0x39e   : > { %5377 = vadd.xlane.f32.xlu0 %v5376_v23  ;;  %v2658_v58 = vpack.i.b16 %v2657_v50, %v2656_v27  ;;  %v2948_v51 = vcombine.high %v2654_v47, %v9599_v61  ;;  %v2955_v3 = vrot.slane %v2654_v47, %v9610_v2  ;;  %v5388_v47 = vsel %vm3708_vm2, %v11048_v49, 0.0 }
 0x39f   : > { %v2977_v20 = vrot.slane %v2963_v0, %v9610_v2  ;;  %v3029_v42 = vcombine.high %v2666_v19, %v9599_v61  ;;  %v3036_v50 = vrot.slane %v2666_v19, %v9610_v2 }
 0x3a0   : > { %v2962_v39 = vrot.slane %v2948_v51, %v9610_v2  ;;  %v2978_v59 = vcombine.low %v2955_v3, %v2970_v44  ;;  %v2979_v23 = vcombine.high %v2955_v3, %v2970_v44  ;;  %v3014_v10 = vcombine.high %v2658_v58, %v9599_v61 }
 0x3a1   : > { %v3021_v5 = vrot.slane %v2658_v58, %v9610_v2  ;;  %v3043_v51 = vrot.slane %v3029_v42, %v9610_v2  ;;  %v11951_v42 = vld [vmem:[#allocation2_spill] sm:$0xff] }
 0x3a2   : > { %5383 = vadd.xlane.f32.xlu0 %v5382_v40  ;;  %v2986_v0 = vrot.slane %v2978_v59, %v9627_v18  ;;  %v2993_v27 = vrot.slane %v2979_v23, %v9627_v18  ;;  %v2994_v12 = vcombine.low %v2962_v39, %v2977_v20  ;;  %v2995_v35 = vcombine.high %v2962_v39, %v2977_v20 }
 0x3a3   : > { %v3028_v44 = vrot.slane %v3014_v10, %v9610_v2  ;;  %v3044_v3 = vcombine.low %v3021_v5, %v3036_v50  ;;  %v3045_v61 = vcombine.high %v3021_v5, %v3036_v50 }
 0x3a4   : > { %v3002_v40 = vrot.slane %v2994_v12, %v9627_v18  ;;  %v3009_v19 = vrot.slane %v2995_v35, %v9627_v18  ;;  %v3412_v58 = vcombine.low %v2986_v0, %v2993_v27  ;;  %v8536_v24 = vcombine.high %v2986_v0, %v2993_v27 }
 0x3a5   : > { %v3052_v59 = vrot.slane %v3044_v3, %v9627_v18  ;;  %v3059_v23 = vrot.slane %v3045_v61, %v9627_v18  ;;  %v3060_v20 = vcombine.low %v3028_v44, %v3043_v51  ;;  %v3061_v39 = vcombine.high %v3028_v44, %v3043_v51 }
 0x3a6   : > { %5389 = vadd.xlane.f32.xlu0 %v5388_v47  ;;  %v11069_v36 = vpop.eup %9288  ;;  %v3419_v10 = vrot.slane %v3412_v58, %v9610_v2  ;;  %v3427_v12 = vrot.slane %v8536_v24, %v9610_v2  ;;  %v3462_v50 = vcombine.low %v3002_v40, %v3009_v19  ;;  %v8538_v35 = vcombine.high %v3002_v40, %v3009_v19 }
 0x3a7   : > { %v3068_v5 = vrot.slane %v3060_v20, %v9627_v18  ;;  %v3075_v47 = vrot.slane %v3061_v39, %v9627_v18  ;;  %v3437_v0 = vcombine.low %v3052_v59, %v3059_v23  ;;  %v8537_v27 = vcombine.high %v3052_v59, %v3059_v23 }
 0x3a8   : > { %2594 = vrot.lane.b32.xlu1 %v11951_v42, %s9455_s10  ;;  %v3428_v3 = vcombine.low %v3419_v10, %v3427_v12  ;;  %v3469_v61 = vrot.slane %v3462_v50, %v9610_v2  ;;  %v3477_v51 = vrot.slane %v8538_v35, %v9610_v2  ;;  %v5394_v44 = vsel %vm3708_vm2, %v11069_v36, 0.0 }
 0x3a9   : > { %v3444_v58 = vrot.slane %v3437_v0, %v9610_v2  ;;  %v3452_v24 = vrot.slane %v8537_v27, %v9610_v2  ;;  %v3487_v42 = vcombine.low %v3068_v5, %v3075_v47  ;;  %v8539_v40 = vcombine.high %v3068_v5, %v3075_v47 }
 0x3aa   : > { %5395 = vadd.xlane.f32.xlu0 %v5394_v44  ;;  %v11086_v19 = vrot.slane %v3428_v3, %v9627_v18  ;;  %v3478_v20 = vcombine.low %v3469_v61, %v3477_v51 }
 0x3ab   : > { %v3453_v59 = vcombine.low %v3444_v58, %v3452_v24  ;;  %v3494_v23 = vrot.slane %v3487_v42, %v9610_v2  ;;  %v3502_v39 = vrot.slane %v8539_v40, %v9610_v2 }
 0x3ac   : > { %v11091_v10 = vrot.slane %v3478_v20, %v9627_v18  ;;  %v11098_v50 = vcombine.high %v11086_v19, %v11915_v38  ;;  %v3663_v5 = vshrl.u32 %v11086_v19, 16 }
 0x3ad   : > { %v11094_v12 = vrot.slane %v3453_v59, %v9627_v18  ;;  %v3503_v35 = vcombine.low %v3494_v23, %v3502_v39  ;;  %v5281_v23 = vsub.f32 %v10897_v57, %v11010_v46  ;;  %v5285_v57 = vsub.f32 %v10913_v30, %v11026_v31 }
 0x3ae   : > { %v11103_v47 = vcombine.high %v11091_v10, %v11915_v38  ;;  %v3669_v24 = vshrl.u32 %v11098_v50, 16  ;;  %v3675_v20 = vshrl.u32 %v11091_v10, 16 }
 0x3af   : > { %v3664_v0 = vshrl.u32 %v11094_v12, 16  ;;  %v11110_v3 = vcombine.high %v11094_v12, %v11915_v38  ;;  %v11113_v61 = vrot.slane %v3503_v35, %v9627_v18  ;;  %v5317_v27 = vmul.f32 1.442695, %v5281_v23 }
 0x3b0   : > { %v3681_v39 = vshrl.u32 %v11103_v47, 16  ;;  %v5325_v46 = vmul.f32 1.442695, %v5285_v57 }
 0x3b1   : > { %v11115_v51 = vpack.i.b16 %v3664_v0, %v3663_v5  ;;  %v3670_v42 = vshrl.u32 %v11110_v3, 16  ;;  %v11125_v40 = vcombine.high %v11113_v61, %v11915_v38  ;;  %v3676_v59 = vshrl.u32 %v11113_v61, 16 }
 0x3b2   : > { %v5283_v38 = vsub.f32 %v10905_v22, %v11017_v16  ;;  %9290 = vpow2.f32 %v5317_v27 }
 0x3b3   : > { %v11132_v35 = vpack.i.b16 %v3670_v42, %v3669_v24  ;;  %v11136_v0 = vpack.i.b16 %v3676_v59, %v3675_v20  ;;  %v3682_v58 = vshrl.u32 %v11125_v40, 16 }
 0x3b4   : > { %v5321_v18 = vmul.f32 1.442695, %v5283_v38 }
 0x3b5   : > { %v11139_v44 = vpack.i.b16 %v3682_v58, %v3681_v39 }
 0x3b6   : > { %9292 = vpow2.f32 %v5321_v18 }
 0x3b7   : > { %9294 = vpow2.f32 %v5325_v46 }
 0x3bc   : > { %v11145_v24 = vpop.eup %9290 }
 0x3bd   : > { %v5385_v42 = vsel %vm3708_vm2, %v11145_v24, 0.0 }
 0x3c0   : > { %v11149_v20 = vpop.eup %9292 }
 0x3c1   : > { %v5391_v18 = vsel %vm3708_vm2, %v11149_v20, 0.0  ;;  %v11155_v30 = vpop.eup %9294 }
 0x3c2   : > { %v5397_v46 = vsel %vm3708_vm2, %v11155_v30, 0.0 }
 0x3cb   : > { %v5213_v58 = vpop.xlane.xlu1 %5212  ;;  %v5210_v22 = vpop.xlane.xlu0 %5209 }
 0x3cc   : > { %5386 = vadd.xlane.f32.xlu1 %v5385_v42  ;;  %v5287_v59 = vsub.f32 %v10921_v56, %v5213_v58  ;;  %v5286_v38 = vsub.f32 %v10923_v6, %v5210_v22 }
 0x3ce   : > { %v5329_v16 = vmul.f32 1.442695, %v5287_v59  ;;  %v5327_v27 = vmul.f32 1.442695, %v5286_v38 }
 0x3cf   : > { %v5219_v31 = vpop.xlane.xlu1 %5218  ;;  %v5216_v39 = vpop.xlane.xlu0 %5215 }
 0x3d0   : > { %5392 = vadd.xlane.f32.xlu1 %v5391_v18  ;;  %9296 = vpow2.f32 %v5329_v16  ;;  %v5289_v23 = vsub.f32 %v10925_v26, %v5219_v31  ;;  %v5288_v56 = vsub.f32 %v10929_v4, %v5216_v39 }
 0x3d1   : > { %9298 = vpow2.f32 %v5327_v27 }
 0x3d2   : > { %v5333_v57 = vmul.f32 1.442695, %v5289_v23  ;;  %v5331_v42 = vmul.f32 1.442695, %v5288_v56 }
 0x3d3   : > { %v5225_v6 = vpop.xlane.xlu1 %5224  ;;  %v5222_v59 = vpop.xlane.xlu0 %5221 }
 0x3d4   : > { %5398 = vadd.xlane.f32.xlu1 %v5397_v46  ;;  %v5291_v58 = vsub.f32 %v10933_v52, %v5225_v6  ;;  %9300 = vpow2.f32 %v5333_v57  ;;  %v5290_v16 = vsub.f32 %v10937_v62, %v5222_v59 }
 0x3d5   : > { %9302 = vpow2.f32 %v5331_v42 }
 0x3d6   : > { %v5337_v22 = vmul.f32 1.442695, %v5291_v58  ;;  %v5335_v26 = vmul.f32 1.442695, %v5290_v16 }
 0x3d7   : > { %v5228_v38 = vpop.xlane.xlu0 %5227 }
 0x3d8   : > { %9304 = vpow2.f32 %v5337_v22  ;;  %v5292_v4 = vsub.f32 %v10939_v25, %v5228_v38 }
 0x3d9   : > { %9306 = vpow2.f32 %v5335_v26 }
 0x3da   : > { %v11163_v18 = vpop.eup %9296  ;;  %v5339_v52 = vmul.f32 1.442695, %v5292_v4 }
 0x3db   : > { %v5403_v31 = vsel %vm3708_vm2, %v11163_v18, 0.0  ;;  %v11168_v27 = vpop.eup %9298 }
 0x3dc   : > { %5404 = vadd.xlane.f32.xlu0 %v5403_v31  ;;  %9308 = vpow2.f32 %v5339_v52  ;;  %v5400_v62 = vsel %vm3708_vm2, %v11168_v27, 0.0 }
 0x3de   : > { %v11170_v23 = vpop.eup %9300  ;;  %v5231_v39 = vpop.xlane.xlu1 %5230 }
 0x3df   : > { %v11174_v57 = vpop.eup %9302  ;;  %v5293_v56 = vsub.f32 %v10955_v28, %v5231_v39  ;;  %v5409_v42 = vsel %vm3708_vm2, %v11170_v23, 0.0 }
 0x3e0   : > { %5401 = vadd.xlane.f32.xlu0 %v5400_v62  ;;  %v5406_v25 = vsel %vm3708_vm2, %v11174_v57, 0.0 }
 0x3e1   : > { %5407 = vadd.xlane.f32.xlu1 %v5406_v25  ;;  %v5341_v6 = vmul.f32 1.442695, %v5293_v56  ;;  %v5234_v58 = vpop.xlane.xlu0 %5233 }
 0x3e2   : > { %v11179_v46 = vpop.eup %9304  ;;  %v5294_v28 = vsub.f32 %v10959_v15, %v5234_v58 }
 0x3e3   : > { %v11183_v59 = vpop.eup %9306  ;;  %9310 = vpow2.f32 %v5341_v6  ;;  %v5415_v22 = vsel %vm3708_vm2, %v11179_v46, 0.0 }
 0x3e4   : > { %5410 = vadd.xlane.f32.xlu0 %v5409_v42  ;;  %v5412_v16 = vsel %vm3708_vm2, %v11183_v59, 0.0  ;;  %v5343_v31 = vmul.f32 1.442695, %v5294_v28 }
 0x3e5   : > { %5416 = vadd.xlane.f32.xlu1 %v5415_v22 }
 0x3e6   : > { %v11190_v38 = vpop.eup %9308 }
 0x3e7   : > { %v5237_v26 = vpop.xlane.xlu1 %5236  ;;  %v5418_v62 = vsel %vm3708_vm2, %v11190_v38, 0.0 }
 0x3e8   : > { %5413 = vadd.xlane.f32.xlu0 %v5412_v16  ;;  %v5295_v4 = vsub.f32 %v10963_v14, %v5237_v26 }
 0x3ea   : > { %v5345_v52 = vmul.f32 1.442695, %v5295_v4 }
 0x3eb   : > { %v5240_v39 = vpop.xlane.xlu0 %5239 }
 0x3ec   : > { %5419 = vadd.xlane.f32.xlu0 %v5418_v62  ;;  %9312 = vpow2.f32 %v5345_v52  ;;  %v5296_v15 = vsub.f32 %v10967_v9, %v5240_v39 }
 0x3ed   : > { %v11195_v56 = vpop.eup %9310  ;;  %9314 = vpow2.f32 %v5343_v31 }
 0x3ee   : > { %v5421_v25 = vsel %vm3708_vm2, %v11195_v56, 0.0  ;;  %v5347_v6 = vmul.f32 1.442695, %v5296_v15 }
 0x3ef   : > { %5422 = vadd.xlane.f32.xlu1 %v5421_v25 }
 0x3f0   : > { %9316 = vpow2.f32 %v5347_v6 }
 0x3f6   : > { %v11200_v42 = vpop.eup %9312 }
 0x3f7   : > { %v5243_v14 = vpop.xlane.xlu1 %5242  ;;  %v5427_v22 = vsel %vm3708_vm2, %v11200_v42, 0.0  ;;  %v11205_v28 = vpop.eup %9314 }
 0x3f8   : > { %v5297_v58 = vsub.f32 %v10971_v8, %v5243_v14  ;;  %5428 = vadd.xlane.f32.xlu0 %v5427_v22  ;;  %v5424_v26 = vsel %vm3708_vm2, %v11205_v28, 0.0 }
 0x3fa   : > { %v5349_v16 = vmul.f32 1.442695, %v5297_v58  ;;  %v5246_v9 = vpop.xlane.xlu0 %5245  ;;  %v11209_v4 = vpop.eup %9316 }
 0x3fb   : > { %v5298_v31 = vsub.f32 %v10975_v41, %v5246_v9  ;;  %v5430_v8 = vsel %vm3708_vm2, %v11209_v4, 0.0 }
 0x3fc   : > { %9318 = vpow2.f32 %v5349_v16  ;;  %5425 = vadd.xlane.f32.xlu0 %v5424_v26  ;;  %5431 = vadd.xlane.f32.xlu1 %v5430_v8 }
 0x3fd   : > { %v5351_v52 = vmul.f32 1.442695, %v5298_v31 }
 0x3ff   : > { %9320 = vpow2.f32 %v5351_v52 }
 0x400   : > { %v5249_v62 = vpop.xlane.xlu1 %5248 }
 0x401   : > { %v5299_v39 = vsub.f32 %v10979_v34, %v5249_v62 }
 0x403   : > { %v5353_v15 = vmul.f32 1.442695, %v5299_v39 }
 0x405   : > { %9322 = vpow2.f32 %v5353_v15 }
 0x406   : > { %v11215_v25 = vpop.eup %9318 }
 0x407   : > { %v5433_v6 = vsel %vm3708_vm2, %v11215_v25, 0.0 }
 0x408   : > { %v5255_v14 = vpop.xlane.xlu0 %5254  ;;  %5434 = vadd.xlane.f32.xlu0 %v5433_v6 }
 0x409   : > { %v5301_v41 = vsub.f32 %v10985_v33, %v5255_v14  ;;  %v11220_v22 = vpop.eup %9320 }
 0x40a   : > { %v5436_v34 = vsel %vm3708_vm2, %v11220_v22, 0.0 }
 0x40b   : > { %v5357_v58 = vmul.f32 1.442695, %v5301_v41 }
 0x40c   : > { %v5252_v16 = vpop.xlane.xlu0 %5251  ;;  %5437 = vadd.xlane.f32.xlu0 %v5436_v34 }
 0x40d   : > { %9324 = vpow2.f32 %v5357_v58  ;;  %v5300_v9 = vsub.f32 %v10983_v13, %v5252_v16 }
 0x40f   : > { %v11225_v26 = vpop.eup %9322  ;;  %v5355_v31 = vmul.f32 1.442695, %v5300_v9 }
 0x410   : > { %v11227_v8 = vpop.xlane.xlu1 %5260  ;;  %v5439_v52 = vsel %vm3708_vm2, %v11225_v26, 0.0 }
 0x411   : > { %9326 = vpow2.f32 %v5355_v31  ;;  %5440 = vadd.xlane.f32.xlu1 %v5439_v52 }
 0x413   : > { %v5264_v58 = vpop.xlane.xlu0 %5263 }
 0x414   : > { %v5258_v33 = vpop.xlane.xlu1 %5257 }
 0x415   : > { %v5302_v62 = vsub.f32 %v10989_v45, %v5258_v33 }
 0x417   : > { %v11232_v39 = vpop.eup %9324  ;;  %v5359_v13 = vmul.f32 1.442695, %v5302_v62  ;;  %v11954_v62 = vld [vmem:[#allocation10_spill] sm:$0xff] }
 0x418   : > { %11952 = vst [vmem:[#allocation11_spill] sm:$0xff] %v11232_v39  ;;  %v5445_v15 = vsel %vm3708_vm2, %v11232_v39, 0.0  ;;  %v11238_v14 = vpop.xlane.xlu1 %5266 }
 0x419   : > { %9328 = vpow2.f32 %v5359_v13  ;;  %5446 = vadd.xlane.f32.xlu1 %v5445_v15  ;;  %v11955_v15 = vld [vmem:[#allocation9_spill] sm:$0xff] }
 0x41b   : > { %v11236_v6 = vpop.eup %9326  ;;  %v11242_v9 = vpop.xlane.xlu0 %5269 }
 0x41c   : > { %v5442_v41 = vsel %vm3708_vm2, %v11236_v6, 0.0 }
 0x41d   : > { %5443 = vadd.xlane.f32.xlu0 %v5442_v41 }
 0x420   : > { %v5273_v16 = vpop.xlane.xlu1 %5272 }
 0x423   : > { %v11244_v45 = vpop.eup %9328  ;;  %v11248_v52 = vpop.xlane.xlu0 %5275 }
 0x424   : > { %11953 = vst [vmem:[#allocation2_spill] sm:$0xff] %v11244_v45  ;;  %v5375_v34 = vpop.xlane.xlu1 %5374  ;;  %v5448_v31 = vsel %vm3708_vm2, %v11244_v45, 0.0 }
 0x425   : > { %5449 = vadd.xlane.f32.xlu0 %v5448_v31  ;;  %9330 = vrcp.f32 %v5375_v34  ;;  %v11956_v34 = vpack.i.b16 %v10707_v60, %v10691_v32 }
 0x427   : > { %v5381_v33 = vpop.xlane.xlu0 %5380  ;;  %v5662_v31 = vsel %vm5568_vm3, %v11956_v34, 0  ;;  %v5800_v34 = vsel %vm5568_vm3, %v10794_v55, 0 }
 0x428   : > { %9332 = vrcp.f32 %v5381_v33 }
 0x42a   : > { %2610 = vrot.lane.b32.xlu1 %v11954_v62, %s9455_s10 }
 0x42b   : > { %v5378_v13 = vpop.xlane.xlu0 %5377 }
 0x42c   : > { %9334 = vrcp.f32 %v5378_v13  ;;  %v5304_v13 = vsub.f32 %v10999_v17, %v5264_v58 }
 0x42e   : > { %2618 = vrot.lane.b32.xlu1 %v11955_v15, %s9455_s10  ;;  %v5363_v17 = vmul.f32 1.442695, %v5304_v13 }
 0x42f   : > { %v9331_v41 = vpop.eup %9330  ;;  %v5384_v39 = vpop.xlane.xlu0 %5383 }
 0x430   : > { %v5501_v5 = vmul.f32 %v9331_v41, %v11023_v48  ;;  %9336 = vrcp.f32 %v5384_v39 }
 0x432   : > { %v5533_v45 = vpack.c.bf16 %v5501_v5, %v5501_v5  ;;  %v9333_v2 = vpop.eup %9332 }
 0x433   : > { %v5503_v33 = vmul.f32 %v9333_v2, %v11034_v29  ;;  %v5390_v62 = vpop.xlane.xlu0 %5389  ;;  %v5708_v2 = vsel %vm5568_vm3, %v10740_v7, 0  ;;  %v11958_v29 = vpack.i.b16 %v10751_v37, %v10719_v1  ;;  %v5307_v7 = vsub.f32 %v11019_v53, %v5273_v16 }
 0x434   : > { %8988 = vmatmul.mubr.msk.bf16.vlgmr.msra.gmra.mrb[64].mxu0 %vm3708_vm2, %v5533_v45  ;;  %9338 = vrcp.f32 %v5390_v62  ;;  %v11957_v45 = vld [vmem:[#allocation8_spill] sm:$0xff]  ;;  %v11959_v62 = vld [vmem:[#allocation5_spill] sm:$0xff] }
 0x435   : > { %8998 = vmatpush3.bf16.msra.mxu0 %v5662_v31  ;;  %8999 = vmatprep.mubr.msk.bf16.mxu0 %vm9451_vm1, %v11916_v63  ;;  %v5535_v32 = vpack.c.bf16 %v5503_v33, %v5503_v33  ;;  %v5369_v58 = vmul.f32 1.442695, %v5307_v7  ;;  %v5305_v31 = vsub.f32 %v11005_v54, %v11238_v14  ;;  %v5306_v55 = vsub.f32 %v11959_v62, %v11242_v9  ;;  %v11964_v62 = vld [vmem:[#allocation13_spill] sm:$0xff] }
 0x436   : > { %9009 = vmatprep.subr.bf16.mxu0 %v11916_v63  ;;  %v9335_v48 = vpop.eup %9334 }
 0x437   : > { %v5502_v5 = vmul.f32 %v9335_v48, %v11039_v11  ;;  %v5754_v11 = vsel %vm5568_vm3, %v11958_v29, 0  ;;  %v5396_v41 = vpop.xlane.xlu0 %5395  ;;  %v5365_v33 = vmul.f32 1.442695, %v5305_v31  ;;  %v11960_v48 = vld [vmem:[#allocation21_spill] sm:$0xff]  ;;  %v5367_v14 = vmul.f32 1.442695, %v5306_v55 }
 0x438   : > { %9340 = vrcp.f32 %v5396_v41 }
 0x439   : > { %v5534_v39 = vpack.c.bf16 %v5502_v5, %v5502_v5  ;;  %9342 = vpow2.f32 %v5363_v17  ;;  %v5892_v5 = vsel %vm5568_vm3, %v11960_v48, 0 }
 0x43a   : > { %v9337_v60 = vpop.eup %9336  ;;  %9344 = vpow2.f32 %v5369_v58 }
 0x43b   : > { %2602 = vrot.lane.b32.xlu0 %v11957_v45, %s9455_s10  ;;  %8994 = vmatmul.mubr.msk.bf16.vlgmr.msra.gmra.mrb[72].mxu1 %vm3708_vm2, %v5534_v39  ;;  %v5504_v15 = vmul.f32 %v9337_v60, %v11044_v21  ;;  %v5303_v21 = vsub.f32 %v10994_v43, %v11227_v8  ;;  %v11961_v39 = vld [vmem:[#allocation3_spill] sm:$0xff] }
 0x43c   : > { %9000 = vmatmul.mubr.msk.bf16.vlgmr.msra.gmra.mrb[68].mxu0 %vm3708_vm2, %v5535_v32  ;;  %9004 = vmatpush3.bf16.msra.mxu1 %v5708_v2  ;;  %v5308_v9 = vsub.f32 %v11961_v39, %v11248_v52  ;;  %v11962_v2 = vld [vmem:[#allocation20_spill] sm:$0xff]  ;;  %v11319_v52 = vpop.permute.xlu1 %2594 }
 0x43d   : > { %9010 = vmatpush3.bf16.msra.mxu0 %v5754_v11  ;;  %9005 = vmatprep.mubr.msk.bf16.mxu1 %vm9451_vm1, %v11916_v63  ;;  %v5536_v1 = vpack.c.bf16 %v5504_v15, %v5504_v15  ;;  %v5361_v16 = vmul.f32 1.442695, %v5303_v21 }
 0x43e   : > { %9015 = vmatprep.subr.bf16.mxu1 %v11916_v63  ;;  %9011 = vmatprep.mubr.msk.bf16.mxu0 %vm9451_vm1, %v11916_v63  ;;  %v9339_v37 = vpop.eup %9338  ;;  %v5371_v13 = vmul.f32 1.442695, %v5308_v9 }
 0x43f   : > { %9021 = vmatprep.subr.bf16.mxu0 %v11916_v63  ;;  %v5506_v53 = vmul.f32 %v9339_v37, %v11048_v49  ;;  %9346 = vpow2.f32 %v5361_v16 }
 0x440   : > { %9348 = vpow2.f32 %v5365_v33  ;;  %v11963_v33 = vld [vmem:[#allocation17_spill] sm:$0xff] }
 0x441   : > { %v5538_v43 = vpack.c.bf16 %v5506_v53, %v5506_v53  ;;  %9350 = vpow2.f32 %v5367_v14  ;;  %v11965_v55 = vpack.i.b16 %v11963_v33, %v11964_v62  ;;  %v11972_v33 = vld [vmem:[#allocation22_spill] sm:$0xff] }
 0x442   : > { %v9341_v8 = vpop.eup %9340  ;;  %9352 = vpow2.f32 %v5371_v13  ;;  %v6076_v62 = vsel %vm5568_vm3, %v11972_v33, 0 }
 0x443   : > { %9006 = vmatmul.mubr.msk.bf16.vlgmr.msra.gmra.mrb[76].mxu1 %vm3708_vm2, %v5536_v1  ;;  %v11300_v49 = vpop.eup %9342  ;;  %v5508_v54 = vmul.f32 %v9341_v8, %v11069_v36  ;;  %v5984_v36 = vsel %vm5568_vm3, %v11962_v2, 0  ;;  %v5846_v48 = vsel %vm5568_vm3, %v11965_v55, 0 }
 0x444   : > { %9016 = vmatpush3.bf16.msra.mxu1 %v5800_v34  ;;  %9017 = vmatprep.mubr.msk.bf16.mxu1 %vm9451_vm1, %v11916_v63  ;;  %v5454_v45 = vsel %vm3708_vm2, %v11300_v49, 0.0  ;;  %v11310_v32 = vpop.eup %9344 }
 0x445   : > { %9027 = vmatprep.subr.bf16.mxu1 %v11916_v63  ;;  %v5540_v60 = vpack.c.bf16 %v5508_v54, %v5508_v54  ;;  %v5463_v29 = vsel %vm3708_vm2, %v11310_v32, 0.0 }
 0x449   : > { %v11317_v11 = vpop.eup %9346 }
 0x44a   : > { %v5451_v15 = vsel %vm3708_vm2, %v11317_v11, 0.0  ;;  %v11326_v41 = vpop.eup %9348 }
 0x44b   : > { %9018 = vmatmul.mubr.msk.bf16.vlgmr.msra.gmra.mrb[80].mxu1 %vm3708_vm2, %v5538_v43  ;;  %v5457_v7 = vsel %vm3708_vm2, %v11326_v41, 0.0  ;;  %v11330_v1 = vpop.eup %9350 }
 0x44c   : > { %9028 = vmatpush3.bf16.msra.mxu1 %v5892_v5  ;;  %9029 = vmatprep.mubr.msk.bf16.mxu1 %vm9451_vm1, %v11916_v63  ;;  %v5460_v21 = vsel %vm3708_vm2, %v11330_v1, 0.0  ;;  %v11334_v58 = vpop.eup %9352 }
 0x44d   : > { %9039 = vmatprep.subr.bf16.mxu1 %v11916_v63  ;;  %v5466_v16 = vsel %vm3708_vm2, %v11334_v58, 0.0 }
 0x452   : > { %5455 = vadd.xlane.f32.xlu1 %v5454_v45  ;;  %v11966_v45 = vld [vmem:[#allocation14_spill] sm:$0xff] }
 0x453   : > { %9030 = vmatmul.mubr.msk.bf16.vlgmr.msra.gmra.mrb[84].mxu1 %vm3708_vm2, %v5540_v60  ;;  %v11967_v60 = vld [vmem:[#allocation12_spill] sm:$0xff] }
 0x454   : > { %9040 = vmatpush3.bf16.msra.mxu1 %v5984_v36  ;;  %9041 = vmatprep.mubr.msk.bf16.mxu1 %vm9451_vm1, %v11916_v63  ;;  %v11968_v13 = vpack.i.b16 %v11966_v45, %v11967_v60  ;;  %v11976_v60 = vld [vmem:[#allocation23_spill] sm:$0xff] }
 0x455   : > { %9051 = vmatprep.subr.bf16.mxu1 %v11916_v63 }
 0x456   : > { %5464 = vadd.xlane.f32.xlu1 %v5463_v29  ;;  %v5938_v2 = vsel %vm5568_vm3, %v11968_v13, 0  ;;  %v6168_v13 = vsel %vm5568_vm3, %v11976_v60, 0 }
 0x459   : > { %v5387_v17 = vpop.xlane.xlu1 %5386 }
 0x45a   : > { %5452 = vadd.xlane.f32.xlu0 %v5451_v15  ;;  %9354 = vrcp.f32 %v5387_v17 }
 0x45d   : > { %v5393_v37 = vpop.xlane.xlu1 %5392 }
 0x45e   : > { %5458 = vadd.xlane.f32.xlu0 %v5457_v7  ;;  %9356 = vrcp.f32 %v5393_v37  ;;  %v11969_v37 = vld [vmem:[#allocation18_spill] sm:$0xff] }
 0x461   : > { %v5399_v34 = vpop.xlane.xlu1 %5398 }
 0x462   : > { %5461 = vadd.xlane.f32.xlu0 %v5460_v21  ;;  %9358 = vrcp.f32 %v5399_v34  ;;  %v11970_v21 = vld [vmem:[#allocation15_spill] sm:$0xff] }
 0x463   : > { %v11971_v34 = vpack.i.b16 %v11969_v37, %v11970_v21 }
 0x464   : > { %v9355_v53 = vpop.eup %9354 }
 0x465   : > { %v5505_v31 = vmul.f32 %v9355_v53, %v11145_v24  ;;  %v6030_v53 = vsel %vm5568_vm3, %v11971_v34, 0 }
 0x466   : > { %5467 = vadd.xlane.f32.xlu0 %v5466_v16 }
 0x467   : > { %v5537_v43 = vpack.c.bf16 %v5505_v31, %v5505_v31 }
 0x468   : > { %v9357_v8 = vpop.eup %9356 }
 0x469   : > { %9012 = vmatmul.mubr.msk.bf16.vlgmr.msra.gmra.mrb[72].mxu0 %vm3708_vm2, %v5537_v43  ;;  %v5405_v5 = vpop.xlane.xlu0 %5404  ;;  %v5507_v54 = vmul.f32 %v9357_v8, %v11149_v20 }
 0x46a   : > { %9022 = vmatpush3.bf16.msra.mxu0 %v5846_v48  ;;  %9023 = vmatprep.mubr.msk.bf16.mxu0 %vm9451_vm1, %v11916_v63  ;;  %9360 = vrcp.f32 %v5405_v5  ;;  %v11973_v5 = vld [vmem:[#allocation19_spill] sm:$0xff] }
 0x46b   : > { %9033 = vmatprep.subr.bf16.mxu0 %v11916_v63  ;;  %v5539_v14 = vpack.c.bf16 %v5507_v54, %v5507_v54  ;;  %v11974_v54 = vld [vmem:[#allocation16_spill] sm:$0xff] }
 0x46c   : > { %v9359_v39 = vpop.eup %9358 }
 0x46d   : > { %v5402_v24 = vpop.xlane.xlu0 %5401  ;;  %v5509_v20 = vmul.f32 %v9359_v39, %v11155_v30 }
 0x46e   : > { %9362 = vrcp.f32 %v5402_v24  ;;  %v5408_v9 = vpop.xlane.xlu1 %5407  ;;  %v11975_v24 = vpack.i.b16 %v11973_v5, %v11974_v54 }
 0x46f   : > { %9364 = vrcp.f32 %v5408_v9  ;;  %v5541_v29 = vpack.c.bf16 %v5509_v20, %v5509_v20 }
 0x471   : > { %9024 = vmatmul.mubr.msk.bf16.vlgmr.msra.gmra.mrb[76].mxu0 %vm3708_vm2, %v5539_v14  ;;  %v5411_v36 = vpop.xlane.xlu0 %5410  ;;  %v6122_v14 = vsel %vm5568_vm3, %v11975_v24, 0 }
 0x472   : > { %9034 = vmatpush3.bf16.msra.mxu0 %v5938_v2  ;;  %9035 = vmatprep.mubr.msk.bf16.mxu0 %vm9451_vm1, %v11916_v63  ;;  %9366 = vrcp.f32 %v5411_v36  ;;  %v5417_v31 = vpop.xlane.xlu1 %5416 }
 0x473   : > { %9045 = vmatprep.subr.bf16.mxu0 %v11916_v63 }
 0x474   : > { %v9361_v15 = vpop.eup %9360 }
 0x475   : > { %v5414_v17 = vpop.xlane.xlu0 %5413  ;;  %v5511_v30 = vmul.f32 %v9361_v15, %v11163_v18  ;;  %v11978_v15 = vld [vmem:[#allocation24_spill] sm:$0xff] }
 0x476   : > { %9368 = vrcp.f32 %v5414_v17 }
 0x477   : > { %9370 = vrcp.f32 %v5417_v31 }
 0x478   : > { %v9363_v7 = vpop.eup %9362 }
 0x479   : > { %9036 = vmatmul.mubr.msk.bf16.vlgmr.msra.gmra.mrb[80].mxu0 %vm3708_vm2, %v5541_v29  ;;  %v5510_v16 = vmul.f32 %v9363_v7, %v11168_v27  ;;  %v9365_v8 = vpop.eup %9364  ;;  %v5543_v27 = vpack.c.bf16 %v5511_v30, %v5511_v30  ;;  %v5420_v48 = vpop.xlane.xlu0 %5419  ;;  %v11977_v29 = vld [vmem:[#allocation25_spill] sm:$0xff] }
 0x47a   : > { %9046 = vmatpush3.bf16.msra.mxu0 %v6030_v53  ;;  %9047 = vmatprep.mubr.msk.bf16.mxu0 %vm9451_vm1, %v11916_v63  ;;  %v5512_v18 = vmul.f32 %v9365_v8, %v11174_v57  ;;  %9372 = vrcp.f32 %v5420_v48  ;;  %v11979_v17 = vpack.i.b16 %v11977_v29, %v11978_v15  ;;  %v11980_v53 = vld [vmem:[#allocation26_spill] sm:$0xff]  ;;  %v11981_v8 = vpack.i.b16 %v11094_v12, %v11086_v19 }
 0x47b   : > { %9057 = vmatprep.subr.bf16.mxu0 %v11916_v63  ;;  %v5542_v43 = vpack.c.bf16 %v5510_v16, %v5510_v16  ;;  %v6260_v16 = vsel %vm5568_vm3, %v11980_v53, 0  ;;  %v11982_v48 = vpack.i.b16 %v11110_v3, %v11098_v50  ;;  %v6444_v50 = vsel %vm5568_vm3, %v11132_v35, 0 }
 0x47c   : > { %v9367_v55 = vpop.eup %9366  ;;  %v5423_v9 = vpop.xlane.xlu1 %5422  ;;  %v5544_v57 = vpack.c.bf16 %v5512_v18, %v5512_v18  ;;  %v6214_v7 = vsel %vm5568_vm3, %v11979_v17, 0  ;;  %v6306_v33 = vsel %vm5568_vm3, %v11981_v8, 0  ;;  %v6352_v18 = vsel %vm5568_vm3, %v11115_v51, 0 }
 0x47d   : > { %9042 = vmatmul.mubr.msk.bf16.vlgmr.msra.gmra.mrb[88].mxu1 %vm3708_vm2, %v5542_v43  ;;  %v5513_v39 = vmul.f32 %v9367_v55, %v11170_v23  ;;  %9374 = vrcp.f32 %v5423_v9  ;;  %v6398_v5 = vsel %vm5568_vm3, %v11982_v48, 0  ;;  %v6628_v29 = vsel %vm5568_vm3, %v11139_v44, 0 }
 0x47e   : > { %9052 = vmatpush3.bf16.msra.mxu1 %v6076_v62  ;;  %9053 = vmatprep.mubr.msk.bf16.mxu1 %vm9451_vm1, %v11916_v63 }
 0x47f   : > { %9063 = vmatprep.subr.bf16.mxu1 %v11916_v63  ;;  %v5545_v36 = vpack.c.bf16 %v5513_v39, %v5513_v39 }
 0x480   : > { %v9369_v45 = vpop.eup %9368 }
 0x481   : > { %9048 = vmatmul.mubr.msk.bf16.vlgmr.msra.gmra.mrb[84].mxu0 %vm3708_vm2, %v5543_v27  ;;  %v9371_v20 = vpop.eup %9370  ;;  %v5514_v23 = vmul.f32 %v9369_v45, %v11183_v59 }
 0x482   : > { %9058 = vmatpush3.bf16.msra.mxu0 %v6122_v14  ;;  %9059 = vmatprep.mubr.msk.bf16.mxu0 %vm9451_vm1, %v11916_v63  ;;  %v5515_v21 = vmul.f32 %v9371_v20, %v11179_v46 }
 0x483   : > { %9069 = vmatprep.subr.bf16.mxu0 %v11916_v63  ;;  %v5546_v59 = vpack.c.bf16 %v5514_v23, %v5514_v23 }
 0x484   : > { %v9373_v34 = vpop.eup %9372  ;;  %v5547_v30 = vpack.c.bf16 %v5515_v21, %v5515_v21 }
 0x485   : > { %9054 = vmatmul.mubr.msk.bf16.vlgmr.msra.gmra.mrb[92].mxu1 %vm3708_vm2, %v5544_v57  ;;  %v5429_v2 = vpop.xlane.xlu0 %5428  ;;  %v5516_v43 = vmul.f32 %v9373_v34, %v11190_v38 }
 0x486   : > { %9064 = vmatpush3.bf16.msra.mxu1 %v6168_v13  ;;  %9065 = vmatprep.mubr.msk.bf16.mxu1 %vm9451_vm1, %v11916_v63  ;;  %v6536_v13 = vsel %vm5568_vm3, %v11136_v0, 0 }
 0x487   : > { %9075 = vmatprep.subr.bf16.mxu1 %v11916_v63  ;;  %v9375_v31 = vpop.eup %9374  ;;  %v5548_v38 = vpack.c.bf16 %v5516_v43, %v5516_v43 }
 0x488   : > { %v5517_v62 = vmul.f32 %v9375_v31, %v11195_v56  ;;  %v11985_v31 = vld [vmem:[#allocation6_spill] sm:$0xff] }
 0x489   : > { %9060 = vmatmul.mubr.msk.bf16.vlgmr.msra.gmra.mrb[88].mxu0 %vm3708_vm2, %v5545_v36  ;;  %v5426_v37 = vpop.xlane.xlu0 %5425  ;;  %v5432_v46 = vpop.xlane.xlu1 %5431 }
 0x48a   : > { %9070 = vmatpush3.bf16.msra.mxu0 %v6214_v7  ;;  %9071 = vmatprep.mubr.msk.bf16.mxu0 %vm9451_vm1, %v11916_v63  ;;  %9376 = vrcp.f32 %v5426_v37  ;;  %v5549_v12 = vpack.c.bf16 %v5517_v62, %v5517_v62 }
 0x48b   : > { %9081 = vmatprep.subr.bf16.mxu0 %v11916_v63  ;;  %9378 = vrcp.f32 %v5429_v2 }
 0x48c   : > { %9380 = vrcp.f32 %v5432_v46 }
 0x48d   : > { %9066 = vmatmul.mubr.msk.bf16.vlgmr.msra.gmra.mrb[96].mxu1 %vm3708_vm2, %v5546_v59  ;;  %v2672_v59 = vshrl.u32 %v11319_v52, 16 }
 0x48e   : > { %9076 = vmatpush3.bf16.msra.mxu1 %v6260_v16  ;;  %9077 = vmatprep.mubr.msk.bf16.mxu1 %vm9451_vm1, %v11916_v63 }
 0x48f   : > { %9087 = vmatprep.subr.bf16.mxu1 %v11916_v63 }
 0x491   : > { %9072 = vmatmul.mubr.msk.bf16.vlgmr.msra.gmra.mrb[92].mxu0 %vm3708_vm2, %v5547_v30 }
 0x492   : > { %9082 = vmatpush3.bf16.msra.mxu0 %v6306_v33  ;;  %9083 = vmatprep.mubr.msk.bf16.mxu0 %vm9451_vm1, %v11916_v63 }
 0x493   : > { %9093 = vmatprep.subr.bf16.mxu0 %v11916_v63 }
 0x494   : > { %v9377_v55 = vpop.eup %9376 }
 0x495   : > { %v5435_v27 = vpop.xlane.xlu0 %5434  ;;  %9078 = vmatmul.mubr.msk.bf16.vlgmr.msra.gmra.mrb[100].mxu1 %vm3708_vm2, %v5548_v38  ;;  %v5518_v19 = vmul.f32 %v9377_v55, %v11205_v28  ;;  %v9379_v56 = vpop.eup %9378  ;;  %v11986_v38 = vld [vmem:[#allocation7_spill] sm:$0xff] }
 0x496   : > { %9382 = vrcp.f32 %v5435_v27  ;;  %9088 = vmatpush3.bf16.msra.mxu1 %v6352_v18  ;;  %9089 = vmatprep.mubr.msk.bf16.mxu1 %vm9451_vm1, %v11916_v63  ;;  %v5519_v54 = vmul.f32 %v9379_v56, %v11200_v42  ;;  %v9381_v24 = vpop.eup %9380  ;;  %v11983_v42 = vpack.i.b16 %v11113_v61, %v11091_v10 }
 0x497   : > { %9099 = vmatprep.subr.bf16.mxu1 %v11916_v63  ;;  %v5550_v28 = vpack.c.bf16 %v5518_v19, %v5518_v19  ;;  %v5520_v9 = vmul.f32 %v9381_v24, %v11209_v4 }
 0x498   : > { %v5551_v3 = vpack.c.bf16 %v5519_v54, %v5519_v54  ;;  %v6490_v57 = vsel %vm5568_vm3, %v11983_v42, 0 }
 0x499   : > { %9084 = vmatmul.mubr.msk.bf16.vlgmr.msra.gmra.mrb[96].mxu0 %vm3708_vm2, %v5549_v12  ;;  %v5438_v51 = vpop.xlane.xlu0 %5437  ;;  %v5552_v45 = vpack.c.bf16 %v5520_v9, %v5520_v9 }
 0x49a   : > { %9094 = vmatpush3.bf16.msra.mxu0 %v6398_v5  ;;  %9095 = vmatprep.mubr.msk.bf16.mxu0 %vm9451_vm1, %v11916_v63  ;;  %9384 = vrcp.f32 %v5438_v51 }
 0x49b   : > { %9105 = vmatprep.subr.bf16.mxu0 %v11916_v63 }
 0x49d   : > { %9090 = vmatmul.mubr.msk.bf16.vlgmr.msra.gmra.mrb[104].mxu1 %vm3708_vm2, %v5550_v28 }
 0x49e   : > { %v5441_v14 = vpop.xlane.xlu1 %5440  ;;  %9100 = vmatpush3.bf16.msra.mxu1 %v6444_v50  ;;  %9101 = vmatprep.mubr.msk.bf16.mxu1 %vm9451_vm1, %v11916_v63 }
 0x49f   : > { %9386 = vrcp.f32 %v5441_v14  ;;  %9111 = vmatprep.subr.bf16.mxu1 %v11916_v63 }
 0x4a0   : > { %v9383_v39 = vpop.eup %9382 }
 0x4a1   : > { %9096 = vmatmul.mubr.msk.bf16.vlgmr.msra.gmra.mrb[100].mxu0 %vm3708_vm2, %v5551_v3  ;;  %v5521_v35 = vmul.f32 %v9383_v39, %v11215_v25  ;;  %v11984_v25 = vpack.i.b16 %v11125_v40, %v11103_v47 }
 0x4a2   : > { %9106 = vmatpush3.bf16.msra.mxu0 %v6490_v57  ;;  %9107 = vmatprep.mubr.msk.bf16.mxu0 %vm9451_vm1, %v11916_v63  ;;  %v11987_v57 = vld [vmem:[#allocation4_spill] sm:$0xff] }
 0x4a3   : > { %9117 = vmatprep.subr.bf16.mxu0 %v11916_v63  ;;  %v5553_v2 = vpack.c.bf16 %v5521_v35, %v5521_v35  ;;  %v6582_v36 = vsel %vm5568_vm3, %v11984_v25, 0 }
 0x4a4   : > { %v9385_v60 = vpop.eup %9384 }
 0x4a5   : > { %9102 = vmatmul.mubr.msk.bf16.vlgmr.msra.gmra.mrb[108].mxu1 %vm3708_vm2, %v5552_v45  ;;  %v5522_v61 = vmul.f32 %v9385_v60, %v11220_v22  ;;  %v11988_v45 = vmov 0  }
 0x4a6   : > { %v5447_v4 = vpop.xlane.xlu1 %5446  ;;  %9112 = vmatpush3.bf16.msra.mxu1 %v6536_v13  ;;  %9113 = vmatprep.mubr.msk.bf16.mxu1 %vm9451_vm1, %v11916_v63 }
 0x4a7   : > { %9123 = vmatprep.subr.bf16.mxu1 %v11916_v63  ;;  %v5554_v22 = vpack.c.bf16 %v5522_v61, %v5522_v61 }
 0x4a9   : > { %v9387_v10 = vpop.eup %9386  ;;  %9108 = vmatmul.mubr.msk.bf16.vlgmr.msra.gmra.mrb[104].mxu0 %vm3708_vm2, %v5553_v2  ;;  %v11989_v2 = vld [vmem:[#allocation11_spill] sm:$0xff] }
 0x4aa   : > { %v5444_v20 = vpop.xlane.xlu0 %5443  ;;  %9118 = vmatpush3.bf16.msra.mxu0 %v6582_v36  ;;  %v2611_v0 = vpop.permute.xlu1 %2610  ;;  %9119 = vmatprep.mubr.msk.bf16.mxu0 %vm9451_vm1, %v11916_v63  ;;  %v5523_v23 = vmul.f32 %v9387_v10, %v11225_v26 }
 0x4ab   : > { %9388 = vrcp.f32 %v5444_v20  ;;  %9129 = vmatprep.subr.bf16.mxu0 %v11916_v63  ;;  %v2680_v37 = vshrl.u32 %v2611_v0, 16 }
 0x4ac   : > { %v5555_v47 = vpack.c.bf16 %v5523_v23, %v5523_v23  ;;  %9390 = vrcp.f32 %v5447_v4 }
 0x4ad   : > { %9114 = vmatmul.mubr.msk.bf16.vlgmr.msra.gmra.mrb[112].mxu1 %vm3708_vm2, %v5554_v22 }
 0x4ae   : > { %9124 = vmatpush3.bf16.msra.mxu1 %v6628_v29  ;;  %9125 = vmatprep.mubr.msk.bf16.mxu1 %vm9451_vm1, %v11916_v63  ;;  %v2619_v40 = vpop.permute.xlu1 %2618  ;;  %v11990_v29 = vld [vmem:[#allocation2_spill] sm:$0xff] }
 0x4af   : > { %9135 = vmatprep.subr.bf16.mxu1 %v11916_v63  ;;  %v2681_v26 = vshrl.u32 %v2619_v40, 16  ;;  %v11472_v7 = vpack.i.b16 %v2619_v40, %v2611_v0 }
 0x4b1   : > { %9120 = vmatmul.mubr.msk.bf16.vlgmr.msra.gmra.mrb[108].mxu0 %vm3708_vm2, %v5555_v47  ;;  %v2682_v16 = vpack.i.b16 %v2681_v26, %v2680_v37  ;;  %v3102_v43 = vrot.slane %v11472_v7, %v11985_v31  ;;  %v3095_v22 = vcombine.high %v11472_v7, %v11987_v57 }
 0x4b2   : > { %v5450_v15 = vpop.xlane.xlu0 %5449  ;;  %9131 = vmatprep.mubr.msk.bf16.mxu0 %vm9451_vm1, %v11916_v63 }
 0x4b3   : > { %9392 = vrcp.f32 %v5450_v15  ;;  %v3161_v61 = vcombine.high %v2682_v16, %v11987_v57 }
 0x4b5   : > { %v9389_v17 = vpop.eup %9388 }
 0x4b6   : > { %v5524_v44 = vmul.f32 %v9389_v17, %v11236_v6  ;;  %v2603_v21 = vpop.permute.xlu0 %2602  ;;  %v3168_v6 = vrot.slane %v2682_v16, %v11985_v31  ;;  %v9391_v9 = vpop.eup %9390  ;;  %v3109_v16 = vrot.slane %v3095_v22, %v11985_v31 }
 0x4b7   : > { %v2670_v34 = vpack.i.b16 %v2603_v21, %v11319_v52  ;;  %v2673_v53 = vshrl.u32 %v2603_v21, 16  ;;  %v5525_v10 = vmul.f32 %v9391_v9, %v11989_v2  ;;  %v3175_v21 = vrot.slane %v3161_v61, %v11985_v31 }
 0x4b8   : > { %v5556_v30 = vpack.c.bf16 %v5524_v44, %v5524_v44 }
 0x4b9   : > { %v2674_v46 = vpack.i.b16 %v2673_v53, %v2672_v59  ;;  %v3087_v8 = vrot.slane %v2670_v34, %v11985_v31  ;;  %v3080_v25 = vcombine.high %v2670_v34, %v11987_v57  ;;  %v5557_v53 = vpack.c.bf16 %v5525_v10, %v5525_v10 }
 0x4ba   : > { %9126 = vmatmul.mubr.msk.bf16.vlgmr.msra.gmra.mrb[116].mxu1 %vm3708_vm2, %v5556_v30 }
 0x4bb   : > { %v3110_v33 = vcombine.low %v3087_v8, %v3102_v43  ;;  %v3111_v62 = vcombine.high %v3087_v8, %v3102_v43  ;;  %9137 = vmatprep.mubr.msk.bf16.mxu1 %vm9451_vm1, %v11916_v63  ;;  %v3153_v52 = vrot.slane %v2674_v46, %v11985_v31  ;;  %v3146_v35 = vcombine.high %v2674_v46, %v11987_v57 }
 0x4bc   : > { %v3094_v59 = vrot.slane %v3080_v25, %v11985_v31 }
 0x4bd   : > { %v3118_v27 = vrot.slane %v3110_v33, %v11986_v38  ;;  %v3125_v55 = vrot.slane %v3111_v62, %v11986_v38  ;;  %v3176_v18 = vcombine.low %v3153_v52, %v3168_v6  ;;  %v3177_v19 = vcombine.high %v3153_v52, %v3168_v6  ;;  %v9393_v4 = vpop.eup %9392 }
 0x4be   : > { %v5526_v47 = vmul.f32 %v9393_v4, %v11990_v29  ;;  %v3160_v40 = vrot.slane %v3146_v35, %v11985_v31  ;;  %v3126_v33 = vcombine.low %v3094_v59, %v3109_v16  ;;  %v3127_v62 = vcombine.high %v3094_v59, %v3109_v16 }
 0x4bf   : > { %v3512_v12 = vcombine.low %v3118_v27, %v3125_v55  ;;  %v8540_v56 = vcombine.high %v3118_v27, %v3125_v55  ;;  %v3184_v48 = vrot.slane %v3176_v18, %v11986_v38  ;;  %v3191_v5 = vrot.slane %v3177_v19, %v11986_v38 }
 0x4c0   : > { %v3192_v30 = vcombine.low %v3160_v40, %v3175_v21  ;;  %v3193_v43 = vcombine.high %v3160_v40, %v3175_v21  ;;  %v5558_v8 = vpack.c.bf16 %v5526_v47, %v5526_v47  ;;  %v3134_v55 = vrot.slane %v3126_v33, %v11986_v38 }
 0x4c1   : > { %v3519_v51 = vrot.slane %v3512_v12, %v11985_v31  ;;  %v3527_v28 = vrot.slane %v8540_v56, %v11985_v31  ;;  %v3537_v54 = vcombine.low %v3184_v48, %v3191_v5  ;;  %v8541_v24 = vcombine.high %v3184_v48, %v3191_v5 }
 0x4c2   : > { %v3200_v52 = vrot.slane %v3192_v30, %v11986_v38  ;;  %v3207_v27 = vrot.slane %v3193_v43, %v11986_v38  ;;  %v3141_v18 = vrot.slane %v3127_v62, %v11986_v38 }
 0x4c3   : > { %v3528_v14 = vcombine.low %v3519_v51, %v3527_v28  ;;  %v3544_v50 = vrot.slane %v3537_v54, %v11985_v31  ;;  %v3552_v3 = vrot.slane %v8541_v24, %v11985_v31 }
 0x4c4   : > { %v3587_v19 = vcombine.low %v3200_v52, %v3207_v27  ;;  %v8543_v12 = vcombine.high %v3200_v52, %v3207_v27  ;;  %v3562_v56 = vcombine.low %v3134_v55, %v3141_v18  ;;  %v8542_v48 = vcombine.high %v3134_v55, %v3141_v18 }
 0x4c5   : > { %v3535_v39 = vrot.slane %v3528_v14, %v11986_v38  ;;  %v3553_v42 = vcombine.low %v3544_v50, %v3552_v3 }
 0x4c6   : > { %v3594_v5 = vrot.slane %v3587_v19, %v11985_v31  ;;  %v3602_v51 = vrot.slane %v8543_v12, %v11985_v31  ;;  %v3569_v28 = vrot.slane %v3562_v56, %v11985_v31  ;;  %v3577_v54 = vrot.slane %v8542_v48, %v11985_v31 }
 0x4c7   : > { %v3536_v60 = vcombine.high %v3535_v39, %v11988_v45  ;;  %v3560_v13 = vrot.slane %v3553_v42, %v11986_v38  ;;  %v3687_v20 = vshrl.u32 %v3535_v39, 16 }
 0x4c8   : > { %v3603_v14 = vcombine.low %v3594_v5, %v3602_v51  ;;  %v3578_v50 = vcombine.low %v3569_v28, %v3577_v54 }
 0x4c9   : > { %v3686_v36 = vpack.i.b16 %v3560_v13, %v3535_v39  ;;  %v3688_v0 = vshrl.u32 %v3560_v13, 16  ;;  %v3561_v23 = vcombine.high %v3560_v13, %v11988_v45  ;;  %v3693_v15 = vshrl.u32 %v3536_v60, 16 }
 0x4ca   : > { %v3610_v3 = vrot.slane %v3603_v14, %v11986_v38  ;;  %v3585_v39 = vrot.slane %v3578_v50, %v11986_v38 }
 0x4cb   : > { %v6674_v26 = vsel %vm5568_vm3, %v3686_v36, 0  ;;  %v3689_v17 = vpack.i.b16 %v3688_v0, %v3687_v20  ;;  %v3692_v44 = vpack.i.b16 %v3561_v23, %v3536_v60  ;;  %v3694_v37 = vshrl.u32 %v3561_v23, 16 }
 0x4cc   : > { %9130 = vmatpush3.bf16.msra.mxu0 %v6674_v26  ;;  %v3700_v42 = vshrl.u32 %v3610_v3, 16  ;;  %v3699_v57 = vshrl.u32 %v3585_v39, 16  ;;  %v3698_v0 = vpack.i.b16 %v3610_v3, %v3585_v39  ;;  %v3611_v23 = vcombine.high %v3610_v3, %v11988_v45 }
 0x4cd   : > { %v6720_v34 = vsel %vm5568_vm3, %v3689_v17, 0  ;;  %9141 = vmatprep.subr.bf16.mxu0 %v11916_v63  ;;  %v3695_v7 = vpack.i.b16 %v3694_v37, %v3693_v15  ;;  %v6766_v46 = vsel %vm5568_vm3, %v3692_v44, 0  ;;  %v3586_v29 = vcombine.high %v3585_v39, %v11988_v45 }
 0x4ce   : > { %9136 = vmatpush3.bf16.msra.mxu1 %v6720_v34  ;;  %v3701_v13 = vpack.i.b16 %v3700_v42, %v3699_v57  ;;  %v6858_v40 = vsel %vm5568_vm3, %v3698_v0, 0  ;;  %v3706_v15 = vshrl.u32 %v3611_v23, 16 }
 0x4cf   : > { %9132 = vmatmul.mubr.msk.bf16.vlgmr.msra.gmra.mrb[112].mxu0 %vm3708_vm2, %v5557_v53  ;;  %9147 = vmatprep.subr.bf16.mxu1 %v11916_v63  ;;  %v6812_v6 = vsel %vm5568_vm3, %v3695_v7, 0  ;;  %v3705_v26 = vshrl.u32 %v3586_v29, 16  ;;  %v3704_v37 = vpack.i.b16 %v3611_v23, %v3586_v29 }
 0x4d0   : > { %9142 = vmatpush3.bf16.msra.mxu0 %v6766_v46  ;;  %9143 = vmatprep.mubr.msk.bf16.mxu0 %vm9451_vm1, %v11916_v63  ;;  %v6904_v61 = vsel %vm5568_vm3, %v3701_v13, 0 }
 0x4d1   : > { %9138 = vmatmul.mubr.msk.bf16.vlgmr.msra.gmra.mrb[120].mxu1 %vm3708_vm2, %v5558_v8  ;;  %9153 = vmatprep.subr.bf16.mxu0 %v11916_v63  ;;  %v3707_v45 = vpack.i.b16 %v3706_v15, %v3705_v26  ;;  %v6950_v7 = vsel %vm5568_vm3, %v3704_v37, 0 }
 0x4d2   : > { %9148 = vmatpush3.bf16.msra.mxu1 %v6812_v6  ;;  %9149 = vmatprep.mubr.msk.bf16.mxu1 %vm9451_vm1, %v11916_v63 }
 0x4d3   : > { %9159 = vmatprep.subr.bf16.mxu1 %v11916_v63 }
 0x4df   : > { %v5456_v24 = vpop.xlane.xlu1 %5455 }
 0x4e0   : > { %9394 = vrcp.f32 %v5456_v24 }
 0x4e3   : > { %v5465_v25 = vpop.xlane.xlu1 %5464 }
 0x4e7   : > { %v5453_v9 = vpop.xlane.xlu0 %5452 }
 0x4e8   : > { %9396 = vrcp.f32 %v5453_v9 }
 0x4ea   : > { %v9395_v35 = vpop.eup %9394 }
 0x4eb   : > { %v5528_v60 = vmul.f32 %v9395_v35, %v11300_v49  ;;  %v5459_v4 = vpop.xlane.xlu0 %5458 }
 0x4ec   : > { %9398 = vrcp.f32 %v5459_v4 }
 0x4ed   : > { %v5560_v2 = vpack.c.bf16 %v5528_v60, %v5528_v60 }
 0x4ef   : > { %v5462_v10 = vpop.xlane.xlu0 %5461  ;;  %9150 = vmatmul.mubr.msk.bf16.vlgmr.msra.gmra.mrb[124].mxu1 %vm3708_vm2, %v5560_v2 }
 0x4f0   : > { %9400 = vrcp.f32 %v5462_v10  ;;  %9160 = vmatpush3.bf16.msra.mxu1 %v6904_v61  ;;  %9161 = vmatprep.mubr.msk.bf16.mxu1 %vm9451_vm1, %v11916_v63 }
 0x4f1   : > { %9171 = vmatprep.subr.bf16.mxu1 %v11916_v63  ;;  %9402 = vrcp.f32 %v5465_v25 }
 0x4f2   : > { %v9397_v36 = vpop.eup %9396 }
 0x4f3   : > { %v5527_v49 = vmul.f32 %v9397_v36, %v11317_v11  ;;  %v5468_v20 = vpop.xlane.xlu0 %5467 }
 0x4f4   : > { %9404 = vrcp.f32 %v5468_v20 }
 0x4f5   : > { %v5559_v22 = vpack.c.bf16 %v5527_v49, %v5527_v49 }
 0x4f6   : > { %v9399_v47 = vpop.eup %9398 }
 0x4f7   : > { %9144 = vmatmul.mubr.msk.bf16.vlgmr.msra.gmra.mrb[116].mxu0 %vm3708_vm2, %v5559_v22  ;;  %v5529_v11 = vmul.f32 %v9399_v47, %v11326_v41  ;;  %v6996_v41 = vsel %vm5568_vm3, %v3707_v45, 0 }
 0x4f8   : > { %9154 = vmatpush3.bf16.msra.mxu0 %v6858_v40  ;;  %9155 = vmatprep.mubr.msk.bf16.mxu0 %vm9451_vm1, %v11916_v63 }
 0x4f9   : > { %9165 = vmatprep.subr.bf16.mxu0 %v11916_v63  ;;  %v5561_v59 = vpack.c.bf16 %v5529_v11, %v5529_v11 }
 0x4fa   : > { %v9401_v17 = vpop.eup %9400 }
 0x4fb   : > { %v5530_v44 = vmul.f32 %v9401_v17, %v11330_v1  ;;  %v9403_v21 = vpop.eup %9402 }
 0x4fc   : > { %v5531_v16 = vmul.f32 %v9403_v21, %v11310_v32 }
 0x4fd   : > { %v5562_v34 = vpack.c.bf16 %v5530_v44, %v5530_v44 }
 0x4fe   : > { %v9405_v53 = vpop.eup %9404  ;;  %v5563_v30 = vpack.c.bf16 %v5531_v16, %v5531_v16 }
 0x4ff   : > { %9156 = vmatmul.mubr.msk.bf16.vlgmr.msra.gmra.mrb[120].mxu0 %vm3708_vm2, %v5561_v59  ;;  %9162 = vmatmul.mubr.msk.bf16.vlgmr.msra.gmra.mrb[128].mxu1 %vm3708_vm2, %v5562_v34  ;;  %v5532_v1 = vmul.f32 %v9405_v53, %v11334_v58 }
 0x500   : > { %9166 = vmatpush3.bf16.msra.mxu0 %v6950_v7  ;;  %9172 = vmatpush3.bf16.msra.mxu1 %v6996_v41 }
 0x501   : > { %9167 = vmatprep.mubr.msk.bf16.mxu0 %vm9451_vm1, %v11916_v63  ;;  %9173 = vmatprep.mubr.msk.bf16.mxu1 %vm9451_vm1, %v11916_v63  ;;  %v5564_v43 = vpack.c.bf16 %v5532_v1, %v5532_v1 }
 0x507   : > { %9168 = vmatmul.mubr.msk.bf16.vlgmr.msra.gmra.mrb[124].mxu0 %vm3708_vm2, %v5563_v30  ;;  %9174 = vmatmul.mubr.msk.bf16.vlgmr.msra.gmra.mrb[132].mxu1 %vm3708_vm2, %v5564_v43  ;;  %v5606_v46 = vpop.f32.mrb[64].mxu0 }
 0x508   : > { %v8989_v8 = vpop.f32.mrb[65].mxu0 }
 0x509   : > { %v5609_v33 = vpop.f32.mrb[66].mxu0 }
 0x50a   : > { %v8990_v62 = vpop.f32.mrb[67].mxu0 }
 0x50e   : > { %v5652_v6 = vpop.f32.mrb[72].mxu1 }
 0x50f   : > { %v5698_v32 = vpop.f32.mrb[68].mxu0  ;;  %v8995_v52 = vpop.f32.mrb[73].mxu1 }
 0x510   : > { %v7038_v58 = vcombine.low %v5606_v46, %v5698_v32  ;;  %v7039_v27 = vcombine.high %v5606_v46, %v5698_v32  ;;  %v9001_v55 = vpop.f32.mrb[69].mxu0  ;;  %v5655_v18 = vpop.f32.mrb[74].mxu1 }
 0x511   : > { %v5701_v19 = vpop.f32.mrb[70].mxu0  ;;  %v8996_v12 = vpop.f32.mrb[75].mxu1 }
 0x512   : > { %v9002_v63 = vpop.f32.mrb[71].mxu0  ;;  %v7046_v54 = vrot.slane %v7038_v58, %v11985_v31  ;;  %v7053_v24 = vrot.slane %v7039_v27, %v11985_v31 }
 0x516   : > { %v5744_v56 = vpop.f32.mrb[76].mxu1 }
 0x517   : > { %v7054_v48 = vcombine.low %v5652_v6, %v5744_v56  ;;  %v7055_v5 = vcombine.high %v5652_v6, %v5744_v56  ;;  %v9007_v51 = vpop.f32.mrb[77].mxu1 }
 0x518   : > { %v5747_v28 = vpop.f32.mrb[78].mxu1 }
 0x519   : > { %v7062_v14 = vrot.slane %v7054_v48, %v11985_v31  ;;  %v7069_v50 = vrot.slane %v7055_v5, %v11985_v31  ;;  %v9008_v3 = vpop.f32.mrb[79].mxu1 }
 0x51b   : > { %v7070_v39 = vcombine.low %v7046_v54, %v7062_v14  ;;  %v7071_v9 = vcombine.high %v7046_v54, %v7062_v14  ;;  %v7086_v42 = vcombine.low %v7053_v24, %v7069_v50  ;;  %v7087_v57 = vcombine.high %v7053_v24, %v7069_v50 }
 0x51d   : > { %v7078_v35 = vrot.slane %v7070_v39, %v11986_v38  ;;  %v7085_v60 = vrot.slane %v7071_v9, %v11986_v38  ;;  %v7094_v4 = vrot.slane %v7086_v42, %v11986_v38  ;;  %v7101_v13 = vrot.slane %v7087_v57, %v11986_v38 }
 0x51e   : > { %v5836_v2 = vpop.f32.mrb[80].mxu1 }
 0x51f   : > { %v7582_v10 = vcombine.low %v7078_v35, %v7085_v60  ;;  %v8608_v61 = vcombine.high %v7078_v35, %v7085_v60  ;;  %v7598_v25 = vcombine.low %v7094_v4, %v7101_v13  ;;  %v8609_v36 = vcombine.high %v7094_v4, %v7101_v13  ;;  %v9019_v49 = vpop.f32.mrb[81].mxu1 }
 0x520   : > { %v5839_v20 = vpop.f32.mrb[82].mxu1 }
 0x521   : > { %v7589_v0 = vrot.slane %v7582_v10, %v11985_v31  ;;  %v7597_v23 = vrot.slane %v8608_v61, %v11985_v31  ;;  %v7605_v22 = vrot.slane %v7598_v25, %v11985_v31  ;;  %v7613_v29 = vrot.slane %v8609_v36, %v11985_v31  ;;  %v9020_v47 = vpop.f32.mrb[83].mxu1 }
 0x523   : > { %v7615_v40 = vcombine.high %v7589_v0, %v7597_v23  ;;  %v7631_v15 = vcombine.high %v7605_v22, %v7613_v29  ;;  %v7614_v11 = vcombine.low %v7589_v0, %v7597_v23  ;;  %v7630_v26 = vcombine.low %v7605_v22, %v7613_v29 }
 0x525   : > { %v11573_v17 = vrot.slane %v7615_v40, %v11986_v38  ;;  %v11576_v44 = vrot.slane %v7631_v15, %v11986_v38  ;;  %v11579_v37 = vrot.slane %v7614_v11, %v11986_v38  ;;  %v11582_v45 = vrot.slane %v7630_v26, %v11986_v38 }
 0x526   : > { %v5928_v21 = vpop.f32.mrb[84].mxu1 }
 0x527   : > { %v7122_v59 = vcombine.low %v5836_v2, %v5928_v21  ;;  %v7123_v34 = vcombine.high %v5836_v2, %v5928_v21  ;;  %v9031_v53 = vpop.f32.mrb[85].mxu1  ;;  %v7649_v7 = vcombine.high %v11573_v17, %v11576_v44  ;;  %v7647_v41 = vcombine.high %v11579_v37, %v11582_v45 }
 0x528   : > { %v5931_v16 = vpop.f32.mrb[86].mxu1  ;;  %v7648_v1 = vcombine.low %v11573_v17, %v11576_v44  ;;  %v7646_v30 = vcombine.low %v11579_v37, %v11582_v45 }
 0x529   : > { %v9032_v43 = vpop.f32.mrb[87].mxu1  ;;  %v7130_v55 = vrot.slane %v7122_v59, %v11985_v31  ;;  %v7137_v18 = vrot.slane %v7123_v34, %v11985_v31 }
 0x53c   : > { %v5790_v46 = vpop.f32.mrb[72].mxu0 }
 0x53d   : > { %v9013_v8 = vpop.f32.mrb[73].mxu0 }
 0x53e   : > { %v5793_v33 = vpop.f32.mrb[74].mxu0 }
 0x53f   : > { %v9014_v62 = vpop.f32.mrb[75].mxu0 }
 0x544   : > { %v5882_v6 = vpop.f32.mrb[76].mxu0 }
 0x545   : > { %v7106_v32 = vcombine.low %v5790_v46, %v5882_v6  ;;  %v7107_v52 = vcombine.high %v5790_v46, %v5882_v6  ;;  %v9025_v58 = vpop.f32.mrb[77].mxu0 }
 0x546   : > { %v5885_v27 = vpop.f32.mrb[78].mxu0 }
 0x547   : > { %v7114_v19 = vrot.slane %v7106_v32, %v11985_v31  ;;  %v7121_v12 = vrot.slane %v7107_v52, %v11985_v31  ;;  %v9026_v63 = vpop.f32.mrb[79].mxu0 }
 0x549   : > { %v7138_v56 = vcombine.low %v7114_v19, %v7130_v55  ;;  %v7139_v48 = vcombine.high %v7114_v19, %v7130_v55  ;;  %v7154_v5 = vcombine.low %v7121_v12, %v7137_v18  ;;  %v7155_v51 = vcombine.high %v7121_v12, %v7137_v18 }
 0x54b   : > { %v7146_v28 = vrot.slane %v7138_v56, %v11986_v38  ;;  %v7153_v54 = vrot.slane %v7139_v48, %v11986_v38  ;;  %v7162_v24 = vrot.slane %v7154_v5, %v11986_v38  ;;  %v7169_v14 = vrot.slane %v7155_v51, %v11986_v38 }
 0x54c   : > { %v5974_v50 = vpop.f32.mrb[80].mxu0 }
 0x54d   : > { %v7650_v3 = vcombine.low %v7146_v28, %v7153_v54  ;;  %v8610_v39 = vcombine.high %v7146_v28, %v7153_v54  ;;  %v7666_v9 = vcombine.low %v7162_v24, %v7169_v14  ;;  %v8611_v42 = vcombine.high %v7162_v24, %v7169_v14  ;;  %v9037_v57 = vpop.f32.mrb[81].mxu0 }
 0x54e   : > { %v5977_v35 = vpop.f32.mrb[82].mxu0 }
 0x54f   : > { %v7657_v60 = vrot.slane %v7650_v3, %v11985_v31  ;;  %v7665_v4 = vrot.slane %v8610_v39, %v11985_v31  ;;  %v7673_v13 = vrot.slane %v7666_v9, %v11985_v31  ;;  %v7681_v2 = vrot.slane %v8611_v42, %v11985_v31  ;;  %v9038_v10 = vpop.f32.mrb[83].mxu0 }
 0x550   : > { %v6020_v61 = vpop.f32.mrb[88].mxu1 }
 0x551   : > { %v7683_v25 = vcombine.high %v7657_v60, %v7665_v4  ;;  %v7699_v36 = vcombine.high %v7673_v13, %v7681_v2  ;;  %v7682_v49 = vcombine.low %v7657_v60, %v7665_v4  ;;  %v7698_v20 = vcombine.low %v7673_v13, %v7681_v2  ;;  %v9043_v0 = vpop.f32.mrb[89].mxu1 }
 0x552   : > { %v6023_v23 = vpop.f32.mrb[90].mxu1 }
 0x553   : > { %v7697_v22 = vrot.slane %v7683_v25, %v11986_v38  ;;  %v7713_v29 = vrot.slane %v7699_v36, %v11986_v38  ;;  %v11607_v47 = vrot.slane %v7682_v49, %v11986_v38  ;;  %v11610_v40 = vrot.slane %v7698_v20, %v11986_v38  ;;  %v9044_v15 = vpop.f32.mrb[91].mxu1 }
 0x554   : > { %v6066_v11 = vpop.f32.mrb[84].mxu0 }
 0x555   : > { %v7174_v26 = vcombine.low %v5974_v50, %v6066_v11  ;;  %v7175_v17 = vcombine.high %v5974_v50, %v6066_v11  ;;  %v9049_v44 = vpop.f32.mrb[85].mxu0  ;;  %v7717_v21 = vcombine.high %v7697_v22, %v7713_v29  ;;  %v7715_v59 = vcombine.high %v11607_v47, %v11610_v40 }
 0x556   : > { %v6069_v34 = vpop.f32.mrb[86].mxu0  ;;  %v7716_v53 = vcombine.low %v7697_v22, %v7713_v29  ;;  %v7714_v16 = vcombine.low %v11607_v47, %v11610_v40 }
 0x557   : > { %v9050_v43 = vpop.f32.mrb[87].mxu0  ;;  %v9224_v46 = vpack.i.bf16 %v7717_v21, %v7649_v7  ;;  %v9214_v8 = vpack.i.bf16 %v7715_v59, %v7647_v41  ;;  %v7182_v58 = vrot.slane %v7174_v26, %v11985_v31  ;;  %v7189_v27 = vrot.slane %v7175_v17, %v11985_v31 }
 0x558   : > { %v9219_v33 = vpack.i.bf16 %v7716_v53, %v7648_v1  ;;  %v6112_v62 = vpop.f32.mrb[92].mxu1 }
 0x559   : > { %9225 = vrot.lane.b32.xlu0 %v9224_v46, %s9456_s11  ;;  %9215 = vrot.lane.b32.xlu1 %v9214_v8, %s9457_s12  ;;  %v7190_v6 = vcombine.low %v6020_v61, %v6112_v62  ;;  %v7191_v32 = vcombine.high %v6020_v61, %v6112_v62  ;;  %v9055_v52 = vpop.f32.mrb[93].mxu1 }
 0x55a   : > { %v6115_v55 = vpop.f32.mrb[94].mxu1 }
 0x55b   : > { %v7198_v18 = vrot.slane %v7190_v6, %v11985_v31  ;;  %v7205_v7 = vrot.slane %v7191_v32, %v11985_v31  ;;  %v9056_v41 = vpop.f32.mrb[95].mxu1 }
 0x55c   : > { %v6158_v1 = vpop.f32.mrb[88].mxu0 }
 0x55d   : > { %9220 = vrot.lane.b32.xlu1 %v9219_v33, %s9458_s13  ;;  %v9061_v19 = vpop.f32.mrb[89].mxu0  ;;  %v7206_v12 = vcombine.low %v7182_v58, %v7198_v18  ;;  %v7207_v63 = vcombine.high %v7182_v58, %v7198_v18  ;;  %v7222_v56 = vcombine.low %v7189_v27, %v7205_v7  ;;  %v7223_v48 = vcombine.high %v7189_v27, %v7205_v7 }
 0x55e   : > { %v6161_v5 = vpop.f32.mrb[90].mxu0 }
 0x55f   : > { %v9062_v51 = vpop.f32.mrb[91].mxu0  ;;  %v7214_v28 = vrot.slane %v7206_v12, %v11986_v38  ;;  %v7221_v54 = vrot.slane %v7207_v63, %v11986_v38  ;;  %v7230_v24 = vrot.slane %v7222_v56, %v11986_v38  ;;  %v7237_v14 = vrot.slane %v7223_v48, %v11986_v38 }
 0x560   : > { %v6204_v50 = vpop.f32.mrb[96].mxu1 }
 0x561   : > { %v7718_v3 = vcombine.low %v7214_v28, %v7221_v54  ;;  %v8612_v39 = vcombine.high %v7214_v28, %v7221_v54  ;;  %v7734_v9 = vcombine.low %v7230_v24, %v7237_v14  ;;  %v8613_v42 = vcombine.high %v7230_v24, %v7237_v14  ;;  %v9067_v57 = vpop.f32.mrb[97].mxu1 }
 0x562   : > { %v6207_v35 = vpop.f32.mrb[98].mxu1 }
 0x563   : > { %v7725_v60 = vrot.slane %v7718_v3, %v11985_v31  ;;  %v7733_v4 = vrot.slane %v8612_v39, %v11985_v31  ;;  %v7741_v13 = vrot.slane %v7734_v9, %v11985_v31  ;;  %v7749_v2 = vrot.slane %v8613_v42, %v11985_v31  ;;  %v9068_v10 = vpop.f32.mrb[99].mxu1  ;;  %v9276_v9 = vld [vmem:[%s11868_s3] sm:$0xff]  }
 0x564   : > { %v6250_v61 = vpop.f32.mrb[92].mxu0  ;;  %9177 = vmatprep.subr.bf16.mxu0 %v9276_v9 }
 0x565   : > { %v7242_v25 = vcombine.low %v6158_v1, %v6250_v61  ;;  %v7243_v36 = vcombine.high %v6158_v1, %v6250_v61  ;;  %v9073_v49 = vpop.f32.mrb[93].mxu0  ;;  %v7751_v0 = vcombine.high %v7725_v60, %v7733_v4  ;;  %v7767_v23 = vcombine.high %v7741_v13, %v7749_v2  ;;  %9178 = vmatpush3.bf16.msra.mxu0 %v9276_v9 }
 0x566   : > { %v6253_v20 = vpop.f32.mrb[94].mxu0  ;;  %v7750_v22 = vcombine.low %v7725_v60, %v7733_v4  ;;  %v7766_v29 = vcombine.low %v7741_v13, %v7749_v2 }
 0x567   : > { %v9074_v15 = vpop.f32.mrb[95].mxu0  ;;  %v11632_v11 = vrot.slane %v7751_v0, %v11986_v38  ;;  %v11635_v26 = vrot.slane %v7767_v23, %v11986_v38  ;;  %v7250_v59 = vrot.slane %v7242_v25, %v11985_v31  ;;  %v7257_v34 = vrot.slane %v7243_v36, %v11985_v31 }
 0x568   : > { %v11638_v17 = vrot.slane %v7750_v22, %v11986_v38  ;;  %v11641_v44 = vrot.slane %v7766_v29, %v11986_v38  ;;  %v6296_v21 = vpop.f32.mrb[100].mxu1 }
 0x569   : > { %v7258_v53 = vcombine.low %v6204_v50, %v6296_v21  ;;  %v7259_v43 = vcombine.high %v6204_v50, %v6296_v21  ;;  %v9079_v46 = vpop.f32.mrb[101].mxu1  ;;  %v7784_v8 = vcombine.low %v11632_v11, %v11635_v26  ;;  %v7785_v6 = vcombine.high %v11632_v11, %v11635_v26 }
 0x56a   : > { %v7783_v33 = vcombine.high %v11638_v17, %v11641_v44  ;;  %v6299_v62 = vpop.f32.mrb[102].mxu1  ;;  %v7782_v32 = vcombine.low %v11638_v17, %v11641_v44 }
 0x56b   : > { %v7266_v52 = vrot.slane %v7258_v53, %v11985_v31  ;;  %v7273_v58 = vrot.slane %v7259_v43, %v11985_v31  ;;  %v9080_v27 = vpop.f32.mrb[103].mxu1 }
 0x56c   : > { %v6342_v55 = vpop.f32.mrb[96].mxu0 }
 0x56d   : > { %v9085_v18 = vpop.f32.mrb[97].mxu0  ;;  %v7274_v7 = vcombine.low %v7250_v59, %v7266_v52  ;;  %v7275_v41 = vcombine.high %v7250_v59, %v7266_v52  ;;  %v7290_v1 = vcombine.low %v7257_v34, %v7273_v58  ;;  %v7291_v19 = vcombine.high %v7257_v34, %v7273_v58  ;;  %v9277_v59 = vld [vmem:[%s11868_s3 + $0x8] sm:$0xff]  }
 0x56e   : > { %v6345_v12 = vpop.f32.mrb[98].mxu0  ;;  %9179 = vmatprep.subr.bf16.mxu0 %v9277_v59 }
 0x56f   : > { %v9086_v63 = vpop.f32.mrb[99].mxu0  ;;  %v7282_v56 = vrot.slane %v7274_v7, %v11986_v38  ;;  %v7289_v48 = vrot.slane %v7275_v41, %v11986_v38  ;;  %v7298_v5 = vrot.slane %v7290_v1, %v11986_v38  ;;  %v7305_v51 = vrot.slane %v7291_v19, %v11986_v38  ;;  %9180 = vmatpush3.bf16.msra.mxu0 %v9277_v59 }
 0x570   : > { %v6388_v28 = vpop.f32.mrb[104].mxu1 }
 0x571   : > { %v7786_v54 = vcombine.low %v7282_v56, %v7289_v48  ;;  %v8614_v24 = vcombine.high %v7282_v56, %v7289_v48  ;;  %v7802_v14 = vcombine.low %v7298_v5, %v7305_v51  ;;  %v8615_v50 = vcombine.high %v7298_v5, %v7305_v51  ;;  %v9091_v3 = vpop.f32.mrb[105].mxu1 }
 0x572   : > { %v6391_v39 = vpop.f32.mrb[106].mxu1 }
 0x573   : > { %v7793_v42 = vrot.slane %v7786_v54, %v11985_v31  ;;  %v7801_v57 = vrot.slane %v8614_v24, %v11985_v31  ;;  %v7809_v35 = vrot.slane %v7802_v14, %v11985_v31  ;;  %v7817_v60 = vrot.slane %v8615_v50, %v11985_v31  ;;  %v9092_v13 = vpop.f32.mrb[107].mxu1 }
 0x574   : > { %v6434_v4 = vpop.f32.mrb[100].mxu0 }
 0x575   : > { %v7310_v2 = vcombine.low %v6342_v55, %v6434_v4  ;;  %v7311_v10 = vcombine.high %v6342_v55, %v6434_v4  ;;  %v9097_v61 = vpop.f32.mrb[101].mxu0  ;;  %v7819_v36 = vcombine.high %v7793_v42, %v7801_v57  ;;  %v7835_v49 = vcombine.high %v7809_v35, %v7817_v60 }
 0x576   : > { %v6437_v25 = vpop.f32.mrb[102].mxu0  ;;  %v7818_v20 = vcombine.low %v7793_v42, %v7801_v57  ;;  %v7834_v0 = vcombine.low %v7809_v35, %v7817_v60 }
 0x577   : > { %v9098_v23 = vpop.f32.mrb[103].mxu0  ;;  %v7833_v22 = vrot.slane %v7819_v36, %v11986_v38  ;;  %v7849_v29 = vrot.slane %v7835_v49, %v11986_v38  ;;  %v7318_v58 = vrot.slane %v7310_v2, %v11985_v31  ;;  %v7325_v27 = vrot.slane %v7311_v10, %v11985_v31 }
 0x578   : > { %v11669_v15 = vrot.slane %v7818_v20, %v11986_v38  ;;  %v11672_v21 = vrot.slane %v7834_v0, %v11986_v38  ;;  %v6480_v34 = vpop.f32.mrb[108].mxu1 }
 0x579   : > { %v7852_v53 = vcombine.low %v7833_v22, %v7849_v29  ;;  %v7326_v46 = vcombine.low %v6388_v28, %v6480_v34  ;;  %v7327_v62 = vcombine.high %v6388_v28, %v6480_v34  ;;  %v9103_v52 = vpop.f32.mrb[109].mxu1  ;;  %v7853_v55 = vcombine.high %v7833_v22, %v7849_v29 }
 0x57a   : > { %v7851_v43 = vcombine.high %v11669_v15, %v11672_v21  ;;  %v6483_v18 = vpop.f32.mrb[110].mxu1  ;;  %v7850_v7 = vcombine.low %v11669_v15, %v11672_v21 }
 0x57b   : > { %v9234_v41 = vpack.i.bf16 %v7852_v53, %v7784_v8  ;;  %v7334_v12 = vrot.slane %v7326_v46, %v11985_v31  ;;  %v7341_v63 = vrot.slane %v7327_v62, %v11985_v31  ;;  %v9104_v56 = vpop.f32.mrb[111].mxu1  ;;  %v9239_v48 = vpack.i.bf16 %v7853_v55, %v7785_v6 }
 0x57c   : > { %v9229_v1 = vpack.i.bf16 %v7851_v43, %v7783_v33  ;;  %v6526_v19 = vpop.f32.mrb[104].mxu0 }
 0x57d   : > { %v9109_v5 = vpop.f32.mrb[105].mxu0  ;;  %9235 = vrot.lane.b32.xlu1 %v9234_v41, %s9458_s13  ;;  %v7342_v8 = vcombine.low %v7318_v58, %v7334_v12  ;;  %v7343_v51 = vcombine.high %v7318_v58, %v7334_v12  ;;  %v7358_v28 = vcombine.low %v7325_v27, %v7341_v63  ;;  %v7359_v33 = vcombine.high %v7325_v27, %v7341_v63 }
 0x57e   : > { %9230 = vrot.lane.b32.xlu0 %v9229_v1, %s9457_s12  ;;  %v6529_v54 = vpop.f32.mrb[106].mxu0 }
 0x57f   : > { %v9110_v24 = vpop.f32.mrb[107].mxu0  ;;  %v7350_v14 = vrot.slane %v7342_v8, %v11986_v38  ;;  %v7357_v50 = vrot.slane %v7343_v51, %v11986_v38  ;;  %v7366_v3 = vrot.slane %v7358_v28, %v11986_v38  ;;  %v7373_v11 = vrot.slane %v7359_v33, %v11986_v38 }
 0x580   : > { %v6572_v26 = vpop.f32.mrb[112].mxu1 }
 0x581   : > { %v7854_v6 = vcombine.low %v7350_v14, %v7357_v50  ;;  %v8616_v39 = vcombine.high %v7350_v14, %v7357_v50  ;;  %9240 = vrot.lane.b32.xlu1 %v9239_v48, %s9456_s11  ;;  %v9115_v9 = vpop.f32.mrb[113].mxu1  ;;  %v7870_v42 = vcombine.low %v7366_v3, %v7373_v11  ;;  %v8617_v57 = vcombine.high %v7366_v3, %v7373_v11 }
 0x582   : > { %v6575_v35 = vpop.f32.mrb[114].mxu1 }
 0x583   : > { %v7861_v60 = vrot.slane %v7854_v6, %v11985_v31  ;;  %v7869_v4 = vrot.slane %v8616_v39, %v11985_v31  ;;  %v9116_v2 = vpop.f32.mrb[115].mxu1  ;;  %v7877_v10 = vrot.slane %v7870_v42, %v11985_v31  ;;  %v7885_v61 = vrot.slane %v8617_v57, %v11985_v31 }
 0x584   : > { %v6618_v13 = vpop.f32.mrb[108].mxu0 }
 0x585   : > { %v7378_v25 = vcombine.low %v6526_v19, %v6618_v13  ;;  %v7379_v36 = vcombine.high %v6526_v19, %v6618_v13  ;;  %v9121_v49 = vpop.f32.mrb[109].mxu0  ;;  %v7886_v0 = vcombine.low %v7861_v60, %v7869_v4  ;;  %v7887_v23 = vcombine.high %v7861_v60, %v7869_v4 }
 0x586   : > { %v6621_v20 = vpop.f32.mrb[110].mxu0  ;;  %v7902_v29 = vcombine.low %v7877_v10, %v7885_v61  ;;  %v7903_v59 = vcombine.high %v7877_v10, %v7885_v61 }
 0x587   : > { %v9122_v22 = vpop.f32.mrb[111].mxu0  ;;  %v11706_v34 = vrot.slane %v7886_v0, %v11986_v38  ;;  %v7901_v53 = vrot.slane %v7887_v23, %v11986_v38  ;;  %v7386_v12 = vrot.slane %v7378_v25, %v11985_v31  ;;  %v7393_v63 = vrot.slane %v7379_v36, %v11985_v31 }
 0x588   : > { %v11710_v43 = vrot.slane %v7902_v29, %v11986_v38  ;;  %v7917_v46 = vrot.slane %v7903_v59, %v11986_v38 }
 0x58a   : > { %v7919_v62 = vcombine.high %v11706_v34, %v11710_v43  ;;  %v7920_v52 = vcombine.low %v7901_v53, %v7917_v46  ;;  %v7921_v58 = vcombine.high %v7901_v53, %v7917_v46  ;;  %v7918_v27 = vcombine.low %v11706_v34, %v11710_v43 }
 0x58d   : > { %v6664_v55 = vpop.f32.mrb[116].mxu1 }
 0x58e   : > { %v7394_v18 = vcombine.low %v6572_v26, %v6664_v55  ;;  %v7395_v41 = vcombine.high %v6572_v26, %v6664_v55  ;;  %v9127_v1 = vpop.f32.mrb[117].mxu1 }
 0x58f   : > { %v6667_v19 = vpop.f32.mrb[118].mxu1 }
 0x590   : > { %v7402_v56 = vrot.slane %v7394_v18, %v11985_v31  ;;  %v7409_v48 = vrot.slane %v7395_v41, %v11985_v31  ;;  %v9128_v5 = vpop.f32.mrb[119].mxu1 }
 0x592   : > { %v7410_v8 = vcombine.low %v7386_v12, %v7402_v56  ;;  %v7411_v51 = vcombine.high %v7386_v12, %v7402_v56  ;;  %v7426_v28 = vcombine.low %v7393_v63, %v7409_v48  ;;  %v7427_v54 = vcombine.high %v7393_v63, %v7409_v48 }
 0x594   : > { %v7418_v33 = vrot.slane %v7410_v8, %v11986_v38  ;;  %v7425_v24 = vrot.slane %v7411_v51, %v11986_v38  ;;  %v7434_v14 = vrot.slane %v7426_v28, %v11986_v38  ;;  %v7441_v50 = vrot.slane %v7427_v54, %v11986_v38 }
 0x596   : > { %v7922_v3 = vcombine.low %v7418_v33, %v7425_v24  ;;  %v8618_v11 = vcombine.high %v7418_v33, %v7425_v24  ;;  %v7938_v26 = vcombine.low %v7434_v14, %v7441_v50  ;;  %v8619_v6 = vcombine.high %v7434_v14, %v7441_v50 }
 0x598   : > { %v7929_v39 = vrot.slane %v7922_v3, %v11985_v31  ;;  %v7937_v9 = vrot.slane %v8618_v11, %v11985_v31  ;;  %v7945_v42 = vrot.slane %v7938_v26, %v11985_v31  ;;  %v7953_v57 = vrot.slane %v8619_v6, %v11985_v31 }
 0x59a   : > { %v7954_v35 = vcombine.low %v7929_v39, %v7937_v9  ;;  %v7970_v60 = vcombine.low %v7945_v42, %v7953_v57  ;;  %v7955_v4 = vcombine.high %v7929_v39, %v7937_v9  ;;  %v7971_v13 = vcombine.high %v7945_v42, %v7953_v57 }
 0x59c   : > { %v11730_v2 = vrot.slane %v7954_v35, %v11986_v38  ;;  %v11733_v10 = vrot.slane %v7970_v60, %v11986_v38  ;;  %v7969_v61 = vrot.slane %v7955_v4, %v11986_v38  ;;  %v7985_v25 = vrot.slane %v7971_v13, %v11986_v38 }
 0x59e   : > { %v7987_v36 = vcombine.high %v11730_v2, %v11733_v10  ;;  %v7988_v49 = vcombine.low %v7969_v61, %v7985_v25  ;;  %v7989_v20 = vcombine.high %v7969_v61, %v7985_v25  ;;  %v7986_v0 = vcombine.low %v11730_v2, %v11733_v10 }
 0x5a0   : > { %v9244_v23 = vpack.i.bf16 %v7987_v36, %v7919_v62  ;;  %v9249_v22 = vpack.i.bf16 %v7988_v49, %v7920_v52  ;;  %v9264_v29 = vpack.i.bf16 %v7989_v20, %v7921_v58 }
 0x5a2   : > { %9245 = vrot.lane.b32.xlu0 %v9244_v23, %s9457_s12  ;;  %v6710_v59 = vpop.f32.mrb[112].mxu0 }
 0x5a3   : > { %v9133_v53 = vpop.f32.mrb[113].mxu0 }
 0x5a4   : > { %v6713_v46 = vpop.f32.mrb[114].mxu0  ;;  %v6756_v55 = vpop.f32.mrb[120].mxu1 }
 0x5a5   : > { %v9134_v18 = vpop.f32.mrb[115].mxu0  ;;  %v9139_v41 = vpop.f32.mrb[121].mxu1 }
 0x5a6   : > { %9250 = vrot.lane.b32.xlu0 %v9249_v22, %s9458_s13  ;;  %v6759_v1 = vpop.f32.mrb[122].mxu1 }
 0x5a7   : > { %v9140_v19 = vpop.f32.mrb[123].mxu1 }
 0x5aa   : > { %9265 = vrot.lane.b32.xlu0 %v9264_v29, %s9456_s11 }
 0x5c2   : > { %v6848_v12 = vpop.f32.mrb[124].mxu1 }
 0x5c3   : > { %v7462_v63 = vcombine.low %v6756_v55, %v6848_v12  ;;  %v7463_v56 = vcombine.high %v6756_v55, %v6848_v12  ;;  %v9151_v62 = vpop.f32.mrb[125].mxu1 }
 0x5c4   : > { %v6851_v52 = vpop.f32.mrb[126].mxu1 }
 0x5c5   : > { %v9152_v58 = vpop.f32.mrb[127].mxu1  ;;  %v7470_v54 = vrot.slane %v7462_v63, %v11985_v31  ;;  %v7477_v33 = vrot.slane %v7463_v56, %v11985_v31 }
 0x5ca   : > { %v6802_v48 = vpop.f32.mrb[116].mxu0 }
 0x5cb   : > { %v7446_v5 = vcombine.low %v6710_v59, %v6802_v48  ;;  %v7447_v8 = vcombine.high %v6710_v59, %v6802_v48  ;;  %v9145_v51 = vpop.f32.mrb[117].mxu0  ;;  %v9216_v28 = vpop.permute.xlu1 %9215 }
 0x5cc   : > { %v6805_v50 = vpop.f32.mrb[118].mxu0  ;;  %v9218_v3 = vunpack.i.h.bf16 %v9216_v28  ;;  %v9217_v11 = vunpack.i.l.bf16 %v9216_v28  ;;  %v9226_v61 = vpop.permute.xlu0 %9225 }
 0x5cd   : > { %v7454_v24 = vrot.slane %v7446_v5, %v11985_v31  ;;  %v7461_v14 = vrot.slane %v7447_v8, %v11985_v31  ;;  %v9146_v26 = vpop.f32.mrb[119].mxu0  ;;  %v9228_v41 = vunpack.i.h.bf16 %v9226_v61  ;;  %v9227_v1 = vunpack.i.l.bf16 %v9226_v61 }
 0x5ce   : > { %v8222_v25 = vsel %vm3708_vm2, %v7646_v30, %v9217_v11  ;;  %v8223_v36 = vsel %vm3708_vm2, %v7714_v16, %v9218_v3 }
 0x5cf   : > { %v7478_v6 = vcombine.low %v7454_v24, %v7470_v54  ;;  %v7479_v39 = vcombine.high %v7454_v24, %v7470_v54  ;;  %v7494_v9 = vcombine.low %v7461_v14, %v7477_v33  ;;  %v7495_v42 = vcombine.high %v7461_v14, %v7477_v33  ;;  %v9221_v57 = vpop.permute.xlu1 %9220 }
 0x5d0   : > { %v9223_v49 = vunpack.i.h.bf16 %v9221_v57  ;;  %v9222_v20 = vunpack.i.l.bf16 %v9221_v57 }
 0x5d1   : > { %v7486_v35 = vrot.slane %v7478_v6, %v11986_v38  ;;  %v7493_v60 = vrot.slane %v7479_v39, %v11986_v38  ;;  %v7502_v4 = vrot.slane %v7494_v9, %v11986_v38  ;;  %v7509_v13 = vrot.slane %v7495_v42, %v11986_v38 }
 0x5d2   : > { %v6894_v23 = vpop.f32.mrb[120].mxu0  ;;  %v6940_v22 = vpop.f32.mrb[128].mxu1  ;;  %v8231_v37 = vsel %vm8230_vm4, %v8222_v25, %v9222_v20  ;;  %v8232_v45 = vsel %vm8230_vm4, %v8223_v36, %v9223_v49 }
 0x5d3   : > { %v7990_v29 = vcombine.low %v7486_v35, %v7493_v60  ;;  %v8620_v59 = vcombine.high %v7486_v35, %v7493_v60  ;;  %v8006_v53 = vcombine.low %v7502_v4, %v7509_v13  ;;  %v8621_v46 = vcombine.high %v7502_v4, %v7509_v13  ;;  %v9157_v55 = vpop.f32.mrb[121].mxu0  ;;  %v9163_v18 = vpop.f32.mrb[129].mxu1 }
 0x5d4   : > { %v6897_v30 = vpop.f32.mrb[122].mxu0  ;;  %v6943_v47 = vpop.f32.mrb[130].mxu1  ;;  %v8240_v62 = vsel %vm8239_vm5, %v8231_v37, %v9227_v1  ;;  %v8241_v52 = vsel %vm8239_vm5, %v8232_v45, %v9228_v41 }
 0x5d5   : > { %v7997_v40 = vrot.slane %v7990_v29, %v11985_v31  ;;  %v8005_v16 = vrot.slane %v8620_v59, %v11985_v31  ;;  %v8013_v19 = vrot.slane %v8006_v53, %v11985_v31  ;;  %v8021_v12 = vrot.slane %v8621_v46, %v11985_v31  ;;  %v9158_v63 = vpop.f32.mrb[123].mxu0  ;;  %v9164_v56 = vpop.f32.mrb[131].mxu1 }
 0x5d6   : > { %v8248_v58 = vpack.c.bf16 %v8241_v52, %v8240_v62 }
 0x5d7   : > { %v8022_v48 = vcombine.low %v7997_v40, %v8005_v16  ;;  %v8038_v5 = vcombine.low %v8013_v19, %v8021_v12  ;;  %v8023_v8 = vcombine.high %v7997_v40, %v8005_v16  ;;  %v8039_v51 = vcombine.high %v8013_v19, %v8021_v12 }
 0x5d8   : > { %9181 = vmatprep.mubr.msk.bf16.mxu0 %vm264_vm0, %v8248_v58 }
 0x5d9   : > { %v11770_v28 = vrot.slane %v8022_v48, %v11986_v38  ;;  %v11773_v54 = vrot.slane %v8038_v5, %v11986_v38  ;;  %v8037_v33 = vrot.slane %v8023_v8, %v11986_v38  ;;  %v8053_v50 = vrot.slane %v8039_v51, %v11986_v38 }
 0x5da   : > { %v6986_v24 = vpop.f32.mrb[124].mxu0  ;;  %v7032_v14 = vpop.f32.mrb[132].mxu1 }
 0x5db   : > { %v7514_v3 = vcombine.low %v6894_v23, %v6986_v24  ;;  %v7515_v11 = vcombine.high %v6894_v23, %v6986_v24  ;;  %v7530_v26 = vcombine.low %v6940_v22, %v7032_v14  ;;  %v7531_v6 = vcombine.high %v6940_v22, %v7032_v14  ;;  %v9169_v39 = vpop.f32.mrb[125].mxu0  ;;  %v9175_v9 = vpop.f32.mrb[133].mxu1 }
 0x5dc   : > { %v6989_v42 = vpop.f32.mrb[126].mxu0  ;;  %v7035_v57 = vpop.f32.mrb[134].mxu1  ;;  %v8055_v35 = vcombine.high %v11770_v28, %v11773_v54  ;;  %v8056_v60 = vcombine.low %v8037_v33, %v8053_v50  ;;  %v8057_v4 = vcombine.high %v8037_v33, %v8053_v50  ;;  %v8054_v13 = vcombine.low %v11770_v28, %v11773_v54  ;;  %v8624_v28 = vld [vmem:[%s11869_s4] ss:$0 sm:$0xff] }
 0x5dd   : > { %v7522_v61 = vrot.slane %v7514_v3, %v11985_v31  ;;  %v7529_v25 = vrot.slane %v7515_v11, %v11985_v31  ;;  %v7538_v36 = vrot.slane %v7530_v26, %v11985_v31  ;;  %v7545_v49 = vrot.slane %v7531_v6, %v11985_v31  ;;  %v9170_v20 = vpop.f32.mrb[127].mxu0  ;;  %v9176_v23 = vpop.f32.mrb[135].mxu1 }
 0x5df   : > { %v7546_v22 = vcombine.low %v7522_v61, %v7538_v36  ;;  %v7547_v29 = vcombine.high %v7522_v61, %v7538_v36  ;;  %v7562_v59 = vcombine.low %v7529_v25, %v7545_v49  ;;  %v7563_v53 = vcombine.high %v7529_v25, %v7545_v49 }
 0x5e1   : > { %v7554_v46 = vrot.slane %v7546_v22, %v11986_v38  ;;  %v7561_v55 = vrot.slane %v7547_v29, %v11986_v38  ;;  %v7570_v18 = vrot.slane %v7562_v59, %v11986_v38  ;;  %v7577_v41 = vrot.slane %v7563_v53, %v11986_v38 }
 0x5e3   : > { %v8058_v1 = vcombine.low %v7554_v46, %v7561_v55  ;;  %v8622_v37 = vcombine.high %v7554_v46, %v7561_v55  ;;  %v8074_v45 = vcombine.low %v7570_v18, %v7577_v41  ;;  %v8623_v30 = vcombine.high %v7570_v18, %v7577_v41 }
 0x5e5   : > { %v8065_v47 = vrot.slane %v8058_v1, %v11985_v31  ;;  %v8073_v40 = vrot.slane %v8622_v37, %v11985_v31  ;;  %v8081_v16 = vrot.slane %v8074_v45, %v11985_v31  ;;  %v8089_v19 = vrot.slane %v8623_v30, %v11985_v31 }
 0x5e7   : > { %v8090_v12 = vcombine.low %v8065_v47, %v8073_v40  ;;  %v8106_v63 = vcombine.low %v8081_v16, %v8089_v19  ;;  %v8091_v56 = vcombine.high %v8065_v47, %v8073_v40  ;;  %v8107_v62 = vcombine.high %v8081_v16, %v8089_v19 }
 0x5e9   : > { %v8098_v52 = vrot.slane %v8090_v12, %v11986_v38  ;;  %v8114_v58 = vrot.slane %v8106_v63, %v11986_v38  ;;  %v8105_v48 = vrot.slane %v8091_v56, %v11986_v38  ;;  %v8121_v5 = vrot.slane %v8107_v62, %v11986_v38 }
 0x5eb   : > { %v8123_v8 = vcombine.high %v8098_v52, %v8114_v58  ;;  %v8124_v51 = vcombine.low %v8105_v48, %v8121_v5  ;;  %v8125_v33 = vcombine.high %v8105_v48, %v8121_v5  ;;  %v8122_v24 = vcombine.low %v8098_v52, %v8114_v58 }
 0x5ed   : > { %v9254_v14 = vpack.i.bf16 %v8123_v8, %v8055_v35  ;;  %v9259_v50 = vpack.i.bf16 %v8124_v51, %v8056_v60  ;;  %v9269_v3 = vpack.i.bf16 %v8125_v33, %v8057_v4 }
 0x5ef   : > { %9255 = vrot.lane.b32.xlu1 %v9254_v14, %s9457_s12  ;;  %v9236_v31 = vpop.permute.xlu1 %9235 }
 0x5f0   : > { %v9231_v11 = vpop.permute.xlu0 %9230  ;;  %v9238_v39 = vunpack.i.h.bf16 %v9236_v31  ;;  %v9237_v9 = vunpack.i.l.bf16 %v9236_v31 }
 0x5f1   : > { %v9233_v26 = vunpack.i.h.bf16 %v9231_v11  ;;  %v9232_v6 = vunpack.i.l.bf16 %v9231_v11 }
 0x5f3   : > { %9260 = vrot.lane.b32.xlu1 %v9259_v50, %s9458_s13  ;;  %v8224_v38 = vsel %vm3708_vm2, %v7782_v32, %v9232_v6  ;;  %v8225_v42 = vsel %vm3708_vm2, %v7850_v7, %v9233_v26  ;;  %v9241_v57 = vpop.permute.xlu1 %9240 }
 0x5f4   : > { %v9243_v35 = vunpack.i.h.bf16 %v9241_v57  ;;  %v9242_v60 = vunpack.i.l.bf16 %v9241_v57  ;;  %v8233_v4 = vsel %vm8230_vm4, %v8224_v38, %v9237_v9  ;;  %v8234_v61 = vsel %vm8230_vm4, %v8225_v42, %v9238_v39 }
 0x5f6   : > { %v8242_v25 = vsel %vm8239_vm5, %v8233_v4, %v9242_v60  ;;  %v8243_v17 = vsel %vm8239_vm5, %v8234_v61, %v9243_v35 }
 0x5f7   : > { %9270 = vrot.lane.b32.xlu1 %v9269_v3, %s9456_s11  ;;  %v8249_v44 = vpack.c.bf16 %v8243_v17, %v8242_v25 }
 0x5f9   : > { %9182 = vmatmul.mubr.msk.bf16.vlgmr.msra.gmra.mrb[128].mxu0 %vm264_vm0, %v8249_v44 }
 0x614   : > { %v9246_v32 = vpop.permute.xlu0 %9245 }
 0x615   : > { %v9248_v21 = vunpack.i.h.bf16 %v9246_v32  ;;  %v9247_v7 = vunpack.i.l.bf16 %v9246_v32 }
 0x617   : > { %v8226_v23 = vsel %vm3708_vm2, %v7918_v27, %v9247_v7  ;;  %v8227_v22 = vsel %vm3708_vm2, %v7986_v0, %v9248_v21 }
 0x618   : > { %v9251_v15 = vpop.permute.xlu0 %9250 }
 0x619   : > { %v9253_v36 = vunpack.i.h.bf16 %v9251_v15  ;;  %v9252_v49 = vunpack.i.l.bf16 %v9251_v15 }
 0x61b   : > { %v8235_v53 = vsel %vm8230_vm4, %v8226_v23, %v9252_v49  ;;  %v8236_v46 = vsel %vm8230_vm4, %v8227_v22, %v9253_v36 }
 0x61c   : > { %v9266_v20 = vpop.permute.xlu0 %9265 }
 0x61d   : > { %v9268_v29 = vunpack.i.h.bf16 %v9266_v20  ;;  %v9267_v59 = vunpack.i.l.bf16 %v9266_v20 }
 0x61f   : > { %v8244_v55 = vsel %vm8239_vm5, %v8235_v53, %v9267_v59  ;;  %v8245_v18 = vsel %vm8239_vm5, %v8236_v46, %v9268_v29 }
 0x620   : > { %v8250_v41 = vpack.c.bf16 %v8245_v18, %v8244_v55 }
 0x622   : > { %9185 = vmatprep.mubr.msk.bf16.mxu0 %vm264_vm0, %v8250_v41 }
 0x661   : > { %v9256_v34 = vpop.permute.xlu1 %9255 }
 0x662   : > { %v9258_v27 = vunpack.i.h.bf16 %v9256_v34  ;;  %v9257_v1 = vunpack.i.l.bf16 %v9256_v34 }
 0x664   : > { %v8228_v37 = vsel %vm3708_vm2, %v8054_v13, %v9257_v1  ;;  %v8229_v45 = vsel %vm3708_vm2, %v8122_v24, %v9258_v27 }
 0x665   : > { %v9261_v43 = vpop.permute.xlu1 %9260 }
 0x666   : > { %v9263_v2 = vunpack.i.h.bf16 %v9261_v43  ;;  %v9262_v10 = vunpack.i.l.bf16 %v9261_v43 }
 0x668   : > { %v8237_v40 = vsel %vm8230_vm4, %v8228_v37, %v9262_v10  ;;  %v8238_v16 = vsel %vm8230_vm4, %v8229_v45, %v9263_v2 }
 0x669   : > { %v9271_v0 = vpop.permute.xlu1 %9270 }
 0x66a   : > { %v9273_v30 = vunpack.i.h.bf16 %v9271_v0  ;;  %v9272_v47 = vunpack.i.l.bf16 %v9271_v0 }
 0x66c   : > { %v8246_v19 = vsel %vm8239_vm5, %v8237_v40, %v9272_v47  ;;  %v8247_v12 = vsel %vm8239_vm5, %v8238_v16, %v9273_v30 }
 0x66d   : > { %v8251_v63 = vpack.c.bf16 %v8247_v12, %v8246_v19 }
 0x66f   : > { %9186 = vmatmul.mubr.msk.bf16.gmra.mrb[132].mxu0 %vm264_vm0, %v8251_v63 }
 0x6cc   : > { %v9183_v54 = vpop.f32.mrb[128].mxu0 }
 0x6cd   : > { %v8330_v13 = vadd.f32 %v9183_v54, %v8624_v28  ;;  %v8321_v56 = vpop.f32.mrb[129].mxu0 }
 0x6ce   : > { %v8322_v62 = vadd.f32 %v8624_v28, %v8321_v56  ;;  %v9184_v52 = vpop.f32.mrb[130].mxu0 }
 0x6cf   : > { %v8633_v58 = vmul.f32 -1.702, %v8330_v13  ;;  %v8333_v48 = vadd.f32 %v9184_v52, %v8624_v28  ;;  %v8324_v5 = vpop.f32.mrb[131].mxu0 }
 0x6d0   : > { %v8631_v8 = vmul.f32 -1.702, %v8322_v62  ;;  %v8325_v51 = vadd.f32 %v8624_v28, %v8324_v5 }
 0x6d1   : > { %v8372_v33 = vmul.f32 1.442695, %v8633_v58  ;;  %v8634_v24 = vmul.f32 -1.702, %v8333_v48 }
 0x6d2   : > { %v8368_v14 = vmul.f32 1.442695, %v8631_v8  ;;  %v8632_v50 = vmul.f32 -1.702, %v8325_v51 }
 0x6d3   : > { %9406 = vpow2.f32 %v8372_v33  ;;  %v8374_v3 = vmul.f32 1.442695, %v8634_v24 }
 0x6d4   : > { %9408 = vpow2.f32 %v8368_v14  ;;  %v8370_v31 = vmul.f32 1.442695, %v8632_v50 }
 0x6d5   : > { %9410 = vpow2.f32 %v8374_v3 }
 0x6d6   : > { %9412 = vpow2.f32 %v8370_v31 }
 0x6dd   : > { %v9407_v11 = vpop.eup %9406 }
 0x6de   : > { %v9409_v26 = vpop.eup %9408  ;;  %v8386_v6 = vadd.f32 1.0, %v9407_v11 }
 0x6df   : > { %v9411_v39 = vpop.eup %9410  ;;  %v8384_v9 = vadd.f32 1.0, %v9409_v26 }
 0x6e0   : > { %v9413_v38 = vpop.eup %9412  ;;  %9414 = vrcp.f32 %v8386_v6  ;;  %v8387_v42 = vadd.f32 1.0, %v9411_v39 }
 0x6e1   : > { %9416 = vrcp.f32 %v8384_v9  ;;  %v8385_v57 = vadd.f32 1.0, %v9413_v38 }
 0x6e2   : > { %9418 = vrcp.f32 %v8387_v42 }
 0x6e3   : > { %9420 = vrcp.f32 %v8385_v57 }
 0x6ea   : > { %v9415_v35 = vpop.eup %9414 }
 0x6eb   : > { %v9417_v60 = vpop.eup %9416  ;;  %v8410_v4 = vmul.f32 %v9415_v35, %v8330_v13 }
 0x6ec   : > { %v9419_v61 = vpop.eup %9418  ;;  %v8408_v25 = vmul.f32 %v9417_v60, %v8322_v62 }
 0x6ed   : > { %v9421_v17 = vpop.eup %9420  ;;  %8418 = vst.msk [vmem:[%s11844_s24 + $0x10] sm:$0xff] %vm264_vm0, %v8410_v4  ;;  %v8411_v44 = vmul.f32 %v9419_v61, %v8333_v48 }
 0x6ee   : > { %8416 = vst.msk [vmem:[%s11844_s24] sm:$0xff] %vm264_vm0, %v8408_v25  ;;  %v8409_v32 = vmul.f32 %v9421_v17, %v8325_v51 }
 0x6ef   : > { %8419 = vst.msk [vmem:[%s11844_s24 + $0x18] sm:$0xff] %vm264_vm0, %v8411_v44 }
 0x6f0   : > { %8417 = vst.msk [vmem:[%s11844_s24 + $0x8] sm:$0xff] %vm264_vm0, %v8409_v32 }
 0x742   : > { %v9187_v15 = vpop.f32.mrb[132].mxu0 }
 0x743   : > { %v8346_v21 = vadd.f32 %v9187_v15, %v8624_v28  ;;  %v8337_v7 = vpop.f32.mrb[133].mxu0 }
 0x744   : > { %v8338_v36 = vadd.f32 %v8624_v28, %v8337_v7  ;;  %v9188_v49 = vpop.f32.mrb[134].mxu0 }
 0x745   : > { %v8637_v20 = vmul.f32 -1.702, %v8346_v21  ;;  %v8349_v23 = vadd.f32 %v9188_v49, %v8624_v28  ;;  %v8340_v22 = vpop.f32.mrb[135].mxu0 }
 0x746   : > { %v8635_v29 = vmul.f32 -1.702, %v8338_v36  ;;  %v8341_v59 = vadd.f32 %v8624_v28, %v8340_v22 }
 0x747   : > { %v8380_v53 = vmul.f32 1.442695, %v8637_v20  ;;  %v8638_v46 = vmul.f32 -1.702, %v8349_v23 }
 0x748   : > { %v8376_v55 = vmul.f32 1.442695, %v8635_v29  ;;  %v8636_v18 = vmul.f32 -1.702, %v8341_v59 }
 0x749   : > { %9422 = vpow2.f32 %v8380_v53  ;;  %v8382_v41 = vmul.f32 1.442695, %v8638_v46 }
 0x74a   : > { %9424 = vpow2.f32 %v8376_v55  ;;  %v8378_v34 = vmul.f32 1.442695, %v8636_v18 }
 0x74b   : > { %9426 = vpow2.f32 %v8382_v41 }
 0x74c   : > { %9428 = vpow2.f32 %v8378_v34 }
 0x753   : > { %v9423_v43 = vpop.eup %9422 }
 0x754   : > { %v9425_v27 = vpop.eup %9424  ;;  %v8390_v1 = vadd.f32 1.0, %v9423_v43 }
 0x755   : > { %v9427_v2 = vpop.eup %9426  ;;  %v8388_v10 = vadd.f32 1.0, %v9425_v27 }
 0x756   : > { %v9429_v0 = vpop.eup %9428  ;;  %9430 = vrcp.f32 %v8390_v1  ;;  %v8391_v37 = vadd.f32 1.0, %v9427_v2 }
 0x757   : > { %9432 = vrcp.f32 %v8388_v10  ;;  %v8389_v45 = vadd.f32 1.0, %v9429_v0 }
 0x758   : > { %9434 = vrcp.f32 %v8391_v37 }
 0x759   : > { %9436 = vrcp.f32 %v8389_v45 }
 0x760   : > { %v9431_v30 = vpop.eup %9430 }
 0x761   : > { %v9433_v47 = vpop.eup %9432  ;;  %v8414_v40 = vmul.f32 %v9431_v30, %v8346_v21 }
 0x762   : > { %v9435_v16 = vpop.eup %9434  ;;  %v8412_v19 = vmul.f32 %v9433_v47, %v8338_v36 }
 0x763   : > { %v9437_v12 = vpop.eup %9436  ;;  %8422 = vst.msk [vmem:[%s11844_s24 + $0x30] sm:$0xff] %vm264_vm0, %v8414_v40  ;;  %v8415_v63 = vmul.f32 %v9435_v16, %v8349_v23 }
 0x764   : > { %8420 = vst.msk [vmem:[%s11844_s24 + $0x20] sm:$0xff] %vm264_vm0, %v8412_v19  ;;  %v8413_v28 = vmul.f32 %v9437_v12, %v8341_v59 }
 0x765   : > { %8423 = vst.msk [vmem:[%s11844_s24 + $0x38] sm:$0xff] %vm264_vm0, %v8415_v63 }
 0x766   : > { %8421 = vst.msk [vmem:[%s11844_s24 + $0x28] sm:$0xff] %vm264_vm0, %v8413_v28 }
 0x767 PF: > { %s15_s18 = sadd.s32 1, %s9444_s18  }
 0x768   : > { %p12_p4 = scmp.ge.s32.totalorder %s15_s18, 6  }
 0x76a   :  { %14 = sbr.rel (!%p12_p4) target bundleno = 1 (0x1), region = 70 }

// kernel: tpu_custom_call.1
= control target key start
LH: loop header
LB: loop body
LE: loop exit
PB: predicated region body
PF: predicated region fallthrough
CT: control target
= control target key end

     0   :  { %s9489_s18 = smov 0   ;;  %s11865_s0 = inlined_call_operand.vmem [shape: f32[256,32], index: 0, kind: input, shape index: {}]   ;;  %s11866_s1 = inlined_call_operand.vmem [shape: bf16[32,96], index: 1, kind: input, shape index: {}]   ;;  %s11867_s2 = inlined_call_operand.vmem [shape: f32[1,96], index: 2, kind: input, shape index: {}]   ;;  %s11868_s3 = inlined_call_operand.vmem [shape: bf16[32,32], index: 3, kind: input, shape index: {}]   ;;  %s11869_s4 = inlined_call_operand.vmem [shape: f32[1,32], index: 4, kind: input, shape index: {}]   ;;  %s11870_s5 = inlined_call_operand.vmem [shape: f32[256,32], index: 5, kind: output, shape index: {}]  }
   0x1 LB: > { %s8480_s19 = sadd.s32 4294967295, %s9444_s18   ;;  %p8484_p0 = scmp.ge.s32.totalorder %s9444_s18, 1  ;;  %s9444_s18 = sphi %s9489_s18, %s15_s18  }
   0x2   : > { %p188_p1 = scmp.lt.s32.totalorder %s9444_s18, 5 }
   0x4   : > { %p189_p2 = pnand %p8484_p0, %p188_p1 }
   0x6   : > { %192 = sbr.rel (%p189_p2) target bundleno = 1895 (0x767), region = 40 }
   0xd   : > { %v9274_v0 = vld [vmem:[%s11866_s1] sm:$0xff]   ;;  %s8485_s22 = sshll.u32 %s8480_s19, 3  ;;  %v9275_v1 = vld [vmem:[%s11866_s1 + $0x8] sm:$0xff]   ;;  %vm264_vm0 = vcmask 261120   ;;  %s9446_s6 = smov 104   ;;  %v11871_v41 = vmov 0.0   ;;  %v448_v48 = vlaneseq }
   0xe   : > { %p217_p3 = scmp.lt.s32.totalorder %s8485_s22, 31  ;;  %8781 = vmatprep.subr.bf16.mxu0 %v9274_v0  ;;  %9189 = vmatprep.subr.bf16.mxu1 %v9274_v0  ;;  %v8489_v15 = vld [vmem:[%s11867_s2] ss:$0 sm:$0xff]  ;;  %s9447_s7 = smov 120   ;;  %vm9451_vm1 = vmmov 0   ;;  %v11873_v60 = vmov 0  }
   0xf   : > { %8782 = vmatpush3.bf16.msra.mxu0 %v9274_v0  ;;  %9191 = vmatpush3.bf16.msra.mxu1 %v9274_v0  ;;  %s9448_s8 = smov 112   ;;  %s9449_s9 = smov 96   ;;  %v9452_v46 = vmov 1983009808   ;;  %v449_v53 = vshrl.u32 %v448_v48, 7  ;;  %v9599_v61 = vpack.i.b16 %v11873_v60, %v11873_v60  ;;  %vm3708_vm2 = vcmask 64512  }
  0x10   : > { %s11992_s22 = smov (!%p217_p3, %s8485_s22), 31  ;;  %8783 = vmatprep.subr.bf16.mxu0 %v9275_v1  ;;  %9190 = vmatprep.subr.bf16.mxu1 %v9275_v1  ;;  %v446_v47 = vunpack.c.l.s4 %v9452_v46  ;;  %v9453_v56 = vmov 1934713408   ;;  %s9455_s10 = smov 64   ;;  %vm5568_vm3 = vcmask 1043456   ;;  %vm8230_vm4 = vcmask 130048  }
  0x11   : > { %s8486_s25 = sshll.u32 %s11992_s22, 3  ;;  %v477_v57 = vunpack.c.l.s4 %v9453_v56  ;;  %11905 = vst [vmem:[#allocation4_spill] sm:$0xff] %v9599_v61  ;;  %s9456_s11 = smov 24   ;;  %vm8239_vm5 = vcmask 195584  }
  0x12   : > { %s220_s28 = scalar_lea.vmem %s11865_s0, %s8486_s25  ;;  %v447_v52 = vunpack.c.0.s8 %v446_v47  ;;  %s9457_s12 = smov 8  }
  0x13   : > { %8784 = vmatpush3.bf16.msra.mxu0 %v9275_v1  ;;  %v229_v2 = vld [vmem:[%s220_s28] sm:$0xff]  ;;  %v230_v3 = vld [vmem:[%s220_s28 + $0x8] sm:$0xff]  ;;  %v231_v4 = vld [vmem:[%s220_s28 + $0x10] sm:$0xff]  ;;  %9192 = vmatpush3.bf16.msra.mxu1 %v9275_v1  ;;  %s9458_s13 = smov 16   ;;  %s11844_s24 = scalar_lea.vmem %s11870_s5, %s8486_s25 }
  0x14   : > { %v237_v5 = vpack.c.bf16 %v230_v3, %v229_v2  ;;  %v232_v6 = vld [vmem:[%s220_s28 + $0x18] sm:$0xff]  ;;  %v233_v7 = vld [vmem:[%s220_s28 + $0x20] sm:$0xff]  ;;  %v234_v8 = vld [vmem:[%s220_s28 + $0x28] sm:$0xff]  ;;  %8793 = vmatprep.subr.bf16.mxu1 %v11871_v41  ;;  %8805 = vmatprep.subr.bf16.mxu0 %v11871_v41  ;;  %v9610_v2 = vsub.s32 %v447_v52, %v449_v53 }
  0x15   : > { %v238_v9 = vpack.c.bf16 %v232_v6, %v231_v4  ;;  %v239_v10 = vpack.c.bf16 %v234_v8, %v233_v7  ;;  %v235_v11 = vld [vmem:[%s220_s28 + $0x30] sm:$0xff]  ;;  %v236_v12 = vld [vmem:[%s220_s28 + $0x38] sm:$0xff]  ;;  %v478_v6 = vunpack.c.0.s8 %v477_v57 }
  0x16   : > { %8785 = vmatprep.mubr.msk.bf16.mxu0 %vm264_vm0, %v237_v5  ;;  %v240_v13 = vpack.c.bf16 %v236_v12, %v235_v11  ;;  %11907 = vst [vmem:[#allocation6_spill] sm:$0xff] %v9610_v2 }
  0x17   : > { %8786 = vmatmul.mubr.msk.bf16.vlgmr.msra.gmra.mrb[0].mxu0 %vm264_vm0, %v238_v9  ;;  %8789 = vmatprep.mubr.msk.bf16.mxu1 %vm264_vm0, %v239_v10 }
  0x18   : > { %8790 = vmatmul.mubr.msk.bf16.vlgmr.msra.gmra.mrb[0].mxu1 %vm264_vm0, %v240_v13  ;;  %8807 = vmatprep.mubr.msk.bf16.mxu0 %vm9451_vm1, %v11871_v41 }
  0x19   : > { %8795 = vmatprep.mubr.msk.bf16.mxu1 %vm9451_vm1, %v11871_v41 }
  0xea   : > { %v8787_v14 = vpop.f32.mrb[0].mxu0 }
  0xeb   : > { %v311_v16 = vpop.f32.mrb[1].mxu0  ;;  %v8791_v17 = vpop.f32.mrb[0].mxu1  ;;  %v320_v21 = vadd.f32 %v8787_v14, %v8489_v15 }
  0xec   : > { %v8788_v18 = vpop.f32.mrb[2].mxu0  ;;  %v336_v19 = vadd.f32 %v8791_v17, %v8489_v15  ;;  %v327_v20 = vpop.f32.mrb[1].mxu1  ;;  %v312_v26 = vadd.f32 %v8489_v15, %v311_v16 }
  0xed   : > { %v323_v22 = vadd.f32 %v8788_v18, %v8489_v15  ;;  %v314_v23 = vpop.f32.mrb[3].mxu0  ;;  %v328_v24 = vadd.f32 %v8489_v15, %v327_v20  ;;  %v8792_v25 = vpop.f32.mrb[2].mxu1  ;;  %v9627_v18 = vsub.s32 %v478_v6, %v449_v53 }
  0xee   : > { %v315_v27 = vadd.f32 %v8489_v15, %v314_v23  ;;  %v339_v28 = vadd.f32 %v8792_v25, %v8489_v15  ;;  %v330_v29 = vpop.f32.mrb[3].mxu1 }
  0xef   : > { %v9518_v30 = vpack.c.bf16 %v323_v22, %v320_v21  ;;  %v331_v31 = vadd.f32 %v8489_v15, %v330_v29  ;;  %11908 = vst [vmem:[#allocation7_spill] sm:$0xff] %v9627_v18 }
  0xf0   : > { %v9520_v32 = vpack.c.bf16 %v315_v27, %v312_v26  ;;  %v9522_v33 = vpack.c.bf16 %v339_v28, %v336_v19 }
  0xf1   : > { %v9524_v34 = vpack.c.bf16 %v331_v31, %v328_v24  ;;  %v400_v13 = vshrl.u32 %v9518_v30, 16 }
  0xf2   : > { %11903 = vst [vmem:[#allocation2_spill] sm:$0xff] %v9522_v33  ;;  %366 = vrot.lane.b32.xlu1 %v9520_v32, %s9446_s6  ;;  %350 = vrot.lane.b32.xlu0 %v9520_v32, %s9447_s7  ;;  %v378_v55 = vshrl.u32 %v9520_v32, 16 }
  0xf6   : > { %352 = vrot.lane.b32.xlu1 %v9518_v30, %s9447_s7  ;;  %358 = vrot.lane.b32.xlu0 %v9520_v32, %s9448_s8 }
  0xfa   : > { %368 = vrot.lane.b32.xlu1 %v9518_v30, %s9446_s6  ;;  %360 = vrot.lane.b32.xlu0 %v9518_v30, %s9448_s8 }
  0xfe   : > { %1468 = vrot.lane.b32.xlu0 %v9520_v32, %s9449_s9 }
 0x164   : > { %v9534_v35 = vpop.permute.xlu0 %350  ;;  %v9538_v36 = vpop.permute.xlu1 %366 }
 0x165   : > { %1476 = vrot.lane.b32.xlu1 %v9534_v35, %s9449_s9  ;;  %v379_v51 = vshrl.u32 %v9534_v35, 16  ;;  %v376_v62 = vpack.i.b16 %v9534_v35, %v9520_v32  ;;  %v387_v0 = vshrl.u32 %v9538_v36, 16 }
 0x167   : > { %v380_v1 = vpack.i.b16 %v379_v51, %v378_v55  ;;  %v444_v9 = vcombine.high %v376_v62, %v9599_v61  ;;  %v451_v14 = vrot.slane %v376_v62, %v9610_v2 }
 0x168   : > { %v9540_v37 = vpop.permute.xlu0 %358  ;;  %v9551_v38 = vpop.permute.xlu1 %352 }
 0x169   : > { %1492 = vrot.lane.b32.xlu1 %v9538_v36, %s9449_s9  ;;  %1484 = vrot.lane.b32.xlu0 %v9540_v37, %s9449_s9  ;;  %v384_v54 = vpack.i.b16 %v9538_v36, %v9540_v37  ;;  %v386_v58 = vshrl.u32 %v9540_v37, 16  ;;  %v398_v4 = vpack.i.b16 %v9551_v38, %v9518_v30  ;;  %v401_v5 = vshrl.u32 %v9551_v38, 16 }
 0x16a   : > { %v510_v12 = vcombine.high %v380_v1, %v9599_v61  ;;  %v458_v21 = vrot.slane %v444_v9, %v9610_v2  ;;  %v517_v26 = vrot.slane %v380_v1, %v9610_v2 }
 0x16b   : > { %v459_v3 = vcombine.high %v384_v54, %v9599_v61  ;;  %v388_v7 = vpack.i.b16 %v387_v0, %v386_v58  ;;  %v466_v10 = vrot.slane %v384_v54, %v9610_v2  ;;  %v402_v16 = vpack.i.b16 %v401_v5, %v400_v13 }
 0x16c   : > { %v9553_v39 = vpop.permute.xlu0 %360  ;;  %v9559_v40 = vpop.permute.xlu1 %368  ;;  %v576_v17 = vcombine.high %v398_v4, %v9599_v61  ;;  %v524_v27 = vrot.slane %v510_v12, %v9610_v2  ;;  %v9642_v28 = vrot.slane %v398_v4, %v9610_v2 }
 0x16d   : > { %362 = vrot.lane.b32.xlu1 %v9524_v34, %s9448_s8  ;;  %354 = vrot.lane.b32.xlu0 %v9524_v34, %s9447_s7  ;;  %v473_v15 = vrot.slane %v459_v3, %v9610_v2  ;;  %v525_v19 = vcombine.high %v388_v7, %v9599_v61  ;;  %v474_v22 = vcombine.low %v451_v14, %v466_v10  ;;  %v409_v47 = vshrl.u32 %v9559_v40, 16 }
 0x16e   : > { %v532_v23 = vrot.slane %v388_v7, %v9610_v2  ;;  %v475_v29 = vcombine.high %v451_v14, %v466_v10  ;;  %v408_v48 = vshrl.u32 %v9553_v39, 16  ;;  %v9647_v51 = vrot.slane %v576_v17, %v9610_v2 }
 0x16f   : > { %v490_v31 = vcombine.low %v458_v21, %v473_v15  ;;  %v491_v46 = vcombine.high %v458_v21, %v473_v15  ;;  %v642_v52 = vcombine.high %v402_v16, %v9599_v61  ;;  %v539_v53 = vrot.slane %v525_v19, %v9610_v2 }
 0x170   : > { %v9576_v43 = vpop.permute.xlu0 %1468  ;;  %v482_v56 = vrot.slane %v474_v22, %v9627_v18  ;;  %v540_v57 = vcombine.low %v517_v26, %v532_v23  ;;  %v541_v58 = vcombine.high %v517_v26, %v532_v23  ;;  %v406_v62 = vpack.i.b16 %v9559_v40, %v9553_v39 }
 0x171   : > { %1470 = vrot.lane.b32.xlu1 %v9518_v30, %s9449_s9  ;;  %370 = vrot.lane.b32.xlu0 %v9524_v34, %s9446_s6  ;;  %v489_v1 = vrot.slane %v475_v29, %v9627_v18  ;;  %v9670_v6 = vrot.slane %v402_v16, %v9610_v2  ;;  %v9673_v7 = vrot.slane %v490_v31, %v9627_v18  ;;  %v1504_v21 = vshrl.u32 %v9576_v43, 16 }
 0x172   : > { %v9676_v9 = vrot.slane %v491_v46, %v9627_v18  ;;  %v410_v10 = vpack.i.b16 %v409_v47, %v408_v48  ;;  %v9679_v12 = vrot.slane %v642_v52, %v9610_v2  ;;  %v556_v13 = vcombine.low %v524_v27, %v539_v53 }
 0x173   : > { %v9684_v14 = vrot.slane %v540_v57, %v9627_v18  ;;  %v9687_v15 = vrot.slane %v541_v58, %v9627_v18  ;;  %v557_v16 = vcombine.high %v524_v27, %v539_v53  ;;  %v598_v17 = vrot.slane %v406_v62, %v9610_v2 }
 0x174   : > { %v972_v19 = vcombine.low %v482_v56, %v489_v1  ;;  %v8496_v23 = vcombine.high %v482_v56, %v489_v1  ;;  %v1022_v26 = vcombine.low %v9673_v7, %v9676_v9  ;;  %v8498_v27 = vcombine.high %v9673_v7, %v9676_v9 }
 0x175   : > { %1486 = vrot.lane.b32.xlu1 %v9553_v39, %s9449_s9  ;;  %1478 = vrot.lane.b32.xlu0 %v9551_v38, %s9449_s9  ;;  %v591_v29 = vcombine.high %v406_v62, %v9599_v61  ;;  %v9705_v47 = vrot.slane %v557_v16, %v9627_v18  ;;  %v8497_v48 = vcombine.high %v9684_v14, %v9687_v15 }
 0x176   : > { %v9715_v53 = vrot.slane %v972_v19, %v9610_v2  ;;  %v606_v56 = vcombine.low %v9642_v28, %v598_v17  ;;  %v9723_v62 = vrot.slane %v8496_v23, %v9610_v2  ;;  %v657_v1 = vcombine.high %v410_v10, %v9599_v61 }
 0x177   : > { %v607_v16 = vcombine.high %v9642_v28, %v598_v17 }
 0x178   : > { %v9749_v17 = vrot.slane %v657_v1, %v9610_v2 }
 0x179   : > { %356 = vrot.lane.b32.xlu1 %v9522_v33, %s9447_s7  ;;  %1494 = vrot.lane.b32.xlu0 %v9559_v40, %s9449_s9 }
 0x17d   : > { %372 = vrot.lane.b32.xlu1 %v9522_v33, %s9446_s6  ;;  %364 = vrot.lane.b32.xlu0 %v9522_v33, %s9448_s8 }
 0x181   : > { %1472 = vrot.lane.b32.xlu0 %v9524_v34, %s9449_s9 }
 0x1d7   : > { %v9574_v42 = vpop.permute.xlu1 %1476 }
 0x1d8   : > { %v1502_v3 = vpack.i.b16 %v9574_v42, %v9576_v43 }
 0x1db   : > { %v9578_v44 = vpop.permute.xlu1 %1492  ;;  %v9580_v45 = vpop.permute.xlu0 %1484 }
 0x1dc   : > { %v1510_v54 = vpack.i.b16 %v9578_v44, %v9580_v45  ;;  %v1513_v4 = vshrl.u32 %v9578_v44, 16  ;;  %v1512_v5 = vshrl.u32 %v9580_v45, 16  ;;  %v1505_v44 = vshrl.u32 %v9574_v42, 16 }
 0x1dd   : > { %v1571_v42 = vrot.slane %v1502_v3, %v9610_v2 }
 0x1de   : > { %v1586_v45 = vrot.slane %v1510_v54, %v9610_v2  ;;  %v1514_v22 = vpack.i.b16 %v1513_v4, %v1512_v5  ;;  %v1506_v31 = vpack.i.b16 %v1505_v44, %v1504_v21  ;;  %v1579_v52 = vcombine.high %v1510_v54, %v9599_v61 }
 0x1df   : > { %v9582_v49 = vpop.permute.xlu1 %362  ;;  %v9584_v50 = vpop.permute.xlu0 %354  ;;  %v605_v54 = vrot.slane %v591_v29, %v9610_v2 }
 0x1e0   : > { %11904 = vst [vmem:[#allocation3_spill] sm:$0xff] %v9584_v50  ;;  %1488 = vrot.lane.b32.xlu0 %v9582_v49, %s9449_s9  ;;  %1480 = vrot.lane.b32.xlu1 %v9584_v50, %s9449_s9  ;;  %v1594_v43 = vcombine.low %v1571_v42, %v1586_v45  ;;  %v1595_v46 = vcombine.high %v1571_v42, %v1586_v45 }
 0x1e1   : > { %v1645_v57 = vcombine.high %v1514_v22, %v9599_v61  ;;  %v1652_v58 = vrot.slane %v1514_v22, %v9610_v2  ;;  %v1630_v4 = vcombine.high %v1506_v31, %v9599_v61  ;;  %v1637_v5 = vrot.slane %v1506_v31, %v9610_v2 }
 0x1e2   : > { %v1609_v44 = vrot.slane %v1595_v46, %v9627_v18  ;;  %v1593_v19 = vrot.slane %v1579_v52, %v9610_v2  ;;  %v622_v23 = vcombine.low %v9647_v51, %v605_v54  ;;  %v623_v29 = vcombine.high %v9647_v51, %v605_v54 }
 0x1e3   : > { %v9595_v59 = vpop.permute.xlu1 %1470  ;;  %v9603_v63 = vpop.permute.xlu0 %370  ;;  %v1659_v21 = vrot.slane %v1645_v57, %v9610_v2  ;;  %v1660_v42 = vcombine.low %v1637_v5, %v1652_v58  ;;  %v1661_v22 = vcombine.high %v1637_v5, %v1652_v58  ;;  %v664_v31 = vrot.slane %v410_v10, %v9610_v2 }
 0x1e4   : > { %11906 = vst [vmem:[#allocation5_spill] sm:$0xff] %v9603_v63  ;;  %1474 = vrot.lane.b32.xlu0 %v9522_v33, %s9449_s9  ;;  %1496 = vrot.lane.b32.xlu1 %v9603_v63, %s9449_s9  ;;  %v9753_v52 = vrot.slane %v607_v16, %v9627_v18  ;;  %v988_v58 = vcombine.low %v9715_v53, %v9723_v62 }
 0x1e5   : > { %v1668_v51 = vrot.slane %v1660_v42, %v9627_v18  ;;  %v1675_v10 = vrot.slane %v1661_v22, %v9627_v18  ;;  %v672_v5 = vcombine.low %v9670_v6, %v664_v31 }
 0x1e7   : > { %v9616_v8 = vpop.permute.xlu1 %1486  ;;  %v9620_v11 = vpop.permute.xlu0 %1478 }
 0x1e8   : > { %v1528_v22 = vshrl.u32 %v9616_v8, 16 }
 0x1eb   : > { %v9630_v20 = vpop.permute.xlu1 %356  ;;  %v9635_v25 = vpop.permute.xlu0 %1494 }
 0x1ec   : > { %11909 = vst [vmem:[#allocation8_spill] sm:$0xff] %v9630_v20  ;;  %1482 = vrot.lane.b32.xlu1 %v9630_v20, %s9449_s9 }
 0x1ef   : > { %v9653_v55 = vpop.permute.xlu1 %372  ;;  %v9658_v0 = vpop.permute.xlu0 %364 }
 0x1f0   : > { %11910 = vst [vmem:[#allocation9_spill] sm:$0xff] %v9653_v55  ;;  %11911 = vst [vmem:[#allocation10_spill] sm:$0xff] %v9658_v0  ;;  %1498 = vrot.lane.b32.xlu1 %v9653_v55, %s9449_s9  ;;  %1490 = vrot.lane.b32.xlu0 %v9658_v0, %s9449_s9 }
 0x1f4   : > { %2588 = vrot.lane.b32.xlu1 %v9520_v32, %s9455_s10  ;;  %2598 = vrot.lane.b32.xlu0 %v9551_v38, %s9455_s10  ;;  %v9702_v32 = vrot.slane %v556_v13, %v9627_v18  ;;  %v997_v38 = vcombine.low %v9684_v14, %v9687_v15  ;;  %v1602_v13 = vrot.slane %v1594_v43, %v9627_v18 }
 0x1f5   : > { %v9810_v14 = vrot.slane %v672_v5, %v9627_v18 }
 0x1f6   : > { %v8499_v45 = vcombine.high %v9702_v32, %v9705_v47  ;;  %v2092_v43 = vcombine.low %v1602_v13, %v1609_v44  ;;  %v8512_v46 = vcombine.high %v1602_v13, %v1609_v44  ;;  %v1529_v13 = vshrl.u32 %v9635_v25, 16 }
 0x1f7   : > { %v673_v44 = vcombine.high %v9670_v6, %v664_v31  ;;  %v2117_v31 = vcombine.low %v1668_v51, %v1675_v10 }
 0x1f8   : > { %2590 = vrot.lane.b32.xlu1 %v9518_v30, %s9455_s10  ;;  %2596 = vrot.lane.b32.xlu0 %v9534_v35, %s9455_s10  ;;  %v1564_v30 = vcombine.high %v1502_v3, %v9599_v61  ;;  %v1047_v35 = vcombine.low %v9702_v32, %v9705_v47  ;;  %v9741_v3 = vrot.slane %v606_v56, %v9627_v18 }
 0x1f9   : > { %v2099_v16 = vrot.slane %v2092_v43, %v9610_v2  ;;  %v9813_v15 = vrot.slane %v673_v44, %v9627_v18  ;;  %v1062_v9 = vrot.slane %v8499_v45, %v9610_v2 }
 0x1fa   : > { %v1578_v28 = vrot.slane %v1564_v30, %v9610_v2  ;;  %v9762_v30 = vrot.slane %v622_v23, %v9627_v18  ;;  %v1521_v23 = vshrl.u32 %v9620_v11, 16  ;;  %v1072_v43 = vcombine.low %v9741_v3, %v9753_v52 }
 0x1fb   : > { %v1097_v62 = vcombine.low %v9810_v14, %v9813_v15  ;;  %v1054_v7 = vrot.slane %v1047_v35, %v9610_v2 }
 0x1fc   : > { %2606 = vrot.lane.b32.xlu1 %v9553_v39, %s9455_s10  ;;  %v1644_v39 = vrot.slane %v1630_v4, %v9610_v2  ;;  %v1610_v56 = vcombine.low %v1578_v28, %v1593_v19  ;;  %v1611_v57 = vcombine.high %v1578_v28, %v1593_v19  ;;  %v9765_v4 = vrot.slane %v623_v29, %v9627_v18 }
 0x1fd   : > { %v2107_v19 = vrot.slane %v8512_v46, %v9610_v2  ;;  %v8513_v28 = vcombine.high %v1668_v51, %v1675_v10  ;;  %v1520_v46 = vshrl.u32 %v9595_v59, 16  ;;  %v1012_v51 = vrot.slane %v8497_v48, %v9610_v2 }
 0x1fe   : > { %v1676_v54 = vcombine.low %v1644_v39, %v1659_v21  ;;  %v1677_v1 = vcombine.high %v1644_v39, %v1659_v21  ;;  %v1618_v21 = vrot.slane %v1610_v56, %v9627_v18  ;;  %v1625_v42 = vrot.slane %v1611_v57, %v9627_v18 }
 0x1ff   : > { %v9787_v56 = vpack.i.b16 %v1529_v13, %v1528_v22  ;;  %v8500_v57 = vcombine.high %v9741_v3, %v9753_v52  ;;  %v2108_v24 = vcombine.low %v2099_v16, %v2107_v19  ;;  %v9799_v39 = vpack.i.b16 %v1521_v23, %v1520_v46 }
 0x200   : > { %2614 = vrot.lane.b32.xlu1 %v9559_v40, %s9455_s10  ;;  %v688_v40 = vcombine.low %v9679_v12, %v9749_v17  ;;  %v1684_v6 = vrot.slane %v1676_v54, %v9627_v18  ;;  %v1691_v29 = vrot.slane %v1677_v1, %v9627_v18  ;;  %v1004_v54 = vrot.slane %v997_v38, %v9610_v2 }
 0x201   : > { %v2142_v10 = vcombine.low %v1618_v21, %v1625_v42  ;;  %v8514_v1 = vcombine.high %v1618_v21, %v1625_v42  ;;  %v9803_v13 = vpack.i.b16 %v9635_v25, %v9616_v8  ;;  %v2124_v38 = vrot.slane %v2117_v31, %v9610_v2 }
 0x202   : > { %v2167_v16 = vcombine.low %v1684_v6, %v1691_v29  ;;  %v8515_v19 = vcombine.high %v1684_v6, %v1691_v29  ;;  %v2132_v22 = vrot.slane %v8513_v28, %v9610_v2  ;;  %v9817_v48 = vpack.i.b16 %v9620_v11, %v9595_v59 }
 0x203   : > { %v1784_v8 = vrot.slane %v9787_v56, %v9610_v2  ;;  %v1122_v25 = vcombine.low %v9762_v30, %v9765_v4  ;;  %v2115_v21 = vrot.slane %v2108_v24, %v9627_v18  ;;  %v1769_v44 = vrot.slane %v9799_v39, %v9610_v2 }
 0x204   : > { %2592 = vrot.lane.b32.xlu1 %v9524_v34, %s9455_s10  ;;  %v2133_v5 = vcombine.low %v2124_v38, %v2132_v22  ;;  %v1718_v42 = vrot.slane %v9803_v13, %v9610_v2  ;;  %v1013_v59 = vcombine.low %v1004_v54, %v1012_v51  ;;  %v2149_v11 = vrot.slane %v2142_v10, %v9610_v2 }
 0x205   : > { %v2157_v23 = vrot.slane %v8514_v1, %v9610_v2  ;;  %v2174_v6 = vrot.slane %v2167_v16, %v9610_v2  ;;  %v2182_v24 = vrot.slane %v8515_v19, %v9610_v2  ;;  %v1703_v29 = vrot.slane %v9817_v48, %v9610_v2 }
 0x206   : > { %v1792_v31 = vcombine.low %v1769_v44, %v1784_v8  ;;  %v1793_v28 = vcombine.high %v1769_v44, %v1784_v8  ;;  %v9841_v54 = vcombine.high %v2115_v21, %v11873_v60  ;;  %v9847_v10 = vrot.slane %v1072_v43, %v9610_v2 }
 0x207   : > { %v2183_v51 = vcombine.low %v2174_v6, %v2182_v24  ;;  %v1726_v1 = vcombine.low %v1703_v29, %v1718_v42  ;;  %v1727_v16 = vcombine.high %v1703_v29, %v1718_v42  ;;  %v9850_v19 = vrot.slane %v1013_v59, %v9627_v18 }
 0x208   : > { %2604 = vrot.lane.b32.xlu1 %v9540_v37, %s9455_s10  ;;  %v9822_v37 = vrot.slane %v688_v40, %v9627_v18  ;;  %v2140_v40 = vrot.slane %v2133_v5, %v9627_v18  ;;  %v2158_v5 = vcombine.low %v2149_v11, %v2157_v23  ;;  %v1800_v44 = vrot.slane %v1792_v31, %v9627_v18 }
 0x209   : > { %v9860_v43 = vrot.slane %v988_v58, %v9627_v18  ;;  %v1029_v42 = vrot.slane %v1022_v26, %v9610_v2  ;;  %v1037_v59 = vrot.slane %v8498_v27, %v9610_v2  ;;  %v1807_v11 = vrot.slane %v1793_v28, %v9627_v18 }
 0x20a   : > { %v2494_v46 = vpack.i.b16 %v2140_v40, %v2115_v21  ;;  %v2496_v8 = vshrl.u32 %v2140_v40, 16  ;;  %v2495_v23 = vshrl.u32 %v2115_v21, 16  ;;  %v9874_v53 = vrot.slane %v2183_v51, %v9627_v18 }
 0x20b   : > { %v9880_v26 = vcombine.high %v9850_v19, %v11873_v60  ;;  %v1734_v27 = vrot.slane %v1726_v1, %v9627_v18  ;;  %v1741_v58 = vrot.slane %v1727_v16, %v9627_v18  ;;  %v9894_v6 = vrot.slane %v2158_v5, %v9627_v18 }
 0x20c   : > { %2612 = vrot.lane.b32.xlu1 %v9538_v36, %s9455_s10  ;;  %v9844_v36 = vcombine.high %v2140_v40, %v11873_v60  ;;  %v3713_v38 = vsel %vm3708_vm2, %v2494_v46, 0  ;;  %v2497_v21 = vpack.i.b16 %v2496_v8, %v2495_v23  ;;  %v8501_v24 = vcombine.high %v9810_v14, %v9813_v15 }
 0x20d   : > { %8794 = vmatpush3.bf16.xpose.msra.mxu1 %v3713_v38  ;;  %v1777_v35 = vcombine.high %v9787_v56, %v9599_v61  ;;  %v9902_v32 = vcombine.high %v9860_v43, %v11873_v60  ;;  %v1038_v47 = vcombine.low %v1029_v42, %v1037_v59  ;;  %v2217_v45 = vcombine.low %v1800_v44, %v1807_v11 }
 0x20e   : > { %v2500_v22 = vpack.i.b16 %v9844_v36, %v9841_v54  ;;  %8799 = vmatprep.subr.bf16.mxu1 %v11871_v41  ;;  %v8517_v29 = vcombine.high %v1800_v44, %v1807_v11  ;;  %v1374_v31 = vpack.i.b16 %v9850_v19, %v9860_v43  ;;  %v2506_v28 = vpack.i.b16 %v9874_v53, %v9894_v6 }
 0x20f   : > { %v1762_v46 = vcombine.high %v9799_v39, %v9599_v61  ;;  %v1711_v14 = vcombine.high %v9803_v13, %v9599_v61  ;;  %v1380_v56 = vpack.i.b16 %v9880_v26, %v9902_v32  ;;  %v1063_v15 = vcombine.low %v1054_v7, %v1062_v9 }
 0x210   : > { %v3805_v40 = vsel %vm3708_vm2, %v2500_v22, 0  ;;  %v2192_v51 = vcombine.low %v1734_v27, %v1741_v58  ;;  %v8516_v1 = vcombine.high %v1734_v27, %v1741_v58  ;;  %v3759_v16 = vsel %vm3708_vm2, %v2497_v21, 0 }
 0x211   : > { %8806 = vmatpush3.bf16.xpose.msra.mxu0 %v3805_v40  ;;  %v2502_v38 = vshrl.u32 %v9844_v36, 16  ;;  %v1696_v22 = vcombine.high %v9817_v48, %v9599_v61  ;;  %v1791_v39 = vrot.slane %v1777_v35, %v9610_v2  ;;  %v1376_v13 = vshrl.u32 %v9850_v19, 16 }
 0x212   : > { %8817 = vmatprep.subr.bf16.mxu0 %v11871_v41  ;;  %v2501_v8 = vshrl.u32 %v9841_v54, 16  ;;  %v3897_v5 = vsel %vm3708_vm2, %v2506_v28, 0  ;;  %v9929_v36 = vcombine.high %v9874_v53, %v11873_v60  ;;  %v2224_v48 = vrot.slane %v2217_v45, %v9610_v2 }
 0x213   : > { %v2232_v44 = vrot.slane %v8517_v29, %v9610_v2  ;;  %v1776_v42 = vrot.slane %v1762_v46, %v9610_v2  ;;  %v1725_v19 = vrot.slane %v1711_v14, %v9610_v2  ;;  %v1375_v54 = vshrl.u32 %v9860_v43, 16 }
 0x214   : > { %8796 = vmatmul.mubr.msk.bf16.vlgmr.msra.gmra.mrb[4].mxu1 %vm3708_vm2, %v1374_v31  ;;  %v9939_v59 = vrot.slane %v1063_v15, %v9627_v18  ;;  %v2199_v11 = vrot.slane %v2192_v51, %v9610_v2  ;;  %v2207_v40 = vrot.slane %v8516_v1, %v9610_v2  ;;  %v2503_v23 = vpack.i.b16 %v2502_v38, %v2501_v8 }
 0x215   : > { %8800 = vmatpush3.bf16.xpose.msra.mxu1 %v3759_v16  ;;  %8801 = vmatprep.mubr.msk.bf16.mxu1 %vm9451_vm1, %v11871_v41  ;;  %v9946_v7 = vcombine.high %v9894_v6, %v11873_v60  ;;  %v1087_v43 = vrot.slane %v8500_v57, %v9610_v2  ;;  %v1710_v9 = vrot.slane %v1696_v22, %v9610_v2 }
 0x216   : > { %8811 = vmatprep.subr.bf16.mxu1 %v11871_v41  ;;  %v1808_v27 = vcombine.low %v1776_v42, %v1791_v39  ;;  %v9954_v58 = vrot.slane %v1038_v47, %v9627_v18  ;;  %v1809_v21 = vcombine.high %v1776_v42, %v1791_v39  ;;  %v1377_v35 = vpack.i.b16 %v1376_v13, %v1375_v54 }
 0x217   : > { %v2512_v45 = vpack.i.b16 %v9929_v36, %v9946_v7  ;;  %v2233_v29 = vcombine.low %v2224_v48, %v2232_v44  ;;  %v1742_v31 = vcombine.low %v1710_v9, %v1725_v19  ;;  %v1104_v46 = vrot.slane %v1097_v62, %v9610_v2 }
 0x218   : > { %8808 = vmatmul.mubr.msk.bf16.vlgmr.msra.gmra.mrb[4].mxu0 %vm3708_vm2, %v1380_v56  ;;  %v1386_v28 = vpack.i.b16 %v9939_v59, %v9954_v58  ;;  %v1112_v3 = vrot.slane %v8501_v24, %v9610_v2  ;;  %v1743_v52 = vcombine.high %v1710_v9, %v1725_v19  ;;  %v3851_v57 = vsel %vm3708_vm2, %v2503_v23, 0 }
 0x219   : > { %8818 = vmatpush3.bf16.xpose.msra.mxu0 %v3897_v5  ;;  %8819 = vmatprep.mubr.msk.bf16.mxu0 %vm9451_vm1, %v11871_v41  ;;  %v2508_v47 = vshrl.u32 %v9874_v53, 16  ;;  %v2208_v14 = vcombine.low %v2199_v11, %v2207_v40  ;;  %v11912_v56 = vcombine.high %v9679_v12, %v9749_v17  ;;  %v1816_v51 = vrot.slane %v1808_v27, %v9627_v18 }
 0x21a   : > { %8829 = vmatprep.subr.bf16.mxu0 %v11871_v41  ;;  %v1382_v62 = vshrl.u32 %v9880_v26, 16  ;;  %v1088_v24 = vcombine.low %v9847_v10, %v1087_v43  ;;  %v1823_v1 = vrot.slane %v1809_v21, %v9627_v18  ;;  %v3989_v53 = vsel %vm3708_vm2, %v2512_v45, 0 }
 0x21b   : > { %v703_v15 = vrot.slane %v11912_v56, %v9627_v18  ;;  %v2507_v12 = vshrl.u32 %v9894_v6, 16  ;;  %v9980_v17 = vrot.slane %v2233_v29, %v9627_v18  ;;  %v8502_v16 = vcombine.high %v9762_v30, %v9765_v4 }
 0x21c   : > { %8802 = vmatmul.mubr.msk.bf16.vlgmr.msra.gmra.mrb[8].mxu1 %vm3708_vm2, %v1377_v35  ;;  %v1381_v26 = vshrl.u32 %v9902_v32, 16  ;;  %v9989_v10 = vcombine.high %v9939_v59, %v11873_v60  ;;  %v1113_v38 = vcombine.low %v1104_v46, %v1112_v3  ;;  %v1750_v22 = vrot.slane %v1742_v31, %v9627_v18 }
 0x21d   : > { %8812 = vmatpush3.bf16.xpose.msra.mxu1 %v3851_v57  ;;  %8813 = vmatprep.mubr.msk.bf16.mxu1 %vm9451_vm1, %v11871_v41  ;;  %v1757_v6 = vrot.slane %v1743_v52, %v9627_v18  ;;  %v2509_v39 = vpack.i.b16 %v2508_v47, %v2507_v12  ;;  %v9995_v13 = vrot.slane %v2208_v14, %v9627_v18  ;;  %v2514_v21 = vshrl.u32 %v9929_v36, 16 }
 0x21e   : > { %8823 = vmatprep.subr.bf16.mxu1 %v11871_v41  ;;  %v1147_v32 = vcombine.low %v9822_v37, %v703_v15  ;;  %v8503_v8 = vcombine.high %v9822_v37, %v703_v15  ;;  %v10001_v5 = vcombine.high %v9954_v58, %v11873_v60  ;;  %v10004_v48 = vrot.slane %v1088_v24, %v9627_v18 }
 0x21f   : > { %v2267_v44 = vcombine.low %v1816_v51, %v1823_v1  ;;  %v8519_v42 = vcombine.high %v1816_v51, %v1823_v1  ;;  %v1383_v19 = vpack.i.b16 %v1382_v62, %v1381_v26  ;;  %v2518_v54 = vpack.i.b16 %v9980_v17, %v9995_v13 }
 0x220   : > { %8820 = vmatmul.mubr.msk.bf16.vlgmr.msra.gmra.mrb[8].mxu0 %vm3708_vm2, %v1386_v28  ;;  %v1392_v11 = vpack.i.b16 %v9989_v10, %v10001_v5  ;;  %v10011_v40 = vrot.slane %v1113_v38, %v9627_v18  ;;  %v1129_v37 = vrot.slane %v1122_v25, %v9610_v2  ;;  %v1137_v23 = vrot.slane %v8502_v16, %v9610_v2 }
 0x221   : > { %8830 = vmatpush3.bf16.xpose.msra.mxu0 %v3989_v53  ;;  %8831 = vmatprep.mubr.msk.bf16.mxu0 %vm9451_vm1, %v11871_v41  ;;  %v2242_v43 = vcombine.low %v1750_v22, %v1757_v6  ;;  %v8518_v9 = vcombine.high %v1750_v22, %v1757_v6  ;;  %v3943_v27 = vsel %vm3708_vm2, %v2509_v39, 0  ;;  %v1388_v35 = vshrl.u32 %v9939_v59, 16 }
 0x222   : > { %8841 = vmatprep.subr.bf16.mxu0 %v11871_v41  ;;  %v2513_v45 = vshrl.u32 %v9946_v7, 16  ;;  %v1154_v30 = vrot.slane %v1147_v32, %v9610_v2  ;;  %v1162_v4 = vrot.slane %v8503_v8, %v9610_v2  ;;  %v4081_v25 = vsel %vm3708_vm2, %v2518_v54, 0 }
 0x223   : > { %v10032_v36 = vcombine.high %v9980_v17, %v11873_v60  ;;  %v2274_v29 = vrot.slane %v2267_v44, %v9610_v2  ;;  %v2282_v59 = vrot.slane %v8519_v42, %v9610_v2  ;;  %v1387_v7 = vshrl.u32 %v9954_v58, 16 }
 0x224   : > { %8814 = vmatmul.mubr.msk.bf16.vlgmr.msra.gmra.mrb[12].mxu1 %vm3708_vm2, %v1383_v19  ;;  %v1398_v31 = vpack.i.b16 %v10011_v40, %v10004_v48  ;;  %v10043_v28 = vcombine.high %v10004_v48, %v11873_v60  ;;  %v10047_v46 = vcombine.high %v10011_v40, %v11873_v60  ;;  %v2515_v3 = vpack.i.b16 %v2514_v21, %v2513_v45 }
 0x225   : > { %8824 = vmatpush3.bf16.xpose.msra.mxu1 %v3943_v27  ;;  %8825 = vmatprep.mubr.msk.bf16.mxu1 %vm9451_vm1, %v11871_v41  ;;  %v10052_v58 = vcombine.high %v9995_v13, %v11873_v60  ;;  %v2249_v52 = vrot.slane %v2242_v43, %v9610_v2  ;;  %v2257_v57 = vrot.slane %v8518_v9, %v9610_v2  ;;  %v425_v47 = vshrl.u32 %v9603_v63, 16 }
 0x226   : > { %8835 = vmatprep.subr.bf16.mxu1 %v11871_v41  ;;  %v1399_v14 = vshrl.u32 %v10004_v48, 16  ;;  %v1400_v56 = vshrl.u32 %v10011_v40, 16  ;;  %v1138_v15 = vcombine.low %v1129_v37, %v1137_v23  ;;  %v1389_v51 = vpack.i.b16 %v1388_v35, %v1387_v7 }
 0x227   : > { %v2524_v62 = vpack.i.b16 %v10032_v36, %v10052_v58  ;;  %v2283_v24 = vcombine.low %v2274_v29, %v2282_v59  ;;  %v1163_v1 = vcombine.low %v1154_v30, %v1162_v4  ;;  %v424_v53 = vshrl.u32 %v9582_v49, 16 }
 0x228   : > { %8832 = vmatmul.mubr.msk.bf16.vlgmr.msra.gmra.mrb[12].mxu0 %vm3708_vm2, %v1392_v11  ;;  %v417_v12 = vshrl.u32 %v9584_v50, 16  ;;  %v422_v16 = vpack.i.b16 %v9603_v63, %v9582_v49  ;;  %v1394_v26 = vshrl.u32 %v9989_v10, 16  ;;  %v4035_v38 = vsel %vm3708_vm2, %v2515_v3, 0 }
 0x229   : > { %8842 = vmatpush3.bf16.xpose.msra.mxu0 %v4081_v25  ;;  %8843 = vmatprep.mubr.msk.bf16.mxu0 %vm9451_vm1, %v11871_v41  ;;  %v2520_v22 = vshrl.u32 %v9980_v17, 16  ;;  %v1404_v6 = vpack.i.b16 %v10047_v46, %v10043_v28  ;;  %v2258_v39 = vcombine.low %v2249_v52, %v2257_v57  ;;  %v414_v32 = vpack.i.b16 %v9584_v50, %v9524_v34 }
 0x22a   : > { %8853 = vmatprep.subr.bf16.mxu0 %v11871_v41  ;;  %v10073_v8 = vpack.i.b16 %v425_v47, %v424_v53  ;;  %v10078_v10 = vrot.slane %v1138_v15, %v9627_v18  ;;  %v1406_v48 = vshrl.u32 %v10047_v46, 16  ;;  %v4173_v17 = vsel %vm3708_vm2, %v2524_v62, 0 }
 0x22b   : > { %v2519_v44 = vshrl.u32 %v9995_v13, 16  ;;  %v10086_v42 = vrot.slane %v2283_v24, %v9627_v18  ;;  %v10089_v19 = vrot.slane %v1163_v1, %v9627_v18  ;;  %v11913_v54 = vshrl.u32 %v9524_v34, 16 }
 0x22c   : > { %8826 = vmatmul.mubr.msk.bf16.vlgmr.msra.gmra.mrb[16].mxu1 %vm3708_vm2, %v1389_v51  ;;  %v723_v40 = vcombine.high %v422_v16, %v9599_v61  ;;  %v730_v37 = vrot.slane %v422_v16, %v9610_v2  ;;  %v1393_v23 = vshrl.u32 %v10001_v5, 16  ;;  %v10100_v43 = vrot.slane %v2258_v39, %v9627_v18 }
 0x22d   : > { %8836 = vmatpush3.bf16.xpose.msra.mxu1 %v4035_v38  ;;  %8837 = vmatprep.mubr.msk.bf16.mxu1 %vm9451_vm1, %v11871_v41  ;;  %v418_v11 = vpack.i.b16 %v417_v12, %v11913_v54  ;;  %v2521_v13 = vpack.i.b16 %v2520_v22, %v2519_v44  ;;  %v1401_v9 = vpack.i.b16 %v1400_v56, %v1399_v14  ;;  %v1405_v34 = vshrl.u32 %v10043_v28, 16 }
 0x22e   : > { %8847 = vmatprep.subr.bf16.mxu1 %v11871_v41  ;;  %v708_v27 = vcombine.high %v414_v32, %v9599_v61  ;;  %v715_v21 = vrot.slane %v414_v32, %v9610_v2  ;;  %v796_v35 = vrot.slane %v10073_v8, %v9610_v2  ;;  %v1395_v5 = vpack.i.b16 %v1394_v26, %v1393_v23 }
 0x22f   : > { %v2530_v45 = vpack.i.b16 %v10086_v42, %v10100_v43  ;;  %v1410_v30 = vpack.i.b16 %v10089_v19, %v10078_v10  ;;  %v10111_v4 = vpack.i.b16 %v1406_v48, %v1405_v34  ;;  %v10115_v25 = vcombine.high %v10078_v10, %v11873_v60 }
 0x230   : > { %8844 = vmatmul.mubr.msk.bf16.vlgmr.msra.gmra.mrb[16].mxu0 %vm3708_vm2, %v1398_v31  ;;  %v781_v29 = vrot.slane %v418_v11, %v9610_v2  ;;  %v737_v59 = vrot.slane %v723_v40, %v9610_v2  ;;  %v738_v7 = vcombine.low %v715_v21, %v730_v37  ;;  %v739_v31 = vcombine.high %v715_v21, %v730_v37 }
 0x231   : > { %8854 = vmatpush3.bf16.xpose.msra.mxu0 %v4173_v17  ;;  %8855 = vmatprep.mubr.msk.bf16.mxu0 %vm9451_vm1, %v11871_v41  ;;  %v774_v28 = vcombine.high %v418_v11, %v9599_v61  ;;  %v4127_v46 = vsel %vm3708_vm2, %v2521_v13, 0  ;;  %v2526_v3 = vshrl.u32 %v10032_v36, 16  ;;  %v10125_v52 = vcombine.high %v10089_v19, %v11873_v60 }
 0x232   : > { %8865 = vmatprep.subr.bf16.mxu0 %v11871_v41  ;;  %v722_v57 = vrot.slane %v708_v27, %v9610_v2  ;;  %v804_v47 = vcombine.low %v781_v29, %v796_v35  ;;  %v805_v14 = vcombine.high %v781_v29, %v796_v35  ;;  %v432_v56 = vshrl.u32 %v9522_v33, 16 }
 0x233   : > { %v789_v15 = vcombine.high %v10073_v8, %v9599_v61  ;;  %v4265_v36 = vsel %vm3708_vm2, %v2530_v45, 0  ;;  %v2525_v51 = vshrl.u32 %v10052_v58, 16  ;;  %v10139_v62 = vcombine.high %v10086_v42, %v11873_v60 }
 0x234   : > { %8838 = vmatmul.mubr.msk.bf16.vlgmr.msra.gmra.mrb[20].mxu1 %vm3708_vm2, %v1395_v5  ;;  %v746_v24 = vrot.slane %v738_v7, %v9627_v18  ;;  %v753_v1 = vrot.slane %v739_v31, %v9627_v18  ;;  %v754_v53 = vcombine.low %v722_v57, %v737_v59  ;;  %v1411_v12 = vshrl.u32 %v10078_v10, 16 }
 0x235   : > { %8848 = vmatpush3.bf16.xpose.msra.mxu1 %v4127_v46  ;;  %8849 = vmatprep.mubr.msk.bf16.mxu1 %vm9451_vm1, %v11871_v41  ;;  %v438_v16 = vpack.i.b16 %v9653_v55, %v9658_v0  ;;  %v2527_v26 = vpack.i.b16 %v2526_v3, %v2525_v51  ;;  %v10151_v58 = vcombine.high %v10100_v43, %v11873_v60  ;;  %v441_v39 = vshrl.u32 %v9653_v55, 16 }
 0x236   : > { %8859 = vmatprep.subr.bf16.mxu1 %v11871_v41  ;;  %v1416_v38 = vpack.i.b16 %v10125_v52, %v10115_v25  ;;  %v812_v22 = vrot.slane %v804_v47, %v9627_v18  ;;  %v440_v32 = vshrl.u32 %v9658_v0, 16  ;;  %v10160_v8 = vrot.slane %v774_v28, %v9610_v2 }
 0x237   : > { %v430_v48 = vpack.i.b16 %v9630_v20, %v9522_v33  ;;  %v433_v17 = vshrl.u32 %v9630_v20, 16  ;;  %v2536_v44 = vpack.i.b16 %v10139_v62, %v10151_v58  ;;  %v755_v54 = vcombine.high %v722_v57, %v737_v59 }
 0x238   : > { %8856 = vmatmul.mubr.msk.bf16.vlgmr.msra.gmra.mrb[20].mxu0 %vm3708_vm2, %v1404_v6  ;;  %v819_v6 = vrot.slane %v805_v14, %v9627_v18  ;;  %v10168_v11 = vrot.slane %v754_v53, %v9627_v18  ;;  %v10171_v40 = vrot.slane %v789_v15, %v9610_v2  ;;  %v1172_v37 = vcombine.low %v746_v24, %v753_v1 }
 0x239   : > { %8866 = vmatpush3.bf16.xpose.msra.mxu0 %v4265_v36  ;;  %8867 = vmatprep.mubr.msk.bf16.mxu0 %vm9451_vm1, %v11871_v41  ;;  %v8504_v23 = vcombine.high %v746_v24, %v753_v1  ;;  %v855_v13 = vcombine.high %v438_v16, %v9599_v61  ;;  %v4219_v34 = vsel %vm3708_vm2, %v2527_v26, 0  ;;  %v2532_v27 = vshrl.u32 %v10086_v42, 16 }
 0x23a   : > { %8877 = vmatprep.subr.bf16.mxu0 %v11871_v41  ;;  %v1197_v21 = vcombine.low %v812_v22, %v819_v6  ;;  %v442_v35 = vpack.i.b16 %v441_v39, %v440_v32  ;;  %v862_v5 = vrot.slane %v438_v16, %v9610_v2  ;;  %v1417_v45 = vshrl.u32 %v10115_v25, 16  ;;  %v1473_v25 = vpop.permute.xlu0 %1472 }
 0x23b   : > { %v8505_v29 = vcombine.high %v812_v22, %v819_v6  ;;  %v840_v59 = vcombine.high %v430_v48, %v9599_v61  ;;  %v2531_v42 = vshrl.u32 %v10100_v43, 16  ;;  %v769_v7 = vrot.slane %v755_v54, %v9627_v18 }
 0x23c   : > { %8850 = vmatmul.mubr.msk.bf16.vlgmr.msra.gmra.mrb[24].mxu1 %vm3708_vm2, %v1401_v9  ;;  %v4357_v9 = vsel %vm3708_vm2, %v2536_v44, 0  ;;  %v434_v31 = vpack.i.b16 %v433_v17, %v432_v56  ;;  %v847_v28 = vrot.slane %v430_v48, %v9610_v2  ;;  %v1412_v46 = vshrl.u32 %v10089_v19, 16 }
 0x23d   : > { %8860 = vmatpush3.bf16.xpose.msra.mxu1 %v4219_v34  ;;  %8861 = vmatprep.mubr.msk.bf16.mxu1 %vm9451_vm1, %v11871_v41  ;;  %v821_v3 = vcombine.high %v10160_v8, %v10171_v40  ;;  %v869_v57 = vrot.slane %v855_v13, %v9610_v2  ;;  %v2533_v43 = vpack.i.b16 %v2532_v27, %v2531_v42  ;;  %v2538_v32 = vshrl.u32 %v10139_v62, 16 }
 0x23e   : > { %8871 = vmatprep.subr.bf16.mxu1 %v11871_v41  ;;  %v1179_v47 = vrot.slane %v1172_v37, %v9610_v2  ;;  %v870_v14 = vcombine.low %v847_v28, %v862_v5  ;;  %v871_v56 = vcombine.high %v847_v28, %v862_v5  ;;  %v921_v15 = vcombine.high %v442_v35, %v9599_v61 }
 0x23f   : > { %v1187_v36 = vrot.slane %v8504_v23, %v9610_v2  ;;  %v854_v19 = vrot.slane %v840_v59, %v9610_v2  ;;  %v1204_v51 = vrot.slane %v1197_v21, %v9610_v2  ;;  %v1212_v24 = vrot.slane %v8505_v29, %v9610_v2 }
 0x240   : > { %8868 = vmatmul.mubr.msk.bf16.vlgmr.msra.gmra.mrb[24].mxu0 %vm3708_vm2, %v1410_v30  ;;  %v820_v30 = vcombine.low %v10160_v8, %v10171_v40  ;;  %v1222_v1 = vcombine.low %v10168_v11, %v769_v7  ;;  %v906_v53 = vcombine.high %v434_v31, %v9599_v61  ;;  %v913_v16 = vrot.slane %v434_v31, %v9610_v2 }
 0x241   : > { %8878 = vmatpush3.bf16.xpose.msra.mxu0 %v4357_v9  ;;  %8879 = vmatprep.mubr.msk.bf16.mxu0 %vm9451_vm1, %v11871_v41  ;;  %v928_v26 = vrot.slane %v442_v35, %v9610_v2  ;;  %v886_v22 = vcombine.low %v854_v19, %v869_v57  ;;  %v887_v6 = vcombine.high %v854_v19, %v869_v57  ;;  %v4311_v39 = vsel %vm3708_vm2, %v2533_v43, 0 }
 0x242   : > { %8889 = vmatprep.subr.bf16.mxu0 %v11871_v41  ;;  %v878_v8 = vrot.slane %v870_v14, %v9627_v18  ;;  %v885_v48 = vrot.slane %v871_v56, %v9627_v18  ;;  %v935_v17 = vrot.slane %v921_v15, %v9610_v2  ;;  %v1418_v44 = vshrl.u32 %v10125_v52, 16 }
 0x243   : > { %v8506_v54 = vcombine.high %v10168_v11, %v769_v7  ;;  %v1188_v62 = vcombine.low %v1179_v47, %v1187_v36  ;;  %v1213_v40 = vcombine.low %v1204_v51, %v1212_v24  ;;  %v828_v37 = vrot.slane %v820_v30, %v9627_v18 }
 0x244   : > { %8862 = vmatmul.mubr.msk.bf16.vlgmr.msra.gmra.mrb[28].mxu1 %vm3708_vm2, %v10111_v4  ;;  %v2537_v4 = vshrl.u32 %v10151_v58, 16  ;;  %v920_v23 = vrot.slane %v906_v53, %v9610_v2  ;;  %v936_v13 = vcombine.low %v913_v16, %v928_v26  ;;  %v937_v34 = vcombine.high %v913_v16, %v928_v26 }
 0x245   : > { %8872 = vmatpush3.bf16.xpose.msra.mxu1 %v4311_v39  ;;  %8873 = vmatprep.mubr.msk.bf16.mxu1 %vm9451_vm1, %v11871_v41  ;;  %v835_v11 = vrot.slane %v821_v3, %v9627_v18  ;;  %v10230_v52 = vrot.slane %v886_v22, %v9627_v18  ;;  %v1272_v35 = vcombine.low %v878_v8, %v885_v48  ;;  %v1536_v53 = vshrl.u32 %v1473_v25, 16 }
 0x246   : > { %8883 = vmatprep.subr.bf16.mxu1 %v11871_v41  ;;  %v2539_v58 = vpack.i.b16 %v2538_v32, %v2537_v4  ;;  %v952_v27 = vcombine.low %v920_v23, %v935_v17  ;;  %v953_v21 = vcombine.high %v920_v23, %v935_v17  ;;  %v1413_v5 = vpack.i.b16 %v1412_v46, %v1411_v12 }
 0x247   : > { %v10238_v29 = vrot.slane %v1188_v62, %v9627_v18  ;;  %v10241_v59 = vrot.slane %v1213_v40, %v9627_v18  ;;  %v1229_v9 = vrot.slane %v1222_v1, %v9610_v2  ;;  %v1237_v42 = vrot.slane %v8506_v54, %v9610_v2 }
 0x248   : > { %8880 = vmatmul.mubr.msk.bf16.vlgmr.msra.gmra.mrb[28].mxu0 %vm3708_vm2, %v1416_v38  ;;  %v10233_v38 = vrot.slane %v887_v6, %v9627_v18  ;;  %v944_v7 = vrot.slane %v936_v13, %v9627_v18  ;;  %v951_v31 = vrot.slane %v937_v34, %v9627_v18  ;;  %v8508_v28 = vcombine.high %v878_v8, %v885_v48 }
 0x249   : > { %8891 = vmatprep.mubr.msk.bf16.mxu0 %vm9451_vm1, %v11871_v41  ;;  %v1419_v30 = vpack.i.b16 %v1418_v44, %v1417_v45  ;;  %v1247_v10 = vcombine.low %v828_v37, %v835_v11  ;;  %v8507_v12 = vcombine.high %v828_v37, %v835_v11  ;;  %v4403_v3 = vsel %vm3708_vm2, %v2539_v58, 0 }
 0x24a   : > { %v1322_v46 = vcombine.low %v10230_v52, %v10233_v38  ;;  %v10254_v57 = vrot.slane %v952_v27, %v9627_v18  ;;  %v10257_v43 = vrot.slane %v953_v21, %v9627_v18  ;;  %v8510_v47 = vcombine.high %v10230_v52, %v10233_v38 }
 0x24b   : > { %v1279_v45 = vrot.slane %v1272_v35, %v9610_v2  ;;  %v10267_v56 = vcombine.high %v10238_v29, %v11873_v60  ;;  %v10271_v15 = vcombine.high %v10241_v59, %v11873_v60  ;;  %v1238_v36 = vcombine.low %v1229_v9, %v1237_v42 }
 0x24c   : > { %8874 = vmatmul.mubr.msk.bf16.vlgmr.msra.gmra.mrb[32].mxu1 %vm3708_vm2, %v1413_v5  ;;  %v1287_v19 = vrot.slane %v8508_v28, %v9610_v2  ;;  %v1297_v51 = vcombine.low %v944_v7, %v951_v31  ;;  %v8509_v24 = vcombine.high %v944_v7, %v951_v31  ;;  %v1424_v1 = vshrl.u32 %v10241_v59, 16 }
 0x24d   : > { %8884 = vmatpush3.bf16.xpose.msra.mxu1 %v4403_v3  ;;  %8885 = vmatprep.mubr.msk.bf16.mxu1 %vm9451_vm1, %v11871_v41  ;;  %v1254_v26 = vrot.slane %v1247_v10, %v9610_v2  ;;  %v1262_v22 = vrot.slane %v8507_v12, %v9610_v2  ;;  %v1347_v6 = vcombine.low %v10254_v57, %v10257_v43  ;;  %v1423_v48 = vshrl.u32 %v10238_v29, 16 }
 0x24e   : > { %8895 = vmatprep.subr.bf16.mxu1 %v11871_v41  ;;  %v8511_v39 = vcombine.high %v10254_v57, %v10257_v43  ;;  %v1429_v54 = vshrl.u32 %v10267_v56, 16  ;;  %v1430_v4 = vshrl.u32 %v10271_v15, 16  ;;  %v10287_v62 = vrot.slane %v1238_v36, %v9627_v18 }
 0x24f   : > { %v10289_v37 = vpack.i.b16 %v1424_v1, %v1423_v48  ;;  %v1288_v13 = vcombine.low %v1279_v45, %v1287_v19  ;;  %v1263_v27 = vcombine.low %v1254_v26, %v1262_v22  ;;  %v10308_v12 = vrot.slane %v1297_v51, %v9610_v2 }
 0x250   : > { %v10300_v7 = vpack.i.b16 %v1430_v4, %v1429_v54  ;;  %v1435_v31 = vshrl.u32 %v10287_v62, 16  ;;  %v10305_v28 = vcombine.high %v10287_v62, %v11873_v60  ;;  %v10311_v3 = vrot.slane %v8509_v24, %v9610_v2 }
 0x251   : > { %v10317_v45 = vrot.slane %v1288_v13, %v9627_v18  ;;  %v10323_v1 = vrot.slane %v1263_v27, %v9627_v18  ;;  %v10334_v48 = vrot.slane %v1322_v46, %v9610_v2  ;;  %v10345_v13 = vrot.slane %v1347_v6, %v9610_v2 }
 0x252   : > { %v1481_v14 = vpop.permute.xlu1 %1480  ;;  %v1489_v8 = vpop.permute.xlu0 %1488  ;;  %v10353_v52 = vrot.slane %v8511_v39, %v9610_v2  ;;  %v11916_v63 = vmov 0.0  }
 0x253   : > { %v1537_v16 = vshrl.u32 %v1481_v14, 16  ;;  %v1534_v32 = vpack.i.b16 %v1481_v14, %v1473_v25  ;;  %v1544_v11 = vshrl.u32 %v1489_v8, 16  ;;  %v10350_v46 = vcombine.high %v10317_v45, %v11873_v60 }
 0x254   : > { %8886 = vmatmul.mubr.msk.bf16.vlgmr.msra.gmra.mrb[36].mxu1 %vm3708_vm2, %v1419_v30  ;;  %v10362_v39 = vcombine.high %v10323_v1, %v11873_v60 }
 0x255   : > { %v1538_v34 = vpack.i.b16 %v1537_v16, %v1536_v53  ;;  %v1828_v21 = vcombine.high %v1534_v32, %v9599_v61  ;;  %v1835_v35 = vrot.slane %v1534_v32, %v9610_v2  ;;  %8897 = vmatprep.mubr.msk.bf16.mxu1 %vm9451_vm1, %v11871_v41 }
 0x256   : > { %v1497_v17 = vpop.permute.xlu1 %1496  ;;  %v1475_v22 = vpop.permute.xlu0 %1474 }
 0x257   : > { %v1542_v40 = vpack.i.b16 %v1497_v17, %v1489_v8  ;;  %v1545_v58 = vshrl.u32 %v1497_v17, 16  ;;  %v1901_v57 = vrot.slane %v1538_v34, %v9610_v2  ;;  %v1842_v14 = vrot.slane %v1828_v21, %v9610_v2 }
 0x258   : > { %v1894_v36 = vcombine.high %v1538_v34, %v9599_v61  ;;  %v1313_v8 = vcombine.low %v10308_v12, %v10311_v3  ;;  %v10340_v17 = vrot.slane %v8510_v47, %v9610_v2 }
 0x259   : > { %v1843_v5 = vcombine.high %v1542_v40, %v9599_v61  ;;  %v1850_v9 = vrot.slane %v1542_v40, %v9610_v2  ;;  %v1546_v42 = vpack.i.b16 %v1545_v58, %v1544_v11 }
 0x25a   : > { %v1908_v38 = vrot.slane %v1894_v36, %v9610_v2 }
 0x25b   : > { %v1858_v30 = vcombine.low %v1835_v35, %v1850_v9  ;;  %v1859_v10 = vcombine.high %v1835_v35, %v1850_v9  ;;  %v1857_v43 = vrot.slane %v1843_v5, %v9610_v2  ;;  %v1916_v25 = vrot.slane %v1546_v42, %v9610_v2 }
 0x25c   : > { %v1909_v19 = vcombine.high %v1546_v42, %v9599_v61 }
 0x25d   : > { %v1866_v24 = vrot.slane %v1858_v30, %v9627_v18  ;;  %v1873_v53 = vrot.slane %v1859_v10, %v9627_v18  ;;  %v1924_v16 = vcombine.low %v1901_v57, %v1916_v25  ;;  %v1925_v26 = vcombine.high %v1901_v57, %v1916_v25 }
 0x25e   : > { %v1483_v51 = vpop.permute.xlu1 %1482  ;;  %v1874_v54 = vcombine.low %v1842_v14, %v1857_v43  ;;  %v1875_v34 = vcombine.high %v1842_v14, %v1857_v43  ;;  %v1923_v11 = vrot.slane %v1909_v19, %v9610_v2  ;;  %v1552_v10 = vshrl.u32 %v1475_v22, 16 }
 0x25f   : > { %v1932_v4 = vrot.slane %v1924_v16, %v9627_v18  ;;  %v1939_v40 = vrot.slane %v1925_v26, %v9627_v18  ;;  %v2292_v47 = vcombine.low %v1866_v24, %v1873_v53  ;;  %v1550_v27 = vpack.i.b16 %v1483_v51, %v1475_v22 }
 0x260   : > { %v8520_v35 = vcombine.high %v1866_v24, %v1873_v53  ;;  %v1553_v42 = vshrl.u32 %v1483_v51, 16  ;;  %v1882_v30 = vrot.slane %v1874_v54, %v9627_v18  ;;  %v1436_v57 = vshrl.u32 %v10323_v1, 16 }
 0x261   : > { %v2317_v5 = vcombine.low %v1932_v4, %v1939_v40  ;;  %v8521_v9 = vcombine.high %v1932_v4, %v1939_v40  ;;  %v1889_v43 = vrot.slane %v1875_v34, %v9627_v18  ;;  %v1940_v25 = vcombine.low %v1908_v38, %v1923_v11 }
 0x262   : > { %v1499_v58 = vpop.permute.xlu1 %1498  ;;  %v1491_v21 = vpop.permute.xlu0 %1490  ;;  %v1941_v14 = vcombine.high %v1908_v38, %v1923_v11  ;;  %v2299_v24 = vrot.slane %v2292_v47, %v9610_v2  ;;  %v1554_v53 = vpack.i.b16 %v1553_v42, %v1552_v10  ;;  %v2307_v26 = vrot.slane %v8520_v35, %v9610_v2 }
 0x263   : > { %v1561_v36 = vshrl.u32 %v1499_v58, 16  ;;  %v1558_v51 = vpack.i.b16 %v1499_v58, %v1491_v21  ;;  %v1560_v16 = vshrl.u32 %v1491_v21, 16  ;;  %v2324_v22 = vrot.slane %v2317_v5, %v9610_v2 }
 0x264   : > { %v2332_v54 = vrot.slane %v8521_v9, %v9610_v2  ;;  %v1960_v4 = vcombine.high %v1550_v27, %v9599_v61  ;;  %v1967_v34 = vrot.slane %v1550_v27, %v9610_v2  ;;  %v10376_v47 = vrot.slane %v1940_v25, %v9627_v18 }
 0x265   : > { %v1562_v11 = vpack.i.b16 %v1561_v36, %v1560_v16  ;;  %v1975_v38 = vcombine.high %v1558_v51, %v9599_v61  ;;  %v1982_v32 = vrot.slane %v1558_v51, %v9610_v2  ;;  %v10379_v58 = vrot.slane %v1941_v14, %v9627_v18 }
 0x266   : > { %v10365_v19 = vpop.permute.xlu1 %2588  ;;  %v2599_v40 = vpop.permute.xlu0 %2598  ;;  %v2342_v21 = vcombine.low %v1882_v30, %v1889_v43  ;;  %v8522_v35 = vcombine.high %v1882_v30, %v1889_v43  ;;  %v2033_v9 = vrot.slane %v1554_v53, %v9610_v2  ;;  %v1974_v25 = vrot.slane %v1960_v4, %v9610_v2 }
 0x267   : > { %v1990_v42 = vcombine.low %v1967_v34, %v1982_v32  ;;  %v1991_v10 = vcombine.high %v1967_v34, %v1982_v32  ;;  %v2641_v6 = vshrl.u32 %v2599_v40, 16  ;;  %v1989_v27 = vrot.slane %v1975_v38, %v9610_v2 }
 0x268   : > { %v2048_v36 = vrot.slane %v1562_v11, %v9610_v2  ;;  %v2041_v14 = vcombine.high %v1562_v11, %v9599_v61  ;;  %v2333_v30 = vcombine.low %v2324_v22, %v2332_v54  ;;  %v2026_v38 = vcombine.high %v1554_v53, %v9599_v61 }
 0x269   : > { %v10386_v23 = vrot.slane %v1990_v42, %v9627_v18  ;;  %v10390_v43 = vrot.slane %v1991_v10, %v9627_v18  ;;  %v2308_v60 = vcombine.low %v2299_v24, %v2307_v26  ;;  %v10397_v4 = vrot.slane %v1313_v8, %v9627_v18 }
 0x26a   : > { %v2591_v5 = vpop.permute.xlu1 %2590  ;;  %v2056_v44 = vcombine.low %v2033_v9, %v2048_v36  ;;  %v2057_v32 = vcombine.high %v2033_v9, %v2048_v36  ;;  %v10402_v22 = vrot.slane %v2342_v21, %v9610_v2  ;;  %v10405_v54 = vrot.slane %v8522_v35, %v9610_v2  ;;  %v2597_v12 = vpop.permute.xlu0 %2596 }
 0x26b   : > { %v2638_v16 = vpack.i.b16 %v2599_v40, %v2591_v5  ;;  %v2640_v51 = vshrl.u32 %v2591_v5, 16  ;;  %v2006_v53 = vcombine.low %v1974_v25, %v1989_v27  ;;  %v2007_v24 = vcombine.high %v1974_v25, %v1989_v27 }
 0x26c   : > { %v10410_v26 = vrot.slane %v2041_v14, %v9610_v2  ;;  %v10414_v3 = vpack.i.b16 %v1436_v57, %v1435_v31  ;;  %v10419_v11 = vrot.slane %v2056_v44, %v9627_v18  ;;  %v10422_v21 = vrot.slane %v2057_v32, %v9627_v18 }
 0x26d   : > { %v2642_v34 = vpack.i.b16 %v2641_v6, %v2640_v51  ;;  %v2367_v6 = vcombine.low %v10376_v47, %v10379_v58  ;;  %v2392_v35 = vcombine.low %v10386_v23, %v10390_v43  ;;  %v2340_v5 = vrot.slane %v2333_v30, %v9627_v18 }
 0x26e   : > { %v2607_v41 = vpop.permute.xlu1 %2606  ;;  %v10430_v31 = vrot.slane %v2026_v38, %v9610_v2  ;;  %v2624_v57 = vshrl.u32 %v10365_v19, 16  ;;  %v2315_v44 = vrot.slane %v2308_v60, %v9627_v18  ;;  %v10435_v10 = vrot.slane %v2006_v53, %v9627_v18 }
 0x26f   : > { %v10438_v27 = vpack.i.b16 %v2597_v12, %v10365_v19  ;;  %v10443_v51 = vrot.slane %v2367_v6, %v9610_v2  ;;  %v10446_v25 = vrot.slane %v2007_v24, %v9627_v18  ;;  %v2816_v30 = vcombine.high %v2638_v16, %v9599_v61 }
 0x270   : > { %v10456_v32 = vrot.slane %v2392_v35, %v9610_v2  ;;  %v2542_v6 = vpack.i.b16 %v2340_v5, %v2315_v44  ;;  %v2882_v53 = vcombine.high %v2642_v34, %v9599_v61  ;;  %v2625_v24 = vshrl.u32 %v2597_v12, 16 }
 0x271   : > { %v2543_v40 = vshrl.u32 %v2315_v44, 16  ;;  %v2544_v8 = vshrl.u32 %v2340_v5, 16  ;;  %v2648_v42 = vshrl.u32 %v2607_v41, 16  ;;  %v2823_v19 = vrot.slane %v2638_v16, %v9610_v2 }
 0x272   : > { %v2615_v9 = vpop.permute.xlu1 %2614  ;;  %v4449_v36 = vsel %vm3708_vm2, %v2542_v6, 0  ;;  %v2830_v35 = vrot.slane %v2816_v30, %v9610_v2  ;;  %v11915_v38 = vmov 0   ;;  %v10473_v16 = vpack.i.b16 %v2625_v24, %v2624_v57 }
 0x273   : > { %v2646_v60 = vpack.i.b16 %v2615_v9, %v2607_v41  ;;  %v2649_v20 = vshrl.u32 %v2615_v9, 16  ;;  %8890 = vmatpush3.bf16.xpose.msra.mxu0 %v4449_v36  ;;  %v2545_v55 = vpack.i.b16 %v2544_v8, %v2543_v40  ;;  %v2316_v0 = vcombine.high %v2315_v44, %v11915_v38 }
 0x274   : > { %8901 = vmatprep.subr.bf16.mxu0 %v11916_v63  ;;  %v2341_v6 = vcombine.high %v2340_v5, %v11915_v38  ;;  %v2889_v41 = vrot.slane %v2642_v34, %v9610_v2  ;;  %v2896_v9 = vrot.slane %v2882_v53, %v9610_v2 }
 0x275   : > { %v2650_v33 = vpack.i.b16 %v2649_v20, %v2648_v42  ;;  %v2831_v12 = vcombine.high %v2646_v60, %v9599_v61  ;;  %v2838_v50 = vrot.slane %v2646_v60, %v9610_v2  ;;  %v4495_v36 = vsel %vm3708_vm2, %v2545_v55, 0 }
 0x276   : > { %v10461_v14 = vpop.permute.xlu1 %2592  ;;  %8896 = vmatpush3.bf16.xpose.msra.mxu1 %v4495_v36  ;;  %v2548_v60 = vpack.i.b16 %v2341_v6, %v2316_v0  ;;  %v2549_v5 = vshrl.u32 %v2316_v0, 16  ;;  %v2550_v34 = vshrl.u32 %v2341_v6, 16 }
 0x277   : > { %11914 = vst [vmem:[#allocation11_spill] sm:$0xff] %v10461_v14  ;;  %v2845_v40 = vrot.slane %v2831_v12, %v9610_v2  ;;  %v2846_v20 = vcombine.low %v2823_v19, %v2838_v50  ;;  %v2847_v8 = vcombine.high %v2823_v19, %v2838_v50  ;;  %v2897_v42 = vcombine.high %v2650_v33, %v9599_v61 }
 0x278   : > { %v2904_v44 = vrot.slane %v2650_v33, %v9610_v2  ;;  %8907 = vmatprep.subr.bf16.mxu1 %v11916_v63  ;;  %v4541_v19 = vsel %vm3708_vm2, %v2548_v60, 0 }
 0x279   : > { %v2854_v57 = vrot.slane %v2846_v20, %v9627_v18  ;;  %v2861_v53 = vrot.slane %v2847_v8, %v9627_v18  ;;  %v2862_v55 = vcombine.low %v2830_v35, %v2845_v40  ;;  %v2863_v24 = vcombine.high %v2830_v35, %v2845_v40 }
 0x27a   : > { %v2605_v30 = vpop.permute.xlu1 %2604  ;;  %v2911_v12 = vrot.slane %v2897_v42, %v9610_v2  ;;  %v2912_v36 = vcombine.low %v2889_v41, %v2904_v44  ;;  %v2913_v50 = vcombine.high %v2889_v41, %v2904_v44  ;;  %v11917_v20 = vpack.i.b16 %v10241_v59, %v10238_v29 }
 0x27b   : > { %v10485_v33 = vrot.slane %v2862_v55, %v9627_v18  ;;  %v10488_v14 = vrot.slane %v2863_v24, %v9627_v18  ;;  %v3312_v0 = vcombine.low %v2854_v57, %v2861_v53  ;;  %v8532_v6 = vcombine.high %v2854_v57, %v2861_v53 }
 0x27c   : > { %8892 = vmatmul.mubr.msk.bf16.vlgmr.msra.gmra.mrb[32].mxu0 %vm3708_vm2, %v11917_v20  ;;  %v10495_v35 = vrot.slane %v2912_v36, %v9627_v18  ;;  %v10498_v41 = vrot.slane %v2913_v50, %v9627_v18  ;;  %v2928_v40 = vcombine.low %v2896_v9, %v2911_v12  ;;  %v2929_v8 = vcombine.high %v2896_v9, %v2911_v12 }
 0x27d   : > { %8902 = vmatpush3.bf16.xpose.msra.mxu0 %v4541_v19  ;;  %v10501_v42 = vrot.slane %v3312_v0, %v9610_v2  ;;  %v10504_v44 = vrot.slane %v8532_v6, %v9610_v2  ;;  %v3362_v29 = vcombine.low %v10485_v33, %v10488_v14  ;;  %v8534_v59 = vcombine.high %v10485_v33, %v10488_v14 }
 0x27e   : > { %8903 = vmatprep.mubr.msk.bf16.mxu0 %vm9451_vm1, %v11916_v63  ;;  %v10513_v60 = vrot.slane %v2928_v40, %v9627_v18  ;;  %v10516_v9 = vrot.slane %v2929_v8, %v9627_v18  ;;  %v3337_v57 = vcombine.low %v10495_v35, %v10498_v41  ;;  %v8533_v53 = vcombine.high %v10495_v35, %v10498_v41  ;;  %v2613_v55 = vpop.permute.xlu1 %2612 }
 0x27f   : > { %8898 = vmatmul.mubr.msk.bf16.vlgmr.msra.gmra.mrb[40].mxu1 %vm3708_vm2, %v10289_v37  ;;  %v11918_v24 = vcombine.high %v10386_v23, %v10390_v43  ;;  %v8525_v36 = vcombine.high %v10419_v11, %v10422_v21  ;;  %v2551_v19 = vpack.i.b16 %v2550_v34, %v2549_v5  ;;  %8913 = vmatprep.subr.bf16.mxu0 %v11916_v63  ;;  %v2632_v8 = vshrl.u32 %v2605_v30, 16 }
 0x280   : > { %v11919_v37 = vcombine.low %v10419_v11, %v10422_v21  ;;  %v2684_v23 = vcombine.high %v10438_v27, %v9599_v61  ;;  %v3387_v43 = vcombine.low %v10513_v60, %v10516_v9  ;;  %8909 = vmatprep.mubr.msk.bf16.mxu1 %vm9451_vm1, %v11916_v63  ;;  %v2691_v5 = vrot.slane %v10438_v27, %v9610_v2 }
 0x281   : > { %v10528_v12 = vrot.slane %v11918_v24, %v9610_v2  ;;  %v4587_v34 = vsel %vm3708_vm2, %v2551_v19, 0  ;;  %v11920_v11 = vcombine.high %v10376_v47, %v10379_v58  ;;  %v2630_v20 = vpack.i.b16 %v2613_v55, %v2605_v30 }
 0x282   : > { %v10539_v0 = vrot.slane %v11919_v37, %v9610_v2  ;;  %v2750_v40 = vcombine.high %v10473_v16, %v9599_v61  ;;  %8908 = vmatpush3.bf16.xpose.msra.mxu1 %v4587_v34  ;;  %v11921_v24 = vcombine.low %v10402_v22, %v10405_v54  ;;  %v2633_v50 = vshrl.u32 %v2613_v55, 16 }
 0x283   : > { %v2382_v21 = vrot.slane %v11920_v11, %v9610_v2  ;;  %v11922_v27 = vpack.i.b16 %v10271_v15, %v10267_v56  ;;  %8919 = vmatprep.subr.bf16.mxu1 %v11916_v63  ;;  %v2699_v58 = vcombine.high %v2630_v20, %v9599_v61  ;;  %v2706_v19 = vrot.slane %v2630_v20, %v9610_v2 }
 0x284   : > { %v2365_v37 = vrot.slane %v11921_v24, %v9627_v18  ;;  %v1442_v30 = vshrl.u32 %v10362_v39, 16  ;;  %v2432_v34 = vrot.slane %v8525_v36, %v9610_v2  ;;  %v2698_v22 = vrot.slane %v2684_v23, %v9610_v2 }
 0x285   : > { %8904 = vmatmul.mubr.msk.bf16.vlgmr.msra.gmra.mrb[36].mxu0 %vm3708_vm2, %v11922_v27  ;;  %v2383_v47 = vcombine.low %v10443_v51, %v2382_v21  ;;  %v2757_v54 = vrot.slane %v10473_v16, %v9610_v2  ;;  %v2634_v56 = vpack.i.b16 %v2633_v50, %v2632_v8  ;;  %v2713_v51 = vrot.slane %v2699_v58, %v9610_v2 }
 0x286   : > { %8915 = vmatprep.mubr.msk.bf16.mxu0 %vm9451_vm1, %v11916_v63  ;;  %v2714_v55 = vcombine.low %v2691_v5, %v2706_v19  ;;  %v2715_v11 = vcombine.high %v2691_v5, %v2706_v19  ;;  %v2764_v21 = vrot.slane %v2750_v40, %v9610_v2  ;;  %v2555_v23 = vshrl.u32 %v2365_v37, 16 }
 0x287   : > { %v2390_v15 = vrot.slane %v2383_v47, %v9627_v18  ;;  %v2765_v20 = vcombine.high %v2634_v56, %v9599_v61  ;;  %v2772_v36 = vrot.slane %v2634_v56, %v9610_v2  ;;  %v2730_v8 = vcombine.low %v2698_v22, %v2713_v51 }
 0x288   : > { %v2722_v16 = vrot.slane %v2714_v55, %v9627_v18  ;;  %v2729_v50 = vrot.slane %v2715_v11, %v9627_v18  ;;  %v2731_v27 = vcombine.high %v2698_v22, %v2713_v51  ;;  %v2366_v19 = vcombine.high %v2365_v37, %v11915_v38 }
 0x289   : > { %v2554_v24 = vpack.i.b16 %v2390_v15, %v2365_v37  ;;  %v2779_v47 = vrot.slane %v2765_v20, %v9610_v2  ;;  %v2780_v6 = vcombine.low %v2757_v54, %v2772_v36  ;;  %v2781_v58 = vcombine.high %v2757_v54, %v2772_v36  ;;  %8910 = vmatmul.mubr.msk.bf16.vlgmr.msra.gmra.mrb[44].mxu1 %vm3708_vm2, %v10300_v7 }
 0x28a   : > { %v2738_v40 = vrot.slane %v2730_v8, %v9627_v18  ;;  %v2433_v56 = vcombine.low %v10539_v0, %v2432_v34  ;;  %v2745_v55 = vrot.slane %v2731_v27, %v9627_v18  ;;  %v3212_v20 = vcombine.low %v2722_v16, %v2729_v50  ;;  %8921 = vmatprep.mubr.msk.bf16.mxu1 %vm9451_vm1, %v11916_v63 }
 0x28b   : > { %v4633_v5 = vsel %vm3708_vm2, %v2554_v24, 0  ;;  %v2788_v22 = vrot.slane %v2780_v6, %v9627_v18  ;;  %v2795_v51 = vrot.slane %v2781_v58, %v9627_v18  ;;  %v2796_v11 = vcombine.low %v2764_v21, %v2779_v47 }
 0x28c   : > { %8914 = vmatpush3.bf16.xpose.msra.mxu0 %v4633_v5  ;;  %v2797_v54 = vcombine.high %v2764_v21, %v2779_v47  ;;  %v8528_v36 = vcombine.high %v2722_v16, %v2729_v50  ;;  %v2556_v24 = vshrl.u32 %v2390_v15, 16  ;;  %v3262_v34 = vcombine.low %v2738_v40, %v2745_v55 }
 0x28d   : > { %8925 = vmatprep.subr.bf16.mxu0 %v11916_v63  ;;  %v10598_v7 = vrot.slane %v2796_v11, %v9627_v18  ;;  %v3237_v0 = vcombine.low %v2788_v22, %v2795_v51  ;;  %v8529_v37 = vcombine.high %v2788_v22, %v2795_v51  ;;  %v8530_v8 = vcombine.high %v2738_v40, %v2745_v55 }
 0x28e   : > { %v10601_v6 = vrot.slane %v2797_v54, %v9627_v18  ;;  %v2557_v27 = vpack.i.b16 %v2556_v24, %v2555_v23  ;;  %v2391_v21 = vcombine.high %v2390_v15, %v11915_v38  ;;  %v11923_v16 = vcombine.low %v10430_v31, %v10410_v26 }
 0x28f   : > { %v11924_v47 = vcombine.high %v10430_v31, %v10410_v26  ;;  %v2442_v5 = vcombine.low %v10435_v10, %v10446_v25  ;;  %v2408_v22 = vcombine.low %v10456_v32, %v10528_v12  ;;  %v2440_v55 = vrot.slane %v2433_v56, %v9627_v18 }
 0x290   : > { %v2080_v50 = vrot.slane %v11923_v16, %v9627_v18  ;;  %v3287_v23 = vcombine.low %v10598_v7, %v10601_v6  ;;  %v8531_v15 = vcombine.high %v10598_v7, %v10601_v6  ;;  %v4679_v40 = vsel %vm3708_vm2, %v2557_v27, 0 }
 0x291   : > { %v2087_v58 = vrot.slane %v11924_v47, %v9627_v18  ;;  %v3219_v51 = vrot.slane %v3212_v20, %v9610_v2  ;;  %v3227_v26 = vrot.slane %v8528_v36, %v9610_v2  ;;  %8920 = vmatpush3.bf16.xpose.msra.mxu1 %v4679_v40  ;;  %v2560_v31 = vpack.i.b16 %v2391_v21, %v2366_v19 }
 0x292   : > { %v2562_v11 = vshrl.u32 %v2391_v21, 16  ;;  %v8526_v32 = vcombine.high %v10435_v10, %v10446_v25  ;;  %v3244_v12 = vrot.slane %v3237_v0, %v9610_v2  ;;  %v3252_v54 = vrot.slane %v8529_v37, %v9610_v2  ;;  %8931 = vmatprep.subr.bf16.mxu1 %v11916_v63 }
 0x293   : > { %v11925_v24 = vpack.i.b16 %v10323_v1, %v10287_v62  ;;  %v2561_v56 = vshrl.u32 %v2366_v19, 16  ;;  %v4725_v20 = vsel %vm3708_vm2, %v2560_v31, 0  ;;  %v2415_v36 = vrot.slane %v2408_v22, %v9627_v18 }
 0x294   : > { %v1446_v10 = vpack.i.b16 %v10397_v4, %v10317_v45  ;;  %v1448_v25 = vshrl.u32 %v10397_v4, 16  ;;  %v3269_v0 = vrot.slane %v3262_v34, %v9610_v2  ;;  %v3277_v62 = vrot.slane %v8530_v8, %v9610_v2 }
 0x295   : > { %8916 = vmatmul.mubr.msk.bf16.vlgmr.msra.gmra.mrb[40].mxu0 %vm3708_vm2, %v11925_v24  ;;  %v2563_v1 = vpack.i.b16 %v2562_v11, %v2561_v56  ;;  %v11926_v19 = vshrl.u32 %v10305_v28, 16  ;;  %v2467_v27 = vcombine.low %v2080_v50, %v2087_v58  ;;  %v8527_v21 = vcombine.high %v2080_v50, %v2087_v58 }
 0x296   : > { %8927 = vmatprep.mubr.msk.bf16.mxu0 %vm9451_vm1, %v11916_v63  ;;  %8926 = vmatpush3.bf16.xpose.msra.mxu0 %v4725_v20  ;;  %v2441_v16 = vcombine.high %v2440_v55, %v11915_v38  ;;  %v3228_v47 = vcombine.low %v3219_v51, %v3227_v26  ;;  %v2449_v22 = vrot.slane %v2442_v5, %v9610_v2  ;;  %v1447_v56 = vshrl.u32 %v10317_v45, 16 }
 0x297   : > { %v1443_v37 = vpack.i.b16 %v1442_v30, %v11926_v19  ;;  %8937 = vmatprep.subr.bf16.mxu0 %v11916_v63  ;;  %v2457_v34 = vrot.slane %v8526_v32, %v9610_v2  ;;  %v10654_v8 = vrot.slane %v3362_v29, %v9610_v2  ;;  %v3253_v40 = vcombine.low %v3244_v12, %v3252_v54 }
 0x298   : > { %v10660_v30 = vrot.slane %v8534_v59, %v9610_v2  ;;  %v2566_v50 = vpack.i.b16 %v2440_v55, %v2415_v36  ;;  %v2416_v58 = vcombine.high %v2415_v36, %v11915_v38  ;;  %v10664_v5 = vrot.slane %v3228_v47, %v9627_v18  ;;  %8922 = vmatmul.mubr.msk.bf16.vlgmr.msra.gmra.mrb[48].mxu1 %vm3708_vm2, %v10414_v3 }
 0x299   : > { %v4771_v51 = vsel %vm3708_vm2, %v2563_v1, 0  ;;  %v2568_v29 = vshrl.u32 %v2440_v55, 16  ;;  %v10670_v26 = vrot.slane %v3253_v40, %v9627_v18  ;;  %v3278_v31 = vcombine.low %v3269_v0, %v3277_v62  ;;  %8933 = vmatprep.mubr.msk.bf16.mxu1 %vm9451_vm1, %v11916_v63 }
 0x29a   : > { %v3344_v14 = vrot.slane %v3337_v57, %v9610_v2  ;;  %8932 = vmatpush3.bf16.xpose.msra.mxu1 %v4771_v51  ;;  %v2574_v33 = vshrl.u32 %v2441_v16, 16  ;;  %v2474_v59 = vrot.slane %v2467_v27, %v9610_v2  ;;  %v2482_v3 = vrot.slane %v8527_v21, %v9610_v2 }
 0x29b   : > { %v3352_v55 = vrot.slane %v8533_v53, %v9610_v2  ;;  %v3394_v11 = vrot.slane %v3387_v43, %v9610_v2  ;;  %8943 = vmatprep.subr.bf16.mxu1 %v11916_v63  ;;  %v2567_v57 = vshrl.u32 %v2415_v36, 16  ;;  %v10691_v32 = vcombine.high %v10664_v5, %v11915_v38 }
 0x29c   : > { %v11927_v12 = vcombine.high %v10513_v60, %v10516_v9  ;;  %v11928_v35 = vpack.i.b16 %v10362_v39, %v10305_v28  ;;  %v4817_v41 = vsel %vm3708_vm2, %v2566_v50, 0  ;;  %v2573_v53 = vshrl.u32 %v2416_v58, 16 }
 0x29d   : > { %v2458_v43 = vcombine.low %v2449_v22, %v2457_v34  ;;  %v2569_v24 = vpack.i.b16 %v2568_v29, %v2567_v57  ;;  %v10707_v60 = vcombine.high %v10670_v26, %v11915_v38  ;;  %v3294_v28 = vrot.slane %v3287_v23, %v9610_v2 }
 0x29e   : > { %v3402_v54 = vrot.slane %v11927_v12, %v9610_v2  ;;  %8928 = vmatmul.mubr.msk.bf16.vlgmr.msra.gmra.mrb[44].mxu0 %vm3708_vm2, %v11928_v35  ;;  %v2572_v39 = vpack.i.b16 %v2441_v16, %v2416_v58  ;;  %v2575_v9 = vpack.i.b16 %v2574_v33, %v2573_v53  ;;  %v2483_v20 = vcombine.low %v2474_v59, %v2482_v3 }
 0x29f   : > { %8938 = vmatpush3.bf16.xpose.msra.mxu0 %v4817_v41  ;;  %8939 = vmatprep.mubr.msk.bf16.mxu0 %vm9451_vm1, %v11916_v63  ;;  %v3621_v36 = vshrl.u32 %v10691_v32, 16  ;;  %v3622_v62 = vshrl.u32 %v10707_v60, 16  ;;  %v10719_v1 = vrot.slane %v3278_v31, %v9627_v18  ;;  %v3302_v23 = vrot.slane %v8531_v15, %v9610_v2 }
 0x2a0   : > { %8949 = vmatprep.subr.bf16.mxu0 %v11916_v63  ;;  %v1449_v19 = vpack.i.b16 %v1448_v25, %v1447_v56  ;;  %v10727_v27 = vcombine.high %v10397_v4, %v11915_v38  ;;  %v10730_v21 = vrot.slane %v2458_v43, %v9627_v18  ;;  %v11929_v16 = vcombine.low %v10501_v42, %v10504_v44 }
 0x2a1   : > { %8934 = vmatmul.mubr.msk.bf16.vlgmr.msra.gmra.mrb[52].mxu1 %vm3708_vm2, %v1443_v37  ;;  %v4863_v22 = vsel %vm3708_vm2, %v2569_v24, 0  ;;  %v10740_v7 = vpack.i.b16 %v3622_v62, %v3621_v36  ;;  %v3303_v6 = vcombine.low %v3294_v28, %v3302_v23  ;;  %v3353_v15 = vcombine.low %v3344_v14, %v3352_v55 }
 0x2a2   : > { %v10736_v47 = vrot.slane %v11929_v16, %v9627_v18  ;;  %8944 = vmatpush3.bf16.xpose.msra.mxu1 %v4863_v22  ;;  %8945 = vmatprep.mubr.msk.bf16.mxu1 %vm9451_vm1, %v11916_v63  ;;  %v4909_v25 = vsel %vm3708_vm2, %v2572_v39, 0  ;;  %v4955_v34 = vsel %vm3708_vm2, %v2575_v9, 0  ;;  %v2490_v42 = vrot.slane %v2483_v20, %v9627_v18 }
 0x2a3   : > { %v3378_v44 = vcombine.low %v10654_v8, %v10660_v30  ;;  %8955 = vmatprep.subr.bf16.mxu1 %v11916_v63  ;;  %v10751_v37 = vrot.slane %v3303_v6, %v9627_v18  ;;  %v10755_v40 = vcombine.high %v10719_v1, %v11915_v38  ;;  %v10758_v50 = vrot.slane %v3353_v15, %v9627_v18 }
 0x2a4   : > { %11930 = vst [vmem:[#allocation12_spill] sm:$0xff] %v10736_v47  ;;  %v3403_v58 = vcombine.low %v3394_v11, %v3402_v54  ;;  %v3627_v8 = vshrl.u32 %v10719_v1, 16  ;;  %v3639_v30 = vshrl.u32 %v10736_v47, 16  ;;  %v10768_v51 = vcombine.high %v10736_v47, %v11915_v38 }
 0x2a5   : > { %11931 = vst [vmem:[#allocation13_spill] sm:$0xff] %v10755_v40  ;;  %11932 = vst [vmem:[#allocation14_spill] sm:$0xff] %v10758_v50  ;;  %v10771_v29 = vrot.slane %v3378_v44, %v9627_v18  ;;  %v3628_v4 = vshrl.u32 %v10751_v37, 16  ;;  %v3640_v31 = vshrl.u32 %v10758_v50, 16  ;;  %v2578_v14 = vpack.i.b16 %v2490_v42, %v10730_v21 }
 0x2a6   : > { %8940 = vmatmul.mubr.msk.bf16.vlgmr.msra.gmra.mrb[48].mxu0 %vm3708_vm2, %v1446_v10  ;;  %11933 = vst [vmem:[#allocation15_spill] sm:$0xff] %v10768_v51  ;;  %v10780_v10 = vcombine.high %v10751_v37, %v11915_v38  ;;  %v10789_v59 = vcombine.high %v10758_v50, %v11915_v38  ;;  %v10792_v3 = vrot.slane %v3403_v58, %v9627_v18  ;;  %v3633_v11 = vshrl.u32 %v10755_v40, 16 }
 0x2a7   : > { %11934 = vst [vmem:[#allocation16_spill] sm:$0xff] %v10771_v29  ;;  %8950 = vmatpush3.bf16.xpose.msra.mxu0 %v4909_v25  ;;  %8951 = vmatprep.mubr.msk.bf16.mxu0 %vm9451_vm1, %v11916_v63  ;;  %v10794_v55 = vpack.i.b16 %v3628_v4, %v3627_v8  ;;  %v10798_v12 = vpack.i.b16 %v3640_v31, %v3639_v30  ;;  %v3645_v35 = vshrl.u32 %v10768_v51, 16  ;;  %v2580_v43 = vshrl.u32 %v2490_v42, 16 }
 0x2a8   : > { %11935 = vst [vmem:[#allocation17_spill] sm:$0xff] %v10780_v10  ;;  %8961 = vmatprep.subr.bf16.mxu0 %v11916_v63  ;;  %11936 = vst [vmem:[#allocation18_spill] sm:$0xff] %v10789_v59  ;;  %v3634_v57 = vshrl.u32 %v10780_v10, 16  ;;  %v3646_v41 = vshrl.u32 %v10789_v59, 16  ;;  %v3651_v56 = vshrl.u32 %v10771_v29, 16  ;;  %v3652_v28 = vshrl.u32 %v10792_v3, 16 }
 0x2a9   : > { %11937 = vst [vmem:[#allocation19_spill] sm:$0xff] %v10792_v3  ;;  %11938 = vst [vmem:[#allocation20_spill] sm:$0xff] %v10798_v12  ;;  %8946 = vmatmul.mubr.msk.bf16.vlgmr.msra.gmra.mrb[56].mxu1 %vm3708_vm2, %v1449_v19  ;;  %v1452_v39 = vpack.i.b16 %v10727_v27, %v10350_v46  ;;  %v1454_v9 = vshrl.u32 %v10727_v27, 16  ;;  %v2579_v62 = vshrl.u32 %v10730_v21, 16  ;;  %v10826_v19 = vcombine.high %v10771_v29, %v11915_v38 }
 0x2aa   : > { %v10807_v24 = vpack.i.b16 %v3634_v57, %v3633_v11  ;;  %8956 = vmatpush3.bf16.xpose.msra.mxu1 %v4955_v34  ;;  %8957 = vmatprep.mubr.msk.bf16.mxu1 %vm9451_vm1, %v11916_v63  ;;  %v10816_v20 = vpack.i.b16 %v3646_v41, %v3645_v35  ;;  %v10822_v23 = vpack.i.b16 %v3652_v28, %v3651_v56  ;;  %v5001_v27 = vsel %vm3708_vm2, %v2578_v14, 0 }
 0x2ab   : > { %8967 = vmatprep.subr.bf16.mxu1 %v11916_v63  ;;  %11942 = vst [vmem:[#allocation24_spill] sm:$0xff] %v10826_v19  ;;  %v10830_v16 = vcombine.high %v10792_v3, %v11915_v38  ;;  %v1453_v22 = vshrl.u32 %v10350_v46, 16  ;;  %v1338_v6 = vcombine.low %v10334_v48, %v10340_v17  ;;  %v2491_v15 = vcombine.high %v2490_v42, %v11915_v38 }
 0x2ac   : > { %11939 = vst [vmem:[#allocation21_spill] sm:$0xff] %v10807_v24  ;;  %11940 = vst [vmem:[#allocation22_spill] sm:$0xff] %v10816_v20  ;;  %v2581_v25 = vpack.i.b16 %v2580_v43, %v2579_v62  ;;  %v3657_v34 = vshrl.u32 %v10826_v19, 16  ;;  %v11944_v46 = vcombine.low %v10345_v13, %v10353_v52  ;;  %v2466_v48 = vcombine.high %v10730_v21, %v11915_v38 }
 0x2ad   : > { %11941 = vst [vmem:[#allocation23_spill] sm:$0xff] %v10822_v23  ;;  %11943 = vst [vmem:[#allocation25_spill] sm:$0xff] %v10830_v16  ;;  %v3658_v44 = vshrl.u32 %v10830_v16, 16  ;;  %v1455_v17 = vpack.i.b16 %v1454_v9, %v1453_v22  ;;  %v1345_v30 = vrot.slane %v1338_v6, %v9627_v18  ;;  %v2586_v14 = vshrl.u32 %v2491_v15, 16 }
 0x2ae   : > { %8952 = vmatmul.mubr.msk.bf16.vlgmr.msra.gmra.mrb[52].mxu0 %vm3708_vm2, %v1452_v39  ;;  %v1370_v8 = vrot.slane %v11944_v46, %v9627_v18  ;;  %v2584_v4 = vpack.i.b16 %v2491_v15, %v2466_v48  ;;  %v5047_v31 = vsel %vm3708_vm2, %v2581_v25, 0  ;;  %v2585_v52 = vshrl.u32 %v2466_v48, 16 }
 0x2af   : > { %8962 = vmatpush3.bf16.xpose.msra.mxu0 %v5001_v27  ;;  %8963 = vmatprep.mubr.msk.bf16.mxu0 %vm9451_vm1, %v11916_v63  ;;  %v10851_v42 = vpack.i.b16 %v3658_v44, %v3657_v34  ;;  %v1459_v57 = vshrl.u32 %v1345_v30, 16  ;;  %v1346_v56 = vcombine.high %v1345_v30, %v11915_v38  ;;  %v3614_v28 = vpack.i.b16 %v10670_v26, %v10664_v5 }
 0x2b0   : > { %8973 = vmatprep.subr.bf16.mxu0 %v11916_v63  ;;  %v1458_v11 = vpack.i.b16 %v1370_v8, %v1345_v30  ;;  %v1460_v13 = vshrl.u32 %v1370_v8, 16  ;;  %v5093_v21 = vsel %vm3708_vm2, %v2584_v4, 0  ;;  %v2587_v35 = vpack.i.b16 %v2586_v14, %v2585_v52 }
 0x2b1   : > { %11945 = vst [vmem:[#allocation26_spill] sm:$0xff] %v10851_v42  ;;  %8958 = vmatmul.mubr.msk.bf16.vlgmr.msra.gmra.mrb[60].mxu1 %vm3708_vm2, %v1455_v17  ;;  %v1371_v41 = vcombine.high %v1370_v8, %v11915_v38  ;;  %v3616_v9 = vshrl.u32 %v10670_v26, 16  ;;  %v3615_v22 = vshrl.u32 %v10664_v5, 16  ;;  %v5570_v6 = vsel %vm5568_vm3, %v3614_v28, 0 }
 0x2b2   : > { %8968 = vmatpush3.bf16.xpose.msra.mxu1 %v5047_v31  ;;  %8969 = vmatprep.mubr.msk.bf16.mxu1 %vm9451_vm1, %v11916_v63  ;;  %v1461_v43 = vpack.i.b16 %v1460_v13, %v1459_v57  ;;  %v5139_v39 = vsel %vm3708_vm2, %v2587_v35, 0  ;;  %v1465_v15 = vshrl.u32 %v1346_v56, 16 }
 0x2b3   : > { %8979 = vmatprep.subr.bf16.mxu1 %v11916_v63  ;;  %v1464_v62 = vpack.i.b16 %v1371_v41, %v1346_v56  ;;  %v1466_v27 = vshrl.u32 %v1371_v41, 16  ;;  %v3617_v25 = vpack.i.b16 %v3616_v9, %v3615_v22 }
 0x2b5   : > { %v1467_v26 = vpack.i.b16 %v1466_v27, %v1465_v15  ;;  %v5616_v34 = vsel %vm5568_vm3, %v3617_v25, 0 }
 0x2b6   : > { %8964 = vmatmul.mubr.msk.bf16.vlgmr.msra.gmra.mrb[56].mxu0 %vm3708_vm2, %v1458_v11 }
 0x2b7   : > { %8974 = vmatpush3.bf16.xpose.msra.mxu0 %v5093_v21  ;;  %8975 = vmatprep.mubr.msk.bf16.mxu0 %vm9451_vm1, %v11916_v63 }
 0x2b8   : > { %8985 = vmatprep.subr.bf16.mxu0 %v11916_v63 }
 0x2b9   : > { %8970 = vmatmul.mubr.msk.bf16.vlgmr.msra.gmra.mrb[64].mxu1 %vm3708_vm2, %v1461_v43 }
 0x2ba   : > { %8980 = vmatpush3.bf16.xpose.msra.mxu1 %v5139_v39  ;;  %8981 = vmatprep.mubr.msk.bf16.mxu1 %vm9451_vm1, %v11916_v63 }
 0x2bb   : > { %8991 = vmatprep.subr.bf16.mxu1 %v11916_v63 }
 0x2be   : > { %8976 = vmatmul.mubr.msk.bf16.vlgmr.msra.gmra.mrb[60].mxu0 %vm3708_vm2, %v1464_v62 }
 0x2bf   : > { %8986 = vmatpush3.bf16.msra.mxu0 %v5570_v6  ;;  %8987 = vmatprep.mubr.msk.bf16.mxu0 %vm9451_vm1, %v11916_v63 }
 0x2c0   : > { %8997 = vmatprep.subr.bf16.mxu0 %v11916_v63 }
 0x2c1   : > { %8982 = vmatmul.mubr.msk.bf16.vlgmr.msra.gmra.mrb[68].mxu1 %vm3708_vm2, %v1467_v26 }
 0x2c2   : > { %8992 = vmatpush3.bf16.msra.mxu1 %v5616_v34  ;;  %8993 = vmatprep.mubr.msk.bf16.mxu1 %vm9451_vm1, %v11916_v63 }
 0x2c3   : > { %9003 = vmatprep.subr.bf16.mxu1 %v11916_v63 }
 0x2e7   : > { %v10885_v5 = vpop.f32.mrb[4].mxu1 }
 0x2e8   : > { %v8797_v44 = vpop.f32.mrb[5].mxu1  ;;  %v5181_v46 = vsel %vm3708_vm2, %v10885_v5, -inf }
 0x2e9   : > { %5182 = vmax.xlane.f32.xlu0 %v5181_v46  ;;  %v3752_v8 = vpop.f32.mrb[6].mxu1 }
 0x2ea   : > { %v8798_v17 = vpop.f32.mrb[7].mxu1 }
 0x2eb   : > { %v10889_v48 = vpop.f32.mrb[4].mxu0 }
 0x2ec   : > { %v8809_v30 = vpop.f32.mrb[5].mxu0  ;;  %v5187_v14 = vsel %vm3708_vm2, %v10889_v48, -inf }
 0x2ed   : > { %v3844_v4 = vpop.f32.mrb[6].mxu0  ;;  %5188 = vmax.xlane.f32.xlu0 %v5187_v14 }
 0x2ee   : > { %v8810_v31 = vpop.f32.mrb[7].mxu0 }
 0x2ef   : > { %v10893_v11 = vpop.f32.mrb[8].mxu1 }
 0x2f0   : > { %v8803_v13 = vpop.f32.mrb[9].mxu1  ;;  %v5184_v52 = vsel %vm3708_vm2, %v10893_v11, -inf }
 0x2f1   : > { %5185 = vmax.xlane.f32.xlu1 %v5184_v52  ;;  %v3798_v21 = vpop.f32.mrb[10].mxu1 }
 0x2f2   : > { %v8804_v35 = vpop.f32.mrb[11].mxu1 }
 0x2f3   : > { %v10897_v57 = vpop.f32.mrb[8].mxu0 }
 0x2f4   : > { %v8821_v41 = vpop.f32.mrb[9].mxu0  ;;  %v5193_v28 = vsel %vm3708_vm2, %v10897_v57, -inf }
 0x2f5   : > { %v3936_v43 = vpop.f32.mrb[10].mxu0  ;;  %5194 = vmax.xlane.f32.xlu1 %v5193_v28 }
 0x2f6   : > { %v8822_v56 = vpop.f32.mrb[11].mxu0 }
 0x2f7   : > { %v10901_v39 = vpop.f32.mrb[12].mxu1 }
 0x2f8   : > { %v8815_v9 = vpop.f32.mrb[13].mxu1  ;;  %v5190_v62 = vsel %vm3708_vm2, %v10901_v39, -inf }
 0x2f9   : > { %v3890_v27 = vpop.f32.mrb[14].mxu1  ;;  %5191 = vmax.xlane.f32.xlu0 %v5190_v62 }
 0x2fa   : > { %v8816_v6 = vpop.f32.mrb[15].mxu1 }
 0x2fb   : > { %v10905_v22 = vpop.f32.mrb[12].mxu0 }
 0x2fc   : > { %v8833_v15 = vpop.f32.mrb[13].mxu0  ;;  %v5199_v25 = vsel %vm3708_vm2, %v10905_v22, -inf }
 0x2fd   : > { %5200 = vmax.xlane.f32.xlu1 %v5199_v25  ;;  %v4028_v26 = vpop.f32.mrb[14].mxu0 }
 0x2fe   : > { %v8834_v34 = vpop.f32.mrb[15].mxu0 }
 0x2ff   : > { %v10909_v44 = vpop.f32.mrb[16].mxu1 }
 0x300   : > { %v8827_v46 = vpop.f32.mrb[17].mxu1  ;;  %v5196_v8 = vsel %vm3708_vm2, %v10909_v44, -inf }
 0x301   : > { %5197 = vmax.xlane.f32.xlu0 %v5196_v8  ;;  %v3982_v17 = vpop.f32.mrb[18].mxu1 }
 0x302   : > { %v8828_v4 = vpop.f32.mrb[19].mxu1 }
 0x303   : > { %v10913_v30 = vpop.f32.mrb[16].mxu0 }
 0x304   : > { %v8845_v31 = vpop.f32.mrb[17].mxu0  ;;  %v5205_v14 = vsel %vm3708_vm2, %v10913_v30, -inf }
 0x305   : > { %5206 = vmax.xlane.f32.xlu1 %v5205_v14  ;;  %v4120_v13 = vpop.f32.mrb[18].mxu0  ;;  %v11946_v14 = vld [vmem:[#allocation5_spill] sm:$0xff] }
 0x306   : > { %v8846_v52 = vpop.f32.mrb[19].mxu0 }
 0x307   : > { %v10917_v21 = vpop.f32.mrb[20].mxu1 }
 0x308   : > { %v8839_v35 = vpop.f32.mrb[21].mxu1  ;;  %v5202_v41 = vsel %vm3708_vm2, %v10917_v21, -inf }
 0x309   : > { %5203 = vmax.xlane.f32.xlu0 %v5202_v41  ;;  %v4074_v43 = vpop.f32.mrb[22].mxu1 }
 0x30a   : > { %v8840_v28 = vpop.f32.mrb[23].mxu1 }
 0x30b   : > { %v10921_v56 = vpop.f32.mrb[20].mxu0 }
 0x30c   : > { %v8857_v9 = vpop.f32.mrb[21].mxu0 }
 0x30d   : > { %v4212_v62 = vpop.f32.mrb[22].mxu0  ;;  %v11947_v9 = vld [vmem:[#allocation3_spill] sm:$0xff] }
 0x30e   : > { %v8858_v27 = vpop.f32.mrb[23].mxu0 }
 0x30f   : > { %v10923_v6 = vpop.f32.mrb[24].mxu1 }
 0x310   : > { %v8851_v15 = vpop.f32.mrb[25].mxu1 }
 0x311   : > { %v4166_v25 = vpop.f32.mrb[26].mxu1 }
 0x312   : > { %v8852_v34 = vpop.f32.mrb[27].mxu1 }
 0x313   : > { %v10925_v26 = vpop.f32.mrb[24].mxu0 }
 0x314   : > { %v8869_v46 = vpop.f32.mrb[25].mxu0 }
 0x315   : > { %v4304_v8 = vpop.f32.mrb[26].mxu0 }
 0x316   : > { %2608 = vrot.lane.b32.xlu1 %v9582_v49, %s9455_s10  ;;  %v8870_v17 = vpop.f32.mrb[27].mxu0 }
 0x317   : > { %v10929_v4 = vpop.f32.mrb[28].mxu1  ;;  %v5211_v17 = vsel %vm3708_vm2, %v10921_v56, -inf }
 0x318   : > { %v8863_v31 = vpop.f32.mrb[29].mxu1 }
 0x319   : > { %v4258_v13 = vpop.f32.mrb[30].mxu1  ;;  %v5208_v31 = vsel %vm3708_vm2, %v10923_v6, -inf }
 0x31a   : > { %2616 = vrot.lane.b32.xlu1 %v11946_v14, %s9455_s10  ;;  %v8864_v35 = vpop.f32.mrb[31].mxu1  ;;  %v5217_v14 = vsel %vm3708_vm2, %v10925_v26, -inf  ;;  %v5214_v13 = vsel %vm3708_vm2, %v10929_v4, -inf }
 0x31b   : > { %v10933_v52 = vpop.f32.mrb[28].mxu0 }
 0x31c   : > { %v8881_v41 = vpop.f32.mrb[29].mxu0  ;;  %v5223_v35 = vsel %vm3708_vm2, %v10933_v52, -inf }
 0x31d   : > { %v4396_v43 = vpop.f32.mrb[30].mxu0 }
 0x31e   : > { %v8882_v28 = vpop.f32.mrb[31].mxu0 }
 0x31f   : > { %2600 = vrot.lane.b32.xlu0 %v11947_v9, %s9455_s10  ;;  %v10937_v62 = vpop.f32.mrb[32].mxu1 }
 0x320   : > { %v8875_v49 = vpop.f32.mrb[33].mxu1  ;;  %v5220_v41 = vsel %vm3708_vm2, %v10937_v62, -inf }
 0x321   : > { %v4350_v27 = vpop.f32.mrb[34].mxu1 }
 0x322   : > { %v8876_v15 = vpop.f32.mrb[35].mxu1 }
 0x327   : > { %v10939_v25 = vpop.f32.mrb[36].mxu1 }
 0x328   : > { %v8887_v34 = vpop.f32.mrb[37].mxu1  ;;  %v5226_v43 = vsel %vm3708_vm2, %v10939_v25, -inf }
 0x329   : > { %v4442_v46 = vpop.f32.mrb[38].mxu1 }
 0x32a   : > { %v8888_v8 = vpop.f32.mrb[39].mxu1 }
 0x33e   : > { %5212 = vmax.xlane.f32.xlu1 %v5211_v17  ;;  %5209 = vmax.xlane.f32.xlu0 %v5208_v31 }
 0x342   : > { %5218 = vmax.xlane.f32.xlu1 %v5217_v14  ;;  %5215 = vmax.xlane.f32.xlu0 %v5214_v13 }
 0x346   : > { %5224 = vmax.xlane.f32.xlu1 %v5223_v35  ;;  %5221 = vmax.xlane.f32.xlu0 %v5220_v41 }
 0x34a   : > { %5227 = vmax.xlane.f32.xlu0 %v5226_v43 }
 0x34f   : > { %v10955_v28 = vpop.f32.mrb[32].mxu0 }
 0x350   : > { %v8893_v9 = vpop.f32.mrb[33].mxu0  ;;  %v5229_v49 = vsel %vm3708_vm2, %v10955_v28, -inf }
 0x351   : > { %5230 = vmax.xlane.f32.xlu1 %v5229_v49  ;;  %v4488_v27 = vpop.f32.mrb[34].mxu0 }
 0x352   : > { %v10959_v15 = vpop.f32.mrb[40].mxu1  ;;  %v8894_v34 = vpop.f32.mrb[35].mxu0 }
 0x353   : > { %v8899_v46 = vpop.f32.mrb[41].mxu1  ;;  %v5232_v8 = vsel %vm3708_vm2, %v10959_v15, -inf }
 0x354   : > { %5233 = vmax.xlane.f32.xlu0 %v5232_v8  ;;  %v4534_v17 = vpop.f32.mrb[42].mxu1 }
 0x355   : > { %v8900_v31 = vpop.f32.mrb[43].mxu1 }
 0x358   : > { %v10963_v14 = vpop.f32.mrb[36].mxu0 }
 0x359   : > { %v8905_v13 = vpop.f32.mrb[37].mxu0  ;;  %v5235_v35 = vsel %vm3708_vm2, %v10963_v14, -inf }
 0x35a   : > { %5236 = vmax.xlane.f32.xlu1 %v5235_v35  ;;  %v4580_v41 = vpop.f32.mrb[38].mxu0 }
 0x35b   : > { %v8906_v43 = vpop.f32.mrb[39].mxu0 }
 0x35c   : > { %v10967_v9 = vpop.f32.mrb[44].mxu1 }
 0x35d   : > { %v8911_v49 = vpop.f32.mrb[45].mxu1  ;;  %v5238_v27 = vsel %vm3708_vm2, %v10967_v9, -inf }
 0x35e   : > { %5239 = vmax.xlane.f32.xlu0 %v5238_v27  ;;  %v4626_v34 = vpop.f32.mrb[46].mxu1 }
 0x35f   : > { %v8912_v46 = vpop.f32.mrb[47].mxu1 }
 0x368   : > { %v10971_v8 = vpop.f32.mrb[40].mxu0 }
 0x369   : > { %v8917_v17 = vpop.f32.mrb[41].mxu0  ;;  %v5241_v31 = vsel %vm3708_vm2, %v10971_v8, -inf }
 0x36a   : > { %5242 = vmax.xlane.f32.xlu1 %v5241_v31  ;;  %v4672_v13 = vpop.f32.mrb[42].mxu0 }
 0x36b   : > { %v8918_v35 = vpop.f32.mrb[43].mxu0  ;;  %v10975_v41 = vpop.f32.mrb[48].mxu1 }
 0x36c   : > { %v8923_v43 = vpop.f32.mrb[49].mxu1  ;;  %v5244_v49 = vsel %vm3708_vm2, %v10975_v41, -inf }
 0x36d   : > { %5245 = vmax.xlane.f32.xlu0 %v5244_v49  ;;  %v4718_v58 = vpop.f32.mrb[50].mxu1 }
 0x36e   : > { %v8924_v27 = vpop.f32.mrb[51].mxu1 }
 0x371   : > { %v10979_v34 = vpop.f32.mrb[44].mxu0 }
 0x372   : > { %v8929_v46 = vpop.f32.mrb[45].mxu0  ;;  %v5247_v17 = vsel %vm3708_vm2, %v10979_v34, -inf }
 0x373   : > { %5248 = vmax.xlane.f32.xlu1 %v5247_v17  ;;  %v4764_v36 = vpop.f32.mrb[46].mxu0 }
 0x374   : > { %v8930_v31 = vpop.f32.mrb[47].mxu0  ;;  %v10983_v13 = vpop.f32.mrb[52].mxu1 }
 0x375   : > { %v8935_v35 = vpop.f32.mrb[53].mxu1  ;;  %v5250_v36 = vsel %vm3708_vm2, %v10983_v13, -inf }
 0x376   : > { %v4810_v53 = vpop.f32.mrb[54].mxu1  ;;  %v5183_v46 = vpop.xlane.xlu0 %5182 }
 0x377   : > { %v8936_v43 = vpop.f32.mrb[55].mxu1  ;;  %v5277_v53 = vsub.f32 %v10885_v5, %v5183_v46 }
 0x379   : > { %v10985_v33 = vpop.f32.mrb[48].mxu0  ;;  %v5309_v42 = vmul.f32 1.442695, %v5277_v53 }
 0x37a   : > { %v8941_v54 = vpop.f32.mrb[49].mxu0  ;;  %v5253_v58 = vsel %vm3708_vm2, %v10985_v33, -inf }
 0x37b   : > { %5254 = vmax.xlane.f32.xlu0 %v5253_v58  ;;  %v4856_v49 = vpop.f32.mrb[50].mxu0  ;;  %9278 = vpow2.f32 %v5309_v42 }
 0x37c   : > { %v8942_v27 = vpop.f32.mrb[51].mxu0  ;;  %v10989_v45 = vpop.f32.mrb[56].mxu1 }
 0x37d   : > { %v8947_v17 = vpop.f32.mrb[57].mxu1  ;;  %v5189_v49 = vpop.xlane.xlu0 %5188  ;;  %v5256_v5 = vsel %vm3708_vm2, %v10989_v45, -inf }
 0x37e   : > { %v4902_v31 = vpop.f32.mrb[58].mxu1  ;;  %v5279_v19 = vsub.f32 %v10889_v48, %v5189_v49  ;;  %v5186_v16 = vpop.xlane.xlu1 %5185 }
 0x37f   : > { %5251 = vmax.xlane.f32.xlu0 %v5250_v36  ;;  %v8948_v35 = vpop.f32.mrb[59].mxu1  ;;  %v5278_v48 = vsub.f32 %v10893_v11, %v5186_v16 }
 0x381   : > { %v10994_v43 = vpop.f32.mrb[52].mxu0 }
 0x382   : > { %v8953_v54 = vpop.f32.mrb[53].mxu0  ;;  %v5259_v58 = vsel %vm3708_vm2, %v10994_v43, -inf }
 0x383   : > { %5260 = vmax.xlane.f32.xlu1 %v5259_v58  ;;  %v4948_v27 = vpop.f32.mrb[54].mxu0 }
 0x384   : > { %v8954_v0 = vpop.f32.mrb[55].mxu0  ;;  %v10999_v17 = vpop.f32.mrb[60].mxu1 }
 0x385   : > { %v8959_v46 = vpop.f32.mrb[61].mxu1  ;;  %v5262_v36 = vsel %vm3708_vm2, %v10999_v17, -inf  ;;  %v5313_v0 = vmul.f32 1.442695, %v5279_v19 }
 0x386   : > { %v4994_v31 = vpop.f32.mrb[62].mxu1  ;;  %5263 = vmax.xlane.f32.xlu0 %v5262_v36  ;;  %v5192_v49 = vpop.xlane.xlu0 %5191 }
 0x387   : > { %5257 = vmax.xlane.f32.xlu1 %v5256_v5  ;;  %v8960_v35 = vpop.f32.mrb[63].mxu1  ;;  %v11010_v46 = vpop.xlane.xlu1 %5194  ;;  %9280 = vpow2.f32 %v5313_v0  ;;  %v5311_v5 = vmul.f32 1.442695, %v5278_v48  ;;  %v5280_v42 = vsub.f32 %v10901_v39, %v5192_v49 }
 0x388   : > { %v11023_v48 = vpop.eup %9278 }
 0x389   : > { %v11005_v54 = vpop.f32.mrb[56].mxu0  ;;  %9282 = vpow2.f32 %v5311_v5  ;;  %v5373_v5 = vsel %vm3708_vm2, %v11023_v48, 0.0 }
 0x38a   : > { %v8965_v53 = vpop.f32.mrb[57].mxu0  ;;  %v5265_v58 = vsel %vm3708_vm2, %v11005_v54, -inf }
 0x38b   : > { %5266 = vmax.xlane.f32.xlu1 %v5265_v58  ;;  %v5040_v27 = vpop.f32.mrb[58].mxu0  ;;  %v11017_v16 = vpop.xlane.xlu1 %5200  ;;  %v5315_v58 = vmul.f32 1.442695, %v5280_v42 }
 0x38c   : > { %v8966_v23 = vpop.f32.mrb[59].mxu0  ;;  %v11013_v36 = vpop.f32.mrb[64].mxu1 }
 0x38d   : > { %11948 = vst [vmem:[#allocation5_spill] sm:$0xff] %v11013_v36  ;;  %v8971_v31 = vpop.f32.mrb[65].mxu1  ;;  %v5268_v19 = vsel %vm3708_vm2, %v11013_v36, -inf  ;;  %9284 = vpow2.f32 %v5315_v58 }
 0x38e   : > { %v5086_v11 = vpop.f32.mrb[66].mxu1  ;;  %5269 = vmax.xlane.f32.xlu0 %v5268_v19  ;;  %v5198_v23 = vpop.xlane.xlu0 %5197 }
 0x38f   : > { %v8972_v35 = vpop.f32.mrb[67].mxu1  ;;  %v5282_v49 = vsub.f32 %v10909_v44, %v5198_v23 }
 0x391   : > { %v11019_v53 = vpop.f32.mrb[60].mxu0  ;;  %v5319_v19 = vmul.f32 1.442695, %v5282_v49  ;;  %v11034_v29 = vpop.eup %9280 }
 0x392   : > { %v8977_v0 = vpop.f32.mrb[61].mxu0  ;;  %v5271_v39 = vsel %vm3708_vm2, %v11019_v53, -inf  ;;  %v11026_v31 = vpop.xlane.xlu1 %5206  ;;  %v5379_v49 = vsel %vm3708_vm2, %v11034_v29, 0.0 }
 0x393   : > { %5272 = vmax.xlane.f32.xlu1 %v5271_v39  ;;  %v5132_v27 = vpop.f32.mrb[62].mxu0  ;;  %9286 = vpow2.f32 %v5319_v19 }
 0x394   : > { %v8978_v11 = vpop.f32.mrb[63].mxu0  ;;  %v11028_v35 = vpop.f32.mrb[68].mxu1 }
 0x395   : > { %11949 = vst [vmem:[#allocation3_spill] sm:$0xff] %v11028_v35  ;;  %v8983_v42 = vpop.f32.mrb[69].mxu1  ;;  %v5274_v0 = vsel %vm3708_vm2, %v11028_v35, -inf  ;;  %v11039_v11 = vpop.eup %9282 }
 0x396   : > { %v2609_v44 = vpop.permute.xlu1 %2608  ;;  %v5178_v23 = vpop.f32.mrb[70].mxu1  ;;  %5275 = vmax.xlane.f32.xlu0 %v5274_v0 }
 0x397   : > { %5374 = vadd.xlane.f32.xlu1 %v5373_v5  ;;  %v8984_v39 = vpop.f32.mrb[71].mxu1  ;;  %v5204_v27 = vpop.xlane.xlu0 %5203  ;;  %v2664_v3 = vshrl.u32 %v2609_v44, 16  ;;  %v5376_v23 = vsel %vm3708_vm2, %v11039_v11, 0.0 }
 0x398   : > { %v5284_v58 = vsub.f32 %v10917_v21, %v5204_v27  ;;  %v11044_v21 = vpop.eup %9284  ;;  %v11950_v39 = vld [vmem:[#allocation11_spill] sm:$0xff] }
 0x399   : > { %v2656_v27 = vshrl.u32 %v11950_v39, 16  ;;  %v5382_v40 = vsel %vm3708_vm2, %v11044_v21, 0.0 }
 0x39a   : > { %v2617_v42 = vpop.permute.xlu1 %2616  ;;  %5380 = vadd.xlane.f32.xlu0 %v5379_v49  ;;  %v5323_v20 = vmul.f32 1.442695, %v5284_v58 }
 0x39b   : > { %v2662_v5 = vpack.i.b16 %v2617_v42, %v2609_v44  ;;  %v2665_v51 = vshrl.u32 %v2617_v42, 16  ;;  %v2601_v59 = vpop.permute.xlu0 %2600 }
 0x39c   : > { %9288 = vpow2.f32 %v5323_v20  ;;  %v2654_v47 = vpack.i.b16 %v2601_v59, %v11950_v39  ;;  %v2657_v50 = vshrl.u32 %v2601_v59, 16 }
 0x39d   : > { %v2666_v19 = vpack.i.b16 %v2665_v51, %v2664_v3  ;;  %v2963_v0 = vcombine.high %v2662_v5, %v9599_v61  ;;  %v11048_v49 = vpop.eup %9286  ;;  %v2970_v44 = vrot.slane %v2662_v5, %v9610_v2 }
 0x39e   : > { %5377 = vadd.xlane.f32.xlu0 %v5376_v23  ;;  %v2658_v58 = vpack.i.b16 %v2657_v50, %v2656_v27  ;;  %v2948_v51 = vcombine.high %v2654_v47, %v9599_v61  ;;  %v2955_v3 = vrot.slane %v2654_v47, %v9610_v2  ;;  %v5388_v47 = vsel %vm3708_vm2, %v11048_v49, 0.0 }
 0x39f   : > { %v2977_v20 = vrot.slane %v2963_v0, %v9610_v2  ;;  %v3029_v42 = vcombine.high %v2666_v19, %v9599_v61  ;;  %v3036_v50 = vrot.slane %v2666_v19, %v9610_v2 }
 0x3a0   : > { %v2962_v39 = vrot.slane %v2948_v51, %v9610_v2  ;;  %v2978_v59 = vcombine.low %v2955_v3, %v2970_v44  ;;  %v2979_v23 = vcombine.high %v2955_v3, %v2970_v44  ;;  %v3014_v10 = vcombine.high %v2658_v58, %v9599_v61 }
 0x3a1   : > { %v3021_v5 = vrot.slane %v2658_v58, %v9610_v2  ;;  %v3043_v51 = vrot.slane %v3029_v42, %v9610_v2  ;;  %v11951_v42 = vld [vmem:[#allocation2_spill] sm:$0xff] }
 0x3a2   : > { %5383 = vadd.xlane.f32.xlu0 %v5382_v40  ;;  %v2986_v0 = vrot.slane %v2978_v59, %v9627_v18  ;;  %v2993_v27 = vrot.slane %v2979_v23, %v9627_v18  ;;  %v2994_v12 = vcombine.low %v2962_v39, %v2977_v20  ;;  %v2995_v35 = vcombine.high %v2962_v39, %v2977_v20 }
 0x3a3   : > { %v3028_v44 = vrot.slane %v3014_v10, %v9610_v2  ;;  %v3044_v3 = vcombine.low %v3021_v5, %v3036_v50  ;;  %v3045_v61 = vcombine.high %v3021_v5, %v3036_v50 }
 0x3a4   : > { %v3002_v40 = vrot.slane %v2994_v12, %v9627_v18  ;;  %v3009_v19 = vrot.slane %v2995_v35, %v9627_v18  ;;  %v3412_v58 = vcombine.low %v2986_v0, %v2993_v27  ;;  %v8536_v24 = vcombine.high %v2986_v0, %v2993_v27 }
 0x3a5   : > { %v3052_v59 = vrot.slane %v3044_v3, %v9627_v18  ;;  %v3059_v23 = vrot.slane %v3045_v61, %v9627_v18  ;;  %v3060_v20 = vcombine.low %v3028_v44, %v3043_v51  ;;  %v3061_v39 = vcombine.high %v3028_v44, %v3043_v51 }
 0x3a6   : > { %5389 = vadd.xlane.f32.xlu0 %v5388_v47  ;;  %v11069_v36 = vpop.eup %9288  ;;  %v3419_v10 = vrot.slane %v3412_v58, %v9610_v2  ;;  %v3427_v12 = vrot.slane %v8536_v24, %v9610_v2  ;;  %v3462_v50 = vcombine.low %v3002_v40, %v3009_v19  ;;  %v8538_v35 = vcombine.high %v3002_v40, %v3009_v19 }
 0x3a7   : > { %v3068_v5 = vrot.slane %v3060_v20, %v9627_v18  ;;  %v3075_v47 = vrot.slane %v3061_v39, %v9627_v18  ;;  %v3437_v0 = vcombine.low %v3052_v59, %v3059_v23  ;;  %v8537_v27 = vcombine.high %v3052_v59, %v3059_v23 }
 0x3a8   : > { %2594 = vrot.lane.b32.xlu1 %v11951_v42, %s9455_s10  ;;  %v3428_v3 = vcombine.low %v3419_v10, %v3427_v12  ;;  %v3469_v61 = vrot.slane %v3462_v50, %v9610_v2  ;;  %v3477_v51 = vrot.slane %v8538_v35, %v9610_v2  ;;  %v5394_v44 = vsel %vm3708_vm2, %v11069_v36, 0.0 }
 0x3a9   : > { %v3444_v58 = vrot.slane %v3437_v0, %v9610_v2  ;;  %v3452_v24 = vrot.slane %v8537_v27, %v9610_v2  ;;  %v3487_v42 = vcombine.low %v3068_v5, %v3075_v47  ;;  %v8539_v40 = vcombine.high %v3068_v5, %v3075_v47 }
 0x3aa   : > { %5395 = vadd.xlane.f32.xlu0 %v5394_v44  ;;  %v11086_v19 = vrot.slane %v3428_v3, %v9627_v18  ;;  %v3478_v20 = vcombine.low %v3469_v61, %v3477_v51 }
 0x3ab   : > { %v3453_v59 = vcombine.low %v3444_v58, %v3452_v24  ;;  %v3494_v23 = vrot.slane %v3487_v42, %v9610_v2  ;;  %v3502_v39 = vrot.slane %v8539_v40, %v9610_v2 }
 0x3ac   : > { %v11091_v10 = vrot.slane %v3478_v20, %v9627_v18  ;;  %v11098_v50 = vcombine.high %v11086_v19, %v11915_v38  ;;  %v3663_v5 = vshrl.u32 %v11086_v19, 16 }
 0x3ad   : > { %v11094_v12 = vrot.slane %v3453_v59, %v9627_v18  ;;  %v3503_v35 = vcombine.low %v3494_v23, %v3502_v39  ;;  %v5281_v23 = vsub.f32 %v10897_v57, %v11010_v46  ;;  %v5285_v57 = vsub.f32 %v10913_v30, %v11026_v31 }
 0x3ae   : > { %v11103_v47 = vcombine.high %v11091_v10, %v11915_v38  ;;  %v3669_v24 = vshrl.u32 %v11098_v50, 16  ;;  %v3675_v20 = vshrl.u32 %v11091_v10, 16 }
 0x3af   : > { %v3664_v0 = vshrl.u32 %v11094_v12, 16  ;;  %v11110_v3 = vcombine.high %v11094_v12, %v11915_v38  ;;  %v11113_v61 = vrot.slane %v3503_v35, %v9627_v18  ;;  %v5317_v27 = vmul.f32 1.442695, %v5281_v23 }
 0x3b0   : > { %v3681_v39 = vshrl.u32 %v11103_v47, 16  ;;  %v5325_v46 = vmul.f32 1.442695, %v5285_v57 }
 0x3b1   : > { %v11115_v51 = vpack.i.b16 %v3664_v0, %v3663_v5  ;;  %v3670_v42 = vshrl.u32 %v11110_v3, 16  ;;  %v11125_v40 = vcombine.high %v11113_v61, %v11915_v38  ;;  %v3676_v59 = vshrl.u32 %v11113_v61, 16 }
 0x3b2   : > { %v5283_v38 = vsub.f32 %v10905_v22, %v11017_v16  ;;  %9290 = vpow2.f32 %v5317_v27 }
 0x3b3   : > { %v11132_v35 = vpack.i.b16 %v3670_v42, %v3669_v24  ;;  %v11136_v0 = vpack.i.b16 %v3676_v59, %v3675_v20  ;;  %v3682_v58 = vshrl.u32 %v11125_v40, 16 }
 0x3b4   : > { %v5321_v18 = vmul.f32 1.442695, %v5283_v38 }
 0x3b5   : > { %v11139_v44 = vpack.i.b16 %v3682_v58, %v3681_v39 }
 0x3b6   : > { %9292 = vpow2.f32 %v5321_v18 }
 0x3b7   : > { %9294 = vpow2.f32 %v5325_v46 }
 0x3bc   : > { %v11145_v24 = vpop.eup %9290 }
 0x3bd   : > { %v5385_v42 = vsel %vm3708_vm2, %v11145_v24, 0.0 }
 0x3c0   : > { %v11149_v20 = vpop.eup %9292 }
 0x3c1   : > { %v5391_v18 = vsel %vm3708_vm2, %v11149_v20, 0.0  ;;  %v11155_v30 = vpop.eup %9294 }
 0x3c2   : > { %v5397_v46 = vsel %vm3708_vm2, %v11155_v30, 0.0 }
 0x3cb   : > { %v5213_v58 = vpop.xlane.xlu1 %5212  ;;  %v5210_v22 = vpop.xlane.xlu0 %5209 }
 0x3cc   : > { %5386 = vadd.xlane.f32.xlu1 %v5385_v42  ;;  %v5287_v59 = vsub.f32 %v10921_v56, %v5213_v58  ;;  %v5286_v38 = vsub.f32 %v10923_v6, %v5210_v22 }
 0x3ce   : > { %v5329_v16 = vmul.f32 1.442695, %v5287_v59  ;;  %v5327_v27 = vmul.f32 1.442695, %v5286_v38 }
 0x3cf   : > { %v5219_v31 = vpop.xlane.xlu1 %5218  ;;  %v5216_v39 = vpop.xlane.xlu0 %5215 }
 0x3d0   : > { %5392 = vadd.xlane.f32.xlu1 %v5391_v18  ;;  %9296 = vpow2.f32 %v5329_v16  ;;  %v5289_v23 = vsub.f32 %v10925_v26, %v5219_v31  ;;  %v5288_v56 = vsub.f32 %v10929_v4, %v5216_v39 }
 0x3d1   : > { %9298 = vpow2.f32 %v5327_v27 }
 0x3d2   : > { %v5333_v57 = vmul.f32 1.442695, %v5289_v23  ;;  %v5331_v42 = vmul.f32 1.442695, %v5288_v56 }
 0x3d3   : > { %v5225_v6 = vpop.xlane.xlu1 %5224  ;;  %v5222_v59 = vpop.xlane.xlu0 %5221 }
 0x3d4   : > { %5398 = vadd.xlane.f32.xlu1 %v5397_v46  ;;  %v5291_v58 = vsub.f32 %v10933_v52, %v5225_v6  ;;  %9300 = vpow2.f32 %v5333_v57  ;;  %v5290_v16 = vsub.f32 %v10937_v62, %v5222_v59 }
 0x3d5   : > { %9302 = vpow2.f32 %v5331_v42 }
 0x3d6   : > { %v5337_v22 = vmul.f32 1.442695, %v5291_v58  ;;  %v5335_v26 = vmul.f32 1.442695, %v5290_v16 }
 0x3d7   : > { %v5228_v38 = vpop.xlane.xlu0 %5227 }
 0x3d8   : > { %9304 = vpow2.f32 %v5337_v22  ;;  %v5292_v4 = vsub.f32 %v10939_v25, %v5228_v38 }
 0x3d9   : > { %9306 = vpow2.f32 %v5335_v26 }
 0x3da   : > { %v11163_v18 = vpop.eup %9296  ;;  %v5339_v52 = vmul.f32 1.442695, %v5292_v4 }
 0x3db   : > { %v5403_v31 = vsel %vm3708_vm2, %v11163_v18, 0.0  ;;  %v11168_v27 = vpop.eup %9298 }
 0x3dc   : > { %5404 = vadd.xlane.f32.xlu0 %v5403_v31  ;;  %9308 = vpow2.f32 %v5339_v52  ;;  %v5400_v62 = vsel %vm3708_vm2, %v11168_v27, 0.0 }
 0x3de   : > { %v11170_v23 = vpop.eup %9300  ;;  %v5231_v39 = vpop.xlane.xlu1 %5230 }
 0x3df   : > { %v11174_v57 = vpop.eup %9302  ;;  %v5293_v56 = vsub.f32 %v10955_v28, %v5231_v39  ;;  %v5409_v42 = vsel %vm3708_vm2, %v11170_v23, 0.0 }
 0x3e0   : > { %5401 = vadd.xlane.f32.xlu0 %v5400_v62  ;;  %v5406_v25 = vsel %vm3708_vm2, %v11174_v57, 0.0 }
 0x3e1   : > { %5407 = vadd.xlane.f32.xlu1 %v5406_v25  ;;  %v5341_v6 = vmul.f32 1.442695, %v5293_v56  ;;  %v5234_v58 = vpop.xlane.xlu0 %5233 }
 0x3e2   : > { %v11179_v46 = vpop.eup %9304  ;;  %v5294_v28 = vsub.f32 %v10959_v15, %v5234_v58 }
 0x3e3   : > { %v11183_v59 = vpop.eup %9306  ;;  %9310 = vpow2.f32 %v5341_v6  ;;  %v5415_v22 = vsel %vm3708_vm2, %v11179_v46, 0.0 }
 0x3e4   : > { %5410 = vadd.xlane.f32.xlu0 %v5409_v42  ;;  %v5412_v16 = vsel %vm3708_vm2, %v11183_v59, 0.0  ;;  %v5343_v31 = vmul.f32 1.442695, %v5294_v28 }
 0x3e5   : > { %5416 = vadd.xlane.f32.xlu1 %v5415_v22 }
 0x3e6   : > { %v11190_v38 = vpop.eup %9308 }
 0x3e7   : > { %v5237_v26 = vpop.xlane.xlu1 %5236  ;;  %v5418_v62 = vsel %vm3708_vm2, %v11190_v38, 0.0 }
 0x3e8   : > { %5413 = vadd.xlane.f32.xlu0 %v5412_v16  ;;  %v5295_v4 = vsub.f32 %v10963_v14, %v5237_v26 }
 0x3ea   : > { %v5345_v52 = vmul.f32 1.442695, %v5295_v4 }
 0x3eb   : > { %v5240_v39 = vpop.xlane.xlu0 %5239 }
 0x3ec   : > { %5419 = vadd.xlane.f32.xlu0 %v5418_v62  ;;  %9312 = vpow2.f32 %v5345_v52  ;;  %v5296_v15 = vsub.f32 %v10967_v9, %v5240_v39 }
 0x3ed   : > { %v11195_v56 = vpop.eup %9310  ;;  %9314 = vpow2.f32 %v5343_v31 }
 0x3ee   : > { %v5421_v25 = vsel %vm3708_vm2, %v11195_v56, 0.0  ;;  %v5347_v6 = vmul.f32 1.442695, %v5296_v15 }
 0x3ef   : > { %5422 = vadd.xlane.f32.xlu1 %v5421_v25 }
 0x3f0   : > { %9316 = vpow2.f32 %v5347_v6 }
 0x3f6   : > { %v11200_v42 = vpop.eup %9312 }
 0x3f7   : > { %v5243_v14 = vpop.xlane.xlu1 %5242  ;;  %v5427_v22 = vsel %vm3708_vm2, %v11200_v42, 0.0  ;;  %v11205_v28 = vpop.eup %9314 }
 0x3f8   : > { %v5297_v58 = vsub.f32 %v10971_v8, %v5243_v14  ;;  %5428 = vadd.xlane.f32.xlu0 %v5427_v22  ;;  %v5424_v26 = vsel %vm3708_vm2, %v11205_v28, 0.0 }
 0x3fa   : > { %v5349_v16 = vmul.f32 1.442695, %v5297_v58  ;;  %v5246_v9 = vpop.xlane.xlu0 %5245  ;;  %v11209_v4 = vpop.eup %9316 }
 0x3fb   : > { %v5298_v31 = vsub.f32 %v10975_v41, %v5246_v9  ;;  %v5430_v8 = vsel %vm3708_vm2, %v11209_v4, 0.0 }
 0x3fc   : > { %9318 = vpow2.f32 %v5349_v16  ;;  %5425 = vadd.xlane.f32.xlu0 %v5424_v26  ;;  %5431 = vadd.xlane.f32.xlu1 %v5430_v8 }
 0x3fd   : > { %v5351_v52 = vmul.f32 1.442695, %v5298_v31 }
 0x3ff   : > { %9320 = vpow2.f32 %v5351_v52 }
 0x400   : > { %v5249_v62 = vpop.xlane.xlu1 %5248 }
 0x401   : > { %v5299_v39 = vsub.f32 %v10979_v34, %v5249_v62 }
 0x403   : > { %v5353_v15 = vmul.f32 1.442695, %v5299_v39 }
 0x405   : > { %9322 = vpow2.f32 %v5353_v15 }
 0x406   : > { %v11215_v25 = vpop.eup %9318 }
 0x407   : > { %v5433_v6 = vsel %vm3708_vm2, %v11215_v25, 0.0 }
 0x408   : > { %v5255_v14 = vpop.xlane.xlu0 %5254  ;;  %5434 = vadd.xlane.f32.xlu0 %v5433_v6 }
 0x409   : > { %v5301_v41 = vsub.f32 %v10985_v33, %v5255_v14  ;;  %v11220_v22 = vpop.eup %9320 }
 0x40a   : > { %v5436_v34 = vsel %vm3708_vm2, %v11220_v22, 0.0 }
 0x40b   : > { %v5357_v58 = vmul.f32 1.442695, %v5301_v41 }
 0x40c   : > { %v5252_v16 = vpop.xlane.xlu0 %5251  ;;  %5437 = vadd.xlane.f32.xlu0 %v5436_v34 }
 0x40d   : > { %9324 = vpow2.f32 %v5357_v58  ;;  %v5300_v9 = vsub.f32 %v10983_v13, %v5252_v16 }
 0x40f   : > { %v11225_v26 = vpop.eup %9322  ;;  %v5355_v31 = vmul.f32 1.442695, %v5300_v9 }
 0x410   : > { %v11227_v8 = vpop.xlane.xlu1 %5260  ;;  %v5439_v52 = vsel %vm3708_vm2, %v11225_v26, 0.0 }
 0x411   : > { %9326 = vpow2.f32 %v5355_v31  ;;  %5440 = vadd.xlane.f32.xlu1 %v5439_v52 }
 0x413   : > { %v5264_v58 = vpop.xlane.xlu0 %5263 }
 0x414   : > { %v5258_v33 = vpop.xlane.xlu1 %5257 }
 0x415   : > { %v5302_v62 = vsub.f32 %v10989_v45, %v5258_v33 }
 0x417   : > { %v11232_v39 = vpop.eup %9324  ;;  %v5359_v13 = vmul.f32 1.442695, %v5302_v62  ;;  %v11954_v62 = vld [vmem:[#allocation10_spill] sm:$0xff] }
 0x418   : > { %11952 = vst [vmem:[#allocation11_spill] sm:$0xff] %v11232_v39  ;;  %v5445_v15 = vsel %vm3708_vm2, %v11232_v39, 0.0  ;;  %v11238_v14 = vpop.xlane.xlu1 %5266 }
 0x419   : > { %9328 = vpow2.f32 %v5359_v13  ;;  %5446 = vadd.xlane.f32.xlu1 %v5445_v15  ;;  %v11955_v15 = vld [vmem:[#allocation9_spill] sm:$0xff] }
 0x41b   : > { %v11236_v6 = vpop.eup %9326  ;;  %v11242_v9 = vpop.xlane.xlu0 %5269 }
 0x41c   : > { %v5442_v41 = vsel %vm3708_vm2, %v11236_v6, 0.0 }
 0x41d   : > { %5443 = vadd.xlane.f32.xlu0 %v5442_v41 }
 0x420   : > { %v5273_v16 = vpop.xlane.xlu1 %5272 }
 0x423   : > { %v11244_v45 = vpop.eup %9328  ;;  %v11248_v52 = vpop.xlane.xlu0 %5275 }
 0x424   : > { %11953 = vst [vmem:[#allocation2_spill] sm:$0xff] %v11244_v45  ;;  %v5375_v34 = vpop.xlane.xlu1 %5374  ;;  %v5448_v31 = vsel %vm3708_vm2, %v11244_v45, 0.0 }
 0x425   : > { %5449 = vadd.xlane.f32.xlu0 %v5448_v31  ;;  %9330 = vrcp.f32 %v5375_v34  ;;  %v11956_v34 = vpack.i.b16 %v10707_v60, %v10691_v32 }
 0x427   : > { %v5381_v33 = vpop.xlane.xlu0 %5380  ;;  %v5662_v31 = vsel %vm5568_vm3, %v11956_v34, 0  ;;  %v5800_v34 = vsel %vm5568_vm3, %v10794_v55, 0 }
 0x428   : > { %9332 = vrcp.f32 %v5381_v33 }
 0x42a   : > { %2610 = vrot.lane.b32.xlu1 %v11954_v62, %s9455_s10 }
 0x42b   : > { %v5378_v13 = vpop.xlane.xlu0 %5377 }
 0x42c   : > { %9334 = vrcp.f32 %v5378_v13  ;;  %v5304_v13 = vsub.f32 %v10999_v17, %v5264_v58 }
 0x42e   : > { %2618 = vrot.lane.b32.xlu1 %v11955_v15, %s9455_s10  ;;  %v5363_v17 = vmul.f32 1.442695, %v5304_v13 }
 0x42f   : > { %v9331_v41 = vpop.eup %9330  ;;  %v5384_v39 = vpop.xlane.xlu0 %5383 }
 0x430   : > { %v5501_v5 = vmul.f32 %v9331_v41, %v11023_v48  ;;  %9336 = vrcp.f32 %v5384_v39 }
 0x432   : > { %v5533_v45 = vpack.c.bf16 %v5501_v5, %v5501_v5  ;;  %v9333_v2 = vpop.eup %9332 }
 0x433   : > { %v5503_v33 = vmul.f32 %v9333_v2, %v11034_v29  ;;  %v5390_v62 = vpop.xlane.xlu0 %5389  ;;  %v5708_v2 = vsel %vm5568_vm3, %v10740_v7, 0  ;;  %v11958_v29 = vpack.i.b16 %v10751_v37, %v10719_v1  ;;  %v5307_v7 = vsub.f32 %v11019_v53, %v5273_v16 }
 0x434   : > { %8988 = vmatmul.mubr.msk.bf16.vlgmr.msra.gmra.mrb[64].mxu0 %vm3708_vm2, %v5533_v45  ;;  %9338 = vrcp.f32 %v5390_v62  ;;  %v11957_v45 = vld [vmem:[#allocation8_spill] sm:$0xff]  ;;  %v11959_v62 = vld [vmem:[#allocation5_spill] sm:$0xff] }
 0x435   : > { %8998 = vmatpush3.bf16.msra.mxu0 %v5662_v31  ;;  %8999 = vmatprep.mubr.msk.bf16.mxu0 %vm9451_vm1, %v11916_v63  ;;  %v5535_v32 = vpack.c.bf16 %v5503_v33, %v5503_v33  ;;  %v5369_v58 = vmul.f32 1.442695, %v5307_v7  ;;  %v5305_v31 = vsub.f32 %v11005_v54, %v11238_v14  ;;  %v5306_v55 = vsub.f32 %v11959_v62, %v11242_v9  ;;  %v11964_v62 = vld [vmem:[#allocation13_spill] sm:$0xff] }
 0x436   : > { %9009 = vmatprep.subr.bf16.mxu0 %v11916_v63  ;;  %v9335_v48 = vpop.eup %9334 }
 0x437   : > { %v5502_v5 = vmul.f32 %v9335_v48, %v11039_v11  ;;  %v5754_v11 = vsel %vm5568_vm3, %v11958_v29, 0  ;;  %v5396_v41 = vpop.xlane.xlu0 %5395  ;;  %v5365_v33 = vmul.f32 1.442695, %v5305_v31  ;;  %v11960_v48 = vld [vmem:[#allocation21_spill] sm:$0xff]  ;;  %v5367_v14 = vmul.f32 1.442695, %v5306_v55 }
 0x438   : > { %9340 = vrcp.f32 %v5396_v41 }
 0x439   : > { %v5534_v39 = vpack.c.bf16 %v5502_v5, %v5502_v5  ;;  %9342 = vpow2.f32 %v5363_v17  ;;  %v5892_v5 = vsel %vm5568_vm3, %v11960_v48, 0 }
 0x43a   : > { %v9337_v60 = vpop.eup %9336  ;;  %9344 = vpow2.f32 %v5369_v58 }
 0x43b   : > { %2602 = vrot.lane.b32.xlu0 %v11957_v45, %s9455_s10  ;;  %8994 = vmatmul.mubr.msk.bf16.vlgmr.msra.gmra.mrb[72].mxu1 %vm3708_vm2, %v5534_v39  ;;  %v5504_v15 = vmul.f32 %v9337_v60, %v11044_v21  ;;  %v5303_v21 = vsub.f32 %v10994_v43, %v11227_v8  ;;  %v11961_v39 = vld [vmem:[#allocation3_spill] sm:$0xff] }
 0x43c   : > { %9000 = vmatmul.mubr.msk.bf16.vlgmr.msra.gmra.mrb[68].mxu0 %vm3708_vm2, %v5535_v32  ;;  %9004 = vmatpush3.bf16.msra.mxu1 %v5708_v2  ;;  %v5308_v9 = vsub.f32 %v11961_v39, %v11248_v52  ;;  %v11962_v2 = vld [vmem:[#allocation20_spill] sm:$0xff]  ;;  %v11319_v52 = vpop.permute.xlu1 %2594 }
 0x43d   : > { %9010 = vmatpush3.bf16.msra.mxu0 %v5754_v11  ;;  %9005 = vmatprep.mubr.msk.bf16.mxu1 %vm9451_vm1, %v11916_v63  ;;  %v5536_v1 = vpack.c.bf16 %v5504_v15, %v5504_v15  ;;  %v5361_v16 = vmul.f32 1.442695, %v5303_v21 }
 0x43e   : > { %9015 = vmatprep.subr.bf16.mxu1 %v11916_v63  ;;  %9011 = vmatprep.mubr.msk.bf16.mxu0 %vm9451_vm1, %v11916_v63  ;;  %v9339_v37 = vpop.eup %9338  ;;  %v5371_v13 = vmul.f32 1.442695, %v5308_v9 }
 0x43f   : > { %9021 = vmatprep.subr.bf16.mxu0 %v11916_v63  ;;  %v5506_v53 = vmul.f32 %v9339_v37, %v11048_v49  ;;  %9346 = vpow2.f32 %v5361_v16 }
 0x440   : > { %9348 = vpow2.f32 %v5365_v33  ;;  %v11963_v33 = vld [vmem:[#allocation17_spill] sm:$0xff] }
 0x441   : > { %v5538_v43 = vpack.c.bf16 %v5506_v53, %v5506_v53  ;;  %9350 = vpow2.f32 %v5367_v14  ;;  %v11965_v55 = vpack.i.b16 %v11963_v33, %v11964_v62  ;;  %v11972_v33 = vld [vmem:[#allocation22_spill] sm:$0xff] }
 0x442   : > { %v9341_v8 = vpop.eup %9340  ;;  %9352 = vpow2.f32 %v5371_v13  ;;  %v6076_v62 = vsel %vm5568_vm3, %v11972_v33, 0 }
 0x443   : > { %9006 = vmatmul.mubr.msk.bf16.vlgmr.msra.gmra.mrb[76].mxu1 %vm3708_vm2, %v5536_v1  ;;  %v11300_v49 = vpop.eup %9342  ;;  %v5508_v54 = vmul.f32 %v9341_v8, %v11069_v36  ;;  %v5984_v36 = vsel %vm5568_vm3, %v11962_v2, 0  ;;  %v5846_v48 = vsel %vm5568_vm3, %v11965_v55, 0 }
 0x444   : > { %9016 = vmatpush3.bf16.msra.mxu1 %v5800_v34  ;;  %9017 = vmatprep.mubr.msk.bf16.mxu1 %vm9451_vm1, %v11916_v63  ;;  %v5454_v45 = vsel %vm3708_vm2, %v11300_v49, 0.0  ;;  %v11310_v32 = vpop.eup %9344 }
 0x445   : > { %9027 = vmatprep.subr.bf16.mxu1 %v11916_v63  ;;  %v5540_v60 = vpack.c.bf16 %v5508_v54, %v5508_v54  ;;  %v5463_v29 = vsel %vm3708_vm2, %v11310_v32, 0.0 }
 0x449   : > { %v11317_v11 = vpop.eup %9346 }
 0x44a   : > { %v5451_v15 = vsel %vm3708_vm2, %v11317_v11, 0.0  ;;  %v11326_v41 = vpop.eup %9348 }
 0x44b   : > { %9018 = vmatmul.mubr.msk.bf16.vlgmr.msra.gmra.mrb[80].mxu1 %vm3708_vm2, %v5538_v43  ;;  %v5457_v7 = vsel %vm3708_vm2, %v11326_v41, 0.0  ;;  %v11330_v1 = vpop.eup %9350 }
 0x44c   : > { %9028 = vmatpush3.bf16.msra.mxu1 %v5892_v5  ;;  %9029 = vmatprep.mubr.msk.bf16.mxu1 %vm9451_vm1, %v11916_v63  ;;  %v5460_v21 = vsel %vm3708_vm2, %v11330_v1, 0.0  ;;  %v11334_v58 = vpop.eup %9352 }
 0x44d   : > { %9039 = vmatprep.subr.bf16.mxu1 %v11916_v63  ;;  %v5466_v16 = vsel %vm3708_vm2, %v11334_v58, 0.0 }
 0x452   : > { %5455 = vadd.xlane.f32.xlu1 %v5454_v45  ;;  %v11966_v45 = vld [vmem:[#allocation14_spill] sm:$0xff] }
 0x453   : > { %9030 = vmatmul.mubr.msk.bf16.vlgmr.msra.gmra.mrb[84].mxu1 %vm3708_vm2, %v5540_v60  ;;  %v11967_v60 = vld [vmem:[#allocation12_spill] sm:$0xff] }
 0x454   : > { %9040 = vmatpush3.bf16.msra.mxu1 %v5984_v36  ;;  %9041 = vmatprep.mubr.msk.bf16.mxu1 %vm9451_vm1, %v11916_v63  ;;  %v11968_v13 = vpack.i.b16 %v11966_v45, %v11967_v60  ;;  %v11976_v60 = vld [vmem:[#allocation23_spill] sm:$0xff] }
 0x455   : > { %9051 = vmatprep.subr.bf16.mxu1 %v11916_v63 }
 0x456   : > { %5464 = vadd.xlane.f32.xlu1 %v5463_v29  ;;  %v5938_v2 = vsel %vm5568_vm3, %v11968_v13, 0  ;;  %v6168_v13 = vsel %vm5568_vm3, %v11976_v60, 0 }
 0x459   : > { %v5387_v17 = vpop.xlane.xlu1 %5386 }
 0x45a   : > { %5452 = vadd.xlane.f32.xlu0 %v5451_v15  ;;  %9354 = vrcp.f32 %v5387_v17 }
 0x45d   : > { %v5393_v37 = vpop.xlane.xlu1 %5392 }
 0x45e   : > { %5458 = vadd.xlane.f32.xlu0 %v5457_v7  ;;  %9356 = vrcp.f32 %v5393_v37  ;;  %v11969_v37 = vld [vmem:[#allocation18_spill] sm:$0xff] }
 0x461   : > { %v5399_v34 = vpop.xlane.xlu1 %5398 }
 0x462   : > { %5461 = vadd.xlane.f32.xlu0 %v5460_v21  ;;  %9358 = vrcp.f32 %v5399_v34  ;;  %v11970_v21 = vld [vmem:[#allocation15_spill] sm:$0xff] }
 0x463   : > { %v11971_v34 = vpack.i.b16 %v11969_v37, %v11970_v21 }
 0x464   : > { %v9355_v53 = vpop.eup %9354 }
 0x465   : > { %v5505_v31 = vmul.f32 %v9355_v53, %v11145_v24  ;;  %v6030_v53 = vsel %vm5568_vm3, %v11971_v34, 0 }
 0x466   : > { %5467 = vadd.xlane.f32.xlu0 %v5466_v16 }
 0x467   : > { %v5537_v43 = vpack.c.bf16 %v5505_v31, %v5505_v31 }
 0x468   : > { %v9357_v8 = vpop.eup %9356 }
 0x469   : > { %9012 = vmatmul.mubr.msk.bf16.vlgmr.msra.gmra.mrb[72].mxu0 %vm3708_vm2, %v5537_v43  ;;  %v5405_v5 = vpop.xlane.xlu0 %5404  ;;  %v5507_v54 = vmul.f32 %v9357_v8, %v11149_v20 }
 0x46a   : > { %9022 = vmatpush3.bf16.msra.mxu0 %v5846_v48  ;;  %9023 = vmatprep.mubr.msk.bf16.mxu0 %vm9451_vm1, %v11916_v63  ;;  %9360 = vrcp.f32 %v5405_v5  ;;  %v11973_v5 = vld [vmem:[#allocation19_spill] sm:$0xff] }
 0x46b   : > { %9033 = vmatprep.subr.bf16.mxu0 %v11916_v63  ;;  %v5539_v14 = vpack.c.bf16 %v5507_v54, %v5507_v54  ;;  %v11974_v54 = vld [vmem:[#allocation16_spill] sm:$0xff] }
 0x46c   : > { %v9359_v39 = vpop.eup %9358 }
 0x46d   : > { %v5402_v24 = vpop.xlane.xlu0 %5401  ;;  %v5509_v20 = vmul.f32 %v9359_v39, %v11155_v30 }
 0x46e   : > { %9362 = vrcp.f32 %v5402_v24  ;;  %v5408_v9 = vpop.xlane.xlu1 %5407  ;;  %v11975_v24 = vpack.i.b16 %v11973_v5, %v11974_v54 }
 0x46f   : > { %9364 = vrcp.f32 %v5408_v9  ;;  %v5541_v29 = vpack.c.bf16 %v5509_v20, %v5509_v20 }
 0x471   : > { %9024 = vmatmul.mubr.msk.bf16.vlgmr.msra.gmra.mrb[76].mxu0 %vm3708_vm2, %v5539_v14  ;;  %v5411_v36 = vpop.xlane.xlu0 %5410  ;;  %v6122_v14 = vsel %vm5568_vm3, %v11975_v24, 0 }
 0x472   : > { %9034 = vmatpush3.bf16.msra.mxu0 %v5938_v2  ;;  %9035 = vmatprep.mubr.msk.bf16.mxu0 %vm9451_vm1, %v11916_v63  ;;  %9366 = vrcp.f32 %v5411_v36  ;;  %v5417_v31 = vpop.xlane.xlu1 %5416 }
 0x473   : > { %9045 = vmatprep.subr.bf16.mxu0 %v11916_v63 }
 0x474   : > { %v9361_v15 = vpop.eup %9360 }
 0x475   : > { %v5414_v17 = vpop.xlane.xlu0 %5413  ;;  %v5511_v30 = vmul.f32 %v9361_v15, %v11163_v18  ;;  %v11978_v15 = vld [vmem:[#allocation24_spill] sm:$0xff] }
 0x476   : > { %9368 = vrcp.f32 %v5414_v17 }
 0x477   : > { %9370 = vrcp.f32 %v5417_v31 }
 0x478   : > { %v9363_v7 = vpop.eup %9362 }
 0x479   : > { %9036 = vmatmul.mubr.msk.bf16.vlgmr.msra.gmra.mrb[80].mxu0 %vm3708_vm2, %v5541_v29  ;;  %v5510_v16 = vmul.f32 %v9363_v7, %v11168_v27  ;;  %v9365_v8 = vpop.eup %9364  ;;  %v5543_v27 = vpack.c.bf16 %v5511_v30, %v5511_v30  ;;  %v5420_v48 = vpop.xlane.xlu0 %5419  ;;  %v11977_v29 = vld [vmem:[#allocation25_spill] sm:$0xff] }
 0x47a   : > { %9046 = vmatpush3.bf16.msra.mxu0 %v6030_v53  ;;  %9047 = vmatprep.mubr.msk.bf16.mxu0 %vm9451_vm1, %v11916_v63  ;;  %v5512_v18 = vmul.f32 %v9365_v8, %v11174_v57  ;;  %9372 = vrcp.f32 %v5420_v48  ;;  %v11979_v17 = vpack.i.b16 %v11977_v29, %v11978_v15  ;;  %v11980_v53 = vld [vmem:[#allocation26_spill] sm:$0xff]  ;;  %v11981_v8 = vpack.i.b16 %v11094_v12, %v11086_v19 }
 0x47b   : > { %9057 = vmatprep.subr.bf16.mxu0 %v11916_v63  ;;  %v5542_v43 = vpack.c.bf16 %v5510_v16, %v5510_v16  ;;  %v6260_v16 = vsel %vm5568_vm3, %v11980_v53, 0  ;;  %v11982_v48 = vpack.i.b16 %v11110_v3, %v11098_v50  ;;  %v6444_v50 = vsel %vm5568_vm3, %v11132_v35, 0 }
 0x47c   : > { %v9367_v55 = vpop.eup %9366  ;;  %v5423_v9 = vpop.xlane.xlu1 %5422  ;;  %v5544_v57 = vpack.c.bf16 %v5512_v18, %v5512_v18  ;;  %v6214_v7 = vsel %vm5568_vm3, %v11979_v17, 0  ;;  %v6306_v33 = vsel %vm5568_vm3, %v11981_v8, 0  ;;  %v6352_v18 = vsel %vm5568_vm3, %v11115_v51, 0 }
 0x47d   : > { %9042 = vmatmul.mubr.msk.bf16.vlgmr.msra.gmra.mrb[88].mxu1 %vm3708_vm2, %v5542_v43  ;;  %v5513_v39 = vmul.f32 %v9367_v55, %v11170_v23  ;;  %9374 = vrcp.f32 %v5423_v9  ;;  %v6398_v5 = vsel %vm5568_vm3, %v11982_v48, 0  ;;  %v6628_v29 = vsel %vm5568_vm3, %v11139_v44, 0 }
 0x47e   : > { %9052 = vmatpush3.bf16.msra.mxu1 %v6076_v62  ;;  %9053 = vmatprep.mubr.msk.bf16.mxu1 %vm9451_vm1, %v11916_v63 }
 0x47f   : > { %9063 = vmatprep.subr.bf16.mxu1 %v11916_v63  ;;  %v5545_v36 = vpack.c.bf16 %v5513_v39, %v5513_v39 }
 0x480   : > { %v9369_v45 = vpop.eup %9368 }
 0x481   : > { %9048 = vmatmul.mubr.msk.bf16.vlgmr.msra.gmra.mrb[84].mxu0 %vm3708_vm2, %v5543_v27  ;;  %v9371_v20 = vpop.eup %9370  ;;  %v5514_v23 = vmul.f32 %v9369_v45, %v11183_v59 }
 0x482   : > { %9058 = vmatpush3.bf16.msra.mxu0 %v6122_v14  ;;  %9059 = vmatprep.mubr.msk.bf16.mxu0 %vm9451_vm1, %v11916_v63  ;;  %v5515_v21 = vmul.f32 %v9371_v20, %v11179_v46 }
 0x483   : > { %9069 = vmatprep.subr.bf16.mxu0 %v11916_v63  ;;  %v5546_v59 = vpack.c.bf16 %v5514_v23, %v5514_v23 }
 0x484   : > { %v9373_v34 = vpop.eup %9372  ;;  %v5547_v30 = vpack.c.bf16 %v5515_v21, %v5515_v21 }
 0x485   : > { %9054 = vmatmul.mubr.msk.bf16.vlgmr.msra.gmra.mrb[92].mxu1 %vm3708_vm2, %v5544_v57  ;;  %v5429_v2 = vpop.xlane.xlu0 %5428  ;;  %v5516_v43 = vmul.f32 %v9373_v34, %v11190_v38 }
 0x486   : > { %9064 = vmatpush3.bf16.msra.mxu1 %v6168_v13  ;;  %9065 = vmatprep.mubr.msk.bf16.mxu1 %vm9451_vm1, %v11916_v63  ;;  %v6536_v13 = vsel %vm5568_vm3, %v11136_v0, 0 }
 0x487   : > { %9075 = vmatprep.subr.bf16.mxu1 %v11916_v63  ;;  %v9375_v31 = vpop.eup %9374  ;;  %v5548_v38 = vpack.c.bf16 %v5516_v43, %v5516_v43 }
 0x488   : > { %v5517_v62 = vmul.f32 %v9375_v31, %v11195_v56  ;;  %v11985_v31 = vld [vmem:[#allocation6_spill] sm:$0xff] }
 0x489   : > { %9060 = vmatmul.mubr.msk.bf16.vlgmr.msra.gmra.mrb[88].mxu0 %vm3708_vm2, %v5545_v36  ;;  %v5426_v37 = vpop.xlane.xlu0 %5425  ;;  %v5432_v46 = vpop.xlane.xlu1 %5431 }
 0x48a   : > { %9070 = vmatpush3.bf16.msra.mxu0 %v6214_v7  ;;  %9071 = vmatprep.mubr.msk.bf16.mxu0 %vm9451_vm1, %v11916_v63  ;;  %9376 = vrcp.f32 %v5426_v37  ;;  %v5549_v12 = vpack.c.bf16 %v5517_v62, %v5517_v62 }
 0x48b   : > { %9081 = vmatprep.subr.bf16.mxu0 %v11916_v63  ;;  %9378 = vrcp.f32 %v5429_v2 }
 0x48c   : > { %9380 = vrcp.f32 %v5432_v46 }
 0x48d   : > { %9066 = vmatmul.mubr.msk.bf16.vlgmr.msra.gmra.mrb[96].mxu1 %vm3708_vm2, %v5546_v59  ;;  %v2672_v59 = vshrl.u32 %v11319_v52, 16 }
 0x48e   : > { %9076 = vmatpush3.bf16.msra.mxu1 %v6260_v16  ;;  %9077 = vmatprep.mubr.msk.bf16.mxu1 %vm9451_vm1, %v11916_v63 }
 0x48f   : > { %9087 = vmatprep.subr.bf16.mxu1 %v11916_v63 }
 0x491   : > { %9072 = vmatmul.mubr.msk.bf16.vlgmr.msra.gmra.mrb[92].mxu0 %vm3708_vm2, %v5547_v30 }
 0x492   : > { %9082 = vmatpush3.bf16.msra.mxu0 %v6306_v33  ;;  %9083 = vmatprep.mubr.msk.bf16.mxu0 %vm9451_vm1, %v11916_v63 }
 0x493   : > { %9093 = vmatprep.subr.bf16.mxu0 %v11916_v63 }
 0x494   : > { %v9377_v55 = vpop.eup %9376 }
 0x495   : > { %v5435_v27 = vpop.xlane.xlu0 %5434  ;;  %9078 = vmatmul.mubr.msk.bf16.vlgmr.msra.gmra.mrb[100].mxu1 %vm3708_vm2, %v5548_v38  ;;  %v5518_v19 = vmul.f32 %v9377_v55, %v11205_v28  ;;  %v9379_v56 = vpop.eup %9378  ;;  %v11986_v38 = vld [vmem:[#allocation7_spill] sm:$0xff] }
 0x496   : > { %9382 = vrcp.f32 %v5435_v27  ;;  %9088 = vmatpush3.bf16.msra.mxu1 %v6352_v18  ;;  %9089 = vmatprep.mubr.msk.bf16.mxu1 %vm9451_vm1, %v11916_v63  ;;  %v5519_v54 = vmul.f32 %v9379_v56, %v11200_v42  ;;  %v9381_v24 = vpop.eup %9380  ;;  %v11983_v42 = vpack.i.b16 %v11113_v61, %v11091_v10 }
 0x497   : > { %9099 = vmatprep.subr.bf16.mxu1 %v11916_v63  ;;  %v5550_v28 = vpack.c.bf16 %v5518_v19, %v5518_v19  ;;  %v5520_v9 = vmul.f32 %v9381_v24, %v11209_v4 }
 0x498   : > { %v5551_v3 = vpack.c.bf16 %v5519_v54, %v5519_v54  ;;  %v6490_v57 = vsel %vm5568_vm3, %v11983_v42, 0 }
 0x499   : > { %9084 = vmatmul.mubr.msk.bf16.vlgmr.msra.gmra.mrb[96].mxu0 %vm3708_vm2, %v5549_v12  ;;  %v5438_v51 = vpop.xlane.xlu0 %5437  ;;  %v5552_v45 = vpack.c.bf16 %v5520_v9, %v5520_v9 }
 0x49a   : > { %9094 = vmatpush3.bf16.msra.mxu0 %v6398_v5  ;;  %9095 = vmatprep.mubr.msk.bf16.mxu0 %vm9451_vm1, %v11916_v63  ;;  %9384 = vrcp.f32 %v5438_v51 }
 0x49b   : > { %9105 = vmatprep.subr.bf16.mxu0 %v11916_v63 }
 0x49d   : > { %9090 = vmatmul.mubr.msk.bf16.vlgmr.msra.gmra.mrb[104].mxu1 %vm3708_vm2, %v5550_v28 }
 0x49e   : > { %v5441_v14 = vpop.xlane.xlu1 %5440  ;;  %9100 = vmatpush3.bf16.msra.mxu1 %v6444_v50  ;;  %9101 = vmatprep.mubr.msk.bf16.mxu1 %vm9451_vm1, %v11916_v63 }
 0x49f   : > { %9386 = vrcp.f32 %v5441_v14  ;;  %9111 = vmatprep.subr.bf16.mxu1 %v11916_v63 }
 0x4a0   : > { %v9383_v39 = vpop.eup %9382 }
 0x4a1   : > { %9096 = vmatmul.mubr.msk.bf16.vlgmr.msra.gmra.mrb[100].mxu0 %vm3708_vm2, %v5551_v3  ;;  %v5521_v35 = vmul.f32 %v9383_v39, %v11215_v25  ;;  %v11984_v25 = vpack.i.b16 %v11125_v40, %v11103_v47 }
 0x4a2   : > { %9106 = vmatpush3.bf16.msra.mxu0 %v6490_v57  ;;  %9107 = vmatprep.mubr.msk.bf16.mxu0 %vm9451_vm1, %v11916_v63  ;;  %v11987_v57 = vld [vmem:[#allocation4_spill] sm:$0xff] }
 0x4a3   : > { %9117 = vmatprep.subr.bf16.mxu0 %v11916_v63  ;;  %v5553_v2 = vpack.c.bf16 %v5521_v35, %v5521_v35  ;;  %v6582_v36 = vsel %vm5568_vm3, %v11984_v25, 0 }
 0x4a4   : > { %v9385_v60 = vpop.eup %9384 }
 0x4a5   : > { %9102 = vmatmul.mubr.msk.bf16.vlgmr.msra.gmra.mrb[108].mxu1 %vm3708_vm2, %v5552_v45  ;;  %v5522_v61 = vmul.f32 %v9385_v60, %v11220_v22  ;;  %v11988_v45 = vmov 0  }
 0x4a6   : > { %v5447_v4 = vpop.xlane.xlu1 %5446  ;;  %9112 = vmatpush3.bf16.msra.mxu1 %v6536_v13  ;;  %9113 = vmatprep.mubr.msk.bf16.mxu1 %vm9451_vm1, %v11916_v63 }
 0x4a7   : > { %9123 = vmatprep.subr.bf16.mxu1 %v11916_v63  ;;  %v5554_v22 = vpack.c.bf16 %v5522_v61, %v5522_v61 }
 0x4a9   : > { %v9387_v10 = vpop.eup %9386  ;;  %9108 = vmatmul.mubr.msk.bf16.vlgmr.msra.gmra.mrb[104].mxu0 %vm3708_vm2, %v5553_v2  ;;  %v11989_v2 = vld [vmem:[#allocation11_spill] sm:$0xff] }
 0x4aa   : > { %v5444_v20 = vpop.xlane.xlu0 %5443  ;;  %9118 = vmatpush3.bf16.msra.mxu0 %v6582_v36  ;;  %v2611_v0 = vpop.permute.xlu1 %2610  ;;  %9119 = vmatprep.mubr.msk.bf16.mxu0 %vm9451_vm1, %v11916_v63  ;;  %v5523_v23 = vmul.f32 %v9387_v10, %v11225_v26 }
 0x4ab   : > { %9388 = vrcp.f32 %v5444_v20  ;;  %9129 = vmatprep.subr.bf16.mxu0 %v11916_v63  ;;  %v2680_v37 = vshrl.u32 %v2611_v0, 16 }
 0x4ac   : > { %v5555_v47 = vpack.c.bf16 %v5523_v23, %v5523_v23  ;;  %9390 = vrcp.f32 %v5447_v4 }
 0x4ad   : > { %9114 = vmatmul.mubr.msk.bf16.vlgmr.msra.gmra.mrb[112].mxu1 %vm3708_vm2, %v5554_v22 }
 0x4ae   : > { %9124 = vmatpush3.bf16.msra.mxu1 %v6628_v29  ;;  %9125 = vmatprep.mubr.msk.bf16.mxu1 %vm9451_vm1, %v11916_v63  ;;  %v2619_v40 = vpop.permute.xlu1 %2618  ;;  %v11990_v29 = vld [vmem:[#allocation2_spill] sm:$0xff] }
 0x4af   : > { %9135 = vmatprep.subr.bf16.mxu1 %v11916_v63  ;;  %v2681_v26 = vshrl.u32 %v2619_v40, 16  ;;  %v11472_v7 = vpack.i.b16 %v2619_v40, %v2611_v0 }
 0x4b1   : > { %9120 = vmatmul.mubr.msk.bf16.vlgmr.msra.gmra.mrb[108].mxu0 %vm3708_vm2, %v5555_v47  ;;  %v2682_v16 = vpack.i.b16 %v2681_v26, %v2680_v37  ;;  %v3102_v43 = vrot.slane %v11472_v7, %v11985_v31  ;;  %v3095_v22 = vcombine.high %v11472_v7, %v11987_v57 }
 0x4b2   : > { %v5450_v15 = vpop.xlane.xlu0 %5449  ;;  %9131 = vmatprep.mubr.msk.bf16.mxu0 %vm9451_vm1, %v11916_v63 }
 0x4b3   : > { %9392 = vrcp.f32 %v5450_v15  ;;  %v3161_v61 = vcombine.high %v2682_v16, %v11987_v57 }
 0x4b5   : > { %v9389_v17 = vpop.eup %9388 }
 0x4b6   : > { %v5524_v44 = vmul.f32 %v9389_v17, %v11236_v6  ;;  %v2603_v21 = vpop.permute.xlu0 %2602  ;;  %v3168_v6 = vrot.slane %v2682_v16, %v11985_v31  ;;  %v9391_v9 = vpop.eup %9390  ;;  %v3109_v16 = vrot.slane %v3095_v22, %v11985_v31 }
 0x4b7   : > { %v2670_v34 = vpack.i.b16 %v2603_v21, %v11319_v52  ;;  %v2673_v53 = vshrl.u32 %v2603_v21, 16  ;;  %v5525_v10 = vmul.f32 %v9391_v9, %v11989_v2  ;;  %v3175_v21 = vrot.slane %v3161_v61, %v11985_v31 }
 0x4b8   : > { %v5556_v30 = vpack.c.bf16 %v5524_v44, %v5524_v44 }
 0x4b9   : > { %v2674_v46 = vpack.i.b16 %v2673_v53, %v2672_v59  ;;  %v3087_v8 = vrot.slane %v2670_v34, %v11985_v31  ;;  %v3080_v25 = vcombine.high %v2670_v34, %v11987_v57  ;;  %v5557_v53 = vpack.c.bf16 %v5525_v10, %v5525_v10 }
 0x4ba   : > { %9126 = vmatmul.mubr.msk.bf16.vlgmr.msra.gmra.mrb[116].mxu1 %vm3708_vm2, %v5556_v30 }
 0x4bb   : > { %v3110_v33 = vcombine.low %v3087_v8, %v3102_v43  ;;  %v3111_v62 = vcombine.high %v3087_v8, %v3102_v43  ;;  %9137 = vmatprep.mubr.msk.bf16.mxu1 %vm9451_vm1, %v11916_v63  ;;  %v3153_v52 = vrot.slane %v2674_v46, %v11985_v31  ;;  %v3146_v35 = vcombine.high %v2674_v46, %v11987_v57 }
 0x4bc   : > { %v3094_v59 = vrot.slane %v3080_v25, %v11985_v31 }
 0x4bd   : > { %v3118_v27 = vrot.slane %v3110_v33, %v11986_v38  ;;  %v3125_v55 = vrot.slane %v3111_v62, %v11986_v38  ;;  %v3176_v18 = vcombine.low %v3153_v52, %v3168_v6  ;;  %v3177_v19 = vcombine.high %v3153_v52, %v3168_v6  ;;  %v9393_v4 = vpop.eup %9392 }
 0x4be   : > { %v5526_v47 = vmul.f32 %v9393_v4, %v11990_v29  ;;  %v3160_v40 = vrot.slane %v3146_v35, %v11985_v31  ;;  %v3126_v33 = vcombine.low %v3094_v59, %v3109_v16  ;;  %v3127_v62 = vcombine.high %v3094_v59, %v3109_v16 }
 0x4bf   : > { %v3512_v12 = vcombine.low %v3118_v27, %v3125_v55  ;;  %v8540_v56 = vcombine.high %v3118_v27, %v3125_v55  ;;  %v3184_v48 = vrot.slane %v3176_v18, %v11986_v38  ;;  %v3191_v5 = vrot.slane %v3177_v19, %v11986_v38 }
 0x4c0   : > { %v3192_v30 = vcombine.low %v3160_v40, %v3175_v21  ;;  %v3193_v43 = vcombine.high %v3160_v40, %v3175_v21  ;;  %v5558_v8 = vpack.c.bf16 %v5526_v47, %v5526_v47  ;;  %v3134_v55 = vrot.slane %v3126_v33, %v11986_v38 }
 0x4c1   : > { %v3519_v51 = vrot.slane %v3512_v12, %v11985_v31  ;;  %v3527_v28 = vrot.slane %v8540_v56, %v11985_v31  ;;  %v3537_v54 = vcombine.low %v3184_v48, %v3191_v5  ;;  %v8541_v24 = vcombine.high %v3184_v48, %v3191_v5 }
 0x4c2   : > { %v3200_v52 = vrot.slane %v3192_v30, %v11986_v38  ;;  %v3207_v27 = vrot.slane %v3193_v43, %v11986_v38  ;;  %v3141_v18 = vrot.slane %v3127_v62, %v11986_v38 }
 0x4c3   : > { %v3528_v14 = vcombine.low %v3519_v51, %v3527_v28  ;;  %v3544_v50 = vrot.slane %v3537_v54, %v11985_v31  ;;  %v3552_v3 = vrot.slane %v8541_v24, %v11985_v31 }
 0x4c4   : > { %v3587_v19 = vcombine.low %v3200_v52, %v3207_v27  ;;  %v8543_v12 = vcombine.high %v3200_v52, %v3207_v27  ;;  %v3562_v56 = vcombine.low %v3134_v55, %v3141_v18  ;;  %v8542_v48 = vcombine.high %v3134_v55, %v3141_v18 }
 0x4c5   : > { %v3535_v39 = vrot.slane %v3528_v14, %v11986_v38  ;;  %v3553_v42 = vcombine.low %v3544_v50, %v3552_v3 }
 0x4c6   : > { %v3594_v5 = vrot.slane %v3587_v19, %v11985_v31  ;;  %v3602_v51 = vrot.slane %v8543_v12, %v11985_v31  ;;  %v3569_v28 = vrot.slane %v3562_v56, %v11985_v31  ;;  %v3577_v54 = vrot.slane %v8542_v48, %v11985_v31 }
 0x4c7   : > { %v3536_v60 = vcombine.high %v3535_v39, %v11988_v45  ;;  %v3560_v13 = vrot.slane %v3553_v42, %v11986_v38  ;;  %v3687_v20 = vshrl.u32 %v3535_v39, 16 }
 0x4c8   : > { %v3603_v14 = vcombine.low %v3594_v5, %v3602_v51  ;;  %v3578_v50 = vcombine.low %v3569_v28, %v3577_v54 }
 0x4c9   : > { %v3686_v36 = vpack.i.b16 %v3560_v13, %v3535_v39  ;;  %v3688_v0 = vshrl.u32 %v3560_v13, 16  ;;  %v3561_v23 = vcombine.high %v3560_v13, %v11988_v45  ;;  %v3693_v15 = vshrl.u32 %v3536_v60, 16 }
 0x4ca   : > { %v3610_v3 = vrot.slane %v3603_v14, %v11986_v38  ;;  %v3585_v39 = vrot.slane %v3578_v50, %v11986_v38 }
 0x4cb   : > { %v6674_v26 = vsel %vm5568_vm3, %v3686_v36, 0  ;;  %v3689_v17 = vpack.i.b16 %v3688_v0, %v3687_v20  ;;  %v3692_v44 = vpack.i.b16 %v3561_v23, %v3536_v60  ;;  %v3694_v37 = vshrl.u32 %v3561_v23, 16 }
 0x4cc   : > { %9130 = vmatpush3.bf16.msra.mxu0 %v6674_v26  ;;  %v3700_v42 = vshrl.u32 %v3610_v3, 16  ;;  %v3699_v57 = vshrl.u32 %v3585_v39, 16  ;;  %v3698_v0 = vpack.i.b16 %v3610_v3, %v3585_v39  ;;  %v3611_v23 = vcombine.high %v3610_v3, %v11988_v45 }
 0x4cd   : > { %v6720_v34 = vsel %vm5568_vm3, %v3689_v17, 0  ;;  %9141 = vmatprep.subr.bf16.mxu0 %v11916_v63  ;;  %v3695_v7 = vpack.i.b16 %v3694_v37, %v3693_v15  ;;  %v6766_v46 = vsel %vm5568_vm3, %v3692_v44, 0  ;;  %v3586_v29 = vcombine.high %v3585_v39, %v11988_v45 }
 0x4ce   : > { %9136 = vmatpush3.bf16.msra.mxu1 %v6720_v34  ;;  %v3701_v13 = vpack.i.b16 %v3700_v42, %v3699_v57  ;;  %v6858_v40 = vsel %vm5568_vm3, %v3698_v0, 0  ;;  %v3706_v15 = vshrl.u32 %v3611_v23, 16 }
 0x4cf   : > { %9132 = vmatmul.mubr.msk.bf16.vlgmr.msra.gmra.mrb[112].mxu0 %vm3708_vm2, %v5557_v53  ;;  %9147 = vmatprep.subr.bf16.mxu1 %v11916_v63  ;;  %v6812_v6 = vsel %vm5568_vm3, %v3695_v7, 0  ;;  %v3705_v26 = vshrl.u32 %v3586_v29, 16  ;;  %v3704_v37 = vpack.i.b16 %v3611_v23, %v3586_v29 }
 0x4d0   : > { %9142 = vmatpush3.bf16.msra.mxu0 %v6766_v46  ;;  %9143 = vmatprep.mubr.msk.bf16.mxu0 %vm9451_vm1, %v11916_v63  ;;  %v6904_v61 = vsel %vm5568_vm3, %v3701_v13, 0 }
 0x4d1   : > { %9138 = vmatmul.mubr.msk.bf16.vlgmr.msra.gmra.mrb[120].mxu1 %vm3708_vm2, %v5558_v8  ;;  %9153 = vmatprep.subr.bf16.mxu0 %v11916_v63  ;;  %v3707_v45 = vpack.i.b16 %v3706_v15, %v3705_v26  ;;  %v6950_v7 = vsel %vm5568_vm3, %v3704_v37, 0 }
 0x4d2   : > { %9148 = vmatpush3.bf16.msra.mxu1 %v6812_v6  ;;  %9149 = vmatprep.mubr.msk.bf16.mxu1 %vm9451_vm1, %v11916_v63 }
 0x4d3   : > { %9159 = vmatprep.subr.bf16.mxu1 %v11916_v63 }
 0x4df   : > { %v5456_v24 = vpop.xlane.xlu1 %5455 }
 0x4e0   : > { %9394 = vrcp.f32 %v5456_v24 }
 0x4e3   : > { %v5465_v25 = vpop.xlane.xlu1 %5464 }
 0x4e7   : > { %v5453_v9 = vpop.xlane.xlu0 %5452 }
 0x4e8   : > { %9396 = vrcp.f32 %v5453_v9 }
 0x4ea   : > { %v9395_v35 = vpop.eup %9394 }
 0x4eb   : > { %v5528_v60 = vmul.f32 %v9395_v35, %v11300_v49  ;;  %v5459_v4 = vpop.xlane.xlu0 %5458 }
 0x4ec   : > { %9398 = vrcp.f32 %v5459_v4 }
 0x4ed   : > { %v5560_v2 = vpack.c.bf16 %v5528_v60, %v5528_v60 }
 0x4ef   : > { %v5462_v10 = vpop.xlane.xlu0 %5461  ;;  %9150 = vmatmul.mubr.msk.bf16.vlgmr.msra.gmra.mrb[124].mxu1 %vm3708_vm2, %v5560_v2 }
 0x4f0   : > { %9400 = vrcp.f32 %v5462_v10  ;;  %9160 = vmatpush3.bf16.msra.mxu1 %v6904_v61  ;;  %9161 = vmatprep.mubr.msk.bf16.mxu1 %vm9451_vm1, %v11916_v63 }
 0x4f1   : > { %9171 = vmatprep.subr.bf16.mxu1 %v11916_v63  ;;  %9402 = vrcp.f32 %v5465_v25 }
 0x4f2   : > { %v9397_v36 = vpop.eup %9396 }
 0x4f3   : > { %v5527_v49 = vmul.f32 %v9397_v36, %v11317_v11  ;;  %v5468_v20 = vpop.xlane.xlu0 %5467 }
 0x4f4   : > { %9404 = vrcp.f32 %v5468_v20 }
 0x4f5   : > { %v5559_v22 = vpack.c.bf16 %v5527_v49, %v5527_v49 }
 0x4f6   : > { %v9399_v47 = vpop.eup %9398 }
 0x4f7   : > { %9144 = vmatmul.mubr.msk.bf16.vlgmr.msra.gmra.mrb[116].mxu0 %vm3708_vm2, %v5559_v22  ;;  %v5529_v11 = vmul.f32 %v9399_v47, %v11326_v41  ;;  %v6996_v41 = vsel %vm5568_vm3, %v3707_v45, 0 }
 0x4f8   : > { %9154 = vmatpush3.bf16.msra.mxu0 %v6858_v40  ;;  %9155 = vmatprep.mubr.msk.bf16.mxu0 %vm9451_vm1, %v11916_v63 }
 0x4f9   : > { %9165 = vmatprep.subr.bf16.mxu0 %v11916_v63  ;;  %v5561_v59 = vpack.c.bf16 %v5529_v11, %v5529_v11 }
 0x4fa   : > { %v9401_v17 = vpop.eup %9400 }
 0x4fb   : > { %v5530_v44 = vmul.f32 %v9401_v17, %v11330_v1  ;;  %v9403_v21 = vpop.eup %9402 }
 0x4fc   : > { %v5531_v16 = vmul.f32 %v9403_v21, %v11310_v32 }
 0x4fd   : > { %v5562_v34 = vpack.c.bf16 %v5530_v44, %v5530_v44 }
 0x4fe   : > { %v9405_v53 = vpop.eup %9404  ;;  %v5563_v30 = vpack.c.bf16 %v5531_v16, %v5531_v16 }
 0x4ff   : > { %9156 = vmatmul.mubr.msk.bf16.vlgmr.msra.gmra.mrb[120].mxu0 %vm3708_vm2, %v5561_v59  ;;  %9162 = vmatmul.mubr.msk.bf16.vlgmr.msra.gmra.mrb[128].mxu1 %vm3708_vm2, %v5562_v34  ;;  %v5532_v1 = vmul.f32 %v9405_v53, %v11334_v58 }
 0x500   : > { %9166 = vmatpush3.bf16.msra.mxu0 %v6950_v7  ;;  %9172 = vmatpush3.bf16.msra.mxu1 %v6996_v41 }
 0x501   : > { %9167 = vmatprep.mubr.msk.bf16.mxu0 %vm9451_vm1, %v11916_v63  ;;  %9173 = vmatprep.mubr.msk.bf16.mxu1 %vm9451_vm1, %v11916_v63  ;;  %v5564_v43 = vpack.c.bf16 %v5532_v1, %v5532_v1 }
 0x507   : > { %9168 = vmatmul.mubr.msk.bf16.vlgmr.msra.gmra.mrb[124].mxu0 %vm3708_vm2, %v5563_v30  ;;  %9174 = vmatmul.mubr.msk.bf16.vlgmr.msra.gmra.mrb[132].mxu1 %vm3708_vm2, %v5564_v43  ;;  %v5606_v46 = vpop.f32.mrb[64].mxu0 }
 0x508   : > { %v8989_v8 = vpop.f32.mrb[65].mxu0 }
 0x509   : > { %v5609_v33 = vpop.f32.mrb[66].mxu0 }
 0x50a   : > { %v8990_v62 = vpop.f32.mrb[67].mxu0 }
 0x50e   : > { %v5652_v6 = vpop.f32.mrb[72].mxu1 }
 0x50f   : > { %v5698_v32 = vpop.f32.mrb[68].mxu0  ;;  %v8995_v52 = vpop.f32.mrb[73].mxu1 }
 0x510   : > { %v7038_v58 = vcombine.low %v5606_v46, %v5698_v32  ;;  %v7039_v27 = vcombine.high %v5606_v46, %v5698_v32  ;;  %v9001_v55 = vpop.f32.mrb[69].mxu0  ;;  %v5655_v18 = vpop.f32.mrb[74].mxu1 }
 0x511   : > { %v5701_v19 = vpop.f32.mrb[70].mxu0  ;;  %v8996_v12 = vpop.f32.mrb[75].mxu1 }
 0x512   : > { %v9002_v63 = vpop.f32.mrb[71].mxu0  ;;  %v7046_v54 = vrot.slane %v7038_v58, %v11985_v31  ;;  %v7053_v24 = vrot.slane %v7039_v27, %v11985_v31 }
 0x516   : > { %v5744_v56 = vpop.f32.mrb[76].mxu1 }
 0x517   : > { %v7054_v48 = vcombine.low %v5652_v6, %v5744_v56  ;;  %v7055_v5 = vcombine.high %v5652_v6, %v5744_v56  ;;  %v9007_v51 = vpop.f32.mrb[77].mxu1 }
 0x518   : > { %v5747_v28 = vpop.f32.mrb[78].mxu1 }
 0x519   : > { %v7062_v14 = vrot.slane %v7054_v48, %v11985_v31  ;;  %v7069_v50 = vrot.slane %v7055_v5, %v11985_v31  ;;  %v9008_v3 = vpop.f32.mrb[79].mxu1 }
 0x51b   : > { %v7070_v39 = vcombine.low %v7046_v54, %v7062_v14  ;;  %v7071_v9 = vcombine.high %v7046_v54, %v7062_v14  ;;  %v7086_v42 = vcombine.low %v7053_v24, %v7069_v50  ;;  %v7087_v57 = vcombine.high %v7053_v24, %v7069_v50 }
 0x51d   : > { %v7078_v35 = vrot.slane %v7070_v39, %v11986_v38  ;;  %v7085_v60 = vrot.slane %v7071_v9, %v11986_v38  ;;  %v7094_v4 = vrot.slane %v7086_v42, %v11986_v38  ;;  %v7101_v13 = vrot.slane %v7087_v57, %v11986_v38 }
 0x51e   : > { %v5836_v2 = vpop.f32.mrb[80].mxu1 }
 0x51f   : > { %v7582_v10 = vcombine.low %v7078_v35, %v7085_v60  ;;  %v8608_v61 = vcombine.high %v7078_v35, %v7085_v60  ;;  %v7598_v25 = vcombine.low %v7094_v4, %v7101_v13  ;;  %v8609_v36 = vcombine.high %v7094_v4, %v7101_v13  ;;  %v9019_v49 = vpop.f32.mrb[81].mxu1 }
 0x520   : > { %v5839_v20 = vpop.f32.mrb[82].mxu1 }
 0x521   : > { %v7589_v0 = vrot.slane %v7582_v10, %v11985_v31  ;;  %v7597_v23 = vrot.slane %v8608_v61, %v11985_v31  ;;  %v7605_v22 = vrot.slane %v7598_v25, %v11985_v31  ;;  %v7613_v29 = vrot.slane %v8609_v36, %v11985_v31  ;;  %v9020_v47 = vpop.f32.mrb[83].mxu1 }
 0x523   : > { %v7615_v40 = vcombine.high %v7589_v0, %v7597_v23  ;;  %v7631_v15 = vcombine.high %v7605_v22, %v7613_v29  ;;  %v7614_v11 = vcombine.low %v7589_v0, %v7597_v23  ;;  %v7630_v26 = vcombine.low %v7605_v22, %v7613_v29 }
 0x525   : > { %v11573_v17 = vrot.slane %v7615_v40, %v11986_v38  ;;  %v11576_v44 = vrot.slane %v7631_v15, %v11986_v38  ;;  %v11579_v37 = vrot.slane %v7614_v11, %v11986_v38  ;;  %v11582_v45 = vrot.slane %v7630_v26, %v11986_v38 }
 0x526   : > { %v5928_v21 = vpop.f32.mrb[84].mxu1 }
 0x527   : > { %v7122_v59 = vcombine.low %v5836_v2, %v5928_v21  ;;  %v7123_v34 = vcombine.high %v5836_v2, %v5928_v21  ;;  %v9031_v53 = vpop.f32.mrb[85].mxu1  ;;  %v7649_v7 = vcombine.high %v11573_v17, %v11576_v44  ;;  %v7647_v41 = vcombine.high %v11579_v37, %v11582_v45 }
 0x528   : > { %v5931_v16 = vpop.f32.mrb[86].mxu1  ;;  %v7648_v1 = vcombine.low %v11573_v17, %v11576_v44  ;;  %v7646_v30 = vcombine.low %v11579_v37, %v11582_v45 }
 0x529   : > { %v9032_v43 = vpop.f32.mrb[87].mxu1  ;;  %v7130_v55 = vrot.slane %v7122_v59, %v11985_v31  ;;  %v7137_v18 = vrot.slane %v7123_v34, %v11985_v31 }
 0x53c   : > { %v5790_v46 = vpop.f32.mrb[72].mxu0 }
 0x53d   : > { %v9013_v8 = vpop.f32.mrb[73].mxu0 }
 0x53e   : > { %v5793_v33 = vpop.f32.mrb[74].mxu0 }
 0x53f   : > { %v9014_v62 = vpop.f32.mrb[75].mxu0 }
 0x544   : > { %v5882_v6 = vpop.f32.mrb[76].mxu0 }
 0x545   : > { %v7106_v32 = vcombine.low %v5790_v46, %v5882_v6  ;;  %v7107_v52 = vcombine.high %v5790_v46, %v5882_v6  ;;  %v9025_v58 = vpop.f32.mrb[77].mxu0 }
 0x546   : > { %v5885_v27 = vpop.f32.mrb[78].mxu0 }
 0x547   : > { %v7114_v19 = vrot.slane %v7106_v32, %v11985_v31  ;;  %v7121_v12 = vrot.slane %v7107_v52, %v11985_v31  ;;  %v9026_v63 = vpop.f32.mrb[79].mxu0 }
 0x549   : > { %v7138_v56 = vcombine.low %v7114_v19, %v7130_v55  ;;  %v7139_v48 = vcombine.high %v7114_v19, %v7130_v55  ;;  %v7154_v5 = vcombine.low %v7121_v12, %v7137_v18  ;;  %v7155_v51 = vcombine.high %v7121_v12, %v7137_v18 }
 0x54b   : > { %v7146_v28 = vrot.slane %v7138_v56, %v11986_v38  ;;  %v7153_v54 = vrot.slane %v7139_v48, %v11986_v38  ;;  %v7162_v24 = vrot.slane %v7154_v5, %v11986_v38  ;;  %v7169_v14 = vrot.slane %v7155_v51, %v11986_v38 }
 0x54c   : > { %v5974_v50 = vpop.f32.mrb[80].mxu0 }
 0x54d   : > { %v7650_v3 = vcombine.low %v7146_v28, %v7153_v54  ;;  %v8610_v39 = vcombine.high %v7146_v28, %v7153_v54  ;;  %v7666_v9 = vcombine.low %v7162_v24, %v7169_v14  ;;  %v8611_v42 = vcombine.high %v7162_v24, %v7169_v14  ;;  %v9037_v57 = vpop.f32.mrb[81].mxu0 }
 0x54e   : > { %v5977_v35 = vpop.f32.mrb[82].mxu0 }
 0x54f   : > { %v7657_v60 = vrot.slane %v7650_v3, %v11985_v31  ;;  %v7665_v4 = vrot.slane %v8610_v39, %v11985_v31  ;;  %v7673_v13 = vrot.slane %v7666_v9, %v11985_v31  ;;  %v7681_v2 = vrot.slane %v8611_v42, %v11985_v31  ;;  %v9038_v10 = vpop.f32.mrb[83].mxu0 }
 0x550   : > { %v6020_v61 = vpop.f32.mrb[88].mxu1 }
 0x551   : > { %v7683_v25 = vcombine.high %v7657_v60, %v7665_v4  ;;  %v7699_v36 = vcombine.high %v7673_v13, %v7681_v2  ;;  %v7682_v49 = vcombine.low %v7657_v60, %v7665_v4  ;;  %v7698_v20 = vcombine.low %v7673_v13, %v7681_v2  ;;  %v9043_v0 = vpop.f32.mrb[89].mxu1 }
 0x552   : > { %v6023_v23 = vpop.f32.mrb[90].mxu1 }
 0x553   : > { %v7697_v22 = vrot.slane %v7683_v25, %v11986_v38  ;;  %v7713_v29 = vrot.slane %v7699_v36, %v11986_v38  ;;  %v11607_v47 = vrot.slane %v7682_v49, %v11986_v38  ;;  %v11610_v40 = vrot.slane %v7698_v20, %v11986_v38  ;;  %v9044_v15 = vpop.f32.mrb[91].mxu1 }
 0x554   : > { %v6066_v11 = vpop.f32.mrb[84].mxu0 }
 0x555   : > { %v7174_v26 = vcombine.low %v5974_v50, %v6066_v11  ;;  %v7175_v17 = vcombine.high %v5974_v50, %v6066_v11  ;;  %v9049_v44 = vpop.f32.mrb[85].mxu0  ;;  %v7717_v21 = vcombine.high %v7697_v22, %v7713_v29  ;;  %v7715_v59 = vcombine.high %v11607_v47, %v11610_v40 }
 0x556   : > { %v6069_v34 = vpop.f32.mrb[86].mxu0  ;;  %v7716_v53 = vcombine.low %v7697_v22, %v7713_v29  ;;  %v7714_v16 = vcombine.low %v11607_v47, %v11610_v40 }
 0x557   : > { %v9050_v43 = vpop.f32.mrb[87].mxu0  ;;  %v9224_v46 = vpack.i.bf16 %v7717_v21, %v7649_v7  ;;  %v9214_v8 = vpack.i.bf16 %v7715_v59, %v7647_v41  ;;  %v7182_v58 = vrot.slane %v7174_v26, %v11985_v31  ;;  %v7189_v27 = vrot.slane %v7175_v17, %v11985_v31 }
 0x558   : > { %v9219_v33 = vpack.i.bf16 %v7716_v53, %v7648_v1  ;;  %v6112_v62 = vpop.f32.mrb[92].mxu1 }
 0x559   : > { %9225 = vrot.lane.b32.xlu0 %v9224_v46, %s9456_s11  ;;  %9215 = vrot.lane.b32.xlu1 %v9214_v8, %s9457_s12  ;;  %v7190_v6 = vcombine.low %v6020_v61, %v6112_v62  ;;  %v7191_v32 = vcombine.high %v6020_v61, %v6112_v62  ;;  %v9055_v52 = vpop.f32.mrb[93].mxu1 }
 0x55a   : > { %v6115_v55 = vpop.f32.mrb[94].mxu1 }
 0x55b   : > { %v7198_v18 = vrot.slane %v7190_v6, %v11985_v31  ;;  %v7205_v7 = vrot.slane %v7191_v32, %v11985_v31  ;;  %v9056_v41 = vpop.f32.mrb[95].mxu1 }
 0x55c   : > { %v6158_v1 = vpop.f32.mrb[88].mxu0 }
 0x55d   : > { %9220 = vrot.lane.b32.xlu1 %v9219_v33, %s9458_s13  ;;  %v9061_v19 = vpop.f32.mrb[89].mxu0  ;;  %v7206_v12 = vcombine.low %v7182_v58, %v7198_v18  ;;  %v7207_v63 = vcombine.high %v7182_v58, %v7198_v18  ;;  %v7222_v56 = vcombine.low %v7189_v27, %v7205_v7  ;;  %v7223_v48 = vcombine.high %v7189_v27, %v7205_v7 }
 0x55e   : > { %v6161_v5 = vpop.f32.mrb[90].mxu0 }
 0x55f   : > { %v9062_v51 = vpop.f32.mrb[91].mxu0  ;;  %v7214_v28 = vrot.slane %v7206_v12, %v11986_v38  ;;  %v7221_v54 = vrot.slane %v7207_v63, %v11986_v38  ;;  %v7230_v24 = vrot.slane %v7222_v56, %v11986_v38  ;;  %v7237_v14 = vrot.slane %v7223_v48, %v11986_v38 }
 0x560   : > { %v6204_v50 = vpop.f32.mrb[96].mxu1 }
 0x561   : > { %v7718_v3 = vcombine.low %v7214_v28, %v7221_v54  ;;  %v8612_v39 = vcombine.high %v7214_v28, %v7221_v54  ;;  %v7734_v9 = vcombine.low %v7230_v24, %v7237_v14  ;;  %v8613_v42 = vcombine.high %v7230_v24, %v7237_v14  ;;  %v9067_v57 = vpop.f32.mrb[97].mxu1 }
 0x562   : > { %v6207_v35 = vpop.f32.mrb[98].mxu1 }
 0x563   : > { %v7725_v60 = vrot.slane %v7718_v3, %v11985_v31  ;;  %v7733_v4 = vrot.slane %v8612_v39, %v11985_v31  ;;  %v7741_v13 = vrot.slane %v7734_v9, %v11985_v31  ;;  %v7749_v2 = vrot.slane %v8613_v42, %v11985_v31  ;;  %v9068_v10 = vpop.f32.mrb[99].mxu1  ;;  %v9276_v9 = vld [vmem:[%s11868_s3] sm:$0xff]  }
 0x564   : > { %v6250_v61 = vpop.f32.mrb[92].mxu0  ;;  %9177 = vmatprep.subr.bf16.mxu0 %v9276_v9 }
 0x565   : > { %v7242_v25 = vcombine.low %v6158_v1, %v6250_v61  ;;  %v7243_v36 = vcombine.high %v6158_v1, %v6250_v61  ;;  %v9073_v49 = vpop.f32.mrb[93].mxu0  ;;  %v7751_v0 = vcombine.high %v7725_v60, %v7733_v4  ;;  %v7767_v23 = vcombine.high %v7741_v13, %v7749_v2  ;;  %9178 = vmatpush3.bf16.msra.mxu0 %v9276_v9 }
 0x566   : > { %v6253_v20 = vpop.f32.mrb[94].mxu0  ;;  %v7750_v22 = vcombine.low %v7725_v60, %v7733_v4  ;;  %v7766_v29 = vcombine.low %v7741_v13, %v7749_v2 }
 0x567   : > { %v9074_v15 = vpop.f32.mrb[95].mxu0  ;;  %v11632_v11 = vrot.slane %v7751_v0, %v11986_v38  ;;  %v11635_v26 = vrot.slane %v7767_v23, %v11986_v38  ;;  %v7250_v59 = vrot.slane %v7242_v25, %v11985_v31  ;;  %v7257_v34 = vrot.slane %v7243_v36, %v11985_v31 }
 0x568   : > { %v11638_v17 = vrot.slane %v7750_v22, %v11986_v38  ;;  %v11641_v44 = vrot.slane %v7766_v29, %v11986_v38  ;;  %v6296_v21 = vpop.f32.mrb[100].mxu1 }
 0x569   : > { %v7258_v53 = vcombine.low %v6204_v50, %v6296_v21  ;;  %v7259_v43 = vcombine.high %v6204_v50, %v6296_v21  ;;  %v9079_v46 = vpop.f32.mrb[101].mxu1  ;;  %v7784_v8 = vcombine.low %v11632_v11, %v11635_v26  ;;  %v7785_v6 = vcombine.high %v11632_v11, %v11635_v26 }
 0x56a   : > { %v7783_v33 = vcombine.high %v11638_v17, %v11641_v44  ;;  %v6299_v62 = vpop.f32.mrb[102].mxu1  ;;  %v7782_v32 = vcombine.low %v11638_v17, %v11641_v44 }
 0x56b   : > { %v7266_v52 = vrot.slane %v7258_v53, %v11985_v31  ;;  %v7273_v58 = vrot.slane %v7259_v43, %v11985_v31  ;;  %v9080_v27 = vpop.f32.mrb[103].mxu1 }
 0x56c   : > { %v6342_v55 = vpop.f32.mrb[96].mxu0 }
 0x56d   : > { %v9085_v18 = vpop.f32.mrb[97].mxu0  ;;  %v7274_v7 = vcombine.low %v7250_v59, %v7266_v52  ;;  %v7275_v41 = vcombine.high %v7250_v59, %v7266_v52  ;;  %v7290_v1 = vcombine.low %v7257_v34, %v7273_v58  ;;  %v7291_v19 = vcombine.high %v7257_v34, %v7273_v58  ;;  %v9277_v59 = vld [vmem:[%s11868_s3 + $0x8] sm:$0xff]  }
 0x56e   : > { %v6345_v12 = vpop.f32.mrb[98].mxu0  ;;  %9179 = vmatprep.subr.bf16.mxu0 %v9277_v59 }
 0x56f   : > { %v9086_v63 = vpop.f32.mrb[99].mxu0  ;;  %v7282_v56 = vrot.slane %v7274_v7, %v11986_v38  ;;  %v7289_v48 = vrot.slane %v7275_v41, %v11986_v38  ;;  %v7298_v5 = vrot.slane %v7290_v1, %v11986_v38  ;;  %v7305_v51 = vrot.slane %v7291_v19, %v11986_v38  ;;  %9180 = vmatpush3.bf16.msra.mxu0 %v9277_v59 }
 0x570   : > { %v6388_v28 = vpop.f32.mrb[104].mxu1 }
 0x571   : > { %v7786_v54 = vcombine.low %v7282_v56, %v7289_v48  ;;  %v8614_v24 = vcombine.high %v7282_v56, %v7289_v48  ;;  %v7802_v14 = vcombine.low %v7298_v5, %v7305_v51  ;;  %v8615_v50 = vcombine.high %v7298_v5, %v7305_v51  ;;  %v9091_v3 = vpop.f32.mrb[105].mxu1 }
 0x572   : > { %v6391_v39 = vpop.f32.mrb[106].mxu1 }
 0x573   : > { %v7793_v42 = vrot.slane %v7786_v54, %v11985_v31  ;;  %v7801_v57 = vrot.slane %v8614_v24, %v11985_v31  ;;  %v7809_v35 = vrot.slane %v7802_v14, %v11985_v31  ;;  %v7817_v60 = vrot.slane %v8615_v50, %v11985_v31  ;;  %v9092_v13 = vpop.f32.mrb[107].mxu1 }
 0x574   : > { %v6434_v4 = vpop.f32.mrb[100].mxu0 }
 0x575   : > { %v7310_v2 = vcombine.low %v6342_v55, %v6434_v4  ;;  %v7311_v10 = vcombine.high %v6342_v55, %v6434_v4  ;;  %v9097_v61 = vpop.f32.mrb[101].mxu0  ;;  %v7819_v36 = vcombine.high %v7793_v42, %v7801_v57  ;;  %v7835_v49 = vcombine.high %v7809_v35, %v7817_v60 }
 0x576   : > { %v6437_v25 = vpop.f32.mrb[102].mxu0  ;;  %v7818_v20 = vcombine.low %v7793_v42, %v7801_v57  ;;  %v7834_v0 = vcombine.low %v7809_v35, %v7817_v60 }
 0x577   : > { %v9098_v23 = vpop.f32.mrb[103].mxu0  ;;  %v7833_v22 = vrot.slane %v7819_v36, %v11986_v38  ;;  %v7849_v29 = vrot.slane %v7835_v49, %v11986_v38  ;;  %v7318_v58 = vrot.slane %v7310_v2, %v11985_v31  ;;  %v7325_v27 = vrot.slane %v7311_v10, %v11985_v31 }
 0x578   : > { %v11669_v15 = vrot.slane %v7818_v20, %v11986_v38  ;;  %v11672_v21 = vrot.slane %v7834_v0, %v11986_v38  ;;  %v6480_v34 = vpop.f32.mrb[108].mxu1 }
 0x579   : > { %v7852_v53 = vcombine.low %v7833_v22, %v7849_v29  ;;  %v7326_v46 = vcombine.low %v6388_v28, %v6480_v34  ;;  %v7327_v62 = vcombine.high %v6388_v28, %v6480_v34  ;;  %v9103_v52 = vpop.f32.mrb[109].mxu1  ;;  %v7853_v55 = vcombine.high %v7833_v22, %v7849_v29 }
 0x57a   : > { %v7851_v43 = vcombine.high %v11669_v15, %v11672_v21  ;;  %v6483_v18 = vpop.f32.mrb[110].mxu1  ;;  %v7850_v7 = vcombine.low %v11669_v15, %v11672_v21 }
 0x57b   : > { %v9234_v41 = vpack.i.bf16 %v7852_v53, %v7784_v8  ;;  %v7334_v12 = vrot.slane %v7326_v46, %v11985_v31  ;;  %v7341_v63 = vrot.slane %v7327_v62, %v11985_v31  ;;  %v9104_v56 = vpop.f32.mrb[111].mxu1  ;;  %v9239_v48 = vpack.i.bf16 %v7853_v55, %v7785_v6 }
 0x57c   : > { %v9229_v1 = vpack.i.bf16 %v7851_v43, %v7783_v33  ;;  %v6526_v19 = vpop.f32.mrb[104].mxu0 }
 0x57d   : > { %v9109_v5 = vpop.f32.mrb[105].mxu0  ;;  %9235 = vrot.lane.b32.xlu1 %v9234_v41, %s9458_s13  ;;  %v7342_v8 = vcombine.low %v7318_v58, %v7334_v12  ;;  %v7343_v51 = vcombine.high %v7318_v58, %v7334_v12  ;;  %v7358_v28 = vcombine.low %v7325_v27, %v7341_v63  ;;  %v7359_v33 = vcombine.high %v7325_v27, %v7341_v63 }
 0x57e   : > { %9230 = vrot.lane.b32.xlu0 %v9229_v1, %s9457_s12  ;;  %v6529_v54 = vpop.f32.mrb[106].mxu0 }
 0x57f   : > { %v9110_v24 = vpop.f32.mrb[107].mxu0  ;;  %v7350_v14 = vrot.slane %v7342_v8, %v11986_v38  ;;  %v7357_v50 = vrot.slane %v7343_v51, %v11986_v38  ;;  %v7366_v3 = vrot.slane %v7358_v28, %v11986_v38  ;;  %v7373_v11 = vrot.slane %v7359_v33, %v11986_v38 }
 0x580   : > { %v6572_v26 = vpop.f32.mrb[112].mxu1 }
 0x581   : > { %v7854_v6 = vcombine.low %v7350_v14, %v7357_v50  ;;  %v8616_v39 = vcombine.high %v7350_v14, %v7357_v50  ;;  %9240 = vrot.lane.b32.xlu1 %v9239_v48, %s9456_s11  ;;  %v9115_v9 = vpop.f32.mrb[113].mxu1  ;;  %v7870_v42 = vcombine.low %v7366_v3, %v7373_v11  ;;  %v8617_v57 = vcombine.high %v7366_v3, %v7373_v11 }
 0x582   : > { %v6575_v35 = vpop.f32.mrb[114].mxu1 }
 0x583   : > { %v7861_v60 = vrot.slane %v7854_v6, %v11985_v31  ;;  %v7869_v4 = vrot.slane %v8616_v39, %v11985_v31  ;;  %v9116_v2 = vpop.f32.mrb[115].mxu1  ;;  %v7877_v10 = vrot.slane %v7870_v42, %v11985_v31  ;;  %v7885_v61 = vrot.slane %v8617_v57, %v11985_v31 }
 0x584   : > { %v6618_v13 = vpop.f32.mrb[108].mxu0 }
 0x585   : > { %v7378_v25 = vcombine.low %v6526_v19, %v6618_v13  ;;  %v7379_v36 = vcombine.high %v6526_v19, %v6618_v13  ;;  %v9121_v49 = vpop.f32.mrb[109].mxu0  ;;  %v7886_v0 = vcombine.low %v7861_v60, %v7869_v4  ;;  %v7887_v23 = vcombine.high %v7861_v60, %v7869_v4 }
 0x586   : > { %v6621_v20 = vpop.f32.mrb[110].mxu0  ;;  %v7902_v29 = vcombine.low %v7877_v10, %v7885_v61  ;;  %v7903_v59 = vcombine.high %v7877_v10, %v7885_v61 }
 0x587   : > { %v9122_v22 = vpop.f32.mrb[111].mxu0  ;;  %v11706_v34 = vrot.slane %v7886_v0, %v11986_v38  ;;  %v7901_v53 = vrot.slane %v7887_v23, %v11986_v38  ;;  %v7386_v12 = vrot.slane %v7378_v25, %v11985_v31  ;;  %v7393_v63 = vrot.slane %v7379_v36, %v11985_v31 }
 0x588   : > { %v11710_v43 = vrot.slane %v7902_v29, %v11986_v38  ;;  %v7917_v46 = vrot.slane %v7903_v59, %v11986_v38 }
 0x58a   : > { %v7919_v62 = vcombine.high %v11706_v34, %v11710_v43  ;;  %v7920_v52 = vcombine.low %v7901_v53, %v7917_v46  ;;  %v7921_v58 = vcombine.high %v7901_v53, %v7917_v46  ;;  %v7918_v27 = vcombine.low %v11706_v34, %v11710_v43 }
 0x58d   : > { %v6664_v55 = vpop.f32.mrb[116].mxu1 }
 0x58e   : > { %v7394_v18 = vcombine.low %v6572_v26, %v6664_v55  ;;  %v7395_v41 = vcombine.high %v6572_v26, %v6664_v55  ;;  %v9127_v1 = vpop.f32.mrb[117].mxu1 }
 0x58f   : > { %v6667_v19 = vpop.f32.mrb[118].mxu1 }
 0x590   : > { %v7402_v56 = vrot.slane %v7394_v18, %v11985_v31  ;;  %v7409_v48 = vrot.slane %v7395_v41, %v11985_v31  ;;  %v9128_v5 = vpop.f32.mrb[119].mxu1 }
 0x592   : > { %v7410_v8 = vcombine.low %v7386_v12, %v7402_v56  ;;  %v7411_v51 = vcombine.high %v7386_v12, %v7402_v56  ;;  %v7426_v28 = vcombine.low %v7393_v63, %v7409_v48  ;;  %v7427_v54 = vcombine.high %v7393_v63, %v7409_v48 }
 0x594   : > { %v7418_v33 = vrot.slane %v7410_v8, %v11986_v38  ;;  %v7425_v24 = vrot.slane %v7411_v51, %v11986_v38  ;;  %v7434_v14 = vrot.slane %v7426_v28, %v11986_v38  ;;  %v7441_v50 = vrot.slane %v7427_v54, %v11986_v38 }
 0x596   : > { %v7922_v3 = vcombine.low %v7418_v33, %v7425_v24  ;;  %v8618_v11 = vcombine.high %v7418_v33, %v7425_v24  ;;  %v7938_v26 = vcombine.low %v7434_v14, %v7441_v50  ;;  %v8619_v6 = vcombine.high %v7434_v14, %v7441_v50 }
 0x598   : > { %v7929_v39 = vrot.slane %v7922_v3, %v11985_v31  ;;  %v7937_v9 = vrot.slane %v8618_v11, %v11985_v31  ;;  %v7945_v42 = vrot.slane %v7938_v26, %v11985_v31  ;;  %v7953_v57 = vrot.slane %v8619_v6, %v11985_v31 }
 0x59a   : > { %v7954_v35 = vcombine.low %v7929_v39, %v7937_v9  ;;  %v7970_v60 = vcombine.low %v7945_v42, %v7953_v57  ;;  %v7955_v4 = vcombine.high %v7929_v39, %v7937_v9  ;;  %v7971_v13 = vcombine.high %v7945_v42, %v7953_v57 }
 0x59c   : > { %v11730_v2 = vrot.slane %v7954_v35, %v11986_v38  ;;  %v11733_v10 = vrot.slane %v7970_v60, %v11986_v38  ;;  %v7969_v61 = vrot.slane %v7955_v4, %v11986_v38  ;;  %v7985_v25 = vrot.slane %v7971_v13, %v11986_v38 }
 0x59e   : > { %v7987_v36 = vcombine.high %v11730_v2, %v11733_v10  ;;  %v7988_v49 = vcombine.low %v7969_v61, %v7985_v25  ;;  %v7989_v20 = vcombine.high %v7969_v61, %v7985_v25  ;;  %v7986_v0 = vcombine.low %v11730_v2, %v11733_v10 }
 0x5a0   : > { %v9244_v23 = vpack.i.bf16 %v7987_v36, %v7919_v62  ;;  %v9249_v22 = vpack.i.bf16 %v7988_v49, %v7920_v52  ;;  %v9264_v29 = vpack.i.bf16 %v7989_v20, %v7921_v58 }
 0x5a2   : > { %9245 = vrot.lane.b32.xlu0 %v9244_v23, %s9457_s12  ;;  %v6710_v59 = vpop.f32.mrb[112].mxu0 }
 0x5a3   : > { %v9133_v53 = vpop.f32.mrb[113].mxu0 }
 0x5a4   : > { %v6713_v46 = vpop.f32.mrb[114].mxu0  ;;  %v6756_v55 = vpop.f32.mrb[120].mxu1 }
 0x5a5   : > { %v9134_v18 = vpop.f32.mrb[115].mxu0  ;;  %v9139_v41 = vpop.f32.mrb[121].mxu1 }
 0x5a6   : > { %9250 = vrot.lane.b32.xlu0 %v9249_v22, %s9458_s13  ;;  %v6759_v1 = vpop.f32.mrb[122].mxu1 }
 0x5a7   : > { %v9140_v19 = vpop.f32.mrb[123].mxu1 }
 0x5aa   : > { %9265 = vrot.lane.b32.xlu0 %v9264_v29, %s9456_s11 }
 0x5c2   : > { %v6848_v12 = vpop.f32.mrb[124].mxu1 }
 0x5c3   : > { %v7462_v63 = vcombine.low %v6756_v55, %v6848_v12  ;;  %v7463_v56 = vcombine.high %v6756_v55, %v6848_v12  ;;  %v9151_v62 = vpop.f32.mrb[125].mxu1 }
 0x5c4   : > { %v6851_v52 = vpop.f32.mrb[126].mxu1 }
 0x5c5   : > { %v9152_v58 = vpop.f32.mrb[127].mxu1  ;;  %v7470_v54 = vrot.slane %v7462_v63, %v11985_v31  ;;  %v7477_v33 = vrot.slane %v7463_v56, %v11985_v31 }
 0x5ca   : > { %v6802_v48 = vpop.f32.mrb[116].mxu0 }
 0x5cb   : > { %v7446_v5 = vcombine.low %v6710_v59, %v6802_v48  ;;  %v7447_v8 = vcombine.high %v6710_v59, %v6802_v48  ;;  %v9145_v51 = vpop.f32.mrb[117].mxu0  ;;  %v9216_v28 = vpop.permute.xlu1 %9215 }
 0x5cc   : > { %v6805_v50 = vpop.f32.mrb[118].mxu0  ;;  %v9218_v3 = vunpack.i.h.bf16 %v9216_v28  ;;  %v9217_v11 = vunpack.i.l.bf16 %v9216_v28  ;;  %v9226_v61 = vpop.permute.xlu0 %9225 }
 0x5cd   : > { %v7454_v24 = vrot.slane %v7446_v5, %v11985_v31  ;;  %v7461_v14 = vrot.slane %v7447_v8, %v11985_v31  ;;  %v9146_v26 = vpop.f32.mrb[119].mxu0  ;;  %v9228_v41 = vunpack.i.h.bf16 %v9226_v61  ;;  %v9227_v1 = vunpack.i.l.bf16 %v9226_v61 }
 0x5ce   : > { %v8222_v25 = vsel %vm3708_vm2, %v7646_v30, %v9217_v11  ;;  %v8223_v36 = vsel %vm3708_vm2, %v7714_v16, %v9218_v3 }
 0x5cf   : > { %v7478_v6 = vcombine.low %v7454_v24, %v7470_v54  ;;  %v7479_v39 = vcombine.high %v7454_v24, %v7470_v54  ;;  %v7494_v9 = vcombine.low %v7461_v14, %v7477_v33  ;;  %v7495_v42 = vcombine.high %v7461_v14, %v7477_v33  ;;  %v9221_v57 = vpop.permute.xlu1 %9220 }
 0x5d0   : > { %v9223_v49 = vunpack.i.h.bf16 %v9221_v57  ;;  %v9222_v20 = vunpack.i.l.bf16 %v9221_v57 }
 0x5d1   : > { %v7486_v35 = vrot.slane %v7478_v6, %v11986_v38  ;;  %v7493_v60 = vrot.slane %v7479_v39, %v11986_v38  ;;  %v7502_v4 = vrot.slane %v7494_v9, %v11986_v38  ;;  %v7509_v13 = vrot.slane %v7495_v42, %v11986_v38 }
 0x5d2   : > { %v6894_v23 = vpop.f32.mrb[120].mxu0  ;;  %v6940_v22 = vpop.f32.mrb[128].mxu1  ;;  %v8231_v37 = vsel %vm8230_vm4, %v8222_v25, %v9222_v20  ;;  %v8232_v45 = vsel %vm8230_vm4, %v8223_v36, %v9223_v49 }
 0x5d3   : > { %v7990_v29 = vcombine.low %v7486_v35, %v7493_v60  ;;  %v8620_v59 = vcombine.high %v7486_v35, %v7493_v60  ;;  %v8006_v53 = vcombine.low %v7502_v4, %v7509_v13  ;;  %v8621_v46 = vcombine.high %v7502_v4, %v7509_v13  ;;  %v9157_v55 = vpop.f32.mrb[121].mxu0  ;;  %v9163_v18 = vpop.f32.mrb[129].mxu1 }
 0x5d4   : > { %v6897_v30 = vpop.f32.mrb[122].mxu0  ;;  %v6943_v47 = vpop.f32.mrb[130].mxu1  ;;  %v8240_v62 = vsel %vm8239_vm5, %v8231_v37, %v9227_v1  ;;  %v8241_v52 = vsel %vm8239_vm5, %v8232_v45, %v9228_v41 }
 0x5d5   : > { %v7997_v40 = vrot.slane %v7990_v29, %v11985_v31  ;;  %v8005_v16 = vrot.slane %v8620_v59, %v11985_v31  ;;  %v8013_v19 = vrot.slane %v8006_v53, %v11985_v31  ;;  %v8021_v12 = vrot.slane %v8621_v46, %v11985_v31  ;;  %v9158_v63 = vpop.f32.mrb[123].mxu0  ;;  %v9164_v56 = vpop.f32.mrb[131].mxu1 }
 0x5d6   : > { %v8248_v58 = vpack.c.bf16 %v8241_v52, %v8240_v62 }
 0x5d7   : > { %v8022_v48 = vcombine.low %v7997_v40, %v8005_v16  ;;  %v8038_v5 = vcombine.low %v8013_v19, %v8021_v12  ;;  %v8023_v8 = vcombine.high %v7997_v40, %v8005_v16  ;;  %v8039_v51 = vcombine.high %v8013_v19, %v8021_v12 }
 0x5d8   : > { %9181 = vmatprep.mubr.msk.bf16.mxu0 %vm264_vm0, %v8248_v58 }
 0x5d9   : > { %v11770_v28 = vrot.slane %v8022_v48, %v11986_v38  ;;  %v11773_v54 = vrot.slane %v8038_v5, %v11986_v38  ;;  %v8037_v33 = vrot.slane %v8023_v8, %v11986_v38  ;;  %v8053_v50 = vrot.slane %v8039_v51, %v11986_v38 }
 0x5da   : > { %v6986_v24 = vpop.f32.mrb[124].mxu0  ;;  %v7032_v14 = vpop.f32.mrb[132].mxu1 }
 0x5db   : > { %v7514_v3 = vcombine.low %v6894_v23, %v6986_v24  ;;  %v7515_v11 = vcombine.high %v6894_v23, %v6986_v24  ;;  %v7530_v26 = vcombine.low %v6940_v22, %v7032_v14  ;;  %v7531_v6 = vcombine.high %v6940_v22, %v7032_v14  ;;  %v9169_v39 = vpop.f32.mrb[125].mxu0  ;;  %v9175_v9 = vpop.f32.mrb[133].mxu1 }
 0x5dc   : > { %v6989_v42 = vpop.f32.mrb[126].mxu0  ;;  %v7035_v57 = vpop.f32.mrb[134].mxu1  ;;  %v8055_v35 = vcombine.high %v11770_v28, %v11773_v54  ;;  %v8056_v60 = vcombine.low %v8037_v33, %v8053_v50  ;;  %v8057_v4 = vcombine.high %v8037_v33, %v8053_v50  ;;  %v8054_v13 = vcombine.low %v11770_v28, %v11773_v54  ;;  %v8624_v28 = vld [vmem:[%s11869_s4] ss:$0 sm:$0xff] }
 0x5dd   : > { %v7522_v61 = vrot.slane %v7514_v3, %v11985_v31  ;;  %v7529_v25 = vrot.slane %v7515_v11, %v11985_v31  ;;  %v7538_v36 = vrot.slane %v7530_v26, %v11985_v31  ;;  %v7545_v49 = vrot.slane %v7531_v6, %v11985_v31  ;;  %v9170_v20 = vpop.f32.mrb[127].mxu0  ;;  %v9176_v23 = vpop.f32.mrb[135].mxu1 }
 0x5df   : > { %v7546_v22 = vcombine.low %v7522_v61, %v7538_v36  ;;  %v7547_v29 = vcombine.high %v7522_v61, %v7538_v36  ;;  %v7562_v59 = vcombine.low %v7529_v25, %v7545_v49  ;;  %v7563_v53 = vcombine.high %v7529_v25, %v7545_v49 }
 0x5e1   : > { %v7554_v46 = vrot.slane %v7546_v22, %v11986_v38  ;;  %v7561_v55 = vrot.slane %v7547_v29, %v11986_v38  ;;  %v7570_v18 = vrot.slane %v7562_v59, %v11986_v38  ;;  %v7577_v41 = vrot.slane %v7563_v53, %v11986_v38 }
 0x5e3   : > { %v8058_v1 = vcombine.low %v7554_v46, %v7561_v55  ;;  %v8622_v37 = vcombine.high %v7554_v46, %v7561_v55  ;;  %v8074_v45 = vcombine.low %v7570_v18, %v7577_v41  ;;  %v8623_v30 = vcombine.high %v7570_v18, %v7577_v41 }
 0x5e5   : > { %v8065_v47 = vrot.slane %v8058_v1, %v11985_v31  ;;  %v8073_v40 = vrot.slane %v8622_v37, %v11985_v31  ;;  %v8081_v16 = vrot.slane %v8074_v45, %v11985_v31  ;;  %v8089_v19 = vrot.slane %v8623_v30, %v11985_v31 }
 0x5e7   : > { %v8090_v12 = vcombine.low %v8065_v47, %v8073_v40  ;;  %v8106_v63 = vcombine.low %v8081_v16, %v8089_v19  ;;  %v8091_v56 = vcombine.high %v8065_v47, %v8073_v40  ;;  %v8107_v62 = vcombine.high %v8081_v16, %v8089_v19 }
 0x5e9   : > { %v8098_v52 = vrot.slane %v8090_v12, %v11986_v38  ;;  %v8114_v58 = vrot.slane %v8106_v63, %v11986_v38  ;;  %v8105_v48 = vrot.slane %v8091_v56, %v11986_v38  ;;  %v8121_v5 = vrot.slane %v8107_v62, %v11986_v38 }
 0x5eb   : > { %v8123_v8 = vcombine.high %v8098_v52, %v8114_v58  ;;  %v8124_v51 = vcombine.low %v8105_v48, %v8121_v5  ;;  %v8125_v33 = vcombine.high %v8105_v48, %v8121_v5  ;;  %v8122_v24 = vcombine.low %v8098_v52, %v8114_v58 }
 0x5ed   : > { %v9254_v14 = vpack.i.bf16 %v8123_v8, %v8055_v35  ;;  %v9259_v50 = vpack.i.bf16 %v8124_v51, %v8056_v60  ;;  %v9269_v3 = vpack.i.bf16 %v8125_v33, %v8057_v4 }
 0x5ef   : > { %9255 = vrot.lane.b32.xlu1 %v9254_v14, %s9457_s12  ;;  %v9236_v31 = vpop.permute.xlu1 %9235 }
 0x5f0   : > { %v9231_v11 = vpop.permute.xlu0 %9230  ;;  %v9238_v39 = vunpack.i.h.bf16 %v9236_v31  ;;  %v9237_v9 = vunpack.i.l.bf16 %v9236_v31 }
 0x5f1   : > { %v9233_v26 = vunpack.i.h.bf16 %v9231_v11  ;;  %v9232_v6 = vunpack.i.l.bf16 %v9231_v11 }
 0x5f3   : > { %9260 = vrot.lane.b32.xlu1 %v9259_v50, %s9458_s13  ;;  %v8224_v38 = vsel %vm3708_vm2, %v7782_v32, %v9232_v6  ;;  %v8225_v42 = vsel %vm3708_vm2, %v7850_v7, %v9233_v26  ;;  %v9241_v57 = vpop.permute.xlu1 %9240 }
 0x5f4   : > { %v9243_v35 = vunpack.i.h.bf16 %v9241_v57  ;;  %v9242_v60 = vunpack.i.l.bf16 %v9241_v57  ;;  %v8233_v4 = vsel %vm8230_vm4, %v8224_v38, %v9237_v9  ;;  %v8234_v61 = vsel %vm8230_vm4, %v8225_v42, %v9238_v39 }
 0x5f6   : > { %v8242_v25 = vsel %vm8239_vm5, %v8233_v4, %v9242_v60  ;;  %v8243_v17 = vsel %vm8239_vm5, %v8234_v61, %v9243_v35 }
 0x5f7   : > { %9270 = vrot.lane.b32.xlu1 %v9269_v3, %s9456_s11  ;;  %v8249_v44 = vpack.c.bf16 %v8243_v17, %v8242_v25 }
 0x5f9   : > { %9182 = vmatmul.mubr.msk.bf16.vlgmr.msra.gmra.mrb[128].mxu0 %vm264_vm0, %v8249_v44 }
 0x614   : > { %v9246_v32 = vpop.permute.xlu0 %9245 }
 0x615   : > { %v9248_v21 = vunpack.i.h.bf16 %v9246_v32  ;;  %v9247_v7 = vunpack.i.l.bf16 %v9246_v32 }
 0x617   : > { %v8226_v23 = vsel %vm3708_vm2, %v7918_v27, %v9247_v7  ;;  %v8227_v22 = vsel %vm3708_vm2, %v7986_v0, %v9248_v21 }
 0x618   : > { %v9251_v15 = vpop.permute.xlu0 %9250 }
 0x619   : > { %v9253_v36 = vunpack.i.h.bf16 %v9251_v15  ;;  %v9252_v49 = vunpack.i.l.bf16 %v9251_v15 }
 0x61b   : > { %v8235_v53 = vsel %vm8230_vm4, %v8226_v23, %v9252_v49  ;;  %v8236_v46 = vsel %vm8230_vm4, %v8227_v22, %v9253_v36 }
 0x61c   : > { %v9266_v20 = vpop.permute.xlu0 %9265 }
 0x61d   : > { %v9268_v29 = vunpack.i.h.bf16 %v9266_v20  ;;  %v9267_v59 = vunpack.i.l.bf16 %v9266_v20 }
 0x61f   : > { %v8244_v55 = vsel %vm8239_vm5, %v8235_v53, %v9267_v59  ;;  %v8245_v18 = vsel %vm8239_vm5, %v8236_v46, %v9268_v29 }
 0x620   : > { %v8250_v41 = vpack.c.bf16 %v8245_v18, %v8244_v55 }
 0x622   : > { %9185 = vmatprep.mubr.msk.bf16.mxu0 %vm264_vm0, %v8250_v41 }
 0x661   : > { %v9256_v34 = vpop.permute.xlu1 %9255 }
 0x662   : > { %v9258_v27 = vunpack.i.h.bf16 %v9256_v34  ;;  %v9257_v1 = vunpack.i.l.bf16 %v9256_v34 }
 0x664   : > { %v8228_v37 = vsel %vm3708_vm2, %v8054_v13, %v9257_v1  ;;  %v8229_v45 = vsel %vm3708_vm2, %v8122_v24, %v9258_v27 }
 0x665   : > { %v9261_v43 = vpop.permute.xlu1 %9260 }
 0x666   : > { %v9263_v2 = vunpack.i.h.bf16 %v9261_v43  ;;  %v9262_v10 = vunpack.i.l.bf16 %v9261_v43 }
 0x668   : > { %v8237_v40 = vsel %vm8230_vm4, %v8228_v37, %v9262_v10  ;;  %v8238_v16 = vsel %vm8230_vm4, %v8229_v45, %v9263_v2 }
 0x669   : > { %v9271_v0 = vpop.permute.xlu1 %9270 }
 0x66a   : > { %v9273_v30 = vunpack.i.h.bf16 %v9271_v0  ;;  %v9272_v47 = vunpack.i.l.bf16 %v9271_v0 }
 0x66c   : > { %v8246_v19 = vsel %vm8239_vm5, %v8237_v40, %v9272_v47  ;;  %v8247_v12 = vsel %vm8239_vm5, %v8238_v16, %v9273_v30 }
 0x66d   : > { %v8251_v63 = vpack.c.bf16 %v8247_v12, %v8246_v19 }
 0x66f   : > { %9186 = vmatmul.mubr.msk.bf16.gmra.mrb[132].mxu0 %vm264_vm0, %v8251_v63 }
 0x6cc   : > { %v9183_v54 = vpop.f32.mrb[128].mxu0 }
 0x6cd   : > { %v8330_v13 = vadd.f32 %v9183_v54, %v8624_v28  ;;  %v8321_v56 = vpop.f32.mrb[129].mxu0 }
 0x6ce   : > { %v8322_v62 = vadd.f32 %v8624_v28, %v8321_v56  ;;  %v9184_v52 = vpop.f32.mrb[130].mxu0 }
 0x6cf   : > { %v8633_v58 = vmul.f32 -1.702, %v8330_v13  ;;  %v8333_v48 = vadd.f32 %v9184_v52, %v8624_v28  ;;  %v8324_v5 = vpop.f32.mrb[131].mxu0 }
 0x6d0   : > { %v8631_v8 = vmul.f32 -1.702, %v8322_v62  ;;  %v8325_v51 = vadd.f32 %v8624_v28, %v8324_v5 }
 0x6d1   : > { %v8372_v33 = vmul.f32 1.442695, %v8633_v58  ;;  %v8634_v24 = vmul.f32 -1.702, %v8333_v48 }
 0x6d2   : > { %v8368_v14 = vmul.f32 1.442695, %v8631_v8  ;;  %v8632_v50 = vmul.f32 -1.702, %v8325_v51 }
 0x6d3   : > { %9406 = vpow2.f32 %v8372_v33  ;;  %v8374_v3 = vmul.f32 1.442695, %v8634_v24 }
 0x6d4   : > { %9408 = vpow2.f32 %v8368_v14  ;;  %v8370_v31 = vmul.f32 1.442695, %v8632_v50 }
 0x6d5   : > { %9410 = vpow2.f32 %v8374_v3 }
 0x6d6   : > { %9412 = vpow2.f32 %v8370_v31 }
 0x6dd   : > { %v9407_v11 = vpop.eup %9406 }
 0x6de   : > { %v9409_v26 = vpop.eup %9408  ;;  %v8386_v6 = vadd.f32 1.0, %v9407_v11 }
 0x6df   : > { %v9411_v39 = vpop.eup %9410  ;;  %v8384_v9 = vadd.f32 1.0, %v9409_v26 }
 0x6e0   : > { %v9413_v38 = vpop.eup %9412  ;;  %9414 = vrcp.f32 %v8386_v6  ;;  %v8387_v42 = vadd.f32 1.0, %v9411_v39 }
 0x6e1   : > { %9416 = vrcp.f32 %v8384_v9  ;;  %v8385_v57 = vadd.f32 1.0, %v9413_v38 }
 0x6e2   : > { %9418 = vrcp.f32 %v8387_v42 }
 0x6e3   : > { %9420 = vrcp.f32 %v8385_v57 }
 0x6ea   : > { %v9415_v35 = vpop.eup %9414 }
 0x6eb   : > { %v9417_v60 = vpop.eup %9416  ;;  %v8410_v4 = vmul.f32 %v9415_v35, %v8330_v13 }
 0x6ec   : > { %v9419_v61 = vpop.eup %9418  ;;  %v8408_v25 = vmul.f32 %v9417_v60, %v8322_v62 }
 0x6ed   : > { %v9421_v17 = vpop.eup %9420  ;;  %8418 = vst.msk [vmem:[%s11844_s24 + $0x10] sm:$0xff] %vm264_vm0, %v8410_v4  ;;  %v8411_v44 = vmul.f32 %v9419_v61, %v8333_v48 }
 0x6ee   : > { %8416 = vst.msk [vmem:[%s11844_s24] sm:$0xff] %vm264_vm0, %v8408_v25  ;;  %v8409_v32 = vmul.f32 %v9421_v17, %v8325_v51 }
 0x6ef   : > { %8419 = vst.msk [vmem:[%s11844_s24 + $0x18] sm:$0xff] %vm264_vm0, %v8411_v44 }
 0x6f0   : > { %8417 = vst.msk [vmem:[%s11844_s24 + $0x8] sm:$0xff] %vm264_vm0, %v8409_v32 }
 0x742   : > { %v9187_v15 = vpop.f32.mrb[132].mxu0 }
 0x743   : > { %v8346_v21 = vadd.f32 %v9187_v15, %v8624_v28  ;;  %v8337_v7 = vpop.f32.mrb[133].mxu0 }
 0x744   : > { %v8338_v36 = vadd.f32 %v8624_v28, %v8337_v7  ;;  %v9188_v49 = vpop.f32.mrb[134].mxu0 }
 0x745   : > { %v8637_v20 = vmul.f32 -1.702, %v8346_v21  ;;  %v8349_v23 = vadd.f32 %v9188_v49, %v8624_v28  ;;  %v8340_v22 = vpop.f32.mrb[135].mxu0 }
 0x746   : > { %v8635_v29 = vmul.f32 -1.702, %v8338_v36  ;;  %v8341_v59 = vadd.f32 %v8624_v28, %v8340_v22 }
 0x747   : > { %v8380_v53 = vmul.f32 1.442695, %v8637_v20  ;;  %v8638_v46 = vmul.f32 -1.702, %v8349_v23 }
 0x748   : > { %v8376_v55 = vmul.f32 1.442695, %v8635_v29  ;;  %v8636_v18 = vmul.f32 -1.702, %v8341_v59 }
 0x749   : > { %9422 = vpow2.f32 %v8380_v53  ;;  %v8382_v41 = vmul.f32 1.442695, %v8638_v46 }
 0x74a   : > { %9424 = vpow2.f32 %v8376_v55  ;;  %v8378_v34 = vmul.f32 1.442695, %v8636_v18 }
 0x74b   : > { %9426 = vpow2.f32 %v8382_v41 }
 0x74c   : > { %9428 = vpow2.f32 %v8378_v34 }
 0x753   : > { %v9423_v43 = vpop.eup %9422 }
 0x754   : > { %v9425_v27 = vpop.eup %9424  ;;  %v8390_v1 = vadd.f32 1.0, %v9423_v43 }
 0x755   : > { %v9427_v2 = vpop.eup %9426  ;;  %v8388_v10 = vadd.f32 1.0, %v9425_v27 }
 0x756   : > { %v9429_v0 = vpop.eup %9428  ;;  %9430 = vrcp.f32 %v8390_v1  ;;  %v8391_v37 = vadd.f32 1.0, %v9427_v2 }
 0x757   : > { %9432 = vrcp.f32 %v8388_v10  ;;  %v8389_v45 = vadd.f32 1.0, %v9429_v0 }
 0x758   : > { %9434 = vrcp.f32 %v8391_v37 }
 0x759   : > { %9436 = vrcp.f32 %v8389_v45 }
 0x760   : > { %v9431_v30 = vpop.eup %9430 }
 0x761   : > { %v9433_v47 = vpop.eup %9432  ;;  %v8414_v40 = vmul.f32 %v9431_v30, %v8346_v21 }
 0x762   : > { %v9435_v16 = vpop.eup %9434  ;;  %v8412_v19 = vmul.f32 %v9433_v47, %v8338_v36 }
 0x763   : > { %v9437_v12 = vpop.eup %9436  ;;  %8422 = vst.msk [vmem:[%s11844_s24 + $0x30] sm:$0xff] %vm264_vm0, %v8414_v40  ;;  %v8415_v63 = vmul.f32 %v9435_v16, %v8349_v23 }
 0x764   : > { %8420 = vst.msk [vmem:[%s11844_s24 + $0x20] sm:$0xff] %vm264_vm0, %v8412_v19  ;;  %v8413_v28 = vmul.f32 %v9437_v12, %v8341_v59 }
 0x765   : > { %8423 = vst.msk [vmem:[%s11844_s24 + $0x38] sm:$0xff] %vm264_vm0, %v8415_v63 }
 0x766   : > { %8421 = vst.msk [vmem:[%s11844_s24 + $0x28] sm:$0xff] %vm264_vm0, %v8413_v28 }
 0x767 PF: > { %s15_s18 = sadd.s32 1, %s9444_s18  }
 0x768   : > { %p12_p4 = scmp.ge.s32.totalorder %s15_s18, 6  }
 0x76a   :  { %14 = sbr.rel (!%p12_p4) target bundleno = 1 (0x1), region = 70 }

</bundles_post_ra>
